<compile_context>
chip_gen: v7x
topology: tpu7x:2x2x1
jax: 0.10.0
libtpu: 0.0.40
codegen_flags: <defaults>
</compile_context>

<pallas_src>
import functools
import math

import jax
import jax.numpy as jnp
from jax.experimental import pallas as pl
from jax.experimental.pallas import tpu as pltpu

# ----------------------------- configuration --------------------------------
BATCH = 2
IN_SIZE = 64
NUM_CLASSES = 10
GFD = 64  # global_feature_dim (kept small for the synthetic run)

LAYER_DIMS = [[64, IN_SIZE // 2], [32, IN_SIZE // 2], [48, IN_SIZE // 4],
              [80, IN_SIZE // 8], [160, IN_SIZE // 16], [224, IN_SIZE // 16],
              [384, IN_SIZE // 32], [640, IN_SIZE // 32], [2560, IN_SIZE // 32]]
NUM_LAYERS = len(LAYER_DIMS)

USE_LAYERS = [False, False, False, True, True, False, False, False, False]
USE_SELECTIONS = [False, False, False, True, True, False, False, False, False]
NUM_SELECTS = [0, 0, 0, 32, 8, 0, 0, 0, 0]   # num_joints = 40

BN_SCALE = 1.0 / math.sqrt(1.0 + 1e-5)        # BatchNorm eval w/ init running stats


# ----------------------------- Pallas matmul kernel --------------------------
def _rup(x, m):
    return ((x + m - 1) // m) * m


def _mm_kernel(x_ref, w_ref, b_ref, *rest, relu, has_residual):
    """Single-K-step matmul: out = x @ w + b (+ residual) (+ ReLU)."""
    if has_residual:
        r_ref, o_ref = rest
    else:
        (o_ref,) = rest
    acc = jnp.dot(x_ref[...], w_ref[...], preferred_element_type=jnp.float32)
    acc = acc + b_ref[...]
    if has_residual:
        acc = acc + r_ref[...]
    if relu:
        acc = jnp.maximum(acc, 0.0)
    o_ref[...] = acc.astype(o_ref.dtype)


def matmul_pallas(x, w, b, relu=False, residual=None):
    """y = x @ w + b (+ residual) (+ ReLU).  x:[M,K] w:[K,N] b:[N] residual:[M,N].

    bf16 operands, f32 accumulation.  K is never tiled (one whole-K block per
    output tile); N is tiled only when it is a multiple of 128; M is tiled at
    256 and only padded when M < 16.
    """
    M, K = x.shape
    N = w.shape[1]
    xb = x.astype(jnp.bfloat16)
    wb = w.astype(jnp.bfloat16)
    bb = b.astype(jnp.float32).reshape(1, N)
    res = None if residual is None else residual.astype(jnp.float32)

    # --- M tiling (the only dim we ever pad, and only for tiny M) ---
    if M <= 256:
        bm = _rup(M, 16)
        Mp = bm
    else:
        bm = 256
        Mp = _rup(M, bm)
    if Mp != M:
        xb = jnp.pad(xb, ((0, Mp - M), (0, 0)))
        if res is not None:
            res = jnp.pad(res, ((0, Mp - M), (0, 0)))

    # --- N tiling: full-extent block when N is not lane-aligned ---
    if N % 256 == 0:
        bn = 256
    elif N % 128 == 0:
        bn = 128
    else:
        bn = N

    has_res = res is not None
    in_specs = [pl.BlockSpec((bm, K), lambda i, j: (i, 0)),
                pl.BlockSpec((K, bn), lambda i, j: (0, j)),
                pl.BlockSpec((1, bn), lambda i, j: (0, j))]
    args = [xb, wb, bb]
    if has_res:
        in_specs.append(pl.BlockSpec((bm, bn), lambda i, j: (i, j)))
        args.append(res)

    out = pl.pallas_call(
        functools.partial(_mm_kernel, relu=relu, has_residual=has_res),
        out_shape=jax.ShapeDtypeStruct((Mp, N), jnp.float32),
        grid_spec=pltpu.PrefetchScalarGridSpec(
            num_scalar_prefetch=0,
            grid=(Mp // bm, N // bn),
            in_specs=in_specs,
            out_specs=pl.BlockSpec((bm, bn), lambda i, j: (i, j))),
        compiler_params=pltpu.CompilerParams(
            dimension_semantics=("parallel", "parallel")),
    )(*args)
    return out[:M] if Mp != M else out


def matmul_auto(x, w, b, relu=False, residual=None):
    """Route through the Pallas kernel only when the problem is big enough to
    amortize a custom-call launch; sub-tile problems (and the K=3 RGB stem)
    stay on plain XLA dot which fuses them with neighbouring elementwise ops."""
    M, K = x.shape
    N = w.shape[1]
    if max(M, K, N) >= 256 and K >= 16:
        return matmul_pallas(x, w, b, relu=relu, residual=residual)
    y = jnp.dot(x.astype(jnp.float32), w.astype(jnp.float32),
                preferred_element_type=jnp.float32) + b
    if residual is not None:
        y = y + residual
    if relu:
        y = jnp.maximum(y, 0.0)
    return y


# ----------------------------- layer helpers (channels-last) -----------------
def conv1x1_nhwc(x, w, b, relu=False, residual=None):
    """1x1 Conv2d on NHWC.  w: [Cout, Cin], b: [Cout], residual: NHWC [.., Cout]."""
    B, H, W, C = x.shape
    t = x.reshape(B * H * W, C)
    r = None if residual is None else residual.reshape(B * H * W, w.shape[0])
    y = matmul_auto(t, w.T, b, relu=relu, residual=r)
    return y.reshape(B, H, W, w.shape[0])


def avgpool2_nhwc(x):
    B, H, W, C = x.shape
    return x.reshape(B, H // 2, 2, W // 2, 2, C).mean(axis=(2, 4))


def upsample2_nhwc(x):
    # nn.Upsample(scale_factor=2, mode='bilinear'); half-pixel centers match
    # PyTorch align_corners=False only approximately at the borders.
    B, H, W, C = x.shape
    return jax.image.resize(x, (B, 2 * H, 2 * W, C), method='bilinear')


# ----------------------------- losses / metrics ------------------------------
def cross_entropy(logits, labels):
    logits = logits.astype(jnp.float32)
    lse = jax.scipy.special.logsumexp(logits, axis=-1)
    ll = jnp.take_along_axis(logits, labels[:, None], axis=-1)[:, 0]
    return jnp.mean(lse - ll)


def accuracy(logits, labels):
    return jnp.mean((jnp.argmax(logits, axis=-1) == labels).astype(jnp.float32))


def selected_accuracy(sl, labels):
    s, ns = sl['selected'], sl['not_selected']
    B, S1, _ = s.shape
    _, S2, _ = ns.shape
    c1 = jnp.sum(jnp.argmax(s, -1) == labels[:, None]).astype(jnp.float32)
    sel_acc = c1 / (B * S1)
    c2 = jnp.sum(jnp.argmax(ns, -1) == labels[:, None]).astype(jnp.float32)
    nsel_acc = c2 / (B * S1 + B * S2)  # reference quirk: `total` is not reset
    return sel_acc, nsel_acc


def select_loss(sl, labels):
    s = sl['selected']
    B, S1, C = s.shape
    loss1 = cross_entropy(s.reshape(-1, C), jnp.repeat(labels, S1))
    # BCEWithLogitsLoss against all-zero targets == mean(softplus(logits))
    loss2 = jnp.mean(jax.nn.softplus(sl['not_selected']))
    return loss1, loss2


def select_features(logits_map, features_map, num_select):
    """NHWC logits/features -> top-`num_select` tokens by max-softmax confidence."""
    B, H, W, C = logits_map.shape
    lt = logits_map.reshape(B, H * W, C).astype(jnp.float32)
    ft = features_map.reshape(B, H * W, features_map.shape[-1])
    probs = jax.nn.softmax(lt, axis=-1)
    max_ids = probs.max(axis=-1)                                   # [B, HW]
    ranks = jnp.argsort(-max_ids, axis=-1)
    confs = -jnp.sort(-max_ids, axis=-1)
    sf = jnp.take_along_axis(ft, ranks[:, :num_select, None], axis=1)
    sel = jnp.take_along_axis(lt, ranks[:, :num_select, None], axis=1)
    nsel = jnp.take_along_axis(lt, ranks[:, num_select:, None], axis=1)
    return sf, confs, {'selected': sel, 'not_selected': nsel}


# ----------------------------- GCN (tiny; plain XLA per review) --------------
def gcn_forward(gp, x):
    """x: [B, in_features, num_joints] -> [B, num_classes]."""

    def pool(x, w, b):                       # nn.Linear over the joints dim
        return jnp.einsum('bfn,jn->bfj', x, w) + b

    def attn(x, wq, bq, wk, bk, adj, alpha):
        # mean over output channels of a 1x1 conv == conv with the
        # channel-averaged weight row -> a single matvec per q/k.
        q = jnp.einsum('bfj,f->bj', x, wq.mean(axis=0)) + bq.mean()
        k = jnp.einsum('bfj,f->bj', x, wk.mean(axis=0)) + bk.mean()
        A = jnp.tanh(q[:, :, None] - k[:, None, :])
        return adj[None, :, :] + A * alpha

    def conv_bmm(x, w, b, A):
        # BatchNorm1d eval-scale folded into the conv weights; batched matmul
        # done as one einsum instead of a per-sample pallas_call loop.
        y = jnp.einsum('of,bfj->boj', w * BN_SCALE, x) + (b * BN_SCALE)[None, :, None]
        return jnp.einsum('bfj,bjk->bfk', y, A)

    # block 1
    x = pool(x, gp['pool1_w'], gp['pool1_b'])
    A1 = attn(x, gp['q1_w'], gp['q1_b'], gp['k1_w'], gp['k1_b'],
              gp['adj1'], gp['alpha1'])
    x = conv_bmm(x, gp['conv1_w'], gp['conv1_b'], A1)
    # block 2
    x = pool(x, gp['pool2_w'], gp['pool2_b'])
    A2 = attn(x, gp['q2_w'], gp['q2_b'], gp['k2_w'], gp['k2_b'],
              gp['adj2'], gp['alpha2'])
    x = conv_bmm(x, gp['conv2_w'], gp['conv2_b'], A2)
    # block 3 -- NOTE: reference reuses conv2 / batch_norm2 here (reproduced)
    x = pool(x, gp['pool3_w'], gp['pool3_b'])
    A3 = attn(x, gp['q3_w'], gp['q3_b'], gp['k3_w'], gp['k3_b'],
              gp['adj3'], gp['alpha3'])
    x = conv_bmm(x, gp['conv2_w'], gp['conv2_b'], A3)
    # pool4 -> dropout(eval, identity) -> flatten(1) -> classifier
    x = pool(x, gp['pool4_w'], gp['pool4_b'])          # [B, F, 1]
    x = x.reshape(x.shape[0], -1)                      # [B, F]
    return x @ gp['cls_w'].T + gp['cls_b']


# ----------------------------- DetEfficientNet forward -----------------------
def det_forward(params, x, labels):
    losses, accuracys, logits = {}, {}, {}

    # model boundary: NCHW -> NHWC once; everything downstream is channels-last
    h = x.transpose(0, 2, 3, 1)

    # backbone stand-in (see TODO(synk) above)
    layers = []
    for i in range(NUM_LAYERS):
        c_out, s_out = LAYER_DIMS[i]
        if h.shape[1] != s_out:
            h = avgpool2_nhwc(h)
        w, b = params['backbone'][i]
        h = conv1x1_nhwc(h, w, b, relu=True)
        layers.append(h)

    # FPN: fpn_i = Conv1x1(C_i,C_i) -> ReLU -> Conv1x1(C_i, GFD); the lateral
    # residual add is fused into the second conv's Pallas epilogue.
    def fpn(i, t, residual=None):
        w1, b1, w2, b2 = params['fpn'][i]
        t = conv1x1_nhwc(t, w1, b1, relu=True)
        return conv1x1_nhwc(t, w2, b2, residual=residual)

    layers[-1] = fpn(NUM_LAYERS - 1, layers[-1])
    for i in range(NUM_LAYERS - 1, 0, -1):
        if LAYER_DIMS[i][1] != LAYER_DIMS[i - 1][1]:
            res = upsample2_nhwc(layers[i])
        else:
            res = layers[i]
        layers[i - 1] = fpn(i - 1, layers[i - 1], residual=res)

    selected_features = []
    for i in range(NUM_LAYERS):
        if USE_LAYERS[i]:
            w1, b1, w2, b2 = params['cls'][i]
            # BatchNorm2d eval-scale folded into the first conv's weights/bias
            t = conv1x1_nhwc(layers[i], w1 * BN_SCALE, b1 * BN_SCALE, relu=True)
            lg_nhwc = conv1x1_nhwc(t, w2, b2)
            logits['l_' + str(i)] = lg_nhwc.transpose(0, 3, 1, 2)   # NCHW at boundary
            if USE_SELECTIONS[i]:
                sf, _sc, sl = select_features(lg_nhwc, layers[i], NUM_SELECTS[i])
                selected_features.append(sf)
                l1, l2 = select_loss(sl, labels)
                losses['l' + str(i) + '_selected'] = l1
                losses['l' + str(i) + '_not_selected'] = l2
                a1, a2 = selected_accuracy(sl, labels)
                accuracys['l' + str(i) + '_selected'] = a1
                accuracys['l' + str(i) + '_not_selected'] = a2
                logits['l' + str(i) + '_selected'] = sl['selected']

    # use_ori=False in this configuration (see header note)

    # GCN branch
    sel = jnp.concatenate(selected_features, axis=1)   # [B, num_joints, GFD]
    sel = sel.transpose(0, 2, 1)                       # [B, GFD, num_joints]
    logits['gcn'] = gcn_forward(params['gcn'], sel)
    losses['gcn'] = cross_entropy(logits['gcn'], labels)
    accuracys['gcn'] = accuracy(logits['gcn'], labels)

    # per-layer classifier loss (token-mean logits)
    for i in range(NUM_LAYERS):
        if USE_LAYERS[i]:
            lg = logits['l_' + str(i)]                  # NCHW
            Bc, Cc, Hc, Wc = lg.shape
            avg = lg.reshape(Bc, Cc, Hc * Wc).transpose(0, 2, 1).mean(axis=1)
            losses['l_' + str(i)] = cross_entropy(avg, labels)
            accuracys['l_' + str(i)] = accuracy(avg, labels)

    return losses, accuracys, logits


# ----------------------------- parameter init --------------------------------
def init_params(key):
    keys = iter(jax.random.split(key, 512))

    def nrm(shape, scale):
        return jax.random.normal(next(keys), shape, jnp.float32) * scale

    def zeros(*shape):
        return jnp.zeros(shape, jnp.float32)

    p = {}
    backbone, c_in = [], 3
    for i in range(NUM_LAYERS):
        c_out = LAYER_DIMS[i][0]
        backbone.append((nrm((c_out, c_in), 1.0 / math.sqrt(c_in)), zeros(c_out)))
        c_in = c_out
    p['backbone'] = backbone

    fpn = []
    for i in range(NUM_LAYERS):
        c = LAYER_DIMS[i][0]
        fpn.append((nrm((c, c), 1.0 / math.sqrt(c)), zeros(c),
                    nrm((GFD, c), 1.0 / math.sqrt(c)), zeros(GFD)))
    p['fpn'] = fpn

    cls = {}
    for i in range(NUM_LAYERS):
        if USE_LAYERS[i]:
            cls[i] = (nrm((GFD, GFD), 1.0 / math.sqrt(GFD)), zeros(GFD),
                      nrm((NUM_CLASSES, GFD), 1.0 / math.sqrt(GFD)), zeros(NUM_CLASSES))
    p['cls'] = cls

    nj = sum(NUM_SELECTS)
    joints = [nj // 8, nj // 16, nj // 32]
    F = GFD
    g = {}
    g['pool1_w'] = nrm((joints[0], nj), 1.0 / math.sqrt(nj)); g['pool1_b'] = zeros(joints[0])
    g['adj1'] = jnp.eye(joints[0], dtype=jnp.float32) / 100.0 + 1.0 / 100.0
    g['conv1_w'] = nrm((F, F), 1.0 / math.sqrt(F)); g['conv1_b'] = zeros(F)
    g['q1_w'] = nrm((F // 4, F), 1.0 / math.sqrt(F)); g['q1_b'] = zeros(F // 4)
    g['k1_w'] = nrm((F // 4, F), 1.0 / math.sqrt(F)); g['k1_b'] = zeros(F // 4)
    g['alpha1'] = zeros(1)
    g['pool2_w'] = nrm((joints[1], joints[0]), 1.0 / math.sqrt(joints[0])); g['pool2_b'] = zeros(joints[1])
    g['adj2'] = jnp.eye(joints[1], dtype=jnp.float32) / 32.0 + 1.0 / 32.0
    g['conv2_w'] = nrm((F, F), 1.0 / math.sqrt(F)); g['conv2_b'] = zeros(F)
    g['q2_w'] = nrm((F // 4, F), 1.0 / math.sqrt(F)); g['q2_b'] = zeros(F // 4)
    g['k2_w'] = nrm((F // 4, F), 1.0 / math.sqrt(F)); g['k2_b'] = zeros(F // 4)
    g['alpha2'] = zeros(1)
    g['pool3_w'] = nrm((joints[2], joints[1]), 1.0 / math.sqrt(joints[1])); g['pool3_b'] = zeros(joints[2])
    g['adj3'] = jnp.eye(joints[2], dtype=jnp.float32) / 32.0 + 1.0 / 32.0
    g['q3_w'] = nrm((F // 4, F), 1.0 / math.sqrt(F)); g['q3_b'] = zeros(F // 4)
    g['k3_w'] = nrm((F // 4, F), 1.0 / math.sqrt(F)); g['k3_b'] = zeros(F // 4)
    g['alpha3'] = zeros(1)
    g['pool4_w'] = nrm((1, joints[2]), 1.0); g['pool4_b'] = zeros(1)
    g['cls_w'] = nrm((NUM_CLASSES, F), 1.0 / math.sqrt(F)); g['cls_b'] = zeros(NUM_CLASSES)
    p['gcn'] = g
    return p


# ----------------------------- main -------------------------------------------
if __name__ == "__main__":
    key = jax.random.PRNGKey(0)
    kp, kx, kl = jax.random.split(key, 3)
    params = init_params(kp)
    x = jax.random.normal(kx, (BATCH, 3, IN_SIZE, IN_SIZE), jnp.float32)
    labels = jax.random.randint(kl, (BATCH,), 0, NUM_CLASSES)

    forward = jax.jit(det_forward)
    losses, accuracys, logits = forward(params, x, labels)
    jax.block_until_ready((losses, accuracys, logits))
    print("KERNEL_OK")
</pallas_src>

<mosaic_0001>
module attributes {stable_mosaic.version = 11 : i64} {
  func.func @_mm_kernel(%arg0: i32, %arg1: i32, %arg2: memref<256x64xbf16, #tpu.memory_space<vmem>>, %arg3: memref<64x32xbf16, #tpu.memory_space<vmem>>, %arg4: memref<1x32xf32, #tpu.memory_space<vmem>>, %arg5: memref<256x32xf32, #tpu.memory_space<vmem>>) attributes {dimension_semantics = [#tpu.dimension_semantics<parallel>, #tpu.dimension_semantics<parallel>], iteration_bounds = array<i64: 8, 1>, scalar_prefetch = 0 : i64, scratch_operands = 0 : i64, tpu.core_type = #tpu.core_type<tc>, window_params = [{transform_indices = @transform_0, window_bounds = array<i64: 256, 64>}, {transform_indices = @transform_1, window_bounds = array<i64: 64, 32>}, {transform_indices = @transform_2, window_bounds = array<i64: 1, 32>}, {transform_indices = @transform_3, window_bounds = array<i64: 256, 32>}]} {
    %c0 = arith.constant 0 : index
    %c0_0 = arith.constant 0 : index
    %0 = vector.load %arg2[%c0, %c0_0] : memref<256x64xbf16, #tpu.memory_space<vmem>>, vector<256x64xbf16>
    %c0_1 = arith.constant 0 : index
    %c0_2 = arith.constant 0 : index
    %1 = vector.load %arg3[%c0_1, %c0_2] : memref<64x32xbf16, #tpu.memory_space<vmem>>, vector<64x32xbf16>
    %cst = arith.constant dense<0.000000e+00> : vector<256x32xf32>
    %2 = tpu.matmul %0, %1, %cst {dimension_numbers = #tpu.dot_dimension_numbers<[1], [0], [0], [1], [0, 0, 1, 1], [], []>} : vector<256x64xbf16>, vector<64x32xbf16>, vector<256x32xf32> -> vector<256x32xf32>
    %c0_3 = arith.constant 0 : index
    %c0_4 = arith.constant 0 : index
    %3 = vector.load %arg4[%c0_3, %c0_4] : memref<1x32xf32, #tpu.memory_space<vmem>>, vector<1x32xf32>
    %4 = vector.broadcast %3 : vector<1x32xf32> to vector<256x32xf32>
    %5 = arith.addf %2, %4 : vector<256x32xf32>
    %cst_5 = arith.constant 0.000000e+00 : f32
    %6 = vector.broadcast %cst_5 : f32 to vector<256x32xf32>
    %7 = arith.maximumf %5, %6 : vector<256x32xf32>
    %c0_6 = arith.constant 0 : index
    %c0_7 = arith.constant 0 : index
    %8 = vector.load %arg5[%c0_6, %c0_7] : memref<256x32xf32, #tpu.memory_space<vmem>>, vector<256x32xf32>
    tpu.vector_store %arg5[%c0_6, %c0_7], %7 {strides = array<i32>} : memref<256x32xf32, #tpu.memory_space<vmem>>, vector<256x32xf32>,
    return
  }
  func.func @transform_0(%arg0: i32, %arg1: i32) -> (i32, i32) {
    %c0_i32 = arith.constant 0 : i32
    %c0_i32_0 = arith.constant 0 : i32
    return %arg0, %c0_i32 : i32, i32
  }
  func.func @transform_1(%arg0: i32, %arg1: i32) -> (i32, i32) {
    %c0_i32 = arith.constant 0 : i32
    %c0_i32_0 = arith.constant 0 : i32
    return %c0_i32, %arg1 : i32, i32
  }
  func.func @transform_2(%arg0: i32, %arg1: i32) -> (i32, i32) {
    %c0_i32 = arith.constant 0 : i32
    %c0_i32_0 = arith.constant 0 : i32
    return %c0_i32, %arg1 : i32, i32
  }
  func.func @transform_3(%arg0: i32, %arg1: i32) -> (i32, i32) {
    %c0_i32 = arith.constant 0 : i32
    return %arg0, %arg1 : i32, i32
  }
}

module attributes {stable_mosaic.version = 11 : i64} {
  func.func @_mm_kernel(%arg0: i32, %arg1: i32, %arg2: memref<256x32xbf16, #tpu.memory_space<vmem>>, %arg3: memref<32x48xbf16, #tpu.memory_space<vmem>>, %arg4: memref<1x48xf32, #tpu.memory_space<vmem>>, %arg5: memref<256x48xf32, #tpu.memory_space<vmem>>) attributes {dimension_semantics = [#tpu.dimension_semantics<parallel>, #tpu.dimension_semantics<parallel>], iteration_bounds = array<i64: 2, 1>, scalar_prefetch = 0 : i64, scratch_operands = 0 : i64, tpu.core_type = #tpu.core_type<tc>, window_params = [{transform_indices = @transform_0, window_bounds = array<i64: 256, 32>}, {transform_indices = @transform_1, window_bounds = array<i64: 32, 48>}, {transform_indices = @transform_2, window_bounds = array<i64: 1, 48>}, {transform_indices = @transform_3, window_bounds = array<i64: 256, 48>}]} {
    %c0 = arith.constant 0 : index
    %c0_0 = arith.constant 0 : index
    %0 = vector.load %arg2[%c0, %c0_0] : memref<256x32xbf16, #tpu.memory_space<vmem>>, vector<256x32xbf16>
    %c0_1 = arith.constant 0 : index
    %c0_2 = arith.constant 0 : index
    %1 = vector.load %arg3[%c0_1, %c0_2] : memref<32x48xbf16, #tpu.memory_space<vmem>>, vector<32x48xbf16>
    %cst = arith.constant dense<0.000000e+00> : vector<256x48xf32>
    %2 = tpu.matmul %0, %1, %cst {dimension_numbers = #tpu.dot_dimension_numbers<[1], [0], [0], [1], [0, 0, 1, 1], [], []>} : vector<256x32xbf16>, vector<32x48xbf16>, vector<256x48xf32> -> vector<256x48xf32>
    %c0_3 = arith.constant 0 : index
    %c0_4 = arith.constant 0 : index
    %3 = vector.load %arg4[%c0_3, %c0_4] : memref<1x48xf32, #tpu.memory_space<vmem>>, vector<1x48xf32>
    %4 = vector.broadcast %3 : vector<1x48xf32> to vector<256x48xf32>
    %5 = arith.addf %2, %4 : vector<256x48xf32>
    %cst_5 = arith.constant 0.000000e+00 : f32
    %6 = vector.broadcast %cst_5 : f32 to vector<256x48xf32>
    %7 = arith.maximumf %5, %6 : vector<256x48xf32>
    %c0_6 = arith.constant 0 : index
    %c0_7 = arith.constant 0 : index
    %8 = vector.load %arg5[%c0_6, %c0_7] : memref<256x48xf32, #tpu.memory_space<vmem>>, vector<256x48xf32>
    tpu.vector_store %arg5[%c0_6, %c0_7], %7 {strides = array<i32>} : memref<256x48xf32, #tpu.memory_space<vmem>>, vector<256x48xf32>,
    return
  }
  func.func @transform_0(%arg0: i32, %arg1: i32) -> (i32, i32) {
    %c0_i32 = arith.constant 0 : i32
    %c0_i32_0 = arith.constant 0 : i32
    return %arg0, %c0_i32 : i32, i32
  }
  func.func @transform_1(%arg0: i32, %arg1: i32) -> (i32, i32) {
    %c0_i32 = arith.constant 0 : i32
    %c0_i32_0 = arith.constant 0 : i32
    return %c0_i32, %arg1 : i32, i32
  }
  func.func @transform_2(%arg0: i32, %arg1: i32) -> (i32, i32) {
    %c0_i32 = arith.constant 0 : i32
    %c0_i32_0 = arith.constant 0 : i32
    return %c0_i32, %arg1 : i32, i32
  }
  func.func @transform_3(%arg0: i32, %arg1: i32) -> (i32, i32) {
    %c0_i32 = arith.constant 0 : i32
    return %arg0, %arg1 : i32, i32
  }
}

module attributes {stable_mosaic.version = 11 : i64} {
  func.func @_mm_kernel(%arg0: i32, %arg1: i32, %arg2: memref<16x224xbf16, #tpu.memory_space<vmem>>, %arg3: memref<224x128xbf16, #tpu.memory_space<vmem>>, %arg4: memref<1x128xf32, #tpu.memory_space<vmem>>, %arg5: memref<16x128xf32, #tpu.memory_space<vmem>>) attributes {dimension_semantics = [#tpu.dimension_semantics<parallel>, #tpu.dimension_semantics<parallel>], iteration_bounds = array<i64: 1, 3>, scalar_prefetch = 0 : i64, scratch_operands = 0 : i64, tpu.core_type = #tpu.core_type<tc>, window_params = [{transform_indices = @transform_0, window_bounds = array<i64: 16, 224>}, {transform_indices = @transform_1, window_bounds = array<i64: 224, 128>}, {transform_indices = @transform_2, window_bounds = array<i64: 1, 128>}, {transform_indices = @transform_3, window_bounds = array<i64: 16, 128>}]} {
    %c0 = arith.constant 0 : index
    %c0_0 = arith.constant 0 : index
    %0 = vector.load %arg2[%c0, %c0_0] : memref<16x224xbf16, #tpu.memory_space<vmem>>, vector<16x224xbf16>
    %c0_1 = arith.constant 0 : index
    %c0_2 = arith.constant 0 : index
    %1 = vector.load %arg3[%c0_1, %c0_2] : memref<224x128xbf16, #tpu.memory_space<vmem>>, vector<224x128xbf16>
    %cst = arith.constant dense<0.000000e+00> : vector<16x128xf32>
    %2 = tpu.matmul %0, %1, %cst {dimension_numbers = #tpu.dot_dimension_numbers<[1], [0], [0], [1], [0, 0, 1, 1], [], []>} : vector<16x224xbf16>, vector<224x128xbf16>, vector<16x128xf32> -> vector<16x128xf32>
    %c0_3 = arith.constant 0 : index
    %c0_4 = arith.constant 0 : index
    %3 = vector.load %arg4[%c0_3, %c0_4] : memref<1x128xf32, #tpu.memory_space<vmem>>, vector<1x128xf32>
    %4 = vector.broadcast %3 : vector<1x128xf32> to vector<16x128xf32>
    %5 = arith.addf %2, %4 : vector<16x128xf32>
    %cst_5 = arith.constant 0.000000e+00 : f32
    %6 = vector.broadcast %cst_5 : f32 to vector<16x128xf32>
    %7 = arith.maximumf %5, %6 : vector<16x128xf32>
    %c0_6 = arith.constant 0 : index
    %c0_7 = arith.constant 0 : index
    %8 = vector.load %arg5[%c0_6, %c0_7] : memref<16x128xf32, #tpu.memory_space<vmem>>, vector<16x128xf32>
    tpu.vector_store %arg5[%c0_6, %c0_7], %7 {strides = array<i32>} : memref<16x128xf32, #tpu.memory_space<vmem>>, vector<16x128xf32>,
    return
  }
  func.func @transform_0(%arg0: i32, %arg1: i32) -> (i32, i32) {
    %c0_i32 = arith.constant 0 : i32
    %c0_i32_0 = arith.constant 0 : i32
    return %arg0, %c0_i32 : i32, i32
  }
  func.func @transform_1(%arg0: i32, %arg1: i32) -> (i32, i32) {
    %c0_i32 = arith.constant 0 : i32
    %c0_i32_0 = arith.constant 0 : i32
    return %c0_i32, %arg1 : i32, i32
  }
  func.func @transform_2(%arg0: i32, %arg1: i32) -> (i32, i32) {
    %c0_i32 = arith.constant 0 : i32
    %c0_i32_0 = arith.constant 0 : i32
    return %c0_i32, %arg1 : i32, i32
  }
  func.func @transform_3(%arg0: i32, %arg1: i32) -> (i32, i32) {
    %c0_i32 = arith.constant 0 : i32
    return %arg0, %arg1 : i32, i32
  }
}

module attributes {stable_mosaic.version = 11 : i64} {
  func.func @_mm_kernel(%arg0: i32, %arg1: i32, %arg2: memref<16x384xbf16, #tpu.memory_space<vmem>>, %arg3: memref<384x128xbf16, #tpu.memory_space<vmem>>, %arg4: memref<1x128xf32, #tpu.memory_space<vmem>>, %arg5: memref<16x128xf32, #tpu.memory_space<vmem>>) attributes {dimension_semantics = [#tpu.dimension_semantics<parallel>, #tpu.dimension_semantics<parallel>], iteration_bounds = array<i64: 1, 5>, scalar_prefetch = 0 : i64, scratch_operands = 0 : i64, tpu.core_type = #tpu.core_type<tc>, window_params = [{transform_indices = @transform_0, window_bounds = array<i64: 16, 384>}, {transform_indices = @transform_1, window_bounds = array<i64: 384, 128>}, {transform_indices = @transform_2, window_bounds = array<i64: 1, 128>}, {transform_indices = @transform_3, window_bounds = array<i64: 16, 128>}]} {
    %c0 = arith.constant 0 : index
    %c0_0 = arith.constant 0 : index
    %0 = vector.load %arg2[%c0, %c0_0] : memref<16x384xbf16, #tpu.memory_space<vmem>>, vector<16x384xbf16>
    %c0_1 = arith.constant 0 : index
    %c0_2 = arith.constant 0 : index
    %1 = vector.load %arg3[%c0_1, %c0_2] : memref<384x128xbf16, #tpu.memory_space<vmem>>, vector<384x128xbf16>
    %cst = arith.constant dense<0.000000e+00> : vector<16x128xf32>
    %2 = tpu.matmul %0, %1, %cst {dimension_numbers = #tpu.dot_dimension_numbers<[1], [0], [0], [1], [0, 0, 1, 1], [], []>} : vector<16x384xbf16>, vector<384x128xbf16>, vector<16x128xf32> -> vector<16x128xf32>
    %c0_3 = arith.constant 0 : index
    %c0_4 = arith.constant 0 : index
    %3 = vector.load %arg4[%c0_3, %c0_4] : memref<1x128xf32, #tpu.memory_space<vmem>>, vector<1x128xf32>
    %4 = vector.broadcast %3 : vector<1x128xf32> to vector<16x128xf32>
    %5 = arith.addf %2, %4 : vector<16x128xf32>
    %cst_5 = arith.constant 0.000000e+00 : f32
    %6 = vector.broadcast %cst_5 : f32 to vector<16x128xf32>
    %7 = arith.maximumf %5, %6 : vector<16x128xf32>
    %c0_6 = arith.constant 0 : index
    %c0_7 = arith.constant 0 : index
    %8 = vector.load %arg5[%c0_6, %c0_7] : memref<16x128xf32, #tpu.memory_space<vmem>>, vector<16x128xf32>
    tpu.vector_store %arg5[%c0_6, %c0_7], %7 {strides = array<i32>} : memref<16x128xf32, #tpu.memory_space<vmem>>, vector<16x128xf32>,
    return
  }
  func.func @transform_0(%arg0: i32, %arg1: i32) -> (i32, i32) {
    %c0_i32 = arith.constant 0 : i32
    %c0_i32_0 = arith.constant 0 : i32
    return %arg0, %c0_i32 : i32, i32
  }
  func.func @transform_1(%arg0: i32, %arg1: i32) -> (i32, i32) {
    %c0_i32 = arith.constant 0 : i32
    %c0_i32_0 = arith.constant 0 : i32
    return %c0_i32, %arg1 : i32, i32
  }
  func.func @transform_2(%arg0: i32, %arg1: i32) -> (i32, i32) {
    %c0_i32 = arith.constant 0 : i32
    %c0_i32_0 = arith.constant 0 : i32
    return %c0_i32, %arg1 : i32, i32
  }
  func.func @transform_3(%arg0: i32, %arg1: i32) -> (i32, i32) {
    %c0_i32 = arith.constant 0 : i32
    return %arg0, %arg1 : i32, i32
  }
}

module attributes {stable_mosaic.version = 11 : i64} {
  func.func @_mm_kernel(%arg0: i32, %arg1: i32, %arg2: memref<16x640xbf16, #tpu.memory_space<vmem>>, %arg3: memref<640x256xbf16, #tpu.memory_space<vmem>>, %arg4: memref<1x256xf32, #tpu.memory_space<vmem>>, %arg5: memref<16x256xf32, #tpu.memory_space<vmem>>) attributes {dimension_semantics = [#tpu.dimension_semantics<parallel>, #tpu.dimension_semantics<parallel>], iteration_bounds = array<i64: 1, 10>, scalar_prefetch = 0 : i64, scratch_operands = 0 : i64, tpu.core_type = #tpu.core_type<tc>, window_params = [{transform_indices = @transform_0, window_bounds = array<i64: 16, 640>}, {transform_indices = @transform_1, window_bounds = array<i64: 640, 256>}, {transform_indices = @transform_2, window_bounds = array<i64: 1, 256>}, {transform_indices = @transform_3, window_bounds = array<i64: 16, 256>}]} {
    %c0 = arith.constant 0 : index
    %c0_0 = arith.constant 0 : index
    %0 = vector.load %arg2[%c0, %c0_0] : memref<16x640xbf16, #tpu.memory_space<vmem>>, vector<16x640xbf16>
    %c0_1 = arith.constant 0 : index
    %c0_2 = arith.constant 0 : index
    %1 = vector.load %arg3[%c0_1, %c0_2] : memref<640x256xbf16, #tpu.memory_space<vmem>>, vector<640x256xbf16>
    %cst = arith.constant dense<0.000000e+00> : vector<16x256xf32>
    %2 = tpu.matmul %0, %1, %cst {dimension_numbers = #tpu.dot_dimension_numbers<[1], [0], [0], [1], [0, 0, 1, 1], [], []>} : vector<16x640xbf16>, vector<640x256xbf16>, vector<16x256xf32> -> vector<16x256xf32>
    %c0_3 = arith.constant 0 : index
    %c0_4 = arith.constant 0 : index
    %3 = vector.load %arg4[%c0_3, %c0_4] : memref<1x256xf32, #tpu.memory_space<vmem>>, vector<1x256xf32>
    %4 = vector.broadcast %3 : vector<1x256xf32> to vector<16x256xf32>
    %5 = arith.addf %2, %4 : vector<16x256xf32>
    %cst_5 = arith.constant 0.000000e+00 : f32
    %6 = vector.broadcast %cst_5 : f32 to vector<16x256xf32>
    %7 = arith.maximumf %5, %6 : vector<16x256xf32>
    %c0_6 = arith.constant 0 : index
    %c0_7 = arith.constant 0 : index
    %8 = vector.load %arg5[%c0_6, %c0_7] : memref<16x256xf32, #tpu.memory_space<vmem>>, vector<16x256xf32>
    tpu.vector_store %arg5[%c0_6, %c0_7], %7 {strides = array<i32>} : memref<16x256xf32, #tpu.memory_space<vmem>>, vector<16x256xf32>,
    return
  }
  func.func @transform_0(%arg0: i32, %arg1: i32) -> (i32, i32) {
    %c0_i32 = arith.constant 0 : i32
    %c0_i32_0 = arith.constant 0 : i32
    return %arg0, %c0_i32 : i32, i32
  }
  func.func @transform_1(%arg0: i32, %arg1: i32) -> (i32, i32) {
    %c0_i32 = arith.constant 0 : i32
    %c0_i32_0 = arith.constant 0 : i32
    return %c0_i32, %arg1 : i32, i32
  }
  func.func @transform_2(%arg0: i32, %arg1: i32) -> (i32, i32) {
    %c0_i32 = arith.constant 0 : i32
    %c0_i32_0 = arith.constant 0 : i32
    return %c0_i32, %arg1 : i32, i32
  }
  func.func @transform_3(%arg0: i32, %arg1: i32) -> (i32, i32) {
    %c0_i32 = arith.constant 0 : i32
    return %arg0, %arg1 : i32, i32
  }
}

module attributes {stable_mosaic.version = 11 : i64} {
  func.func @_mm_kernel(%arg0: i32, %arg1: i32, %arg2: memref<16x2560xbf16, #tpu.memory_space<vmem>>, %arg3: memref<2560x256xbf16, #tpu.memory_space<vmem>>, %arg4: memref<1x256xf32, #tpu.memory_space<vmem>>, %arg5: memref<16x256xf32, #tpu.memory_space<vmem>>) attributes {dimension_semantics = [#tpu.dimension_semantics<parallel>, #tpu.dimension_semantics<parallel>], iteration_bounds = array<i64: 1, 10>, scalar_prefetch = 0 : i64, scratch_operands = 0 : i64, tpu.core_type = #tpu.core_type<tc>, window_params = [{transform_indices = @transform_0, window_bounds = array<i64: 16, 2560>}, {transform_indices = @transform_1, window_bounds = array<i64: 2560, 256>}, {transform_indices = @transform_2, window_bounds = array<i64: 1, 256>}, {transform_indices = @transform_3, window_bounds = array<i64: 16, 256>}]} {
    %c0 = arith.constant 0 : index
    %c0_0 = arith.constant 0 : index
    %0 = vector.load %arg2[%c0, %c0_0] : memref<16x2560xbf16, #tpu.memory_space<vmem>>, vector<16x2560xbf16>
    %c0_1 = arith.constant 0 : index
    %c0_2 = arith.constant 0 : index
    %1 = vector.load %arg3[%c0_1, %c0_2] : memref<2560x256xbf16, #tpu.memory_space<vmem>>, vector<2560x256xbf16>
    %cst = arith.constant dense<0.000000e+00> : vector<16x256xf32>
    %2 = tpu.matmul %0, %1, %cst {dimension_numbers = #tpu.dot_dimension_numbers<[1], [0], [0], [1], [0, 0, 1, 1], [], []>} : vector<16x2560xbf16>, vector<2560x256xbf16>, vector<16x256xf32> -> vector<16x256xf32>
    %c0_3 = arith.constant 0 : index
    %c0_4 = arith.constant 0 : index
    %3 = vector.load %arg4[%c0_3, %c0_4] : memref<1x256xf32, #tpu.memory_space<vmem>>, vector<1x256xf32>
    %4 = vector.broadcast %3 : vector<1x256xf32> to vector<16x256xf32>
    %5 = arith.addf %2, %4 : vector<16x256xf32>
    %cst_5 = arith.constant 0.000000e+00 : f32
    %6 = vector.broadcast %cst_5 : f32 to vector<16x256xf32>
    %7 = arith.maximumf %5, %6 : vector<16x256xf32>
    %c0_6 = arith.constant 0 : index
    %c0_7 = arith.constant 0 : index
    %8 = vector.load %arg5[%c0_6, %c0_7] : memref<16x256xf32, #tpu.memory_space<vmem>>, vector<16x256xf32>
    tpu.vector_store %arg5[%c0_6, %c0_7], %7 {strides = array<i32>} : memref<16x256xf32, #tpu.memory_space<vmem>>, vector<16x256xf32>,
    return
  }
  func.func @transform_0(%arg0: i32, %arg1: i32) -> (i32, i32) {
    %c0_i32 = arith.constant 0 : i32
    %c0_i32_0 = arith.constant 0 : i32
    return %arg0, %c0_i32 : i32, i32
  }
  func.func @transform_1(%arg0: i32, %arg1: i32) -> (i32, i32) {
    %c0_i32 = arith.constant 0 : i32
    %c0_i32_0 = arith.constant 0 : i32
    return %c0_i32, %arg1 : i32, i32
  }
  func.func @transform_2(%arg0: i32, %arg1: i32) -> (i32, i32) {
    %c0_i32 = arith.constant 0 : i32
    %c0_i32_0 = arith.constant 0 : i32
    return %c0_i32, %arg1 : i32, i32
  }
  func.func @transform_3(%arg0: i32, %arg1: i32) -> (i32, i32) {
    %c0_i32 = arith.constant 0 : i32
    return %arg0, %arg1 : i32, i32
  }
}

module attributes {stable_mosaic.version = 11 : i64} {
  func.func @_mm_kernel(%arg0: i32, %arg1: i32, %arg2: memref<16x2560xbf16, #tpu.memory_space<vmem>>, %arg3: memref<2560x64xbf16, #tpu.memory_space<vmem>>, %arg4: memref<1x64xf32, #tpu.memory_space<vmem>>, %arg5: memref<16x64xf32, #tpu.memory_space<vmem>>) attributes {dimension_semantics = [#tpu.dimension_semantics<parallel>, #tpu.dimension_semantics<parallel>], iteration_bounds = array<i64: 1, 1>, scalar_prefetch = 0 : i64, scratch_operands = 0 : i64, tpu.core_type = #tpu.core_type<tc>, window_params = [{transform_indices = @transform_0, window_bounds = array<i64: 16, 2560>}, {transform_indices = @transform_1, window_bounds = array<i64: 2560, 64>}, {transform_indices = @transform_2, window_bounds = array<i64: 1, 64>}, {transform_indices = @transform_3, window_bounds = array<i64: 16, 64>}]} {
    %c0 = arith.constant 0 : index
    %c0_0 = arith.constant 0 : index
    %0 = vector.load %arg2[%c0, %c0_0] : memref<16x2560xbf16, #tpu.memory_space<vmem>>, vector<16x2560xbf16>
    %c0_1 = arith.constant 0 : index
    %c0_2 = arith.constant 0 : index
    %1 = vector.load %arg3[%c0_1, %c0_2] : memref<2560x64xbf16, #tpu.memory_space<vmem>>, vector<2560x64xbf16>
    %cst = arith.constant dense<0.000000e+00> : vector<16x64xf32>
    %2 = tpu.matmul %0, %1, %cst {dimension_numbers = #tpu.dot_dimension_numbers<[1], [0], [0], [1], [0, 0, 1, 1], [], []>} : vector<16x2560xbf16>, vector<2560x64xbf16>, vector<16x64xf32> -> vector<16x64xf32>
    %c0_3 = arith.constant 0 : index
    %c0_4 = arith.constant 0 : index
    %3 = vector.load %arg4[%c0_3, %c0_4] : memref<1x64xf32, #tpu.memory_space<vmem>>, vector<1x64xf32>
    %4 = vector.broadcast %3 : vector<1x64xf32> to vector<16x64xf32>
    %5 = arith.addf %2, %4 : vector<16x64xf32>
    %c0_5 = arith.constant 0 : index
    %c0_6 = arith.constant 0 : index
    %6 = vector.load %arg5[%c0_5, %c0_6] : memref<16x64xf32, #tpu.memory_space<vmem>>, vector<16x64xf32>
    tpu.vector_store %arg5[%c0_5, %c0_6], %5 {strides = array<i32>} : memref<16x64xf32, #tpu.memory_space<vmem>>, vector<16x64xf32>,
    return
  }
  func.func @transform_0(%arg0: i32, %arg1: i32) -> (i32, i32) {
    %c0_i32 = arith.constant 0 : i32
    %c0_i32_0 = arith.constant 0 : i32
    return %arg0, %c0_i32 : i32, i32
  }
  func.func @transform_1(%arg0: i32, %arg1: i32) -> (i32, i32) {
    %c0_i32 = arith.constant 0 : i32
    %c0_i32_0 = arith.constant 0 : i32
    return %c0_i32, %arg1 : i32, i32
  }
  func.func @transform_2(%arg0: i32, %arg1: i32) -> (i32, i32) {
    %c0_i32 = arith.constant 0 : i32
    %c0_i32_0 = arith.constant 0 : i32
    return %c0_i32, %arg1 : i32, i32
  }
  func.func @transform_3(%arg0: i32, %arg1: i32) -> (i32, i32) {
    %c0_i32 = arith.constant 0 : i32
    return %arg0, %arg1 : i32, i32
  }
}

module attributes {stable_mosaic.version = 11 : i64} {
  func.func @_mm_kernel(%arg0: i32, %arg1: i32, %arg2: memref<16x640xbf16, #tpu.memory_space<vmem>>, %arg3: memref<640x128xbf16, #tpu.memory_space<vmem>>, %arg4: memref<1x128xf32, #tpu.memory_space<vmem>>, %arg5: memref<16x128xf32, #tpu.memory_space<vmem>>) attributes {dimension_semantics = [#tpu.dimension_semantics<parallel>, #tpu.dimension_semantics<parallel>], iteration_bounds = array<i64: 1, 5>, scalar_prefetch = 0 : i64, scratch_operands = 0 : i64, tpu.core_type = #tpu.core_type<tc>, window_params = [{transform_indices = @transform_0, window_bounds = array<i64: 16, 640>}, {transform_indices = @transform_1, window_bounds = array<i64: 640, 128>}, {transform_indices = @transform_2, window_bounds = array<i64: 1, 128>}, {transform_indices = @transform_3, window_bounds = array<i64: 16, 128>}]} {
    %c0 = arith.constant 0 : index
    %c0_0 = arith.constant 0 : index
    %0 = vector.load %arg2[%c0, %c0_0] : memref<16x640xbf16, #tpu.memory_space<vmem>>, vector<16x640xbf16>
    %c0_1 = arith.constant 0 : index
    %c0_2 = arith.constant 0 : index
    %1 = vector.load %arg3[%c0_1, %c0_2] : memref<640x128xbf16, #tpu.memory_space<vmem>>, vector<640x128xbf16>
    %cst = arith.constant dense<0.000000e+00> : vector<16x128xf32>
    %2 = tpu.matmul %0, %1, %cst {dimension_numbers = #tpu.dot_dimension_numbers<[1], [0], [0], [1], [0, 0, 1, 1], [], []>} : vector<16x640xbf16>, vector<640x128xbf16>, vector<16x128xf32> -> vector<16x128xf32>
    %c0_3 = arith.constant 0 : index
    %c0_4 = arith.constant 0 : index
    %3 = vector.load %arg4[%c0_3, %c0_4] : memref<1x128xf32, #tpu.memory_space<vmem>>, vector<1x128xf32>
    %4 = vector.broadcast %3 : vector<1x128xf32> to vector<16x128xf32>
    %5 = arith.addf %2, %4 : vector<16x128xf32>
    %cst_5 = arith.constant 0.000000e+00 : f32
    %6 = vector.broadcast %cst_5 : f32 to vector<16x128xf32>
    %7 = arith.maximumf %5, %6 : vector<16x128xf32>
    %c0_6 = arith.constant 0 : index
    %c0_7 = arith.constant 0 : index
    %8 = vector.load %arg5[%c0_6, %c0_7] : memref<16x128xf32, #tpu.memory_space<vmem>>, vector<16x128xf32>
    tpu.vector_store %arg5[%c0_6, %c0_7], %7 {strides = array<i32>} : memref<16x128xf32, #tpu.memory_space<vmem>>, vector<16x128xf32>,
    return
  }
  func.func @transform_0(%arg0: i32, %arg1: i32) -> (i32, i32) {
    %c0_i32 = arith.constant 0 : i32
    %c0_i32_0 = arith.constant 0 : i32
    return %arg0, %c0_i32 : i32, i32
  }
  func.func @transform_1(%arg0: i32, %arg1: i32) -> (i32, i32) {
    %c0_i32 = arith.constant 0 : i32
    %c0_i32_0 = arith.constant 0 : i32
    return %c0_i32, %arg1 : i32, i32
  }
  func.func @transform_2(%arg0: i32, %arg1: i32) -> (i32, i32) {
    %c0_i32 = arith.constant 0 : i32
    %c0_i32_0 = arith.constant 0 : i32
    return %c0_i32, %arg1 : i32, i32
  }
  func.func @transform_3(%arg0: i32, %arg1: i32) -> (i32, i32) {
    %c0_i32 = arith.constant 0 : i32
    return %arg0, %arg1 : i32, i32
  }
}

module attributes {stable_mosaic.version = 11 : i64} {
  func.func @_mm_kernel(%arg0: i32, %arg1: i32, %arg2: memref<16x640xbf16, #tpu.memory_space<vmem>>, %arg3: memref<640x64xbf16, #tpu.memory_space<vmem>>, %arg4: memref<1x64xf32, #tpu.memory_space<vmem>>, %arg5: memref<16x64xf32, #tpu.memory_space<vmem>>, %arg6: memref<16x64xf32, #tpu.memory_space<vmem>>) attributes {dimension_semantics = [#tpu.dimension_semantics<parallel>, #tpu.dimension_semantics<parallel>], iteration_bounds = array<i64: 1, 1>, scalar_prefetch = 0 : i64, scratch_operands = 0 : i64, tpu.core_type = #tpu.core_type<tc>, window_params = [{transform_indices = @transform_0, window_bounds = array<i64: 16, 640>}, {transform_indices = @transform_1, window_bounds = array<i64: 640, 64>}, {transform_indices = @transform_2, window_bounds = array<i64: 1, 64>}, {transform_indices = @transform_3, window_bounds = array<i64: 16, 64>}, {transform_indices = @transform_4, window_bounds = array<i64: 16, 64>}]} {
    %c0 = arith.constant 0 : index
    %c0_0 = arith.constant 0 : index
    %0 = vector.load %arg2[%c0, %c0_0] : memref<16x640xbf16, #tpu.memory_space<vmem>>, vector<16x640xbf16>
    %c0_1 = arith.constant 0 : index
    %c0_2 = arith.constant 0 : index
    %1 = vector.load %arg3[%c0_1, %c0_2] : memref<640x64xbf16, #tpu.memory_space<vmem>>, vector<640x64xbf16>
    %cst = arith.constant dense<0.000000e+00> : vector<16x64xf32>
    %2 = tpu.matmul %0, %1, %cst {dimension_numbers = #tpu.dot_dimension_numbers<[1], [0], [0], [1], [0, 0, 1, 1], [], []>} : vector<16x640xbf16>, vector<640x64xbf16>, vector<16x64xf32> -> vector<16x64xf32>
    %c0_3 = arith.constant 0 : index
    %c0_4 = arith.constant 0 : index
    %3 = vector.load %arg4[%c0_3, %c0_4] : memref<1x64xf32, #tpu.memory_space<vmem>>, vector<1x64xf32>
    %4 = vector.broadcast %3 : vector<1x64xf32> to vector<16x64xf32>
    %5 = arith.addf %2, %4 : vector<16x64xf32>
    %c0_5 = arith.constant 0 : index
    %c0_6 = arith.constant 0 : index
    %6 = vector.load %arg5[%c0_5, %c0_6] : memref<16x64xf32, #tpu.memory_space<vmem>>, vector<16x64xf32>
    %7 = arith.addf %5, %6 : vector<16x64xf32>
    %c0_7 = arith.constant 0 : index
    %c0_8 = arith.constant 0 : index
    %8 = vector.load %arg6[%c0_7, %c0_8] : memref<16x64xf32, #tpu.memory_space<vmem>>, vector<16x64xf32>
    tpu.vector_store %arg6[%c0_7, %c0_8], %7 {strides = array<i32>} : memref<16x64xf32, #tpu.memory_space<vmem>>, vector<16x64xf32>,
    return
  }
  func.func @transform_0(%arg0: i32, %arg1: i32) -> (i32, i32) {
    %c0_i32 = arith.constant 0 : i32
    %c0_i32_0 = arith.constant 0 : i32
    return %arg0, %c0_i32 : i32, i32
  }
  func.func @transform_1(%arg0: i32, %arg1: i32) -> (i32, i32) {
    %c0_i32 = arith.constant 0 : i32
    %c0_i32_0 = arith.constant 0 : i32
    return %c0_i32, %arg1 : i32, i32
  }
  func.func @transform_2(%arg0: i32, %arg1: i32) -> (i32, i32) {
    %c0_i32 = arith.constant 0 : i32
    %c0_i32_0 = arith.constant 0 : i32
    return %c0_i32, %arg1 : i32, i32
  }
  func.func @transform_3(%arg0: i32, %arg1: i32) -> (i32, i32) {
    %c0_i32 = arith.constant 0 : i32
    return %arg0, %arg1 : i32, i32
  }
  func.func @transform_4(%arg0: i32, %arg1: i32) -> (i32, i32) {
    %c0_i32 = arith.constant 0 : i32
    return %arg0, %arg1 : i32, i32
  }
}

module attributes {stable_mosaic.version = 11 : i64} {
  func.func @_mm_kernel(%arg0: i32, %arg1: i32, %arg2: memref<16x384xbf16, #tpu.memory_space<vmem>>, %arg3: memref<384x128xbf16, #tpu.memory_space<vmem>>, %arg4: memref<1x128xf32, #tpu.memory_space<vmem>>, %arg5: memref<16x128xf32, #tpu.memory_space<vmem>>) attributes {dimension_semantics = [#tpu.dimension_semantics<parallel>, #tpu.dimension_semantics<parallel>], iteration_bounds = array<i64: 1, 3>, scalar_prefetch = 0 : i64, scratch_operands = 0 : i64, tpu.core_type = #tpu.core_type<tc>, window_params = [{transform_indices = @transform_0, window_bounds = array<i64: 16, 384>}, {transform_indices = @transform_1, window_bounds = array<i64: 384, 128>}, {transform_indices = @transform_2, window_bounds = array<i64: 1, 128>}, {transform_indices = @transform_3, window_bounds = array<i64: 16, 128>}]} {
    %c0 = arith.constant 0 : index
    %c0_0 = arith.constant 0 : index
    %0 = vector.load %arg2[%c0, %c0_0] : memref<16x384xbf16, #tpu.memory_space<vmem>>, vector<16x384xbf16>
    %c0_1 = arith.constant 0 : index
    %c0_2 = arith.constant 0 : index
    %1 = vector.load %arg3[%c0_1, %c0_2] : memref<384x128xbf16, #tpu.memory_space<vmem>>, vector<384x128xbf16>
    %cst = arith.constant dense<0.000000e+00> : vector<16x128xf32>
    %2 = tpu.matmul %0, %1, %cst {dimension_numbers = #tpu.dot_dimension_numbers<[1], [0], [0], [1], [0, 0, 1, 1], [], []>} : vector<16x384xbf16>, vector<384x128xbf16>, vector<16x128xf32> -> vector<16x128xf32>
    %c0_3 = arith.constant 0 : index
    %c0_4 = arith.constant 0 : index
    %3 = vector.load %arg4[%c0_3, %c0_4] : memref<1x128xf32, #tpu.memory_space<vmem>>, vector<1x128xf32>
    %4 = vector.broadcast %3 : vector<1x128xf32> to vector<16x128xf32>
    %5 = arith.addf %2, %4 : vector<16x128xf32>
    %cst_5 = arith.constant 0.000000e+00 : f32
    %6 = vector.broadcast %cst_5 : f32 to vector<16x128xf32>
    %7 = arith.maximumf %5, %6 : vector<16x128xf32>
    %c0_6 = arith.constant 0 : index
    %c0_7 = arith.constant 0 : index
    %8 = vector.load %arg5[%c0_6, %c0_7] : memref<16x128xf32, #tpu.memory_space<vmem>>, vector<16x128xf32>
    tpu.vector_store %arg5[%c0_6, %c0_7], %7 {strides = array<i32>} : memref<16x128xf32, #tpu.memory_space<vmem>>, vector<16x128xf32>,
    return
  }
  func.func @transform_0(%arg0: i32, %arg1: i32) -> (i32, i32) {
    %c0_i32 = arith.constant 0 : i32
    %c0_i32_0 = arith.constant 0 : i32
    return %arg0, %c0_i32 : i32, i32
  }
  func.func @transform_1(%arg0: i32, %arg1: i32) -> (i32, i32) {
    %c0_i32 = arith.constant 0 : i32
    %c0_i32_0 = arith.constant 0 : i32
    return %c0_i32, %arg1 : i32, i32
  }
  func.func @transform_2(%arg0: i32, %arg1: i32) -> (i32, i32) {
    %c0_i32 = arith.constant 0 : i32
    %c0_i32_0 = arith.constant 0 : i32
    return %c0_i32, %arg1 : i32, i32
  }
  func.func @transform_3(%arg0: i32, %arg1: i32) -> (i32, i32) {
    %c0_i32 = arith.constant 0 : i32
    return %arg0, %arg1 : i32, i32
  }
}

module attributes {stable_mosaic.version = 11 : i64} {
  func.func @_mm_kernel(%arg0: i32, %arg1: i32, %arg2: memref<16x384xbf16, #tpu.memory_space<vmem>>, %arg3: memref<384x64xbf16, #tpu.memory_space<vmem>>, %arg4: memref<1x64xf32, #tpu.memory_space<vmem>>, %arg5: memref<16x64xf32, #tpu.memory_space<vmem>>, %arg6: memref<16x64xf32, #tpu.memory_space<vmem>>) attributes {dimension_semantics = [#tpu.dimension_semantics<parallel>, #tpu.dimension_semantics<parallel>], iteration_bounds = array<i64: 1, 1>, scalar_prefetch = 0 : i64, scratch_operands = 0 : i64, tpu.core_type = #tpu.core_type<tc>, window_params = [{transform_indices = @transform_0, window_bounds = array<i64: 16, 384>}, {transform_indices = @transform_1, window_bounds = array<i64: 384, 64>}, {transform_indices = @transform_2, window_bounds = array<i64: 1, 64>}, {transform_indices = @transform_3, window_bounds = array<i64: 16, 64>}, {transform_indices = @transform_4, window_bounds = array<i64: 16, 64>}]} {
    %c0 = arith.constant 0 : index
    %c0_0 = arith.constant 0 : index
    %0 = vector.load %arg2[%c0, %c0_0] : memref<16x384xbf16, #tpu.memory_space<vmem>>, vector<16x384xbf16>
    %c0_1 = arith.constant 0 : index
    %c0_2 = arith.constant 0 : index
    %1 = vector.load %arg3[%c0_1, %c0_2] : memref<384x64xbf16, #tpu.memory_space<vmem>>, vector<384x64xbf16>
    %cst = arith.constant dense<0.000000e+00> : vector<16x64xf32>
    %2 = tpu.matmul %0, %1, %cst {dimension_numbers = #tpu.dot_dimension_numbers<[1], [0], [0], [1], [0, 0, 1, 1], [], []>} : vector<16x384xbf16>, vector<384x64xbf16>, vector<16x64xf32> -> vector<16x64xf32>
    %c0_3 = arith.constant 0 : index
    %c0_4 = arith.constant 0 : index
    %3 = vector.load %arg4[%c0_3, %c0_4] : memref<1x64xf32, #tpu.memory_space<vmem>>, vector<1x64xf32>
    %4 = vector.broadcast %3 : vector<1x64xf32> to vector<16x64xf32>
    %5 = arith.addf %2, %4 : vector<16x64xf32>
    %c0_5 = arith.constant 0 : index
    %c0_6 = arith.constant 0 : index
    %6 = vector.load %arg5[%c0_5, %c0_6] : memref<16x64xf32, #tpu.memory_space<vmem>>, vector<16x64xf32>
    %7 = arith.addf %5, %6 : vector<16x64xf32>
    %c0_7 = arith.constant 0 : index
    %c0_8 = arith.constant 0 : index
    %8 = vector.load %arg6[%c0_7, %c0_8] : memref<16x64xf32, #tpu.memory_space<vmem>>, vector<16x64xf32>
    tpu.vector_store %arg6[%c0_7, %c0_8], %7 {strides = array<i32>} : memref<16x64xf32, #tpu.memory_space<vmem>>, vector<16x64xf32>,
    return
  }
  func.func @transform_0(%arg0: i32, %arg1: i32) -> (i32, i32) {
    %c0_i32 = arith.constant 0 : i32
    %c0_i32_0 = arith.constant 0 : i32
    return %arg0, %c0_i32 : i32, i32
  }
  func.func @transform_1(%arg0: i32, %arg1: i32) -> (i32, i32) {
    %c0_i32 = arith.constant 0 : i32
    %c0_i32_0 = arith.constant 0 : i32
    return %c0_i32, %arg1 : i32, i32
  }
  func.func @transform_2(%arg0: i32, %arg1: i32) -> (i32, i32) {
    %c0_i32 = arith.constant 0 : i32
    %c0_i32_0 = arith.constant 0 : i32
    return %c0_i32, %arg1 : i32, i32
  }
  func.func @transform_3(%arg0: i32, %arg1: i32) -> (i32, i32) {
    %c0_i32 = arith.constant 0 : i32
    return %arg0, %arg1 : i32, i32
  }
  func.func @transform_4(%arg0: i32, %arg1: i32) -> (i32, i32) {
    %c0_i32 = arith.constant 0 : i32
    return %arg0, %arg1 : i32, i32
  }
}

</mosaic_0001>

<bundles_post_ra>
// kernel: det_forward.11
= control target key start
LH: loop header
LB: loop body
LE: loop exit
PB: predicated region body
PF: predicated region fallthrough
CT: control target
= control target key end

     0   :  { %s960_s12 = smov 0   ;;  %s962_s13 = smov 0   ;;  %s1146_s0 = inlined_call_operand.vmem [shape: bf16[2048,64], index: 0, kind: input, shape index: {}]   ;;  %s1147_s1 = inlined_call_operand.vmem [shape: bf16[64,32], index: 1, kind: input, shape index: {}]   ;;  %s1148_s2 = inlined_call_operand.vmem [shape: f32[1,32], index: 2, kind: input, shape index: {}]   ;;  %s1149_s3 = inlined_call_operand.vmem [shape: f32[2048,32], index: 3, kind: output, shape index: {}]  }
   0x1   :  { %s964_s14 = smov 0  }
   0x2 LB: > { %s25_s15 = sadd.s32 1, %s934_s13  ;;  %p760_p0 = scmp.ge.s32.totalorder %s938_s14, 1  ;;  %s938_s14 = sphi %s964_s14, %s13_s14   ;;  %s934_s13 = sphi %s962_s13, %s1151_s13   ;;  %s930_s12 = sphi %s960_s12, %s1150_s12  }
   0x3   : > { %p27_p1 = scmp.ge.s32.totalorder %s25_s15, 8  ;;  %p169_p2 = scmp.lt.s32.totalorder %s938_s14, 9 }
   0x5   : > { %s1153_s15 = smov (%p27_p1, %s25_s15), 0  ;;  %p170_p3 = pnand %p760_p0, %p169_p2 }
   0x6   : > { %v896_v0 = vld [vmem:[%s1147_s1] sm:$0xff] (!%p170_p3)   ;;  %s761_s18 = sshll.u32 (!%p170_p3), %s930_s12, 5  ;;  %v897_v1 = vld [vmem:[%s1147_s1 + $0x8] sm:$0xff] (!%p170_p3)   ;;  %v898_v2 = vld [vmem:[%s1147_s1 + $0x10] sm:$0xff] (!%p170_p3)   ;;  %vm377_vm0 = vcmask (!%p170_p3), 523264   ;;  %vm619_vm1 = vcmask (!%p170_p3), 261120  }
   0x7   : > { %173 = sbr.rel (%p170_p3) target bundleno = 267 (0x10b), region = 32  ;;  %p204_p4 = scmp.lt.s32.totalorder (!%p170_p3), %s761_s18, 255  ;;  %824 = vmatprep.subr.bf16.mxu0 (!%p170_p3), %v896_v0  ;;  %864 = vmatprep.subr.bf16.mxu1 (!%p170_p3), %v896_v0  ;;  %v899_v3 = vld [vmem:[%s1147_s1 + $0x18] sm:$0xff] (!%p170_p3)   ;;  %v1033_v20 = vld [vmem:[%s1148_s2] ss:$0 sm:$0xff] (!%p170_p3) }
   0x8   : > { %825 = vmatpush3.bf16.msra.mxu0 (!%p170_p3), %v896_v0  ;;  %868 = vmatpush3.bf16.msra.mxu1 (!%p170_p3), %v896_v0 }
   0x9   : > { %826 = vmatprep.subr.bf16.mxu0 (!%p170_p3), %v897_v1  ;;  %865 = vmatprep.subr.bf16.mxu1 (!%p170_p3), %v897_v1 }
   0xc   : > { %827 = vmatpush3.bf16.msra.mxu0 (!%p170_p3), %v897_v1  ;;  %869 = vmatpush3.bf16.msra.mxu1 (!%p170_p3), %v897_v1 }
   0xd   : > { %828 = vmatprep.subr.bf16.mxu0 (!%p170_p3), %v898_v2  ;;  %866 = vmatprep.subr.bf16.mxu1 (!%p170_p3), %v898_v2 }
   0xe   : > { %s1155_s18 = smov (!%p204_p4, %s761_s18), 255 }
   0xf   : > { %s762_s23 = sshll.u32 %s1155_s18, 2  ;;  %s764_s4 = sshll.u32 %s1155_s18, 3 }
  0x10   : > { %s996_s28 = scalar_lea.vmem %s1146_s0, %s762_s23  ;;  %829 = vmatpush3.bf16.msra.mxu0 %v898_v2  ;;  %870 = vmatpush3.bf16.msra.mxu1 %v898_v2  ;;  %s1041_s7 = scalar_lea.vmem %s1149_s3, %s764_s4 }
  0x11   : > { %v900_v4 = vld [vmem:[%s996_s28] sm:$0xff]   ;;  %830 = vmatprep.subr.bf16.mxu0 %v899_v3  ;;  %867 = vmatprep.subr.bf16.mxu1 %v899_v3  ;;  %v902_v6 = vld [vmem:[%s996_s28 + $0x8] sm:$0xff]   ;;  %v904_v8 = vld [vmem:[%s996_s28 + $0x10] sm:$0xff]  }
  0x12   : > { %v901_v5 = vld [vmem:[%s996_s28 + $0x40] sm:$0xff]   ;;  %832 = vmatprep.mubr.msk.bf16.mxu0 %vm377_vm0, %v900_v4  ;;  %v903_v7 = vld [vmem:[%s996_s28 + $0x48] sm:$0xff]   ;;  %v905_v9 = vld [vmem:[%s996_s28 + $0x50] sm:$0xff]  }
  0x13   : > { %848 = vmatprep.mubr.msk.bf16.mxu1 %vm377_vm0, %v901_v5  ;;  %v906_v10 = vld [vmem:[%s996_s28 + $0x18] sm:$0xff]   ;;  %v908_v12 = vld [vmem:[%s996_s28 + $0x20] sm:$0xff]   ;;  %v910_v14 = vld [vmem:[%s996_s28 + $0x28] sm:$0xff]  }
  0x14   : > { %831 = vmatpush3.bf16.msra.mxu0 %v899_v3  ;;  %871 = vmatpush3.bf16.msra.mxu1 %v899_v3  ;;  %v907_v11 = vld [vmem:[%s996_s28 + $0x58] sm:$0xff]   ;;  %v909_v13 = vld [vmem:[%s996_s28 + $0x60] sm:$0xff]   ;;  %v911_v15 = vld [vmem:[%s996_s28 + $0x68] sm:$0xff]  }
  0x15   : > { %v912_v16 = vld [vmem:[%s996_s28 + $0x30] sm:$0xff]   ;;  %v914_v18 = vld [vmem:[%s996_s28 + $0x38] sm:$0xff]  }
  0x16   : > { %v913_v17 = vld [vmem:[%s996_s28 + $0x70] sm:$0xff]   ;;  %v915_v19 = vld [vmem:[%s996_s28 + $0x78] sm:$0xff]  }
  0x17   : > { %833 = vmatmul.mubr.msk.bf16.vlgmr.msra.gmra.mrb[0].mxu0 %vm377_vm0, %v902_v6  ;;  %849 = vmatmul.mubr.msk.bf16.vlgmr.msra.gmra.mrb[0].mxu1 %vm377_vm0, %v903_v7 }
  0x18   : > { %836 = vmatprep.mubr.msk.bf16.mxu0 %vm377_vm0, %v904_v8  ;;  %852 = vmatprep.mubr.msk.bf16.mxu1 %vm377_vm0, %v905_v9 }
  0x1f   : > { %837 = vmatmul.mubr.msk.bf16.gmra.mrb[4].mxu0 %vm377_vm0, %v906_v10  ;;  %853 = vmatmul.mubr.msk.bf16.gmra.mrb[4].mxu1 %vm377_vm0, %v907_v11 }
  0x20   : > { %840 = vmatprep.mubr.msk.bf16.mxu0 %vm377_vm0, %v908_v12  ;;  %856 = vmatprep.mubr.msk.bf16.mxu1 %vm377_vm0, %v909_v13 }
  0x27   : > { %841 = vmatmul.mubr.msk.bf16.gmra.mrb[8].mxu0 %vm377_vm0, %v910_v14  ;;  %857 = vmatmul.mubr.msk.bf16.gmra.mrb[8].mxu1 %vm377_vm0, %v911_v15 }
  0x28   : > { %844 = vmatprep.mubr.msk.bf16.mxu0 %vm377_vm0, %v912_v16  ;;  %860 = vmatprep.mubr.msk.bf16.mxu1 %vm377_vm0, %v913_v17 }
  0x2f   : > { %845 = vmatmul.mubr.msk.bf16.gmra.mrb[12].mxu0 %vm377_vm0, %v914_v18  ;;  %861 = vmatmul.mubr.msk.bf16.gmra.mrb[12].mxu1 %vm377_vm0, %v915_v19 }
  0xea   : > { %v834_v21 = vpop.f32.mrb[0].mxu0  ;;  %v850_v22 = vpop.f32.mrb[0].mxu1 }
  0xeb   : > { %v469_v23 = vadd.f32 %v834_v21, %v1033_v20  ;;  %v533_v24 = vadd.f32 %v850_v22, %v1033_v20  ;;  %v460_v25 = vpop.f32.mrb[1].mxu0  ;;  %v524_v26 = vpop.f32.mrb[1].mxu1 }
  0xec   : > { %v461_v27 = vadd.f32 %v1033_v20, %v460_v25  ;;  %v525_v28 = vadd.f32 %v1033_v20, %v524_v26  ;;  %v835_v29 = vpop.f32.mrb[2].mxu0  ;;  %v851_v30 = vpop.f32.mrb[2].mxu1 }
  0xed   : > { %v589_v31 = vmax.f32 %v469_v23, 0.0  ;;  %v605_v32 = vmax.f32 %v533_v24, 0.0  ;;  %v472_v33 = vadd.f32 %v835_v29, %v1033_v20  ;;  %v536_v34 = vadd.f32 %v851_v30, %v1033_v20  ;;  %v463_v35 = vpop.f32.mrb[3].mxu0  ;;  %v527_v36 = vpop.f32.mrb[3].mxu1 }
  0xee   : > { %v587_v37 = vmax.f32 %v461_v27, 0.0  ;;  %v603_v38 = vmax.f32 %v525_v28, 0.0  ;;  %v464_v39 = vadd.f32 %v1033_v20, %v463_v35  ;;  %v528_v40 = vadd.f32 %v1033_v20, %v527_v36 }
  0xef   : > { %622 = vst.msk [vmem:[%s1041_s7 + $0x10] sm:$0xff] %vm619_vm1, %v589_v31  ;;  %638 = vst.msk [vmem:[%s1041_s7 + $0x90] sm:$0xff] %vm619_vm1, %v605_v32  ;;  %v590_v41 = vmax.f32 %v472_v33, 0.0  ;;  %v606_v42 = vmax.f32 %v536_v34, 0.0 }
  0xf0   : > { %620 = vst.msk [vmem:[%s1041_s7] sm:$0xff] %vm619_vm1, %v587_v37  ;;  %636 = vst.msk [vmem:[%s1041_s7 + $0x80] sm:$0xff] %vm619_vm1, %v603_v38  ;;  %v588_v43 = vmax.f32 %v464_v39, 0.0  ;;  %v604_v44 = vmax.f32 %v528_v40, 0.0 }
  0xf1   : > { %623 = vst.msk [vmem:[%s1041_s7 + $0x18] sm:$0xff] %vm619_vm1, %v590_v41  ;;  %639 = vst.msk [vmem:[%s1041_s7 + $0x98] sm:$0xff] %vm619_vm1, %v606_v42 }
  0xf2   : > { %621 = vst.msk [vmem:[%s1041_s7 + $0x8] sm:$0xff] %vm619_vm1, %v588_v43  ;;  %637 = vst.msk [vmem:[%s1041_s7 + $0x88] sm:$0xff] %vm619_vm1, %v604_v44  ;;  %v838_v45 = vpop.f32.mrb[4].mxu0  ;;  %v854_v46 = vpop.f32.mrb[4].mxu1 }
  0xf3   : > { %v485_v47 = vadd.f32 %v838_v45, %v1033_v20  ;;  %v549_v48 = vadd.f32 %v854_v46, %v1033_v20  ;;  %v476_v49 = vpop.f32.mrb[5].mxu0  ;;  %v540_v50 = vpop.f32.mrb[5].mxu1 }
  0xf4   : > { %v477_v51 = vadd.f32 %v1033_v20, %v476_v49  ;;  %v541_v52 = vadd.f32 %v1033_v20, %v540_v50  ;;  %v839_v53 = vpop.f32.mrb[6].mxu0  ;;  %v855_v54 = vpop.f32.mrb[6].mxu1 }
  0xf5   : > { %v593_v55 = vmax.f32 %v485_v47, 0.0  ;;  %v609_v56 = vmax.f32 %v549_v48, 0.0  ;;  %v488_v57 = vadd.f32 %v839_v53, %v1033_v20  ;;  %v552_v58 = vadd.f32 %v855_v54, %v1033_v20  ;;  %v479_v59 = vpop.f32.mrb[7].mxu0  ;;  %v543_v60 = vpop.f32.mrb[7].mxu1 }
  0xf6   : > { %v591_v61 = vmax.f32 %v477_v51, 0.0  ;;  %v607_v62 = vmax.f32 %v541_v52, 0.0  ;;  %v480_v63 = vadd.f32 %v1033_v20, %v479_v59  ;;  %v544_v0 = vadd.f32 %v1033_v20, %v543_v60 }
  0xf7   : > { %626 = vst.msk [vmem:[%s1041_s7 + $0x30] sm:$0xff] %vm619_vm1, %v593_v55  ;;  %642 = vst.msk [vmem:[%s1041_s7 + $0xb0] sm:$0xff] %vm619_vm1, %v609_v56  ;;  %v594_v1 = vmax.f32 %v488_v57, 0.0  ;;  %v610_v2 = vmax.f32 %v552_v58, 0.0 }
  0xf8   : > { %624 = vst.msk [vmem:[%s1041_s7 + $0x20] sm:$0xff] %vm619_vm1, %v591_v61  ;;  %640 = vst.msk [vmem:[%s1041_s7 + $0xa0] sm:$0xff] %vm619_vm1, %v607_v62  ;;  %v592_v3 = vmax.f32 %v480_v63, 0.0  ;;  %v608_v4 = vmax.f32 %v544_v0, 0.0 }
  0xf9   : > { %627 = vst.msk [vmem:[%s1041_s7 + $0x38] sm:$0xff] %vm619_vm1, %v594_v1  ;;  %643 = vst.msk [vmem:[%s1041_s7 + $0xb8] sm:$0xff] %vm619_vm1, %v610_v2 }
  0xfa   : > { %625 = vst.msk [vmem:[%s1041_s7 + $0x28] sm:$0xff] %vm619_vm1, %v592_v3  ;;  %641 = vst.msk [vmem:[%s1041_s7 + $0xa8] sm:$0xff] %vm619_vm1, %v608_v4  ;;  %v842_v5 = vpop.f32.mrb[8].mxu0  ;;  %v858_v6 = vpop.f32.mrb[8].mxu1 }
  0xfb   : > { %v501_v7 = vadd.f32 %v842_v5, %v1033_v20  ;;  %v565_v8 = vadd.f32 %v858_v6, %v1033_v20  ;;  %v492_v9 = vpop.f32.mrb[9].mxu0  ;;  %v556_v10 = vpop.f32.mrb[9].mxu1 }
  0xfc   : > { %v493_v11 = vadd.f32 %v1033_v20, %v492_v9  ;;  %v557_v12 = vadd.f32 %v1033_v20, %v556_v10  ;;  %v843_v13 = vpop.f32.mrb[10].mxu0  ;;  %v859_v14 = vpop.f32.mrb[10].mxu1 }
  0xfd   : > { %v597_v15 = vmax.f32 %v501_v7, 0.0  ;;  %v613_v16 = vmax.f32 %v565_v8, 0.0  ;;  %v504_v17 = vadd.f32 %v843_v13, %v1033_v20  ;;  %v568_v18 = vadd.f32 %v859_v14, %v1033_v20  ;;  %v495_v19 = vpop.f32.mrb[11].mxu0  ;;  %v559_v21 = vpop.f32.mrb[11].mxu1 }
  0xfe   : > { %v595_v22 = vmax.f32 %v493_v11, 0.0  ;;  %v611_v23 = vmax.f32 %v557_v12, 0.0  ;;  %v496_v24 = vadd.f32 %v1033_v20, %v495_v19  ;;  %v560_v25 = vadd.f32 %v1033_v20, %v559_v21 }
  0xff   : > { %630 = vst.msk [vmem:[%s1041_s7 + $0x50] sm:$0xff] %vm619_vm1, %v597_v15  ;;  %646 = vst.msk [vmem:[%s1041_s7 + $0xd0] sm:$0xff] %vm619_vm1, %v613_v16  ;;  %v598_v26 = vmax.f32 %v504_v17, 0.0  ;;  %v614_v27 = vmax.f32 %v568_v18, 0.0 }
 0x100   : > { %628 = vst.msk [vmem:[%s1041_s7 + $0x40] sm:$0xff] %vm619_vm1, %v595_v22  ;;  %644 = vst.msk [vmem:[%s1041_s7 + $0xc0] sm:$0xff] %vm619_vm1, %v611_v23  ;;  %v596_v28 = vmax.f32 %v496_v24, 0.0  ;;  %v612_v29 = vmax.f32 %v560_v25, 0.0 }
 0x101   : > { %631 = vst.msk [vmem:[%s1041_s7 + $0x58] sm:$0xff] %vm619_vm1, %v598_v26  ;;  %647 = vst.msk [vmem:[%s1041_s7 + $0xd8] sm:$0xff] %vm619_vm1, %v614_v27 }
 0x102   : > { %629 = vst.msk [vmem:[%s1041_s7 + $0x48] sm:$0xff] %vm619_vm1, %v596_v28  ;;  %645 = vst.msk [vmem:[%s1041_s7 + $0xc8] sm:$0xff] %vm619_vm1, %v612_v29  ;;  %v846_v30 = vpop.f32.mrb[12].mxu0  ;;  %v862_v31 = vpop.f32.mrb[12].mxu1 }
 0x103   : > { %v517_v32 = vadd.f32 %v846_v30, %v1033_v20  ;;  %v581_v33 = vadd.f32 %v862_v31, %v1033_v20  ;;  %v508_v34 = vpop.f32.mrb[13].mxu0  ;;  %v572_v35 = vpop.f32.mrb[13].mxu1 }
 0x104   : > { %v509_v36 = vadd.f32 %v1033_v20, %v508_v34  ;;  %v573_v37 = vadd.f32 %v1033_v20, %v572_v35  ;;  %v847_v38 = vpop.f32.mrb[14].mxu0  ;;  %v863_v39 = vpop.f32.mrb[14].mxu1 }
 0x105   : > { %v601_v40 = vmax.f32 %v517_v32, 0.0  ;;  %v617_v41 = vmax.f32 %v581_v33, 0.0  ;;  %v520_v42 = vadd.f32 %v847_v38, %v1033_v20  ;;  %v584_v43 = vadd.f32 %v863_v39, %v1033_v20  ;;  %v511_v44 = vpop.f32.mrb[15].mxu0  ;;  %v575_v45 = vpop.f32.mrb[15].mxu1 }
 0x106   : > { %v599_v46 = vmax.f32 %v509_v36, 0.0  ;;  %v615_v47 = vmax.f32 %v573_v37, 0.0  ;;  %v512_v48 = vadd.f32 %v1033_v20, %v511_v44  ;;  %v576_v49 = vadd.f32 %v1033_v20, %v575_v45 }
 0x107   : > { %634 = vst.msk [vmem:[%s1041_s7 + $0x70] sm:$0xff] %vm619_vm1, %v601_v40  ;;  %650 = vst.msk [vmem:[%s1041_s7 + $0xf0] sm:$0xff] %vm619_vm1, %v617_v41  ;;  %v602_v50 = vmax.f32 %v520_v42, 0.0  ;;  %v618_v51 = vmax.f32 %v584_v43, 0.0 }
 0x108   : > { %632 = vst.msk [vmem:[%s1041_s7 + $0x60] sm:$0xff] %vm619_vm1, %v599_v46  ;;  %648 = vst.msk [vmem:[%s1041_s7 + $0xe0] sm:$0xff] %vm619_vm1, %v615_v47  ;;  %v600_v52 = vmax.f32 %v512_v48, 0.0  ;;  %v616_v53 = vmax.f32 %v576_v49, 0.0 }
 0x109   : > { %635 = vst.msk [vmem:[%s1041_s7 + $0x78] sm:$0xff] %vm619_vm1, %v602_v50  ;;  %651 = vst.msk [vmem:[%s1041_s7 + $0xf8] sm:$0xff] %vm619_vm1, %v618_v51 }
 0x10a   : > { %633 = vst.msk [vmem:[%s1041_s7 + $0x68] sm:$0xff] %vm619_vm1, %v600_v52  ;;  %649 = vst.msk [vmem:[%s1041_s7 + $0xe8] sm:$0xff] %vm619_vm1, %v616_v53 }
 0x10b PF: > { %s13_s14 = sadd.s32 1, %s938_s14   ;;  %s1150_s12 = smov %s934_s13 }
 0x10c   : > { %p10_p5 = scmp.ge.s32.totalorder %s13_s14, 10   ;;  %s1151_s13 = smov %s1153_s15 }
 0x10e   :  { %12 = sbr.rel (!%p10_p5) target bundleno = 2 (0x2), region = 68 }

// kernel: det_forward.12
= control target key start
LH: loop header
LB: loop body
LE: loop exit
PB: predicated region body
PF: predicated region fallthrough
CT: control target
= control target key end

     0   :  { %s930_s12 = smov 0   ;;  %s932_s13 = smov 0   ;;  %s1110_s0 = inlined_call_operand.vmem [shape: bf16[512,32], index: 0, kind: input, shape index: {}]   ;;  %s1111_s1 = inlined_call_operand.vmem [shape: bf16[32,48], index: 1, kind: input, shape index: {}]   ;;  %s1112_s2 = inlined_call_operand.vmem [shape: f32[1,48], index: 2, kind: input, shape index: {}]   ;;  %s1113_s3 = inlined_call_operand.vmem [shape: f32[512,48], index: 3, kind: output, shape index: {}]  }
   0x1   :  { %s934_s14 = smov 0  }
   0x2 LB: > { %s25_s15 = sadd.s32 1, %s904_s13  ;;  %p744_p0 = scmp.ge.s32.totalorder %s908_s14, 1  ;;  %s908_s14 = sphi %s934_s14, %s13_s14   ;;  %s904_s13 = sphi %s932_s13, %s1115_s13   ;;  %s900_s12 = sphi %s930_s12, %s1114_s12  }
   0x3   : > { %p27_p1 = scmp.ge.s32.totalorder %s25_s15, 2  ;;  %p169_p2 = scmp.lt.s32.totalorder %s908_s14, 3 }
   0x5   : > { %s1117_s15 = smov (%p27_p1, %s25_s15), 0  ;;  %p170_p3 = pnand %p744_p0, %p169_p2 }
   0x6   : > { %v868_v0 = vld [vmem:[%s1111_s1] sm:$0xff] (!%p170_p3)   ;;  %s745_s18 = sshll.u32 (!%p170_p3), %s900_s12, 5  ;;  %v869_v1 = vld [vmem:[%s1111_s1 + $0x8] sm:$0xff] (!%p170_p3)   ;;  %vm361_vm0 = vcmask (!%p170_p3), 261120   ;;  %vm603_vm1 = vcmask (!%p170_p3), 392192  }
   0x7   : > { %173 = sbr.rel (%p170_p3) target bundleno = 264 (0x108), region = 32  ;;  %p204_p4 = scmp.lt.s32.totalorder (!%p170_p3), %s745_s18, 63  ;;  %804 = vmatprep.subr.bf16.mxu0 (!%p170_p3), %v868_v0  ;;  %840 = vmatprep.subr.bf16.mxu1 (!%p170_p3), %v868_v0  ;;  %v997_v18 = vld [vmem:[%s1112_s2] ss:$0 sm:$0xff] (!%p170_p3) }
   0x8   : > { %805 = vmatpush3.bf16.msra.mxu0 (!%p170_p3), %v868_v0  ;;  %842 = vmatpush3.bf16.msra.mxu1 (!%p170_p3), %v868_v0 }
   0x9   : > { %806 = vmatprep.subr.bf16.mxu0 (!%p170_p3), %v869_v1  ;;  %841 = vmatprep.subr.bf16.mxu1 (!%p170_p3), %v869_v1 }
   0xc   : > { %807 = vmatpush3.bf16.msra.mxu0 (!%p170_p3), %v869_v1  ;;  %843 = vmatpush3.bf16.msra.mxu1 (!%p170_p3), %v869_v1 }
   0xe   : > { %s1119_s18 = smov (!%p204_p4, %s745_s18), 63 }
   0xf   : > { %s746_s21 = sshll.u32 %s1119_s18, 2  ;;  %s748_s27 = sshll.u32 %s1119_s18, 3 }
  0x10   : > { %s960_s24 = scalar_lea.vmem %s1110_s0, %s746_s21  ;;  %s1004_s30 = scalar_lea.vmem %s1113_s3, %s748_s27 }
  0x11   : > { %v870_v2 = vld [vmem:[%s960_s24] sm:$0xff]   ;;  %v872_v4 = vld [vmem:[%s960_s24 + $0x8] sm:$0xff]   ;;  %v874_v6 = vld [vmem:[%s960_s24 + $0x10] sm:$0xff]  }
  0x12   : > { %v871_v3 = vld [vmem:[%s960_s24 + $0x40] sm:$0xff]   ;;  %808 = vmatprep.mubr.msk.bf16.mxu0 %vm361_vm0, %v870_v2  ;;  %v873_v5 = vld [vmem:[%s960_s24 + $0x48] sm:$0xff]   ;;  %v875_v7 = vld [vmem:[%s960_s24 + $0x50] sm:$0xff]  }
  0x13   : > { %824 = vmatprep.mubr.msk.bf16.mxu1 %vm361_vm0, %v871_v3  ;;  %809 = vmatmul.mubr.msk.bf16.vlgmr.msra.gmra.mrb[0].mxu0 %vm361_vm0, %v872_v4  ;;  %v876_v8 = vld [vmem:[%s960_s24 + $0x18] sm:$0xff]   ;;  %v878_v10 = vld [vmem:[%s960_s24 + $0x20] sm:$0xff]   ;;  %v880_v12 = vld [vmem:[%s960_s24 + $0x28] sm:$0xff]  }
  0x14   : > { %825 = vmatmul.mubr.msk.bf16.vlgmr.msra.gmra.mrb[0].mxu1 %vm361_vm0, %v873_v5  ;;  %812 = vmatprep.mubr.msk.bf16.mxu0 %vm361_vm0, %v874_v6  ;;  %v877_v9 = vld [vmem:[%s960_s24 + $0x58] sm:$0xff]   ;;  %v879_v11 = vld [vmem:[%s960_s24 + $0x60] sm:$0xff]   ;;  %v881_v13 = vld [vmem:[%s960_s24 + $0x68] sm:$0xff]  }
  0x15   : > { %828 = vmatprep.mubr.msk.bf16.mxu1 %vm361_vm0, %v875_v7  ;;  %v882_v14 = vld [vmem:[%s960_s24 + $0x30] sm:$0xff]   ;;  %v884_v16 = vld [vmem:[%s960_s24 + $0x38] sm:$0xff]  }
  0x16   : > { %v883_v15 = vld [vmem:[%s960_s24 + $0x70] sm:$0xff]   ;;  %v885_v17 = vld [vmem:[%s960_s24 + $0x78] sm:$0xff]  }
  0x1b   : > { %813 = vmatmul.mubr.msk.bf16.gmra.mrb[4].mxu0 %vm361_vm0, %v876_v8 }
  0x1c   : > { %829 = vmatmul.mubr.msk.bf16.gmra.mrb[4].mxu1 %vm361_vm0, %v877_v9  ;;  %816 = vmatprep.mubr.msk.bf16.mxu0 %vm361_vm0, %v878_v10 }
  0x1d   : > { %832 = vmatprep.mubr.msk.bf16.mxu1 %vm361_vm0, %v879_v11 }
  0x23   : > { %817 = vmatmul.mubr.msk.bf16.gmra.mrb[8].mxu0 %vm361_vm0, %v880_v12 }
  0x24   : > { %833 = vmatmul.mubr.msk.bf16.gmra.mrb[8].mxu1 %vm361_vm0, %v881_v13  ;;  %820 = vmatprep.mubr.msk.bf16.mxu0 %vm361_vm0, %v882_v14 }
  0x25   : > { %836 = vmatprep.mubr.msk.bf16.mxu1 %vm361_vm0, %v883_v15 }
  0x2b   : > { %821 = vmatmul.mubr.msk.bf16.gmra.mrb[12].mxu0 %vm361_vm0, %v884_v16 }
  0x2c   : > { %837 = vmatmul.mubr.msk.bf16.gmra.mrb[12].mxu1 %vm361_vm0, %v885_v17 }
  0xe6   : > { %v810_v19 = vpop.f32.mrb[0].mxu0 }
  0xe7   : > { %v453_v20 = vadd.f32 %v810_v19, %v997_v18  ;;  %v826_v21 = vpop.f32.mrb[0].mxu1  ;;  %v444_v22 = vpop.f32.mrb[1].mxu0 }
  0xe8   : > { %v517_v23 = vadd.f32 %v826_v21, %v997_v18  ;;  %v445_v24 = vadd.f32 %v997_v18, %v444_v22  ;;  %v508_v25 = vpop.f32.mrb[1].mxu1  ;;  %v811_v26 = vpop.f32.mrb[2].mxu0 }
  0xe9   : > { %v573_v27 = vmax.f32 %v453_v20, 0.0  ;;  %v509_v28 = vadd.f32 %v997_v18, %v508_v25  ;;  %v456_v29 = vadd.f32 %v811_v26, %v997_v18  ;;  %v827_v30 = vpop.f32.mrb[2].mxu1  ;;  %v447_v31 = vpop.f32.mrb[3].mxu0 }
  0xea   : > { %v589_v32 = vmax.f32 %v517_v23, 0.0  ;;  %v571_v33 = vmax.f32 %v445_v24, 0.0  ;;  %v520_v34 = vadd.f32 %v827_v30, %v997_v18  ;;  %v448_v35 = vadd.f32 %v997_v18, %v447_v31  ;;  %v511_v36 = vpop.f32.mrb[3].mxu1 }
  0xeb   : > { %606 = vst.msk [vmem:[%s1004_s30 + $0x10] sm:$0xff] %vm603_vm1, %v573_v27  ;;  %v587_v37 = vmax.f32 %v509_v28, 0.0  ;;  %v574_v38 = vmax.f32 %v456_v29, 0.0  ;;  %v512_v39 = vadd.f32 %v997_v18, %v511_v36 }
  0xec   : > { %622 = vst.msk [vmem:[%s1004_s30 + $0x90] sm:$0xff] %vm603_vm1, %v589_v32  ;;  %604 = vst.msk [vmem:[%s1004_s30] sm:$0xff] %vm603_vm1, %v571_v33  ;;  %v590_v40 = vmax.f32 %v520_v34, 0.0  ;;  %v572_v41 = vmax.f32 %v448_v35, 0.0 }
  0xed   : > { %620 = vst.msk [vmem:[%s1004_s30 + $0x80] sm:$0xff] %vm603_vm1, %v587_v37  ;;  %607 = vst.msk [vmem:[%s1004_s30 + $0x18] sm:$0xff] %vm603_vm1, %v574_v38  ;;  %v588_v42 = vmax.f32 %v512_v39, 0.0 }
  0xee   : > { %623 = vst.msk [vmem:[%s1004_s30 + $0x98] sm:$0xff] %vm603_vm1, %v590_v40  ;;  %605 = vst.msk [vmem:[%s1004_s30 + $0x8] sm:$0xff] %vm603_vm1, %v572_v41  ;;  %v814_v43 = vpop.f32.mrb[4].mxu0 }
  0xef   : > { %621 = vst.msk [vmem:[%s1004_s30 + $0x88] sm:$0xff] %vm603_vm1, %v588_v42  ;;  %v469_v44 = vadd.f32 %v814_v43, %v997_v18  ;;  %v830_v45 = vpop.f32.mrb[4].mxu1  ;;  %v460_v46 = vpop.f32.mrb[5].mxu0 }
  0xf0   : > { %v533_v47 = vadd.f32 %v830_v45, %v997_v18  ;;  %v461_v48 = vadd.f32 %v997_v18, %v460_v46  ;;  %v524_v49 = vpop.f32.mrb[5].mxu1  ;;  %v815_v50 = vpop.f32.mrb[6].mxu0 }
  0xf1   : > { %v577_v51 = vmax.f32 %v469_v44, 0.0  ;;  %v525_v52 = vadd.f32 %v997_v18, %v524_v49  ;;  %v472_v53 = vadd.f32 %v815_v50, %v997_v18  ;;  %v831_v54 = vpop.f32.mrb[6].mxu1  ;;  %v463_v55 = vpop.f32.mrb[7].mxu0 }
  0xf2   : > { %v593_v56 = vmax.f32 %v533_v47, 0.0  ;;  %v575_v57 = vmax.f32 %v461_v48, 0.0  ;;  %v536_v58 = vadd.f32 %v831_v54, %v997_v18  ;;  %v464_v59 = vadd.f32 %v997_v18, %v463_v55  ;;  %v527_v60 = vpop.f32.mrb[7].mxu1 }
  0xf3   : > { %610 = vst.msk [vmem:[%s1004_s30 + $0x30] sm:$0xff] %vm603_vm1, %v577_v51  ;;  %v591_v61 = vmax.f32 %v525_v52, 0.0  ;;  %v578_v62 = vmax.f32 %v472_v53, 0.0  ;;  %v528_v63 = vadd.f32 %v997_v18, %v527_v60 }
  0xf4   : > { %626 = vst.msk [vmem:[%s1004_s30 + $0xb0] sm:$0xff] %vm603_vm1, %v593_v56  ;;  %608 = vst.msk [vmem:[%s1004_s30 + $0x20] sm:$0xff] %vm603_vm1, %v575_v57  ;;  %v594_v0 = vmax.f32 %v536_v58, 0.0  ;;  %v576_v1 = vmax.f32 %v464_v59, 0.0 }
  0xf5   : > { %624 = vst.msk [vmem:[%s1004_s30 + $0xa0] sm:$0xff] %vm603_vm1, %v591_v61  ;;  %611 = vst.msk [vmem:[%s1004_s30 + $0x38] sm:$0xff] %vm603_vm1, %v578_v62  ;;  %v592_v2 = vmax.f32 %v528_v63, 0.0 }
  0xf6   : > { %627 = vst.msk [vmem:[%s1004_s30 + $0xb8] sm:$0xff] %vm603_vm1, %v594_v0  ;;  %609 = vst.msk [vmem:[%s1004_s30 + $0x28] sm:$0xff] %vm603_vm1, %v576_v1  ;;  %v818_v3 = vpop.f32.mrb[8].mxu0 }
  0xf7   : > { %625 = vst.msk [vmem:[%s1004_s30 + $0xa8] sm:$0xff] %vm603_vm1, %v592_v2  ;;  %v485_v4 = vadd.f32 %v818_v3, %v997_v18  ;;  %v834_v5 = vpop.f32.mrb[8].mxu1  ;;  %v476_v6 = vpop.f32.mrb[9].mxu0 }
  0xf8   : > { %v549_v7 = vadd.f32 %v834_v5, %v997_v18  ;;  %v477_v8 = vadd.f32 %v997_v18, %v476_v6  ;;  %v540_v9 = vpop.f32.mrb[9].mxu1  ;;  %v819_v10 = vpop.f32.mrb[10].mxu0 }
  0xf9   : > { %v581_v11 = vmax.f32 %v485_v4, 0.0  ;;  %v541_v12 = vadd.f32 %v997_v18, %v540_v9  ;;  %v488_v13 = vadd.f32 %v819_v10, %v997_v18  ;;  %v835_v14 = vpop.f32.mrb[10].mxu1  ;;  %v479_v15 = vpop.f32.mrb[11].mxu0 }
  0xfa   : > { %v597_v16 = vmax.f32 %v549_v7, 0.0  ;;  %v579_v17 = vmax.f32 %v477_v8, 0.0  ;;  %v552_v19 = vadd.f32 %v835_v14, %v997_v18  ;;  %v480_v20 = vadd.f32 %v997_v18, %v479_v15  ;;  %v543_v21 = vpop.f32.mrb[11].mxu1 }
  0xfb   : > { %614 = vst.msk [vmem:[%s1004_s30 + $0x50] sm:$0xff] %vm603_vm1, %v581_v11  ;;  %v595_v22 = vmax.f32 %v541_v12, 0.0  ;;  %v582_v23 = vmax.f32 %v488_v13, 0.0  ;;  %v544_v24 = vadd.f32 %v997_v18, %v543_v21 }
  0xfc   : > { %630 = vst.msk [vmem:[%s1004_s30 + $0xd0] sm:$0xff] %vm603_vm1, %v597_v16  ;;  %612 = vst.msk [vmem:[%s1004_s30 + $0x40] sm:$0xff] %vm603_vm1, %v579_v17  ;;  %v598_v25 = vmax.f32 %v552_v19, 0.0  ;;  %v580_v26 = vmax.f32 %v480_v20, 0.0 }
  0xfd   : > { %628 = vst.msk [vmem:[%s1004_s30 + $0xc0] sm:$0xff] %vm603_vm1, %v595_v22  ;;  %615 = vst.msk [vmem:[%s1004_s30 + $0x58] sm:$0xff] %vm603_vm1, %v582_v23  ;;  %v596_v27 = vmax.f32 %v544_v24, 0.0 }
  0xfe   : > { %631 = vst.msk [vmem:[%s1004_s30 + $0xd8] sm:$0xff] %vm603_vm1, %v598_v25  ;;  %613 = vst.msk [vmem:[%s1004_s30 + $0x48] sm:$0xff] %vm603_vm1, %v580_v26  ;;  %v822_v28 = vpop.f32.mrb[12].mxu0 }
  0xff   : > { %629 = vst.msk [vmem:[%s1004_s30 + $0xc8] sm:$0xff] %vm603_vm1, %v596_v27  ;;  %v501_v29 = vadd.f32 %v822_v28, %v997_v18  ;;  %v838_v30 = vpop.f32.mrb[12].mxu1  ;;  %v492_v31 = vpop.f32.mrb[13].mxu0 }
 0x100   : > { %v565_v32 = vadd.f32 %v838_v30, %v997_v18  ;;  %v493_v33 = vadd.f32 %v997_v18, %v492_v31  ;;  %v556_v34 = vpop.f32.mrb[13].mxu1  ;;  %v823_v35 = vpop.f32.mrb[14].mxu0 }
 0x101   : > { %v585_v36 = vmax.f32 %v501_v29, 0.0  ;;  %v557_v37 = vadd.f32 %v997_v18, %v556_v34  ;;  %v504_v38 = vadd.f32 %v823_v35, %v997_v18  ;;  %v839_v39 = vpop.f32.mrb[14].mxu1  ;;  %v495_v40 = vpop.f32.mrb[15].mxu0 }
 0x102   : > { %v601_v41 = vmax.f32 %v565_v32, 0.0  ;;  %v583_v42 = vmax.f32 %v493_v33, 0.0  ;;  %v568_v43 = vadd.f32 %v839_v39, %v997_v18  ;;  %v496_v44 = vadd.f32 %v997_v18, %v495_v40  ;;  %v559_v45 = vpop.f32.mrb[15].mxu1 }
 0x103   : > { %618 = vst.msk [vmem:[%s1004_s30 + $0x70] sm:$0xff] %vm603_vm1, %v585_v36  ;;  %v599_v46 = vmax.f32 %v557_v37, 0.0  ;;  %v586_v47 = vmax.f32 %v504_v38, 0.0  ;;  %v560_v48 = vadd.f32 %v997_v18, %v559_v45 }
 0x104   : > { %634 = vst.msk [vmem:[%s1004_s30 + $0xf0] sm:$0xff] %vm603_vm1, %v601_v41  ;;  %616 = vst.msk [vmem:[%s1004_s30 + $0x60] sm:$0xff] %vm603_vm1, %v583_v42  ;;  %v602_v49 = vmax.f32 %v568_v43, 0.0  ;;  %v584_v50 = vmax.f32 %v496_v44, 0.0 }
 0x105   : > { %632 = vst.msk [vmem:[%s1004_s30 + $0xe0] sm:$0xff] %vm603_vm1, %v599_v46  ;;  %619 = vst.msk [vmem:[%s1004_s30 + $0x78] sm:$0xff] %vm603_vm1, %v586_v47  ;;  %v600_v51 = vmax.f32 %v560_v48, 0.0 }
 0x106   : > { %635 = vst.msk [vmem:[%s1004_s30 + $0xf8] sm:$0xff] %vm603_vm1, %v602_v49  ;;  %617 = vst.msk [vmem:[%s1004_s30 + $0x68] sm:$0xff] %vm603_vm1, %v584_v50 }
 0x107   : > { %633 = vst.msk [vmem:[%s1004_s30 + $0xe8] sm:$0xff] %vm603_vm1, %v600_v51 }
 0x108 PF: > { %s13_s14 = sadd.s32 1, %s908_s14   ;;  %s1114_s12 = smov %s904_s13 }
 0x109   : > { %p10_p5 = scmp.ge.s32.totalorder %s13_s14, 4   ;;  %s1115_s13 = smov %s1117_s15 }
 0x10b   :  { %12 = sbr.rel (!%p10_p5) target bundleno = 2 (0x2), region = 68 }

// kernel: det_forward.13
= control target key start
LH: loop header
LB: loop body
LE: loop exit
PB: predicated region body
PF: predicated region fallthrough
CT: control target
= control target key end

     0   :  { %s838_s12 = smov 0   ;;  %s840_s13 = smov 0   ;;  %s1001_s0 = inlined_call_operand.vmem [shape: bf16[16,224], index: 0, kind: input, shape index: {}]   ;;  %s1002_s1 = inlined_call_operand.vmem [shape: bf16[224,384], index: 1, kind: input, shape index: {}]   ;;  %s1003_s2 = inlined_call_operand.vmem [shape: f32[1,384], index: 2, kind: input, shape index: {}]   ;;  %s1004_s3 = inlined_call_operand.vmem [shape: f32[16,384], index: 3, kind: output, shape index: {}]  }
   0x1   :  { %s842_s14 = smov 0   ;;  %s844_s15 = smov 0  }
   0x2   :  { %s846_s16 = smov 0  }
   0x3 LB: > { %s22_s17 = sadd.s32 1, %s811_s15  ;;  %s687_s18 = sadd.s32 4294967295, %s815_s16   ;;  %s815_s16 = sphi %s846_s16, %s13_s16   ;;  %s811_s15 = sphi %s844_s15, %s1009_s15   ;;  %s807_s14 = sphi %s842_s14, %s1008_s14   ;;  %s803_s13 = sphi %s840_s13, %s1007_s13   ;;  %s799_s12 = sphi %s838_s12, %s1006_s12  }
   0x4   : > { %p23_p0 = scmp.ge.s32.totalorder %s22_s17, 3  ;;  %p65_p1 = scmp.ne.s32.totalorder %s803_s13, %s799_s12 }
   0x5   : > { %p66_p2 = scmp.eq.s32.totalorder %s815_s16, 0  ;;  %p123_p4 = scmp.eq.s32.totalorder %s687_s18, 2 }
   0x6   : > { %s1011_s17 = smov (%p23_p0, %s22_s17), 0  ;;  %s58_s20 = sadd.s32 1, %s803_s13 }
   0x7   : > { %p67_p3 = por %p66_p2, %p65_p1  ;;  %s55_s19 = ssub.s32 %s811_s15, %s1011_s17 }
   0x8   : > { %p56_p5 = scmp.eq.s32.totalorder %s55_s19, 0  ;;  %p873_p6 = por %p123_p4, %p65_p1 }
   0x9   : > { %p691_p7 = scmp.ge.s32.totalorder %s815_s16, 3 }
   0xa   : > { %s878_s22 = scalar_select %p56_p5, %s803_s13, %s58_s20  }
   0xb   : > { %155 = sbr.rel (%p691_p7) target bundleno = 41 (0x29), region = 20 }
  0x12   : > { %158 = sbr.rel (!%p67_p3) target bundleno = 41 (0x29), region = 24  ;;  %s160_s23 = sand.u32 (%p67_p3), 1, %s803_s13  }
  0x13   : > { %s692_s24 = sshll.u32 (%p67_p3), %s811_s15, 2  ;;  %s717_s25 = smul.u32 (%p67_p3), 112, %s160_s23 }
  0x14   : > { %s886_s28 = scalar_lea.vmem (%p67_p3), %s1002_s1, %s692_s24 }
  0x15   : > { %v180_v0 = vld [vmem:[%s886_s28] sm:$0xf] (%p67_p3)  ;;  %v182_v1 = vld [vmem:[%s886_s28 + $0xc] sm:$0xf] (%p67_p3)  ;;  %v184_v2 = vld [vmem:[%s886_s28 + $0x18] sm:$0xf] (%p67_p3) }
  0x16   : > { %v186_v3 = vld [vmem:[%s886_s28 + $0x24] sm:$0xf] (%p67_p3)  ;;  %v188_v4 = vld [vmem:[%s886_s28 + $0x30] sm:$0xf] (%p67_p3)  ;;  %s893_s29 = scalar_lea.vmem (%p67_p3), [#allocation2], %s717_s25 }
  0x17   : > { %181 = vst [vmem:[%s893_s29] sm:$0xf] (%p67_p3), %v180_v0  ;;  %183 = vst [vmem:[%s893_s29 + $0x4] sm:$0xf] (%p67_p3), %v182_v1  ;;  %v190_v5 = vld [vmem:[%s886_s28 + $0x3c] sm:$0xf] (%p67_p3) }
  0x18   : > { %185 = vst [vmem:[%s893_s29 + $0x8] sm:$0xf] (%p67_p3), %v184_v2  ;;  %187 = vst [vmem:[%s893_s29 + $0xc] sm:$0xf] (%p67_p3), %v186_v3  ;;  %v192_v6 = vld [vmem:[%s886_s28 + $0x48] sm:$0xf] (%p67_p3) }
  0x19   : > { %189 = vst [vmem:[%s893_s29 + $0x10] sm:$0xf] %v188_v4  ;;  %v194_v7 = vld [vmem:[%s886_s28 + $0x54] sm:$0xf]  ;;  %191 = vst [vmem:[%s893_s29 + $0x14] sm:$0xf] %v190_v5 }
  0x1a   : > { %193 = vst [vmem:[%s893_s29 + $0x18] sm:$0xf] %v192_v6  ;;  %195 = vst [vmem:[%s893_s29 + $0x1c] sm:$0xf] %v194_v7  ;;  %v196_v8 = vld [vmem:[%s886_s28 + $0x60] sm:$0xf] }
  0x1b   : > { %v198_v9 = vld [vmem:[%s886_s28 + $0x6c] sm:$0xf]  ;;  %v200_v10 = vld [vmem:[%s886_s28 + $0x78] sm:$0xf]  ;;  %197 = vst [vmem:[%s893_s29 + $0x20] sm:$0xf] %v196_v8 }
  0x1c   : > { %199 = vst [vmem:[%s893_s29 + $0x24] sm:$0xf] %v198_v9  ;;  %201 = vst [vmem:[%s893_s29 + $0x28] sm:$0xf] %v200_v10  ;;  %v202_v11 = vld [vmem:[%s886_s28 + $0x84] sm:$0xf] }
  0x1d   : > { %v204_v12 = vld [vmem:[%s886_s28 + $0x90] sm:$0xf]  ;;  %v206_v13 = vld [vmem:[%s886_s28 + $0x9c] sm:$0xf]  ;;  %203 = vst [vmem:[%s893_s29 + $0x2c] sm:$0xf] %v202_v11 }
  0x1e   : > { %205 = vst [vmem:[%s893_s29 + $0x30] sm:$0xf] %v204_v12  ;;  %207 = vst [vmem:[%s893_s29 + $0x34] sm:$0xf] %v206_v13  ;;  %v208_v14 = vld [vmem:[%s886_s28 + $0xa8] sm:$0xf] }
  0x1f   : > { %v210_v15 = vld [vmem:[%s886_s28 + $0xb4] sm:$0xf]  ;;  %v212_v16 = vld [vmem:[%s886_s28 + $0xc0] sm:$0xf]  ;;  %209 = vst [vmem:[%s893_s29 + $0x38] sm:$0xf] %v208_v14 }
  0x20   : > { %211 = vst [vmem:[%s893_s29 + $0x3c] sm:$0xf] %v210_v15  ;;  %213 = vst [vmem:[%s893_s29 + $0x40] sm:$0xf] %v212_v16  ;;  %v214_v17 = vld [vmem:[%s886_s28 + $0xcc] sm:$0xf] }
  0x21   : > { %v216_v18 = vld [vmem:[%s886_s28 + $0xd8] sm:$0xf]  ;;  %v218_v19 = vld [vmem:[%s886_s28 + $0xe4] sm:$0xf]  ;;  %215 = vst [vmem:[%s893_s29 + $0x44] sm:$0xf] %v214_v17 }
  0x22   : > { %217 = vst [vmem:[%s893_s29 + $0x48] sm:$0xf] %v216_v18  ;;  %219 = vst [vmem:[%s893_s29 + $0x4c] sm:$0xf] %v218_v19  ;;  %v220_v20 = vld [vmem:[%s886_s28 + $0xf0] sm:$0xf] }
  0x23   : > { %v222_v21 = vld [vmem:[%s886_s28 + $0xfc] sm:$0xf]  ;;  %v224_v22 = vld [vmem:[%s886_s28 + $0x108] sm:$0xf]  ;;  %221 = vst [vmem:[%s893_s29 + $0x50] sm:$0xf] %v220_v20 }
  0x24   : > { %223 = vst [vmem:[%s893_s29 + $0x54] sm:$0xf] %v222_v21  ;;  %225 = vst [vmem:[%s893_s29 + $0x58] sm:$0xf] %v224_v22  ;;  %v226_v23 = vld [vmem:[%s886_s28 + $0x114] sm:$0xf] }
  0x25   : > { %v228_v24 = vld [vmem:[%s886_s28 + $0x120] sm:$0xf]  ;;  %v230_v25 = vld [vmem:[%s886_s28 + $0x12c] sm:$0xf]  ;;  %227 = vst [vmem:[%s893_s29 + $0x5c] sm:$0xf] %v226_v23 }
  0x26   : > { %229 = vst [vmem:[%s893_s29 + $0x60] sm:$0xf] %v228_v24  ;;  %231 = vst [vmem:[%s893_s29 + $0x64] sm:$0xf] %v230_v25  ;;  %v232_v26 = vld [vmem:[%s886_s28 + $0x138] sm:$0xf] }
  0x27   : > { %v234_v27 = vld [vmem:[%s886_s28 + $0x144] sm:$0xf]  ;;  %233 = vst [vmem:[%s893_s29 + $0x68] sm:$0xf] %v232_v26 }
  0x28   : > { %235 = vst [vmem:[%s893_s29 + $0x6c] sm:$0xf] %v234_v27 }
  0x29 PF: > { %p693_p8 = scmp.ge.s32.totalorder %s815_s16, 1  ;;  %p319_p9 = scmp.lt.s32.totalorder %s815_s16, 4 }
  0x2b   : > { %p320_p10 = pnand %p693_p8, %p319_p9 }
  0x2c   : > { %s326_s30 = sand.u32 (!%p320_p10), 1, %s799_s12   ;;  %v817_v28 = vmov (!%p320_p10), 0   ;;  %v776_v29 = vld [vmem:[%s1001_s0 + $0x4] ss:$8 sps:$4 sm:$0xff] (!%p320_p10)   ;;  %vm499_vm0 = vcmask (!%p320_p10), 785408   ;;  %p364_p11 = scmp.lt.s32.totalorder (!%p320_p10), %s807_s14, 2 }
  0x2d   : > { %323 = sbr.rel (%p320_p10) target bundleno = 332 (0x14c), region = 69  ;;  %503 = vmatprep.subr.bf16.mxu0 (!%p320_p10), %v817_v28  ;;  %712 = vmatprep.mubr.msk.bf16.mxu0 (!%p320_p10), %vm499_vm0, %v776_v29  ;;  %v774_v44 = vld [vmem:[%s1001_s0] ss:$8 sps:$4 sm:$0xff] (!%p320_p10)   ;;  %s694_s20 = sshll.u32 (!%p320_p10), %s326_s30, 4 }
  0x2e   : > { %s718_s4 = smul.u32 (!%p320_p10), 112, %s326_s30  ;;  %s356_s23 = scalar_lea.vmem (!%p320_p10), [#allocation3], %s694_s20 }
  0x30   : > { %s954_s7 = scalar_lea.vmem (!%p320_p10), [#allocation2], %s718_s4 }
  0x31   : > { %v760_v30 = vld [vmem:[%s954_s7] sm:$0xff] (!%p320_p10)   ;;  %v761_v31 = vld [vmem:[%s954_s7 + $0x8] sm:$0xff] (!%p320_p10)   ;;  %v762_v32 = vld [vmem:[%s954_s7 + $0x10] sm:$0xff] (!%p320_p10)  }
  0x32   : > { %504 = vmatpush1.bf16.msra.mxu0 (!%p320_p10), %v760_v30  ;;  %v763_v33 = vld [vmem:[%s954_s7 + $0x18] sm:$0xff] (!%p320_p10)   ;;  %v764_v34 = vld [vmem:[%s954_s7 + $0x20] sm:$0xff] (!%p320_p10)   ;;  %v765_v35 = vld [vmem:[%s954_s7 + $0x28] sm:$0xff] (!%p320_p10)  }
  0x33   : > { %505 = vmatprep.subr.bf16.mxu0 (!%p320_p10), %v817_v28  ;;  %v766_v36 = vld [vmem:[%s954_s7 + $0x30] sm:$0xff] (!%p320_p10)   ;;  %v767_v37 = vld [vmem:[%s954_s7 + $0x38] sm:$0xff] (!%p320_p10)   ;;  %v768_v38 = vld [vmem:[%s954_s7 + $0x40] sm:$0xff] (!%p320_p10)  }
  0x34   : > { %v769_v39 = vld [vmem:[%s954_s7 + $0x48] sm:$0xff]   ;;  %v770_v40 = vld [vmem:[%s954_s7 + $0x50] sm:$0xff]   ;;  %v771_v41 = vld [vmem:[%s954_s7 + $0x58] sm:$0xff]   ;;  %s365_s10 = scalar_select %p364_p11, %s807_s14, 2 }
  0x35   : > { %v772_v42 = vld [vmem:[%s954_s7 + $0x60] sm:$0xff]   ;;  %v773_v43 = vld [vmem:[%s954_s7 + $0x68] sm:$0xff]   ;;  %s714_s24 = sshll.u32 (%p873_p6), %s807_s14, 3 }
  0x36   : > { %506 = vmatpush1.bf16.msra.mxu0 %v761_v31  ;;  %s366_s19 = scalar_lea.vmem %s1003_s2, %s365_s10  ;;  %s559_s26 = scalar_lea.vmem (%p873_p6), %s1004_s3, %s714_s24 }
  0x37   : > { %507 = vmatprep.subr.bf16.mxu0 %v817_v28  ;;  %v695_v45 = vld [vmem:[%s366_s19] ss:$0 sm:$0xff] }
  0x3a   : > { %508 = vmatpush1.bf16.msra.mxu0 %v762_v32 }
  0x3b   : > { %509 = vmatprep.subr.bf16.mxu0 %v817_v28 }
  0x3e   : > { %510 = vmatpush1.bf16.msra.mxu0 %v763_v33 }
  0x3f   : > { %511 = vmatprep.subr.bf16.mxu0 %v817_v28 }
  0x42   : > { %512 = vmatpush1.bf16.msra.mxu0 %v764_v34 }
  0x43   : > { %513 = vmatprep.subr.bf16.mxu0 %v817_v28 }
  0x46   : > { %514 = vmatpush1.bf16.msra.mxu0 %v765_v35 }
  0x47   : > { %515 = vmatprep.subr.bf16.mxu0 %v817_v28 }
  0x4a   : > { %516 = vmatpush1.bf16.msra.mxu0 %v766_v36 }
  0x4b   : > { %517 = vmatprep.subr.bf16.mxu0 %v817_v28 }
  0x4e   : > { %518 = vmatpush1.bf16.msra.mxu0 %v767_v37 }
  0x4f   : > { %519 = vmatprep.subr.bf16.mxu0 %v817_v28 }
  0x52   : > { %520 = vmatpush1.bf16.msra.mxu0 %v768_v38 }
  0x53   : > { %521 = vmatprep.subr.bf16.mxu0 %v817_v28 }
  0x56   : > { %522 = vmatpush1.bf16.msra.mxu0 %v769_v39 }
  0x57   : > { %523 = vmatprep.subr.bf16.mxu0 %v817_v28 }
  0x5a   : > { %524 = vmatpush1.bf16.msra.mxu0 %v770_v40 }
  0x5b   : > { %525 = vmatprep.subr.bf16.mxu0 %v817_v28 }
  0x5e   : > { %526 = vmatpush1.bf16.msra.mxu0 %v771_v41 }
  0x5f   : > { %527 = vmatprep.subr.bf16.mxu0 %v817_v28 }
  0x62   : > { %528 = vmatpush1.bf16.msra.mxu0 %v772_v42 }
  0x63   : > { %529 = vmatprep.subr.bf16.mxu0 %v817_v28 }
  0x66   : > { %530 = vmatpush1.bf16.msra.mxu0 %v773_v43 }
  0x69   : > { %536 = vmatmul.mubr.bf16.vlgmr.msra.gmra.mrb[0].mxu0 %v774_v44 }
 0x13c   : > { %v537_v46 = vpop.f32.mrb[0].mxu0 }
 0x13d   : > { %v538_v47 = vadd.f32 %v695_v45, %v537_v46  ;;  %v539_v48 = vpop.f32.mrb[1].mxu0  ;;  %554 = sbr.rel (!%p873_p6) target bundleno = 332 (0x14c), region = 77 }
 0x13e   : > { %v540_v49 = vpop.f32.mrb[2].mxu0 }
 0x13f   : > { %v544_v50 = vmax.f32 %v538_v47, 0.0  ;;  %v541_v51 = vadd.f32 %v695_v45, %v540_v49  ;;  %v542_v52 = vpop.f32.mrb[3].mxu0 }
 0x141   : > { %546 = vst [vmem:[%s356_s23] sm:$0xff] %v544_v50  ;;  %v545_v53 = vmax.f32 %v541_v51, 0.0 }
 0x143   : > { %547 = vst [vmem:[%s356_s23 + $0x8] sm:$0xff] %v545_v53 }
 0x148   : > { %v589_v54 = vld [vmem:[%s356_s23] sm:$0xff] }
 0x149   : > { %590 = vst [vmem:[%s559_s26] sm:$0xff] %v589_v54 }
 0x14a   : > { %v591_v55 = vld [vmem:[%s356_s23 + $0x8] sm:$0xff] }
 0x14b   : > { %592 = vst [vmem:[%s559_s26 + $0x18] sm:$0xff] %v591_v55 }
 0x14c PF: > { %s13_s16 = sadd.s32 1, %s815_s16   ;;  %s1006_s12 = smov %s803_s13 }
 0x14d   : > { %p10_p12 = scmp.ge.s32.totalorder %s13_s16, 5   ;;  %s1007_s13 = smov %s878_s22 }
 0x14e   : > { %s1008_s14 = smov %s811_s15  ;;  %s1009_s15 = smov %s1011_s17 }
 0x14f   :  { %12 = sbr.rel (!%p10_p12) target bundleno = 3 (0x3), region = 152 }

// kernel: det_forward.14
= control target key start
LH: loop header
LB: loop body
LE: loop exit
PB: predicated region body
PF: predicated region fallthrough
CT: control target
= control target key end

     0   :  { %s1118_s12 = smov 0   ;;  %s1120_s13 = smov 0   ;;  %s1334_s0 = inlined_call_operand.vmem [shape: bf16[16,384], index: 0, kind: input, shape index: {}]   ;;  %s1335_s1 = inlined_call_operand.vmem [shape: bf16[384,640], index: 1, kind: input, shape index: {}]   ;;  %s1336_s2 = inlined_call_operand.vmem [shape: f32[1,640], index: 2, kind: input, shape index: {}]   ;;  %s1337_s3 = inlined_call_operand.vmem [shape: f32[16,640], index: 3, kind: output, shape index: {}]  }
   0x1   :  { %s1122_s14 = smov 0   ;;  %s1124_s15 = smov 0  }
   0x2   :  { %s1126_s16 = smov 0  }
   0x3 LB: > { %s22_s17 = sadd.s32 1, %s1090_s15  ;;  %s893_s18 = sadd.s32 4294967295, %s1094_s16   ;;  %s1094_s16 = sphi %s1126_s16, %s13_s16   ;;  %s1090_s15 = sphi %s1124_s15, %s1342_s15   ;;  %s1086_s14 = sphi %s1122_s14, %s1341_s14   ;;  %s1082_s13 = sphi %s1120_s13, %s1340_s13   ;;  %s1078_s12 = sphi %s1118_s12, %s1339_s12  }
   0x4   : > { %p23_p0 = scmp.ge.s32.totalorder %s22_s17, 5  ;;  %p65_p1 = scmp.ne.s32.totalorder %s1082_s13, %s1078_s12 }
   0x5   : > { %p66_p2 = scmp.eq.s32.totalorder %s1094_s16, 0  ;;  %p123_p4 = scmp.eq.s32.totalorder %s893_s18, 4 }
   0x6   : > { %s1344_s17 = smov (%p23_p0, %s22_s17), 0  ;;  %s58_s20 = sadd.s32 1, %s1082_s13 }
   0x7   : > { %p67_p3 = por %p66_p2, %p65_p1  ;;  %s55_s19 = ssub.s32 %s1090_s15, %s1344_s17 }
   0x8   : > { %p56_p5 = scmp.eq.s32.totalorder %s55_s19, 0  ;;  %p1153_p6 = por %p123_p4, %p65_p1 }
   0x9   : > { %p897_p7 = scmp.ge.s32.totalorder %s1094_s16, 5 }
   0xa   : > { %s1158_s22 = scalar_select %p56_p5, %s1082_s13, %s58_s20  }
   0xb   : > { %155 = sbr.rel (%p897_p7) target bundleno = 54 (0x36), region = 20 }
  0x12   : > { %158 = sbr.rel (!%p67_p3) target bundleno = 54 (0x36), region = 24  ;;  %s160_s23 = sand.u32 (%p67_p3), 1, %s1082_s13  }
  0x13   : > { %s898_s24 = sshll.u32 (%p67_p3), %s1090_s15, 2  ;;  %s984_s25 = smul.u32 (%p67_p3), 192, %s160_s23 }
  0x14   : > { %s1166_s28 = scalar_lea.vmem (%p67_p3), %s1335_s1, %s898_s24 }
  0x15   : > { %v180_v0 = vld [vmem:[%s1166_s28] sm:$0xf] (%p67_p3)  ;;  %v182_v1 = vld [vmem:[%s1166_s28 + $0x14] sm:$0xf] (%p67_p3)  ;;  %v184_v2 = vld [vmem:[%s1166_s28 + $0x28] sm:$0xf] (%p67_p3) }
  0x16   : > { %v186_v3 = vld [vmem:[%s1166_s28 + $0x3c] sm:$0xf] (%p67_p3)  ;;  %v188_v4 = vld [vmem:[%s1166_s28 + $0x50] sm:$0xf] (%p67_p3)  ;;  %s1173_s29 = scalar_lea.vmem (%p67_p3), [#allocation2], %s984_s25 }
  0x17   : > { %181 = vst [vmem:[%s1173_s29] sm:$0xf] (%p67_p3), %v180_v0  ;;  %183 = vst [vmem:[%s1173_s29 + $0x4] sm:$0xf] (%p67_p3), %v182_v1  ;;  %v190_v5 = vld [vmem:[%s1166_s28 + $0x64] sm:$0xf] (%p67_p3) }
  0x18   : > { %185 = vst [vmem:[%s1173_s29 + $0x8] sm:$0xf] (%p67_p3), %v184_v2  ;;  %187 = vst [vmem:[%s1173_s29 + $0xc] sm:$0xf] (%p67_p3), %v186_v3  ;;  %v192_v6 = vld [vmem:[%s1166_s28 + $0x78] sm:$0xf] (%p67_p3) }
  0x19   : > { %189 = vst [vmem:[%s1173_s29 + $0x10] sm:$0xf] %v188_v4  ;;  %v194_v7 = vld [vmem:[%s1166_s28 + $0x8c] sm:$0xf]  ;;  %191 = vst [vmem:[%s1173_s29 + $0x14] sm:$0xf] %v190_v5 }
  0x1a   : > { %193 = vst [vmem:[%s1173_s29 + $0x18] sm:$0xf] %v192_v6  ;;  %195 = vst [vmem:[%s1173_s29 + $0x1c] sm:$0xf] %v194_v7  ;;  %v196_v8 = vld [vmem:[%s1166_s28 + $0xa0] sm:$0xf] }
  0x1b   : > { %v198_v9 = vld [vmem:[%s1166_s28 + $0xb4] sm:$0xf]  ;;  %v200_v10 = vld [vmem:[%s1166_s28 + $0xc8] sm:$0xf]  ;;  %197 = vst [vmem:[%s1173_s29 + $0x20] sm:$0xf] %v196_v8 }
  0x1c   : > { %199 = vst [vmem:[%s1173_s29 + $0x24] sm:$0xf] %v198_v9  ;;  %201 = vst [vmem:[%s1173_s29 + $0x28] sm:$0xf] %v200_v10  ;;  %v202_v11 = vld [vmem:[%s1166_s28 + $0xdc] sm:$0xf] }
  0x1d   : > { %v204_v12 = vld [vmem:[%s1166_s28 + $0xf0] sm:$0xf]  ;;  %v206_v13 = vld [vmem:[%s1166_s28 + $0x104] sm:$0xf]  ;;  %203 = vst [vmem:[%s1173_s29 + $0x2c] sm:$0xf] %v202_v11 }
  0x1e   : > { %205 = vst [vmem:[%s1173_s29 + $0x30] sm:$0xf] %v204_v12  ;;  %207 = vst [vmem:[%s1173_s29 + $0x34] sm:$0xf] %v206_v13  ;;  %v208_v14 = vld [vmem:[%s1166_s28 + $0x118] sm:$0xf] }
  0x1f   : > { %v210_v15 = vld [vmem:[%s1166_s28 + $0x12c] sm:$0xf]  ;;  %v212_v16 = vld [vmem:[%s1166_s28 + $0x140] sm:$0xf]  ;;  %209 = vst [vmem:[%s1173_s29 + $0x38] sm:$0xf] %v208_v14 }
  0x20   : > { %211 = vst [vmem:[%s1173_s29 + $0x3c] sm:$0xf] %v210_v15  ;;  %213 = vst [vmem:[%s1173_s29 + $0x40] sm:$0xf] %v212_v16  ;;  %v214_v17 = vld [vmem:[%s1166_s28 + $0x154] sm:$0xf] }
  0x21   : > { %v216_v18 = vld [vmem:[%s1166_s28 + $0x168] sm:$0xf]  ;;  %v218_v19 = vld [vmem:[%s1166_s28 + $0x17c] sm:$0xf]  ;;  %215 = vst [vmem:[%s1173_s29 + $0x44] sm:$0xf] %v214_v17 }
  0x22   : > { %217 = vst [vmem:[%s1173_s29 + $0x48] sm:$0xf] %v216_v18  ;;  %219 = vst [vmem:[%s1173_s29 + $0x4c] sm:$0xf] %v218_v19  ;;  %v220_v20 = vld [vmem:[%s1166_s28 + $0x190] sm:$0xf] }
  0x23   : > { %v222_v21 = vld [vmem:[%s1166_s28 + $0x1a4] sm:$0xf]  ;;  %v224_v22 = vld [vmem:[%s1166_s28 + $0x1b8] sm:$0xf]  ;;  %221 = vst [vmem:[%s1173_s29 + $0x50] sm:$0xf] %v220_v20 }
  0x24   : > { %223 = vst [vmem:[%s1173_s29 + $0x54] sm:$0xf] %v222_v21  ;;  %225 = vst [vmem:[%s1173_s29 + $0x58] sm:$0xf] %v224_v22  ;;  %v226_v23 = vld [vmem:[%s1166_s28 + $0x1cc] sm:$0xf] }
  0x25   : > { %v228_v24 = vld [vmem:[%s1166_s28 + $0x1e0] sm:$0xf]  ;;  %v230_v25 = vld [vmem:[%s1166_s28 + $0x1f4] sm:$0xf]  ;;  %227 = vst [vmem:[%s1173_s29 + $0x5c] sm:$0xf] %v226_v23 }
  0x26   : > { %229 = vst [vmem:[%s1173_s29 + $0x60] sm:$0xf] %v228_v24  ;;  %231 = vst [vmem:[%s1173_s29 + $0x64] sm:$0xf] %v230_v25  ;;  %v232_v26 = vld [vmem:[%s1166_s28 + $0x208] sm:$0xf] }
  0x27   : > { %v234_v27 = vld [vmem:[%s1166_s28 + $0x21c] sm:$0xf]  ;;  %v236_v28 = vld [vmem:[%s1166_s28 + $0x230] sm:$0xf]  ;;  %233 = vst [vmem:[%s1173_s29 + $0x68] sm:$0xf] %v232_v26 }
  0x28   : > { %235 = vst [vmem:[%s1173_s29 + $0x6c] sm:$0xf] %v234_v27  ;;  %237 = vst [vmem:[%s1173_s29 + $0x70] sm:$0xf] %v236_v28  ;;  %v238_v29 = vld [vmem:[%s1166_s28 + $0x244] sm:$0xf] }
  0x29   : > { %v240_v30 = vld [vmem:[%s1166_s28 + $0x258] sm:$0xf]  ;;  %v242_v31 = vld [vmem:[%s1166_s28 + $0x26c] sm:$0xf]  ;;  %239 = vst [vmem:[%s1173_s29 + $0x74] sm:$0xf] %v238_v29 }
  0x2a   : > { %241 = vst [vmem:[%s1173_s29 + $0x78] sm:$0xf] %v240_v30  ;;  %243 = vst [vmem:[%s1173_s29 + $0x7c] sm:$0xf] %v242_v31  ;;  %v244_v32 = vld [vmem:[%s1166_s28 + $0x280] sm:$0xf] }
  0x2b   : > { %v246_v33 = vld [vmem:[%s1166_s28 + $0x294] sm:$0xf]  ;;  %v248_v34 = vld [vmem:[%s1166_s28 + $0x2a8] sm:$0xf]  ;;  %245 = vst [vmem:[%s1173_s29 + $0x80] sm:$0xf] %v244_v32 }
  0x2c   : > { %247 = vst [vmem:[%s1173_s29 + $0x84] sm:$0xf] %v246_v33  ;;  %249 = vst [vmem:[%s1173_s29 + $0x88] sm:$0xf] %v248_v34  ;;  %v250_v35 = vld [vmem:[%s1166_s28 + $0x2bc] sm:$0xf] }
  0x2d   : > { %v252_v36 = vld [vmem:[%s1166_s28 + $0x2d0] sm:$0xf]  ;;  %v254_v37 = vld [vmem:[%s1166_s28 + $0x2e4] sm:$0xf]  ;;  %251 = vst [vmem:[%s1173_s29 + $0x8c] sm:$0xf] %v250_v35 }
  0x2e   : > { %253 = vst [vmem:[%s1173_s29 + $0x90] sm:$0xf] %v252_v36  ;;  %255 = vst [vmem:[%s1173_s29 + $0x94] sm:$0xf] %v254_v37  ;;  %v256_v38 = vld [vmem:[%s1166_s28 + $0x2f8] sm:$0xf] }
  0x2f   : > { %v258_v39 = vld [vmem:[%s1166_s28 + $0x30c] sm:$0xf]  ;;  %v260_v40 = vld [vmem:[%s1166_s28 + $0x320] sm:$0xf]  ;;  %257 = vst [vmem:[%s1173_s29 + $0x98] sm:$0xf] %v256_v38 }
  0x30   : > { %259 = vst [vmem:[%s1173_s29 + $0x9c] sm:$0xf] %v258_v39  ;;  %261 = vst [vmem:[%s1173_s29 + $0xa0] sm:$0xf] %v260_v40  ;;  %v262_v41 = vld [vmem:[%s1166_s28 + $0x334] sm:$0xf] }
  0x31   : > { %v264_v42 = vld [vmem:[%s1166_s28 + $0x348] sm:$0xf]  ;;  %v266_v43 = vld [vmem:[%s1166_s28 + $0x35c] sm:$0xf]  ;;  %263 = vst [vmem:[%s1173_s29 + $0xa4] sm:$0xf] %v262_v41 }
  0x32   : > { %265 = vst [vmem:[%s1173_s29 + $0xa8] sm:$0xf] %v264_v42  ;;  %267 = vst [vmem:[%s1173_s29 + $0xac] sm:$0xf] %v266_v43  ;;  %v268_v44 = vld [vmem:[%s1166_s28 + $0x370] sm:$0xf] }
  0x33   : > { %v270_v45 = vld [vmem:[%s1166_s28 + $0x384] sm:$0xf]  ;;  %v272_v46 = vld [vmem:[%s1166_s28 + $0x398] sm:$0xf]  ;;  %269 = vst [vmem:[%s1173_s29 + $0xb0] sm:$0xf] %v268_v44 }
  0x34   : > { %271 = vst [vmem:[%s1173_s29 + $0xb4] sm:$0xf] %v270_v45  ;;  %273 = vst [vmem:[%s1173_s29 + $0xb8] sm:$0xf] %v272_v46  ;;  %v274_v47 = vld [vmem:[%s1166_s28 + $0x3ac] sm:$0xf] }
  0x35   : > { %275 = vst [vmem:[%s1173_s29 + $0xbc] sm:$0xf] %v274_v47 }
  0x36 PF: > { %p899_p8 = scmp.ge.s32.totalorder %s1094_s16, 1  ;;  %p399_p9 = scmp.lt.s32.totalorder %s1094_s16, 6 }
  0x38   : > { %p400_p10 = pnand %p899_p8, %p399_p9 }
  0x39   : > { %s406_s30 = sand.u32 (!%p400_p10), 1, %s1078_s12   ;;  %v1096_v48 = vmov (!%p400_p10), 0.0   ;;  %v1053_v49 = vld [vmem:[%s1334_s0 + $0x4] ss:$12 sps:$4 sm:$0xff] (!%p400_p10)   ;;  %vm1097_vm0 = vmmov (!%p400_p10), 0   ;;  %p444_p11 = scmp.lt.s32.totalorder (!%p400_p10), %s1086_s14, 4 }
  0x3a   : > { %403 = sbr.rel (%p400_p10) target bundleno = 327 (0x147), region = 69  ;;  %964 = vmatprep.subr.bf16.mxu1 (!%p400_p10), %v1096_v48  ;;  %980 = vmatprep.mubr.msk.bf16.mxu1 (!%p400_p10), %vm1097_vm0, %v1096_v48  ;;  %v1051_v10 = vld [vmem:[%s1334_s0] ss:$12 sps:$4 sm:$0xff] (!%p400_p10)   ;;  %v1055_v11 = vld [vmem:[%s1334_s0 + $0x8] ss:$12 sps:$4 sm:$0xff] (!%p400_p10)   ;;  %s900_s24 = sshll.u32 (!%p400_p10), %s406_s30, 4 }
  0x3b   : > { %s985_s4 = smul.u32 (!%p400_p10), 192, %s406_s30  ;;  %700 = vmatprep.mubr.bf16.mxu0 (!%p400_p10), %v1053_v49  ;;  %s436_s25 = scalar_lea.vmem (!%p400_p10), [#allocation3], %s900_s24 }
  0x3d   : > { %s1274_s7 = scalar_lea.vmem (!%p400_p10), [#allocation2], %s985_s4 }
  0x3e   : > { %v1028_v50 = vld [vmem:[%s1274_s7 + $0x40] sm:$0xff] (!%p400_p10)   ;;  %v1031_v53 = vld [vmem:[%s1274_s7 + $0x48] sm:$0xff] (!%p400_p10)   ;;  %v1034_v56 = vld [vmem:[%s1274_s7 + $0x50] sm:$0xff] (!%p400_p10)  }
  0x3f   : > { %v1029_v51 = vld [vmem:[%s1274_s7] sm:$0xff] (!%p400_p10)   ;;  %933 = vmatprep.subr.bf16.mxu0 (!%p400_p10), %v1028_v50  ;;  %v1032_v54 = vld [vmem:[%s1274_s7 + $0x8] sm:$0xff] (!%p400_p10)   ;;  %v1035_v57 = vld [vmem:[%s1274_s7 + $0x10] sm:$0xff] (!%p400_p10)  }
  0x40   : > { %v1030_v52 = vld [vmem:[%s1274_s7 + $0x80] sm:$0xff] (!%p400_p10)   ;;  %934 = vmatpush3.bf16.msra.mxu0 (!%p400_p10), %v1029_v51  ;;  %v1033_v55 = vld [vmem:[%s1274_s7 + $0x88] sm:$0xff] (!%p400_p10)   ;;  %v1036_v58 = vld [vmem:[%s1274_s7 + $0x90] sm:$0xff] (!%p400_p10)  }
  0x41   : > { %965 = vmatpush3.bf16.msra.mxu1 %v1030_v52  ;;  %935 = vmatprep.subr.bf16.mxu0 %v1031_v53  ;;  %v1037_v59 = vld [vmem:[%s1274_s7 + $0x58] sm:$0xff]   ;;  %v1040_v62 = vld [vmem:[%s1274_s7 + $0x60] sm:$0xff]   ;;  %v1043_v1 = vld [vmem:[%s1274_s7 + $0x68] sm:$0xff]   ;;  %s445_s18 = scalar_select %p444_p11, %s1086_s14, 4 }
  0x42   : > { %966 = vmatprep.subr.bf16.mxu1 %v1096_v48  ;;  %v1038_v60 = vld [vmem:[%s1274_s7 + $0x18] sm:$0xff]   ;;  %v1041_v63 = vld [vmem:[%s1274_s7 + $0x20] sm:$0xff]   ;;  %v1044_v2 = vld [vmem:[%s1274_s7 + $0x28] sm:$0xff]   ;;  %s930_s26 = sshll.u32 (%p1153_p6), %s1086_s14, 3 }
  0x43   : > { %v1039_v61 = vld [vmem:[%s1274_s7 + $0x98] sm:$0xff]   ;;  %v1042_v0 = vld [vmem:[%s1274_s7 + $0xa0] sm:$0xff]   ;;  %v1045_v3 = vld [vmem:[%s1274_s7 + $0xa8] sm:$0xff]   ;;  %s446_s23 = scalar_lea.vmem %s1336_s2, %s445_s18  ;;  %s765_s28 = scalar_lea.vmem (%p1153_p6), %s1337_s3, %s930_s26 }
  0x44   : > { %936 = vmatpush3.bf16.msra.mxu0 %v1032_v54  ;;  %v1046_v4 = vld [vmem:[%s1274_s7 + $0x70] sm:$0xff]   ;;  %v1049_v7 = vld [vmem:[%s1274_s7 + $0x78] sm:$0xff]   ;;  %v901_v14 = vld [vmem:[%s446_s23] ss:$0 sm:$0xff] }
  0x45   : > { %967 = vmatpush3.bf16.msra.mxu1 %v1033_v55  ;;  %937 = vmatprep.subr.bf16.mxu0 %v1034_v56  ;;  %v1047_v5 = vld [vmem:[%s1274_s7 + $0x30] sm:$0xff]   ;;  %v1050_v8 = vld [vmem:[%s1274_s7 + $0x38] sm:$0xff]  }
  0x46   : > { %968 = vmatprep.subr.bf16.mxu1 %v1096_v48  ;;  %v1048_v6 = vld [vmem:[%s1274_s7 + $0xb0] sm:$0xff]   ;;  %v1054_v9 = vld [vmem:[%s1274_s7 + $0xb8] sm:$0xff]  }
  0x48   : > { %938 = vmatpush3.bf16.msra.mxu0 %v1035_v57 }
  0x49   : > { %969 = vmatpush3.bf16.msra.mxu1 %v1036_v58  ;;  %939 = vmatprep.subr.bf16.mxu0 %v1037_v59 }
  0x4a   : > { %970 = vmatprep.subr.bf16.mxu1 %v1096_v48 }
  0x4c   : > { %940 = vmatpush3.bf16.msra.mxu0 %v1038_v60 }
  0x4d   : > { %971 = vmatpush3.bf16.msra.mxu1 %v1039_v61  ;;  %941 = vmatprep.subr.bf16.mxu0 %v1040_v62 }
  0x4e   : > { %972 = vmatprep.subr.bf16.mxu1 %v1096_v48 }
  0x50   : > { %942 = vmatpush3.bf16.msra.mxu0 %v1041_v63 }
  0x51   : > { %973 = vmatpush3.bf16.msra.mxu1 %v1042_v0  ;;  %943 = vmatprep.subr.bf16.mxu0 %v1043_v1 }
  0x52   : > { %974 = vmatprep.subr.bf16.mxu1 %v1096_v48 }
  0x54   : > { %944 = vmatpush3.bf16.msra.mxu0 %v1044_v2 }
  0x55   : > { %975 = vmatpush3.bf16.msra.mxu1 %v1045_v3  ;;  %945 = vmatprep.subr.bf16.mxu0 %v1046_v4 }
  0x56   : > { %976 = vmatprep.subr.bf16.mxu1 %v1096_v48 }
  0x58   : > { %946 = vmatpush3.bf16.msra.mxu0 %v1047_v5 }
  0x59   : > { %977 = vmatpush3.bf16.msra.mxu1 %v1048_v6  ;;  %947 = vmatprep.subr.bf16.mxu0 %v1049_v7 }
  0x5a   : > { %978 = vmatprep.subr.bf16.mxu1 %v1096_v48 }
  0x5c   : > { %948 = vmatpush3.bf16.msra.mxu0 %v1050_v8 }
  0x5d   : > { %979 = vmatpush3.bf16.msra.mxu1 %v1054_v9 }
  0x5f   : > { %701 = vmatmul.mubr.bf16.vlgmr.msra.gmra.mrb[0].mxu0 %v1051_v10 }
  0x60   : > { %981 = vmatmul.mubr.bf16.vlgmr.msra.gmra.mrb[0].mxu1 %v1055_v11 }
 0x132   : > { %v949_v12 = vpop.f32.mrb[0].mxu0 }
 0x133   : > { %v950_v13 = vpop.f32.mrb[1].mxu0  ;;  %v743_v15 = vpop.f32.mrb[0].mxu1 }
 0x134   : > { %v951_v16 = vadd.f32 %v950_v13, %v949_v12  ;;  %v952_v17 = vpop.f32.mrb[2].mxu0  ;;  %v982_v18 = vpop.f32.mrb[1].mxu1 }
 0x135   : > { %v953_v19 = vpop.f32.mrb[3].mxu0  ;;  %v746_v20 = vpop.f32.mrb[2].mxu1 }
 0x136   : > { %v703_v21 = vadd.f32 %v951_v16, %v901_v14  ;;  %v954_v22 = vadd.f32 %v953_v19, %v952_v17  ;;  %v983_v23 = vpop.f32.mrb[3].mxu1 }
 0x138   : > { %v744_v24 = vadd.f32 %v743_v15, %v703_v21  ;;  %v706_v25 = vadd.f32 %v954_v22, %v901_v14  ;;  %760 = sbr.rel (!%p1153_p6) target bundleno = 327 (0x147), region = 77 }
 0x13a   : > { %v750_v26 = vmax.f32 %v744_v24, 0.0  ;;  %v747_v27 = vadd.f32 %v746_v20, %v706_v25 }
 0x13c   : > { %752 = vst [vmem:[%s436_s25] sm:$0xff] %v750_v26  ;;  %v751_v28 = vmax.f32 %v747_v27, 0.0 }
 0x13e   : > { %753 = vst [vmem:[%s436_s25 + $0x8] sm:$0xff] %v751_v28 }
 0x143   : > { %v795_v29 = vld [vmem:[%s436_s25] sm:$0xff] }
 0x144   : > { %796 = vst [vmem:[%s765_s28] sm:$0xff] %v795_v29 }
 0x145   : > { %v797_v30 = vld [vmem:[%s436_s25 + $0x8] sm:$0xff] }
 0x146   : > { %798 = vst [vmem:[%s765_s28 + $0x28] sm:$0xff] %v797_v30 }
 0x147 PF: > { %s13_s16 = sadd.s32 1, %s1094_s16   ;;  %s1339_s12 = smov %s1082_s13 }
 0x148   : > { %p10_p12 = scmp.ge.s32.totalorder %s13_s16, 7   ;;  %s1340_s13 = smov %s1158_s22 }
 0x149   : > { %s1341_s14 = smov %s1090_s15  ;;  %s1342_s15 = smov %s1344_s17 }
 0x14a   :  { %12 = sbr.rel (!%p10_p12) target bundleno = 3 (0x3), region = 152 }

// kernel: det_forward.15
= control target key start
LH: loop header
LB: loop body
LE: loop exit
PB: predicated region body
PF: predicated region fallthrough
CT: control target
= control target key end

     0   :  { %s1712_s12 = smov 0   ;;  %s1714_s13 = smov 0   ;;  %s2053_s0 = inlined_call_operand.vmem [shape: bf16[16,640], index: 0, kind: input, shape index: {}]   ;;  %s2054_s1 = inlined_call_operand.vmem [shape: bf16[640,2560], index: 1, kind: input, shape index: {}]   ;;  %s2055_s2 = inlined_call_operand.vmem [shape: f32[1,2560], index: 2, kind: input, shape index: {}]   ;;  %s2056_s3 = inlined_call_operand.vmem [shape: f32[16,2560], index: 3, kind: output, shape index: {}]  }
   0x1   :  { %s1716_s14 = smov 0   ;;  %s1718_s15 = smov 0  }
   0x2   :  { %s1720_s16 = smov 0  }
   0x3 LB: > { %s22_s17 = sadd.s32 1, %s1685_s15  ;;  %s1367_s18 = sadd.s32 4294967295, %s1689_s16   ;;  %s1689_s16 = sphi %s1720_s16, %s13_s16   ;;  %s1685_s15 = sphi %s1718_s15, %s2061_s15   ;;  %s1681_s14 = sphi %s1716_s14, %s2060_s14   ;;  %s1677_s13 = sphi %s1714_s13, %s2059_s13   ;;  %s1673_s12 = sphi %s1712_s12, %s2058_s12  }
   0x4   : > { %p23_p0 = scmp.ge.s32.totalorder %s22_s17, 10  ;;  %p65_p1 = scmp.ne.s32.totalorder %s1677_s13, %s1673_s12 }
   0x5   : > { %p66_p2 = scmp.eq.s32.totalorder %s1689_s16, 0  ;;  %p123_p4 = scmp.eq.s32.totalorder %s1367_s18, 9 }
   0x6   : > { %s2063_s17 = smov (%p23_p0, %s22_s17), 0  ;;  %s58_s20 = sadd.s32 1, %s1677_s13 }
   0x7   : > { %p67_p3 = por %p66_p2, %p65_p1  ;;  %s55_s19 = ssub.s32 %s1685_s15, %s2063_s17 }
   0x8   : > { %p56_p5 = scmp.eq.s32.totalorder %s55_s19, 0  ;;  %p1747_p6 = por %p123_p4, %p65_p1 }
   0x9   : > { %p1371_p7 = scmp.ge.s32.totalorder %s1689_s16, 10 }
   0xa   : > { %s1752_s22 = scalar_select %p56_p5, %s1677_s13, %s58_s20  }
   0xb   : > { %155 = sbr.rel (%p1371_p7) target bundleno = 62 (0x3e), region = 20 }
  0x12   : > { %158 = sbr.rel (!%p67_p3) target bundleno = 62 (0x3e), region = 24  ;;  %s160_s23 = sand.u32 (%p67_p3), 1, %s1677_s13  }
  0x13   : > { %s1467_s24 = sshll.u32 (%p67_p3), %s1685_s15, 3  ;;  %s1481_s25 = smul.u32 (%p67_p3), 640, %s160_s23 }
  0x14   : > { %s1760_s28 = scalar_lea.vmem (%p67_p3), %s2054_s1, %s1467_s24 }
  0x15   : > { %v351_v0 = vld [vmem:[%s1760_s28] sm:$0xff] (%p67_p3)  ;;  %v353_v1 = vld [vmem:[%s1760_s28 + $0x50] sm:$0xff] (%p67_p3)  ;;  %s1768_s29 = scalar_lea.vmem (%p67_p3), [#allocation2], %s1481_s25 }
  0x16   : > { %v355_v2 = vld [vmem:[%s1760_s28 + $0xa0] sm:$0xff] (%p67_p3)  ;;  %v357_v3 = vld [vmem:[%s1760_s28 + $0xf0] sm:$0xff] (%p67_p3)  ;;  %352 = vst [vmem:[%s1768_s29] sm:$0xff] (%p67_p3), %v351_v0  ;;  %354 = vst [vmem:[%s1768_s29 + $0x8] sm:$0xff] (%p67_p3), %v353_v1 }
  0x17   : > { %v359_v4 = vld [vmem:[%s1760_s28 + $0x140] sm:$0xff] (%p67_p3)  ;;  %v361_v5 = vld [vmem:[%s1760_s28 + $0x190] sm:$0xff] (%p67_p3)  ;;  %356 = vst [vmem:[%s1768_s29 + $0x10] sm:$0xff] (%p67_p3), %v355_v2  ;;  %358 = vst [vmem:[%s1768_s29 + $0x18] sm:$0xff] (%p67_p3), %v357_v3 }
  0x18   : > { %360 = vst [vmem:[%s1768_s29 + $0x20] sm:$0xff] (%p67_p3), %v359_v4  ;;  %362 = vst [vmem:[%s1768_s29 + $0x28] sm:$0xff] (%p67_p3), %v361_v5  ;;  %v363_v6 = vld [vmem:[%s1760_s28 + $0x1e0] sm:$0xff] (%p67_p3)  ;;  %v365_v7 = vld [vmem:[%s1760_s28 + $0x230] sm:$0xff] (%p67_p3) }
  0x19   : > { %v367_v8 = vld [vmem:[%s1760_s28 + $0x280] sm:$0xff]  ;;  %364 = vst [vmem:[%s1768_s29 + $0x30] sm:$0xff] %v363_v6  ;;  %366 = vst [vmem:[%s1768_s29 + $0x38] sm:$0xff] %v365_v7  ;;  %v369_v9 = vld [vmem:[%s1760_s28 + $0x2d0] sm:$0xff] }
  0x1a   : > { %368 = vst [vmem:[%s1768_s29 + $0x40] sm:$0xff] %v367_v8  ;;  %v371_v10 = vld [vmem:[%s1760_s28 + $0x320] sm:$0xff]  ;;  %v373_v11 = vld [vmem:[%s1760_s28 + $0x370] sm:$0xff]  ;;  %370 = vst [vmem:[%s1768_s29 + $0x48] sm:$0xff] %v369_v9 }
  0x1b   : > { %372 = vst [vmem:[%s1768_s29 + $0x50] sm:$0xff] %v371_v10  ;;  %374 = vst [vmem:[%s1768_s29 + $0x58] sm:$0xff] %v373_v11  ;;  %v375_v12 = vld [vmem:[%s1760_s28 + $0x3c0] sm:$0xff]  ;;  %v377_v13 = vld [vmem:[%s1760_s28 + $0x410] sm:$0xff] }
  0x1c   : > { %v379_v14 = vld [vmem:[%s1760_s28 + $0x460] sm:$0xff]  ;;  %376 = vst [vmem:[%s1768_s29 + $0x60] sm:$0xff] %v375_v12  ;;  %378 = vst [vmem:[%s1768_s29 + $0x68] sm:$0xff] %v377_v13  ;;  %v381_v15 = vld [vmem:[%s1760_s28 + $0x4b0] sm:$0xff] }
  0x1d   : > { %380 = vst [vmem:[%s1768_s29 + $0x70] sm:$0xff] %v379_v14  ;;  %v383_v16 = vld [vmem:[%s1760_s28 + $0x500] sm:$0xff]  ;;  %v385_v17 = vld [vmem:[%s1760_s28 + $0x550] sm:$0xff]  ;;  %382 = vst [vmem:[%s1768_s29 + $0x78] sm:$0xff] %v381_v15 }
  0x1e   : > { %384 = vst [vmem:[%s1768_s29 + $0x80] sm:$0xff] %v383_v16  ;;  %386 = vst [vmem:[%s1768_s29 + $0x88] sm:$0xff] %v385_v17  ;;  %v387_v18 = vld [vmem:[%s1760_s28 + $0x5a0] sm:$0xff]  ;;  %v389_v19 = vld [vmem:[%s1760_s28 + $0x5f0] sm:$0xff] }
  0x1f   : > { %v391_v20 = vld [vmem:[%s1760_s28 + $0x640] sm:$0xff]  ;;  %388 = vst [vmem:[%s1768_s29 + $0x90] sm:$0xff] %v387_v18  ;;  %390 = vst [vmem:[%s1768_s29 + $0x98] sm:$0xff] %v389_v19  ;;  %v393_v21 = vld [vmem:[%s1760_s28 + $0x690] sm:$0xff] }
  0x20   : > { %392 = vst [vmem:[%s1768_s29 + $0xa0] sm:$0xff] %v391_v20  ;;  %v395_v22 = vld [vmem:[%s1760_s28 + $0x6e0] sm:$0xff]  ;;  %v397_v23 = vld [vmem:[%s1760_s28 + $0x730] sm:$0xff]  ;;  %394 = vst [vmem:[%s1768_s29 + $0xa8] sm:$0xff] %v393_v21 }
  0x21   : > { %396 = vst [vmem:[%s1768_s29 + $0xb0] sm:$0xff] %v395_v22  ;;  %398 = vst [vmem:[%s1768_s29 + $0xb8] sm:$0xff] %v397_v23  ;;  %v399_v24 = vld [vmem:[%s1760_s28 + $0x780] sm:$0xff]  ;;  %v401_v25 = vld [vmem:[%s1760_s28 + $0x7d0] sm:$0xff] }
  0x22   : > { %v403_v26 = vld [vmem:[%s1760_s28 + $0x820] sm:$0xff]  ;;  %400 = vst [vmem:[%s1768_s29 + $0xc0] sm:$0xff] %v399_v24  ;;  %402 = vst [vmem:[%s1768_s29 + $0xc8] sm:$0xff] %v401_v25  ;;  %v405_v27 = vld [vmem:[%s1760_s28 + $0x870] sm:$0xff] }
  0x23   : > { %404 = vst [vmem:[%s1768_s29 + $0xd0] sm:$0xff] %v403_v26  ;;  %v407_v28 = vld [vmem:[%s1760_s28 + $0x8c0] sm:$0xff]  ;;  %v409_v29 = vld [vmem:[%s1760_s28 + $0x910] sm:$0xff]  ;;  %406 = vst [vmem:[%s1768_s29 + $0xd8] sm:$0xff] %v405_v27 }
  0x24   : > { %408 = vst [vmem:[%s1768_s29 + $0xe0] sm:$0xff] %v407_v28  ;;  %410 = vst [vmem:[%s1768_s29 + $0xe8] sm:$0xff] %v409_v29  ;;  %v411_v30 = vld [vmem:[%s1760_s28 + $0x960] sm:$0xff]  ;;  %v413_v31 = vld [vmem:[%s1760_s28 + $0x9b0] sm:$0xff] }
  0x25   : > { %v415_v32 = vld [vmem:[%s1760_s28 + $0xa00] sm:$0xff]  ;;  %412 = vst [vmem:[%s1768_s29 + $0xf0] sm:$0xff] %v411_v30  ;;  %414 = vst [vmem:[%s1768_s29 + $0xf8] sm:$0xff] %v413_v31  ;;  %v417_v33 = vld [vmem:[%s1760_s28 + $0xa50] sm:$0xff] }
  0x26   : > { %416 = vst [vmem:[%s1768_s29 + $0x100] sm:$0xff] %v415_v32  ;;  %v419_v34 = vld [vmem:[%s1760_s28 + $0xaa0] sm:$0xff]  ;;  %v421_v35 = vld [vmem:[%s1760_s28 + $0xaf0] sm:$0xff]  ;;  %418 = vst [vmem:[%s1768_s29 + $0x108] sm:$0xff] %v417_v33 }
  0x27   : > { %420 = vst [vmem:[%s1768_s29 + $0x110] sm:$0xff] %v419_v34  ;;  %422 = vst [vmem:[%s1768_s29 + $0x118] sm:$0xff] %v421_v35  ;;  %v423_v36 = vld [vmem:[%s1760_s28 + $0xb40] sm:$0xff]  ;;  %v425_v37 = vld [vmem:[%s1760_s28 + $0xb90] sm:$0xff] }
  0x28   : > { %v427_v38 = vld [vmem:[%s1760_s28 + $0xbe0] sm:$0xff]  ;;  %424 = vst [vmem:[%s1768_s29 + $0x120] sm:$0xff] %v423_v36  ;;  %426 = vst [vmem:[%s1768_s29 + $0x128] sm:$0xff] %v425_v37  ;;  %v429_v39 = vld [vmem:[%s1760_s28 + $0xc30] sm:$0xff] }
  0x29   : > { %428 = vst [vmem:[%s1768_s29 + $0x130] sm:$0xff] %v427_v38  ;;  %v431_v40 = vld [vmem:[%s1760_s28 + $0xc80] sm:$0xff]  ;;  %v433_v41 = vld [vmem:[%s1760_s28 + $0xcd0] sm:$0xff]  ;;  %430 = vst [vmem:[%s1768_s29 + $0x138] sm:$0xff] %v429_v39 }
  0x2a   : > { %432 = vst [vmem:[%s1768_s29 + $0x140] sm:$0xff] %v431_v40  ;;  %434 = vst [vmem:[%s1768_s29 + $0x148] sm:$0xff] %v433_v41  ;;  %v435_v42 = vld [vmem:[%s1760_s28 + $0xd20] sm:$0xff]  ;;  %v437_v43 = vld [vmem:[%s1760_s28 + $0xd70] sm:$0xff] }
  0x2b   : > { %v439_v44 = vld [vmem:[%s1760_s28 + $0xdc0] sm:$0xff]  ;;  %436 = vst [vmem:[%s1768_s29 + $0x150] sm:$0xff] %v435_v42  ;;  %438 = vst [vmem:[%s1768_s29 + $0x158] sm:$0xff] %v437_v43  ;;  %v441_v45 = vld [vmem:[%s1760_s28 + $0xe10] sm:$0xff] }
  0x2c   : > { %440 = vst [vmem:[%s1768_s29 + $0x160] sm:$0xff] %v439_v44  ;;  %v443_v46 = vld [vmem:[%s1760_s28 + $0xe60] sm:$0xff]  ;;  %v445_v47 = vld [vmem:[%s1760_s28 + $0xeb0] sm:$0xff]  ;;  %442 = vst [vmem:[%s1768_s29 + $0x168] sm:$0xff] %v441_v45 }
  0x2d   : > { %444 = vst [vmem:[%s1768_s29 + $0x170] sm:$0xff] %v443_v46  ;;  %446 = vst [vmem:[%s1768_s29 + $0x178] sm:$0xff] %v445_v47  ;;  %v447_v48 = vld [vmem:[%s1760_s28 + $0xf00] sm:$0xff]  ;;  %v449_v49 = vld [vmem:[%s1760_s28 + $0xf50] sm:$0xff] }
  0x2e   : > { %v451_v50 = vld [vmem:[%s1760_s28 + $0xfa0] sm:$0xff]  ;;  %448 = vst [vmem:[%s1768_s29 + $0x180] sm:$0xff] %v447_v48  ;;  %450 = vst [vmem:[%s1768_s29 + $0x188] sm:$0xff] %v449_v49  ;;  %v453_v51 = vld [vmem:[%s1760_s28 + $0xff0] sm:$0xff] }
  0x2f   : > { %452 = vst [vmem:[%s1768_s29 + $0x190] sm:$0xff] %v451_v50  ;;  %v455_v52 = vld [vmem:[%s1760_s28 + $0x1040] sm:$0xff]  ;;  %v457_v53 = vld [vmem:[%s1760_s28 + $0x1090] sm:$0xff]  ;;  %454 = vst [vmem:[%s1768_s29 + $0x198] sm:$0xff] %v453_v51 }
  0x30   : > { %456 = vst [vmem:[%s1768_s29 + $0x1a0] sm:$0xff] %v455_v52  ;;  %458 = vst [vmem:[%s1768_s29 + $0x1a8] sm:$0xff] %v457_v53  ;;  %v459_v54 = vld [vmem:[%s1760_s28 + $0x10e0] sm:$0xff]  ;;  %v461_v55 = vld [vmem:[%s1760_s28 + $0x1130] sm:$0xff] }
  0x31   : > { %v463_v56 = vld [vmem:[%s1760_s28 + $0x1180] sm:$0xff]  ;;  %460 = vst [vmem:[%s1768_s29 + $0x1b0] sm:$0xff] %v459_v54  ;;  %462 = vst [vmem:[%s1768_s29 + $0x1b8] sm:$0xff] %v461_v55  ;;  %v465_v57 = vld [vmem:[%s1760_s28 + $0x11d0] sm:$0xff] }
  0x32   : > { %464 = vst [vmem:[%s1768_s29 + $0x1c0] sm:$0xff] %v463_v56  ;;  %v467_v58 = vld [vmem:[%s1760_s28 + $0x1220] sm:$0xff]  ;;  %v469_v59 = vld [vmem:[%s1760_s28 + $0x1270] sm:$0xff]  ;;  %466 = vst [vmem:[%s1768_s29 + $0x1c8] sm:$0xff] %v465_v57 }
  0x33   : > { %468 = vst [vmem:[%s1768_s29 + $0x1d0] sm:$0xff] %v467_v58  ;;  %470 = vst [vmem:[%s1768_s29 + $0x1d8] sm:$0xff] %v469_v59  ;;  %v471_v60 = vld [vmem:[%s1760_s28 + $0x12c0] sm:$0xff]  ;;  %v473_v61 = vld [vmem:[%s1760_s28 + $0x1310] sm:$0xff] }
  0x34   : > { %v475_v62 = vld [vmem:[%s1760_s28 + $0x1360] sm:$0xff]  ;;  %472 = vst [vmem:[%s1768_s29 + $0x1e0] sm:$0xff] %v471_v60  ;;  %474 = vst [vmem:[%s1768_s29 + $0x1e8] sm:$0xff] %v473_v61  ;;  %v477_v63 = vld [vmem:[%s1760_s28 + $0x13b0] sm:$0xff] }
  0x35   : > { %476 = vst [vmem:[%s1768_s29 + $0x1f0] sm:$0xff] %v475_v62  ;;  %v479_v0 = vld [vmem:[%s1760_s28 + $0x1400] sm:$0xff]  ;;  %v481_v1 = vld [vmem:[%s1760_s28 + $0x1450] sm:$0xff]  ;;  %478 = vst [vmem:[%s1768_s29 + $0x1f8] sm:$0xff] %v477_v63 }
  0x36   : > { %480 = vst [vmem:[%s1768_s29 + $0x200] sm:$0xff] %v479_v0  ;;  %482 = vst [vmem:[%s1768_s29 + $0x208] sm:$0xff] %v481_v1  ;;  %v483_v2 = vld [vmem:[%s1760_s28 + $0x14a0] sm:$0xff]  ;;  %v485_v3 = vld [vmem:[%s1760_s28 + $0x14f0] sm:$0xff] }
  0x37   : > { %v487_v4 = vld [vmem:[%s1760_s28 + $0x1540] sm:$0xff]  ;;  %484 = vst [vmem:[%s1768_s29 + $0x210] sm:$0xff] %v483_v2  ;;  %486 = vst [vmem:[%s1768_s29 + $0x218] sm:$0xff] %v485_v3  ;;  %v489_v5 = vld [vmem:[%s1760_s28 + $0x1590] sm:$0xff] }
  0x38   : > { %488 = vst [vmem:[%s1768_s29 + $0x220] sm:$0xff] %v487_v4  ;;  %v491_v6 = vld [vmem:[%s1760_s28 + $0x15e0] sm:$0xff]  ;;  %v493_v7 = vld [vmem:[%s1760_s28 + $0x1630] sm:$0xff]  ;;  %490 = vst [vmem:[%s1768_s29 + $0x228] sm:$0xff] %v489_v5 }
  0x39   : > { %492 = vst [vmem:[%s1768_s29 + $0x230] sm:$0xff] %v491_v6  ;;  %494 = vst [vmem:[%s1768_s29 + $0x238] sm:$0xff] %v493_v7  ;;  %v495_v8 = vld [vmem:[%s1760_s28 + $0x1680] sm:$0xff]  ;;  %v497_v9 = vld [vmem:[%s1760_s28 + $0x16d0] sm:$0xff] }
  0x3a   : > { %v499_v10 = vld [vmem:[%s1760_s28 + $0x1720] sm:$0xff]  ;;  %496 = vst [vmem:[%s1768_s29 + $0x240] sm:$0xff] %v495_v8  ;;  %498 = vst [vmem:[%s1768_s29 + $0x248] sm:$0xff] %v497_v9  ;;  %v501_v11 = vld [vmem:[%s1760_s28 + $0x1770] sm:$0xff] }
  0x3b   : > { %500 = vst [vmem:[%s1768_s29 + $0x250] sm:$0xff] %v499_v10  ;;  %v503_v12 = vld [vmem:[%s1760_s28 + $0x17c0] sm:$0xff]  ;;  %v505_v13 = vld [vmem:[%s1760_s28 + $0x1810] sm:$0xff]  ;;  %502 = vst [vmem:[%s1768_s29 + $0x258] sm:$0xff] %v501_v11 }
  0x3c   : > { %504 = vst [vmem:[%s1768_s29 + $0x260] sm:$0xff] %v503_v12  ;;  %506 = vst [vmem:[%s1768_s29 + $0x268] sm:$0xff] %v505_v13  ;;  %v507_v14 = vld [vmem:[%s1760_s28 + $0x1860] sm:$0xff]  ;;  %v509_v15 = vld [vmem:[%s1760_s28 + $0x18b0] sm:$0xff] }
  0x3d   : > { %508 = vst [vmem:[%s1768_s29 + $0x270] sm:$0xff] %v507_v14  ;;  %510 = vst [vmem:[%s1768_s29 + $0x278] sm:$0xff] %v509_v15 }
  0x3e PF: > { %p1374_p8 = scmp.ge.s32.totalorder %s1689_s16, 1  ;;  %p523_p9 = scmp.lt.s32.totalorder %s1689_s16, 11 }
  0x40   : > { %p524_p10 = pnand %p1374_p8, %p523_p9 }
  0x41   : > { %s530_s30 = sand.u32 (!%p524_p10), 1, %s1673_s12   ;;  %v1604_v16 = vld [vmem:[%s2053_s0 + $0xc] ss:$20 sps:$4 sm:$0xff] (!%p524_p10)   ;;  %v1646_v17 = vld [vmem:[%s2053_s0 + $0x4] ss:$20 sps:$4 sm:$0xff] (!%p524_p10)   ;;  %s1376_s24 = sshll.u32 (!%p524_p10), %s1681_s14, 1 }
  0x42   : > { %527 = sbr.rel (%p524_p10) target bundleno = 395 (0x18b), region = 66  ;;  %1177 = vmatprep.mubr.bf16.mxu0 (!%p524_p10), %v1604_v16  ;;  %1134 = vmatprep.mubr.bf16.mxu1 (!%p524_p10), %v1646_v17  ;;  %v1602_v15 = vld [vmem:[%s2053_s0 + $0x8] ss:$20 sps:$4 sm:$0xff] (!%p524_p10)   ;;  %p571_p11 = scmp.lt.s32.totalorder (!%p524_p10), %s1376_s24, 19 }
  0x43   : > { %s1482_s4 = smul.u32 (!%p524_p10), 640, %s530_s30  ;;  %s1375_s28 = sshll.u32 (!%p524_p10), %s530_s30, 5 }
  0x44   : > { %s561_s29 = scalar_lea.vmem (!%p524_p10), [#allocation3], %s1375_s28 }
  0x45   : > { %s1935_s9 = scalar_lea.vmem (!%p524_p10), [#allocation2], %s1482_s4 }
  0x46   : > { %v1524_v18 = vld [vmem:[%s1935_s9 + $0x104] ss:$8 sps:$4 sm:$0xff] (!%p524_p10)   ;;  %v1526_v19 = vld [vmem:[%s1935_s9 + $0x100] ss:$8 sps:$4 sm:$0xff] (!%p524_p10)   ;;  %v1527_v20 = vld [vmem:[%s1935_s9 + $0x114] ss:$8 sps:$4 sm:$0xff] (!%p524_p10)  }
  0x47   : > { %1145 = vmatprep.subr.bf16.mxu0 (!%p524_p10), %v1524_v18  ;;  %v1529_v21 = vld [vmem:[%s1935_s9 + $0x110] ss:$8 sps:$4 sm:$0xff] (!%p524_p10)   ;;  %v1530_v22 = vld [vmem:[%s1935_s9 + $0x124] ss:$8 sps:$4 sm:$0xff] (!%p524_p10)   ;;  %v1532_v23 = vld [vmem:[%s1935_s9 + $0x120] ss:$8 sps:$4 sm:$0xff] (!%p524_p10)  }
  0x48   : > { %1146 = vmatpush1.bf16.msra.mxu0 (!%p524_p10), %v1526_v19  ;;  %v1533_v24 = vld [vmem:[%s1935_s9 + $0x134] ss:$8 sps:$4 sm:$0xff] (!%p524_p10)   ;;  %v1545_v25 = vld [vmem:[%s1935_s9 + $0x4] ss:$8 sps:$4 sm:$0xff] (!%p524_p10)   ;;  %v1547_v26 = vld [vmem:[%s1935_s9] ss:$8 sps:$4 sm:$0xff] (!%p524_p10)  }
  0x49   : > { %1147 = vmatprep.subr.bf16.mxu0 %v1527_v20  ;;  %v1535_v27 = vld [vmem:[%s1935_s9 + $0x130] ss:$8 sps:$4 sm:$0xff]   ;;  %v1536_v28 = vld [vmem:[%s1935_s9 + $0x144] ss:$8 sps:$4 sm:$0xff]   ;;  %1102 = vmatprep.subr.bf16.mxu1 %v1545_v25  ;;  %v1551_v29 = vld [vmem:[%s1935_s9 + $0x14] ss:$8 sps:$4 sm:$0xff]  }
  0x4a   : > { %1103 = vmatpush1.bf16.msra.mxu1 %v1547_v26  ;;  %v1553_v30 = vld [vmem:[%s1935_s9 + $0x10] ss:$8 sps:$4 sm:$0xff]   ;;  %v1538_v31 = vld [vmem:[%s1935_s9 + $0x140] ss:$8 sps:$4 sm:$0xff]   ;;  %v1557_v32 = vld [vmem:[%s1935_s9 + $0x24] ss:$8 sps:$4 sm:$0xff]  }
  0x4b   : > { %1104 = vmatprep.subr.bf16.mxu1 %v1551_v29  ;;  %v1539_v33 = vld [vmem:[%s1935_s9 + $0x154] ss:$8 sps:$4 sm:$0xff]   ;;  %v1559_v34 = vld [vmem:[%s1935_s9 + $0x20] ss:$8 sps:$4 sm:$0xff]   ;;  %v1541_v36 = vld [vmem:[%s1935_s9 + $0x150] ss:$8 sps:$4 sm:$0xff]  }
  0x4c   : > { %1148 = vmatpush1.bf16.msra.mxu0 %v1529_v21  ;;  %v1563_v35 = vld [vmem:[%s1935_s9 + $0x34] ss:$8 sps:$4 sm:$0xff]   ;;  %v1542_v37 = vld [vmem:[%s1935_s9 + $0x164] ss:$8 sps:$4 sm:$0xff]   ;;  %v1565_v38 = vld [vmem:[%s1935_s9 + $0x30] ss:$8 sps:$4 sm:$0xff]  }
  0x4d   : > { %1149 = vmatprep.subr.bf16.mxu0 %v1530_v22  ;;  %v1569_v39 = vld [vmem:[%s1935_s9 + $0x44] ss:$8 sps:$4 sm:$0xff]   ;;  %v1544_v40 = vld [vmem:[%s1935_s9 + $0x160] ss:$8 sps:$4 sm:$0xff]   ;;  %v1548_v41 = vld [vmem:[%s1935_s9 + $0x174] ss:$8 sps:$4 sm:$0xff]  }
  0x4e   : > { %1105 = vmatpush1.bf16.msra.mxu1 %v1553_v30  ;;  %v1571_v42 = vld [vmem:[%s1935_s9 + $0x40] ss:$8 sps:$4 sm:$0xff]   ;;  %v1575_v43 = vld [vmem:[%s1935_s9 + $0x54] ss:$8 sps:$4 sm:$0xff]   ;;  %v1550_v44 = vld [vmem:[%s1935_s9 + $0x170] ss:$8 sps:$4 sm:$0xff]  }
  0x4f   : > { %1106 = vmatprep.subr.bf16.mxu1 %v1557_v32  ;;  %v1554_v45 = vld [vmem:[%s1935_s9 + $0x184] ss:$8 sps:$4 sm:$0xff]   ;;  %v1577_v46 = vld [vmem:[%s1935_s9 + $0x50] ss:$8 sps:$4 sm:$0xff]   ;;  %v1556_v48 = vld [vmem:[%s1935_s9 + $0x180] ss:$8 sps:$4 sm:$0xff]  }
  0x50   : > { %1150 = vmatpush1.bf16.msra.mxu0 %v1532_v23  ;;  %v1581_v47 = vld [vmem:[%s1935_s9 + $0x64] ss:$8 sps:$4 sm:$0xff]   ;;  %v1560_v49 = vld [vmem:[%s1935_s9 + $0x194] ss:$8 sps:$4 sm:$0xff]   ;;  %v1583_v50 = vld [vmem:[%s1935_s9 + $0x60] ss:$8 sps:$4 sm:$0xff]  }
  0x51   : > { %1151 = vmatprep.subr.bf16.mxu0 %v1533_v24  ;;  %v1587_v51 = vld [vmem:[%s1935_s9 + $0x74] ss:$8 sps:$4 sm:$0xff]   ;;  %v1562_v52 = vld [vmem:[%s1935_s9 + $0x190] ss:$8 sps:$4 sm:$0xff]   ;;  %v1566_v53 = vld [vmem:[%s1935_s9 + $0x1a4] ss:$8 sps:$4 sm:$0xff]  }
  0x52   : > { %1107 = vmatpush1.bf16.msra.mxu1 %v1559_v34  ;;  %v1589_v54 = vld [vmem:[%s1935_s9 + $0x70] ss:$8 sps:$4 sm:$0xff]   ;;  %v1593_v55 = vld [vmem:[%s1935_s9 + $0x84] ss:$8 sps:$4 sm:$0xff]   ;;  %v1568_v56 = vld [vmem:[%s1935_s9 + $0x1a0] ss:$8 sps:$4 sm:$0xff]  }
  0x53   : > { %1108 = vmatprep.subr.bf16.mxu1 %v1563_v35  ;;  %v1572_v57 = vld [vmem:[%s1935_s9 + $0x1b4] ss:$8 sps:$4 sm:$0xff]   ;;  %v1595_v58 = vld [vmem:[%s1935_s9 + $0x80] ss:$8 sps:$4 sm:$0xff]   ;;  %v1574_v60 = vld [vmem:[%s1935_s9 + $0x1b0] ss:$8 sps:$4 sm:$0xff]  }
  0x54   : > { %1152 = vmatpush1.bf16.msra.mxu0 %v1535_v27  ;;  %v1599_v59 = vld [vmem:[%s1935_s9 + $0x94] ss:$8 sps:$4 sm:$0xff]   ;;  %v1578_v61 = vld [vmem:[%s1935_s9 + $0x1c4] ss:$8 sps:$4 sm:$0xff]   ;;  %v1601_v62 = vld [vmem:[%s1935_s9 + $0x90] ss:$8 sps:$4 sm:$0xff]  }
  0x55   : > { %1153 = vmatprep.subr.bf16.mxu0 %v1536_v28  ;;  %v1608_v63 = vld [vmem:[%s1935_s9 + $0xa4] ss:$8 sps:$4 sm:$0xff]   ;;  %v1580_v0 = vld [vmem:[%s1935_s9 + $0x1c0] ss:$8 sps:$4 sm:$0xff]   ;;  %v1584_v1 = vld [vmem:[%s1935_s9 + $0x1d4] ss:$8 sps:$4 sm:$0xff]  }
  0x56   : > { %1109 = vmatpush1.bf16.msra.mxu1 %v1565_v38  ;;  %v1610_v2 = vld [vmem:[%s1935_s9 + $0xa0] ss:$8 sps:$4 sm:$0xff]   ;;  %v1614_v3 = vld [vmem:[%s1935_s9 + $0xb4] ss:$8 sps:$4 sm:$0xff]   ;;  %v1586_v4 = vld [vmem:[%s1935_s9 + $0x1d0] ss:$8 sps:$4 sm:$0xff]  }
  0x57   : > { %1110 = vmatprep.subr.bf16.mxu1 %v1569_v39  ;;  %v1590_v5 = vld [vmem:[%s1935_s9 + $0x1e4] ss:$8 sps:$4 sm:$0xff]   ;;  %v1616_v6 = vld [vmem:[%s1935_s9 + $0xb0] ss:$8 sps:$4 sm:$0xff]   ;;  %v1592_v8 = vld [vmem:[%s1935_s9 + $0x1e0] ss:$8 sps:$4 sm:$0xff]  }
  0x58   : > { %1154 = vmatpush1.bf16.msra.mxu0 %v1538_v31  ;;  %v1620_v7 = vld [vmem:[%s1935_s9 + $0xc4] ss:$8 sps:$4 sm:$0xff]   ;;  %v1596_v9 = vld [vmem:[%s1935_s9 + $0x1f4] ss:$8 sps:$4 sm:$0xff]   ;;  %v1622_v10 = vld [vmem:[%s1935_s9 + $0xc0] ss:$8 sps:$4 sm:$0xff]  }
  0x59   : > { %1155 = vmatprep.subr.bf16.mxu0 %v1539_v33  ;;  %v1626_v11 = vld [vmem:[%s1935_s9 + $0xd4] ss:$8 sps:$4 sm:$0xff]   ;;  %v1598_v12 = vld [vmem:[%s1935_s9 + $0x1f0] ss:$8 sps:$4 sm:$0xff]   ;;  %v1607_v13 = vld [vmem:[%s1935_s9 + $0x204] ss:$8 sps:$4 sm:$0xff]  }
  0x5a   : > { %1111 = vmatpush1.bf16.msra.mxu1 %v1571_v42  ;;  %v1628_v14 = vld [vmem:[%s1935_s9 + $0xd0] ss:$8 sps:$4 sm:$0xff]   ;;  %v1632_v16 = vld [vmem:[%s1935_s9 + $0xe4] ss:$8 sps:$4 sm:$0xff]   ;;  %v1605_v17 = vld [vmem:[%s1935_s9 + $0x200] ss:$8 sps:$4 sm:$0xff]  }
  0x5b   : > { %1112 = vmatprep.subr.bf16.mxu1 %v1575_v43  ;;  %v1613_v18 = vld [vmem:[%s1935_s9 + $0x214] ss:$8 sps:$4 sm:$0xff]   ;;  %v1634_v19 = vld [vmem:[%s1935_s9 + $0xe0] ss:$8 sps:$4 sm:$0xff]   ;;  %v1611_v21 = vld [vmem:[%s1935_s9 + $0x210] ss:$8 sps:$4 sm:$0xff]  }
  0x5c   : > { %1156 = vmatpush1.bf16.msra.mxu0 %v1541_v36  ;;  %v1638_v20 = vld [vmem:[%s1935_s9 + $0xf4] ss:$8 sps:$4 sm:$0xff]   ;;  %v1691_v22 = vmov 0   ;;  %v1619_v23 = vld [vmem:[%s1935_s9 + $0x224] ss:$8 sps:$4 sm:$0xff]   ;;  %s2065_s24 = smov (!%p571_p11, %s1376_s24), 19 }
  0x5d   : > { %1157 = vmatprep.subr.bf16.mxu0 %v1542_v37  ;;  %v1640_v24 = vld [vmem:[%s1935_s9 + $0xf0] ss:$8 sps:$4 sm:$0xff]   ;;  %v1617_v25 = vld [vmem:[%s1935_s9 + $0x220] ss:$8 sps:$4 sm:$0xff]   ;;  %v1625_v26 = vld [vmem:[%s1935_s9 + $0x234] ss:$8 sps:$4 sm:$0xff]   ;;  %s573_s27 = scalar_lea.vmem %s2055_s2, %s2065_s24 }
  0x5e   : > { %1113 = vmatpush1.bf16.msra.mxu1 %v1577_v46  ;;  %v1644_v27 = vld [vmem:[%s2053_s0] ss:$20 sps:$4 sm:$0xff]   ;;  %v1623_v28 = vld [vmem:[%s1935_s9 + $0x230] ss:$8 sps:$4 sm:$0xff]   ;;  %v1631_v29 = vld [vmem:[%s1935_s9 + $0x244] ss:$8 sps:$4 sm:$0xff]  }
  0x5f   : > { %1114 = vmatprep.subr.bf16.mxu1 %v1581_v47  ;;  %v1629_v30 = vld [vmem:[%s1935_s9 + $0x240] ss:$8 sps:$4 sm:$0xff]   ;;  %v1637_v31 = vld [vmem:[%s1935_s9 + $0x254] ss:$8 sps:$4 sm:$0xff]   ;;  %v1635_v32 = vld [vmem:[%s1935_s9 + $0x250] ss:$8 sps:$4 sm:$0xff]  }
  0x60   : > { %1158 = vmatpush1.bf16.msra.mxu0 %v1544_v40  ;;  %v1643_v33 = vld [vmem:[%s1935_s9 + $0x264] ss:$8 sps:$4 sm:$0xff]   ;;  %v1641_v34 = vld [vmem:[%s1935_s9 + $0x260] ss:$8 sps:$4 sm:$0xff]   ;;  %v1649_v35 = vld [vmem:[%s1935_s9 + $0x274] ss:$8 sps:$4 sm:$0xff]  }
  0x61   : > { %1159 = vmatprep.subr.bf16.mxu0 %v1548_v41  ;;  %v1647_v36 = vld [vmem:[%s1935_s9 + $0x270] ss:$8 sps:$4 sm:$0xff]   ;;  %v666_v41 = vlaneseq  ;;  %s1468_s12 = sshll.u32 (%p1747_p6), %s1681_s14, 4 }
  0x62   : > { %1115 = vmatpush1.bf16.msra.mxu1 %v1583_v50  ;;  %v1650_v37 = vld [vmem:[%s2053_s0 + $0x10] ss:$20 sps:$4 sm:$0xff]   ;;  %s1251_s5 = scalar_lea.vmem (%p1747_p6), %s2056_s3, %s1468_s12 }
  0x63   : > { %1116 = vmatprep.subr.bf16.mxu1 %v1587_v51  ;;  %v667_v43 = vshrl.u32 %v666_v41, 7 }
  0x64   : > { %1160 = vmatpush1.bf16.msra.mxu0 %v1550_v44 }
  0x65   : > { %1161 = vmatprep.subr.bf16.mxu0 %v1554_v45  ;;  %v668_v44 = vsub.s32 0, %v667_v43  ;;  %v664_v45 = vld [vmem:[%s573_s27] sm:$0x3]  ;;  %v672_v46 = vsub.s32 1, %v667_v43 }
  0x66   : > { %1117 = vmatpush1.bf16.msra.mxu1 %v1589_v54 }
  0x67   : > { %1118 = vmatprep.subr.bf16.mxu1 %v1593_v55  ;;  %v669_v47 = vrot.slane %v664_v45, %v668_v44 }
  0x68   : > { %1162 = vmatpush1.bf16.msra.mxu0 %v1556_v48  ;;  %v673_v48 = vrot.slane %v664_v45, %v672_v46 }
  0x69   : > { %1163 = vmatprep.subr.bf16.mxu0 %v1560_v49 }
  0x6a   : > { %1119 = vmatpush1.bf16.msra.mxu1 %v1595_v58 }
  0x6b   : > { %1120 = vmatprep.subr.bf16.mxu1 %v1599_v59 }
  0x6c   : > { %1164 = vmatpush1.bf16.msra.mxu0 %v1562_v52 }
  0x6d   : > { %1165 = vmatprep.subr.bf16.mxu0 %v1566_v53 }
  0x6e   : > { %1121 = vmatpush1.bf16.msra.mxu1 %v1601_v62 }
  0x6f   : > { %1122 = vmatprep.subr.bf16.mxu1 %v1608_v63 }
  0x70   : > { %1166 = vmatpush1.bf16.msra.mxu0 %v1568_v56 }
  0x71   : > { %1167 = vmatprep.subr.bf16.mxu0 %v1572_v57 }
  0x72   : > { %1123 = vmatpush1.bf16.msra.mxu1 %v1610_v2 }
  0x73   : > { %1124 = vmatprep.subr.bf16.mxu1 %v1614_v3 }
  0x74   : > { %1168 = vmatpush1.bf16.msra.mxu0 %v1574_v60 }
  0x75   : > { %1169 = vmatprep.subr.bf16.mxu0 %v1578_v61 }
  0x76   : > { %1125 = vmatpush1.bf16.msra.mxu1 %v1616_v6 }
  0x77   : > { %1126 = vmatprep.subr.bf16.mxu1 %v1620_v7 }
  0x78   : > { %1170 = vmatpush1.bf16.msra.mxu0 %v1580_v0 }
  0x79   : > { %1171 = vmatprep.subr.bf16.mxu0 %v1584_v1 }
  0x7a   : > { %1127 = vmatpush1.bf16.msra.mxu1 %v1622_v10 }
  0x7b   : > { %1128 = vmatprep.subr.bf16.mxu1 %v1626_v11 }
  0x7c   : > { %1172 = vmatpush1.bf16.msra.mxu0 %v1586_v4 }
  0x7d   : > { %1173 = vmatprep.subr.bf16.mxu0 %v1590_v5 }
  0x7e   : > { %1129 = vmatpush1.bf16.msra.mxu1 %v1628_v14 }
  0x7f   : > { %1130 = vmatprep.subr.bf16.mxu1 %v1632_v16 }
  0x80   : > { %1174 = vmatpush1.bf16.msra.mxu0 %v1592_v8 }
  0x81   : > { %1175 = vmatprep.subr.bf16.mxu0 %v1596_v9 }
  0x82   : > { %1131 = vmatpush1.bf16.msra.mxu1 %v1634_v19 }
  0x83   : > { %1132 = vmatprep.subr.bf16.mxu1 %v1638_v20 }
  0x84   : > { %1176 = vmatpush1.bf16.msra.mxu0 %v1598_v12 }
  0x85   : > { %1188 = vmatprep.subr.bf16.mxu0 %v1607_v13 }
  0x86   : > { %1133 = vmatpush1.bf16.msra.mxu1 %v1640_v24 }
  0x87   : > { %1178 = vmatmul.mubr.bf16.vlgmr.msra.gmra.mrb[0].mxu0 %v1602_v15 }
  0x88   : > { %1189 = vmatpush1.bf16.msra.mxu0 %v1605_v17  ;;  %1220 = vmatprep.mubr.bf16.mxu0 %v1691_v22 }
  0x89   : > { %1190 = vmatprep.subr.bf16.mxu0 %v1613_v18  ;;  %1135 = vmatmul.mubr.bf16.vlgmr.msra.gmra.mrb[0].mxu1 %v1644_v27 }
  0x8c   : > { %1191 = vmatpush1.bf16.msra.mxu0 %v1611_v21 }
  0x8d   : > { %1192 = vmatprep.subr.bf16.mxu0 %v1619_v23 }
  0x90   : > { %1193 = vmatpush1.bf16.msra.mxu0 %v1617_v25 }
  0x91   : > { %1194 = vmatprep.subr.bf16.mxu0 %v1625_v26 }
  0x94   : > { %1195 = vmatpush1.bf16.msra.mxu0 %v1623_v28 }
  0x95   : > { %1196 = vmatprep.subr.bf16.mxu0 %v1631_v29 }
  0x98   : > { %1197 = vmatpush1.bf16.msra.mxu0 %v1629_v30 }
  0x99   : > { %1198 = vmatprep.subr.bf16.mxu0 %v1637_v31 }
  0x9c   : > { %1199 = vmatpush1.bf16.msra.mxu0 %v1635_v32 }
  0x9d   : > { %1200 = vmatprep.subr.bf16.mxu0 %v1643_v33 }
  0xa0   : > { %1201 = vmatpush1.bf16.msra.mxu0 %v1641_v34 }
  0xa1   : > { %1202 = vmatprep.subr.bf16.mxu0 %v1649_v35 }
  0xa4   : > { %1203 = vmatpush1.bf16.msra.mxu0 %v1647_v36 }
  0xa7   : > { %1221 = vmatmul.mubr.bf16.vlgmr.msra.gmra.mrb[0].mxu0 %v1650_v37 }
 0x15c   : > { %v1136_v38 = vpop.f32.mrb[0].mxu1 }
 0x15d   : > { %v1138_v39 = vpop.f32.mrb[1].mxu1  ;;  %v1137_v49 = vadd.f32 %v1136_v38, %v669_v47 }
 0x15e   : > { %v1140_v40 = vpop.f32.mrb[2].mxu1  ;;  %v1139_v50 = vadd.f32 %v1138_v39, %v673_v48 }
 0x15f   : > { %v1142_v42 = vpop.f32.mrb[3].mxu1  ;;  %v1141_v52 = vadd.f32 %v1140_v40, %v669_v47 }
 0x160   : > { %v1143_v55 = vadd.f32 %v1142_v42, %v673_v48 }
 0x17a   : > { %v1222_v51 = vpop.f32.mrb[0].mxu0 }
 0x17b   : > { %v1470_v53 = vadd.f32 %v1222_v51, %v1137_v49  ;;  %v1224_v54 = vpop.f32.mrb[1].mxu0 }
 0x17c   : > { %v1472_v56 = vadd.f32 %v1224_v54, %v1139_v50  ;;  %v1226_v57 = vpop.f32.mrb[2].mxu0  ;;  %1245 = sbr.rel (!%p1747_p6) target bundleno = 395 (0x18b), region = 74 }
 0x17d   : > { %v1231_v58 = vmax.f32 %v1470_v53, 0.0  ;;  %v1474_v59 = vadd.f32 %v1226_v57, %v1141_v52  ;;  %v1228_v60 = vpop.f32.mrb[3].mxu0 }
 0x17e   : > { %v1232_v61 = vmax.f32 %v1472_v56, 0.0  ;;  %v1476_v62 = vadd.f32 %v1228_v60, %v1143_v55 }
 0x17f   : > { %1235 = vst [vmem:[%s561_s29] sm:$0xff] %v1231_v58  ;;  %v1233_v63 = vmax.f32 %v1474_v59, 0.0 }
 0x180   : > { %1236 = vst [vmem:[%s561_s29 + $0x8] sm:$0xff] %v1232_v61  ;;  %v1234_v0 = vmax.f32 %v1476_v62, 0.0 }
 0x181   : > { %1237 = vst [vmem:[%s561_s29 + $0x10] sm:$0xff] %v1233_v63 }
 0x182   : > { %1238 = vst [vmem:[%s561_s29 + $0x18] sm:$0xff] %v1234_v0 }
 0x186   : > { %v1264_v1 = vld [vmem:[%s561_s29] sm:$0xff] }
 0x187   : > { %v1266_v2 = vld [vmem:[%s561_s29 + $0x8] sm:$0xff]  ;;  %1265 = vst [vmem:[%s1251_s5] sm:$0xff] %v1264_v1 }
 0x188   : > { %v1268_v3 = vld [vmem:[%s561_s29 + $0x10] sm:$0xff]  ;;  %1267 = vst [vmem:[%s1251_s5 + $0x8] sm:$0xff] %v1266_v2 }
 0x189   : > { %v1270_v4 = vld [vmem:[%s561_s29 + $0x18] sm:$0xff]  ;;  %1269 = vst [vmem:[%s1251_s5 + $0xa0] sm:$0xff] %v1268_v3 }
 0x18a   : > { %1271 = vst [vmem:[%s1251_s5 + $0xa8] sm:$0xff] %v1270_v4 }
 0x18b PF: > { %s13_s16 = sadd.s32 1, %s1689_s16   ;;  %s2058_s12 = smov %s1677_s13 }
 0x18c   : > { %p10_p12 = scmp.ge.s32.totalorder %s13_s16, 12   ;;  %s2059_s13 = smov %s1752_s22 }
 0x18d   : > { %s2060_s14 = smov %s1685_s15  ;;  %s2061_s15 = smov %s2063_s17 }
 0x18e   :  { %12 = sbr.rel (!%p10_p12) target bundleno = 3 (0x3), region = 134 }

// kernel: det_forward.16
= control target key start
LH: loop header
LB: loop body
LE: loop exit
PB: predicated region body
PF: predicated region fallthrough
CT: control target
= control target key end

     0   :  { %s5164_s12 = smov 0   ;;  %s5166_s13 = smov 0   ;;  %s6270_s0 = inlined_call_operand.vmem [shape: bf16[16,2560], index: 0, kind: input, shape index: {}]   ;;  %s6271_s1 = inlined_call_operand.vmem [shape: bf16[2560,2560], index: 1, kind: input, shape index: {}]   ;;  %s6272_s2 = inlined_call_operand.vmem [shape: f32[1,2560], index: 2, kind: input, shape index: {}]   ;;  %s6273_s3 = inlined_call_operand.vmem [shape: f32[16,2560], index: 3, kind: output, shape index: {}]  }
   0x1   :  { %s5168_s14 = smov 0   ;;  %s5170_s15 = smov 0  }
   0x2   :  { %s5172_s16 = smov 0  }
   0x3 LB: > { %s22_s17 = sadd.s32 1, %s5138_s15  ;;  %s4155_s18 = sadd.s32 4294967295, %s5142_s16   ;;  %s5142_s16 = sphi %s5172_s16, %s13_s16   ;;  %s5138_s15 = sphi %s5170_s15, %s6278_s15   ;;  %s5134_s14 = sphi %s5168_s14, %s6277_s14   ;;  %s5130_s13 = sphi %s5166_s13, %s6276_s13   ;;  %s5126_s12 = sphi %s5164_s12, %s6275_s12  }
   0x4   : > { %p23_p0 = scmp.ge.s32.totalorder %s22_s17, 10  ;;  %p65_p1 = scmp.ne.s32.totalorder %s5130_s13, %s5126_s12 }
   0x5   : > { %p66_p2 = scmp.eq.s32.totalorder %s5142_s16, 0  ;;  %p123_p4 = scmp.eq.s32.totalorder %s4155_s18, 9 }
   0x6   : > { %s6280_s17 = smov (%p23_p0, %s22_s17), 0  ;;  %s58_s20 = sadd.s32 1, %s5130_s13 }
   0x7   : > { %p67_p3 = por %p66_p2, %p65_p1  ;;  %s55_s19 = ssub.s32 %s5138_s15, %s6280_s17 }
   0x8   : > { %p56_p5 = scmp.eq.s32.totalorder %s55_s19, 0  ;;  %p5199_p6 = por %p123_p4, %p65_p1 }
   0x9   : > { %p4159_p7 = scmp.ge.s32.totalorder %s5142_s16, 10 }
   0xa   : > { %s5204_s22 = scalar_select %p56_p5, %s5130_s13, %s58_s20  }
   0xb   : > { %155 = sbr.rel (%p4159_p7) target bundleno = 182 (0xb6), region = 20 }
  0x12   : > { %158 = sbr.rel (!%p67_p3) target bundleno = 182 (0xb6), region = 24  ;;  %s160_s23 = sand.u32 (%p67_p3), 1, %s5130_s13  }
  0x13   : > { %s4510_s24 = sshll.u32 (%p67_p3), %s5138_s15, 3  ;;  %s4552_s25 = smul.u32 (%p67_p3), 2560, %s160_s23 }
  0x14   : > { %s5212_s28 = scalar_lea.vmem (%p67_p3), %s6271_s1, %s4510_s24 }
  0x15   : > { %v831_v0 = vld [vmem:[%s5212_s28] sm:$0xff] (%p67_p3)  ;;  %v833_v1 = vld [vmem:[%s5212_s28 + $0x50] sm:$0xff] (%p67_p3)  ;;  %s5220_s29 = scalar_lea.vmem (%p67_p3), [#allocation2], %s4552_s25 }
  0x16   : > { %v835_v2 = vld [vmem:[%s5212_s28 + $0xa0] sm:$0xff] (%p67_p3)  ;;  %v837_v3 = vld [vmem:[%s5212_s28 + $0xf0] sm:$0xff] (%p67_p3)  ;;  %832 = vst [vmem:[%s5220_s29] sm:$0xff] (%p67_p3), %v831_v0  ;;  %834 = vst [vmem:[%s5220_s29 + $0x8] sm:$0xff] (%p67_p3), %v833_v1 }
  0x17   : > { %v839_v4 = vld [vmem:[%s5212_s28 + $0x140] sm:$0xff] (%p67_p3)  ;;  %v841_v5 = vld [vmem:[%s5212_s28 + $0x190] sm:$0xff] (%p67_p3)  ;;  %836 = vst [vmem:[%s5220_s29 + $0x10] sm:$0xff] (%p67_p3), %v835_v2  ;;  %838 = vst [vmem:[%s5220_s29 + $0x18] sm:$0xff] (%p67_p3), %v837_v3 }
  0x18   : > { %840 = vst [vmem:[%s5220_s29 + $0x20] sm:$0xff] (%p67_p3), %v839_v4  ;;  %842 = vst [vmem:[%s5220_s29 + $0x28] sm:$0xff] (%p67_p3), %v841_v5  ;;  %v843_v6 = vld [vmem:[%s5212_s28 + $0x1e0] sm:$0xff] (%p67_p3)  ;;  %v845_v7 = vld [vmem:[%s5212_s28 + $0x230] sm:$0xff] (%p67_p3) }
  0x19   : > { %v847_v8 = vld [vmem:[%s5212_s28 + $0x280] sm:$0xff]  ;;  %844 = vst [vmem:[%s5220_s29 + $0x30] sm:$0xff] %v843_v6  ;;  %846 = vst [vmem:[%s5220_s29 + $0x38] sm:$0xff] %v845_v7  ;;  %v849_v9 = vld [vmem:[%s5212_s28 + $0x2d0] sm:$0xff] }
  0x1a   : > { %848 = vst [vmem:[%s5220_s29 + $0x40] sm:$0xff] %v847_v8  ;;  %v851_v10 = vld [vmem:[%s5212_s28 + $0x320] sm:$0xff]  ;;  %v853_v11 = vld [vmem:[%s5212_s28 + $0x370] sm:$0xff]  ;;  %850 = vst [vmem:[%s5220_s29 + $0x48] sm:$0xff] %v849_v9 }
  0x1b   : > { %852 = vst [vmem:[%s5220_s29 + $0x50] sm:$0xff] %v851_v10  ;;  %854 = vst [vmem:[%s5220_s29 + $0x58] sm:$0xff] %v853_v11  ;;  %v855_v12 = vld [vmem:[%s5212_s28 + $0x3c0] sm:$0xff]  ;;  %v857_v13 = vld [vmem:[%s5212_s28 + $0x410] sm:$0xff] }
  0x1c   : > { %v859_v14 = vld [vmem:[%s5212_s28 + $0x460] sm:$0xff]  ;;  %856 = vst [vmem:[%s5220_s29 + $0x60] sm:$0xff] %v855_v12  ;;  %858 = vst [vmem:[%s5220_s29 + $0x68] sm:$0xff] %v857_v13  ;;  %v861_v15 = vld [vmem:[%s5212_s28 + $0x4b0] sm:$0xff] }
  0x1d   : > { %860 = vst [vmem:[%s5220_s29 + $0x70] sm:$0xff] %v859_v14  ;;  %v863_v16 = vld [vmem:[%s5212_s28 + $0x500] sm:$0xff]  ;;  %v865_v17 = vld [vmem:[%s5212_s28 + $0x550] sm:$0xff]  ;;  %862 = vst [vmem:[%s5220_s29 + $0x78] sm:$0xff] %v861_v15 }
  0x1e   : > { %864 = vst [vmem:[%s5220_s29 + $0x80] sm:$0xff] %v863_v16  ;;  %866 = vst [vmem:[%s5220_s29 + $0x88] sm:$0xff] %v865_v17  ;;  %v867_v18 = vld [vmem:[%s5212_s28 + $0x5a0] sm:$0xff]  ;;  %v869_v19 = vld [vmem:[%s5212_s28 + $0x5f0] sm:$0xff] }
  0x1f   : > { %v871_v20 = vld [vmem:[%s5212_s28 + $0x640] sm:$0xff]  ;;  %868 = vst [vmem:[%s5220_s29 + $0x90] sm:$0xff] %v867_v18  ;;  %870 = vst [vmem:[%s5220_s29 + $0x98] sm:$0xff] %v869_v19  ;;  %v873_v21 = vld [vmem:[%s5212_s28 + $0x690] sm:$0xff] }
  0x20   : > { %872 = vst [vmem:[%s5220_s29 + $0xa0] sm:$0xff] %v871_v20  ;;  %v875_v22 = vld [vmem:[%s5212_s28 + $0x6e0] sm:$0xff]  ;;  %v877_v23 = vld [vmem:[%s5212_s28 + $0x730] sm:$0xff]  ;;  %874 = vst [vmem:[%s5220_s29 + $0xa8] sm:$0xff] %v873_v21 }
  0x21   : > { %876 = vst [vmem:[%s5220_s29 + $0xb0] sm:$0xff] %v875_v22  ;;  %878 = vst [vmem:[%s5220_s29 + $0xb8] sm:$0xff] %v877_v23  ;;  %v879_v24 = vld [vmem:[%s5212_s28 + $0x780] sm:$0xff]  ;;  %v881_v25 = vld [vmem:[%s5212_s28 + $0x7d0] sm:$0xff] }
  0x22   : > { %v883_v26 = vld [vmem:[%s5212_s28 + $0x820] sm:$0xff]  ;;  %880 = vst [vmem:[%s5220_s29 + $0xc0] sm:$0xff] %v879_v24  ;;  %882 = vst [vmem:[%s5220_s29 + $0xc8] sm:$0xff] %v881_v25  ;;  %v885_v27 = vld [vmem:[%s5212_s28 + $0x870] sm:$0xff] }
  0x23   : > { %884 = vst [vmem:[%s5220_s29 + $0xd0] sm:$0xff] %v883_v26  ;;  %v887_v28 = vld [vmem:[%s5212_s28 + $0x8c0] sm:$0xff]  ;;  %v889_v29 = vld [vmem:[%s5212_s28 + $0x910] sm:$0xff]  ;;  %886 = vst [vmem:[%s5220_s29 + $0xd8] sm:$0xff] %v885_v27 }
  0x24   : > { %888 = vst [vmem:[%s5220_s29 + $0xe0] sm:$0xff] %v887_v28  ;;  %890 = vst [vmem:[%s5220_s29 + $0xe8] sm:$0xff] %v889_v29  ;;  %v891_v30 = vld [vmem:[%s5212_s28 + $0x960] sm:$0xff]  ;;  %v893_v31 = vld [vmem:[%s5212_s28 + $0x9b0] sm:$0xff] }
  0x25   : > { %v895_v32 = vld [vmem:[%s5212_s28 + $0xa00] sm:$0xff]  ;;  %892 = vst [vmem:[%s5220_s29 + $0xf0] sm:$0xff] %v891_v30  ;;  %894 = vst [vmem:[%s5220_s29 + $0xf8] sm:$0xff] %v893_v31  ;;  %v897_v33 = vld [vmem:[%s5212_s28 + $0xa50] sm:$0xff] }
  0x26   : > { %896 = vst [vmem:[%s5220_s29 + $0x100] sm:$0xff] %v895_v32  ;;  %v899_v34 = vld [vmem:[%s5212_s28 + $0xaa0] sm:$0xff]  ;;  %v901_v35 = vld [vmem:[%s5212_s28 + $0xaf0] sm:$0xff]  ;;  %898 = vst [vmem:[%s5220_s29 + $0x108] sm:$0xff] %v897_v33 }
  0x27   : > { %900 = vst [vmem:[%s5220_s29 + $0x110] sm:$0xff] %v899_v34  ;;  %902 = vst [vmem:[%s5220_s29 + $0x118] sm:$0xff] %v901_v35  ;;  %v903_v36 = vld [vmem:[%s5212_s28 + $0xb40] sm:$0xff]  ;;  %v905_v37 = vld [vmem:[%s5212_s28 + $0xb90] sm:$0xff] }
  0x28   : > { %v907_v38 = vld [vmem:[%s5212_s28 + $0xbe0] sm:$0xff]  ;;  %904 = vst [vmem:[%s5220_s29 + $0x120] sm:$0xff] %v903_v36  ;;  %906 = vst [vmem:[%s5220_s29 + $0x128] sm:$0xff] %v905_v37  ;;  %v909_v39 = vld [vmem:[%s5212_s28 + $0xc30] sm:$0xff] }
  0x29   : > { %908 = vst [vmem:[%s5220_s29 + $0x130] sm:$0xff] %v907_v38  ;;  %v911_v40 = vld [vmem:[%s5212_s28 + $0xc80] sm:$0xff]  ;;  %v913_v41 = vld [vmem:[%s5212_s28 + $0xcd0] sm:$0xff]  ;;  %910 = vst [vmem:[%s5220_s29 + $0x138] sm:$0xff] %v909_v39 }
  0x2a   : > { %912 = vst [vmem:[%s5220_s29 + $0x140] sm:$0xff] %v911_v40  ;;  %914 = vst [vmem:[%s5220_s29 + $0x148] sm:$0xff] %v913_v41  ;;  %v915_v42 = vld [vmem:[%s5212_s28 + $0xd20] sm:$0xff]  ;;  %v917_v43 = vld [vmem:[%s5212_s28 + $0xd70] sm:$0xff] }
  0x2b   : > { %v919_v44 = vld [vmem:[%s5212_s28 + $0xdc0] sm:$0xff]  ;;  %916 = vst [vmem:[%s5220_s29 + $0x150] sm:$0xff] %v915_v42  ;;  %918 = vst [vmem:[%s5220_s29 + $0x158] sm:$0xff] %v917_v43  ;;  %v921_v45 = vld [vmem:[%s5212_s28 + $0xe10] sm:$0xff] }
  0x2c   : > { %920 = vst [vmem:[%s5220_s29 + $0x160] sm:$0xff] %v919_v44  ;;  %v923_v46 = vld [vmem:[%s5212_s28 + $0xe60] sm:$0xff]  ;;  %v925_v47 = vld [vmem:[%s5212_s28 + $0xeb0] sm:$0xff]  ;;  %922 = vst [vmem:[%s5220_s29 + $0x168] sm:$0xff] %v921_v45 }
  0x2d   : > { %924 = vst [vmem:[%s5220_s29 + $0x170] sm:$0xff] %v923_v46  ;;  %926 = vst [vmem:[%s5220_s29 + $0x178] sm:$0xff] %v925_v47  ;;  %v927_v48 = vld [vmem:[%s5212_s28 + $0xf00] sm:$0xff]  ;;  %v929_v49 = vld [vmem:[%s5212_s28 + $0xf50] sm:$0xff] }
  0x2e   : > { %v931_v50 = vld [vmem:[%s5212_s28 + $0xfa0] sm:$0xff]  ;;  %928 = vst [vmem:[%s5220_s29 + $0x180] sm:$0xff] %v927_v48  ;;  %930 = vst [vmem:[%s5220_s29 + $0x188] sm:$0xff] %v929_v49  ;;  %v933_v51 = vld [vmem:[%s5212_s28 + $0xff0] sm:$0xff] }
  0x2f   : > { %932 = vst [vmem:[%s5220_s29 + $0x190] sm:$0xff] %v931_v50  ;;  %v935_v52 = vld [vmem:[%s5212_s28 + $0x1040] sm:$0xff]  ;;  %v937_v53 = vld [vmem:[%s5212_s28 + $0x1090] sm:$0xff]  ;;  %934 = vst [vmem:[%s5220_s29 + $0x198] sm:$0xff] %v933_v51 }
  0x30   : > { %936 = vst [vmem:[%s5220_s29 + $0x1a0] sm:$0xff] %v935_v52  ;;  %938 = vst [vmem:[%s5220_s29 + $0x1a8] sm:$0xff] %v937_v53  ;;  %v939_v54 = vld [vmem:[%s5212_s28 + $0x10e0] sm:$0xff]  ;;  %v941_v55 = vld [vmem:[%s5212_s28 + $0x1130] sm:$0xff] }
  0x31   : > { %v943_v56 = vld [vmem:[%s5212_s28 + $0x1180] sm:$0xff]  ;;  %940 = vst [vmem:[%s5220_s29 + $0x1b0] sm:$0xff] %v939_v54  ;;  %942 = vst [vmem:[%s5220_s29 + $0x1b8] sm:$0xff] %v941_v55  ;;  %v945_v57 = vld [vmem:[%s5212_s28 + $0x11d0] sm:$0xff] }
  0x32   : > { %944 = vst [vmem:[%s5220_s29 + $0x1c0] sm:$0xff] %v943_v56  ;;  %v947_v58 = vld [vmem:[%s5212_s28 + $0x1220] sm:$0xff]  ;;  %v949_v59 = vld [vmem:[%s5212_s28 + $0x1270] sm:$0xff]  ;;  %946 = vst [vmem:[%s5220_s29 + $0x1c8] sm:$0xff] %v945_v57 }
  0x33   : > { %948 = vst [vmem:[%s5220_s29 + $0x1d0] sm:$0xff] %v947_v58  ;;  %950 = vst [vmem:[%s5220_s29 + $0x1d8] sm:$0xff] %v949_v59  ;;  %v951_v60 = vld [vmem:[%s5212_s28 + $0x12c0] sm:$0xff]  ;;  %v953_v61 = vld [vmem:[%s5212_s28 + $0x1310] sm:$0xff] }
  0x34   : > { %v955_v62 = vld [vmem:[%s5212_s28 + $0x1360] sm:$0xff]  ;;  %952 = vst [vmem:[%s5220_s29 + $0x1e0] sm:$0xff] %v951_v60  ;;  %954 = vst [vmem:[%s5220_s29 + $0x1e8] sm:$0xff] %v953_v61  ;;  %v957_v63 = vld [vmem:[%s5212_s28 + $0x13b0] sm:$0xff] }
  0x35   : > { %956 = vst [vmem:[%s5220_s29 + $0x1f0] sm:$0xff] %v955_v62  ;;  %v959_v0 = vld [vmem:[%s5212_s28 + $0x1400] sm:$0xff]  ;;  %v961_v1 = vld [vmem:[%s5212_s28 + $0x1450] sm:$0xff]  ;;  %958 = vst [vmem:[%s5220_s29 + $0x1f8] sm:$0xff] %v957_v63 }
  0x36   : > { %960 = vst [vmem:[%s5220_s29 + $0x200] sm:$0xff] %v959_v0  ;;  %962 = vst [vmem:[%s5220_s29 + $0x208] sm:$0xff] %v961_v1  ;;  %v963_v2 = vld [vmem:[%s5212_s28 + $0x14a0] sm:$0xff]  ;;  %v965_v3 = vld [vmem:[%s5212_s28 + $0x14f0] sm:$0xff] }
  0x37   : > { %v967_v4 = vld [vmem:[%s5212_s28 + $0x1540] sm:$0xff]  ;;  %964 = vst [vmem:[%s5220_s29 + $0x210] sm:$0xff] %v963_v2  ;;  %966 = vst [vmem:[%s5220_s29 + $0x218] sm:$0xff] %v965_v3  ;;  %v969_v5 = vld [vmem:[%s5212_s28 + $0x1590] sm:$0xff] }
  0x38   : > { %968 = vst [vmem:[%s5220_s29 + $0x220] sm:$0xff] %v967_v4  ;;  %v971_v6 = vld [vmem:[%s5212_s28 + $0x15e0] sm:$0xff]  ;;  %v973_v7 = vld [vmem:[%s5212_s28 + $0x1630] sm:$0xff]  ;;  %970 = vst [vmem:[%s5220_s29 + $0x228] sm:$0xff] %v969_v5 }
  0x39   : > { %972 = vst [vmem:[%s5220_s29 + $0x230] sm:$0xff] %v971_v6  ;;  %974 = vst [vmem:[%s5220_s29 + $0x238] sm:$0xff] %v973_v7  ;;  %v975_v8 = vld [vmem:[%s5212_s28 + $0x1680] sm:$0xff]  ;;  %v977_v9 = vld [vmem:[%s5212_s28 + $0x16d0] sm:$0xff] }
  0x3a   : > { %v979_v10 = vld [vmem:[%s5212_s28 + $0x1720] sm:$0xff]  ;;  %976 = vst [vmem:[%s5220_s29 + $0x240] sm:$0xff] %v975_v8  ;;  %978 = vst [vmem:[%s5220_s29 + $0x248] sm:$0xff] %v977_v9  ;;  %v981_v11 = vld [vmem:[%s5212_s28 + $0x1770] sm:$0xff] }
  0x3b   : > { %980 = vst [vmem:[%s5220_s29 + $0x250] sm:$0xff] %v979_v10  ;;  %v983_v12 = vld [vmem:[%s5212_s28 + $0x17c0] sm:$0xff]  ;;  %v985_v13 = vld [vmem:[%s5212_s28 + $0x1810] sm:$0xff]  ;;  %982 = vst [vmem:[%s5220_s29 + $0x258] sm:$0xff] %v981_v11 }
  0x3c   : > { %984 = vst [vmem:[%s5220_s29 + $0x260] sm:$0xff] %v983_v12  ;;  %986 = vst [vmem:[%s5220_s29 + $0x268] sm:$0xff] %v985_v13  ;;  %v987_v14 = vld [vmem:[%s5212_s28 + $0x1860] sm:$0xff]  ;;  %v989_v15 = vld [vmem:[%s5212_s28 + $0x18b0] sm:$0xff] }
  0x3d   : > { %v991_v16 = vld [vmem:[%s5212_s28 + $0x1900] sm:$0xff]  ;;  %988 = vst [vmem:[%s5220_s29 + $0x270] sm:$0xff] %v987_v14  ;;  %990 = vst [vmem:[%s5220_s29 + $0x278] sm:$0xff] %v989_v15  ;;  %v993_v17 = vld [vmem:[%s5212_s28 + $0x1950] sm:$0xff] }
  0x3e   : > { %992 = vst [vmem:[%s5220_s29 + $0x280] sm:$0xff] %v991_v16  ;;  %v995_v18 = vld [vmem:[%s5212_s28 + $0x19a0] sm:$0xff]  ;;  %v997_v19 = vld [vmem:[%s5212_s28 + $0x19f0] sm:$0xff]  ;;  %994 = vst [vmem:[%s5220_s29 + $0x288] sm:$0xff] %v993_v17 }
  0x3f   : > { %996 = vst [vmem:[%s5220_s29 + $0x290] sm:$0xff] %v995_v18  ;;  %998 = vst [vmem:[%s5220_s29 + $0x298] sm:$0xff] %v997_v19  ;;  %v999_v20 = vld [vmem:[%s5212_s28 + $0x1a40] sm:$0xff]  ;;  %v1001_v21 = vld [vmem:[%s5212_s28 + $0x1a90] sm:$0xff] }
  0x40   : > { %v1003_v22 = vld [vmem:[%s5212_s28 + $0x1ae0] sm:$0xff]  ;;  %1000 = vst [vmem:[%s5220_s29 + $0x2a0] sm:$0xff] %v999_v20  ;;  %1002 = vst [vmem:[%s5220_s29 + $0x2a8] sm:$0xff] %v1001_v21  ;;  %v1005_v23 = vld [vmem:[%s5212_s28 + $0x1b30] sm:$0xff] }
  0x41   : > { %1004 = vst [vmem:[%s5220_s29 + $0x2b0] sm:$0xff] %v1003_v22  ;;  %v1007_v24 = vld [vmem:[%s5212_s28 + $0x1b80] sm:$0xff]  ;;  %v1009_v25 = vld [vmem:[%s5212_s28 + $0x1bd0] sm:$0xff]  ;;  %1006 = vst [vmem:[%s5220_s29 + $0x2b8] sm:$0xff] %v1005_v23 }
  0x42   : > { %1008 = vst [vmem:[%s5220_s29 + $0x2c0] sm:$0xff] %v1007_v24  ;;  %1010 = vst [vmem:[%s5220_s29 + $0x2c8] sm:$0xff] %v1009_v25  ;;  %v1011_v26 = vld [vmem:[%s5212_s28 + $0x1c20] sm:$0xff]  ;;  %v1013_v27 = vld [vmem:[%s5212_s28 + $0x1c70] sm:$0xff] }
  0x43   : > { %v1015_v28 = vld [vmem:[%s5212_s28 + $0x1cc0] sm:$0xff]  ;;  %1012 = vst [vmem:[%s5220_s29 + $0x2d0] sm:$0xff] %v1011_v26  ;;  %1014 = vst [vmem:[%s5220_s29 + $0x2d8] sm:$0xff] %v1013_v27  ;;  %v1017_v29 = vld [vmem:[%s5212_s28 + $0x1d10] sm:$0xff] }
  0x44   : > { %1016 = vst [vmem:[%s5220_s29 + $0x2e0] sm:$0xff] %v1015_v28  ;;  %v1019_v30 = vld [vmem:[%s5212_s28 + $0x1d60] sm:$0xff]  ;;  %v1021_v31 = vld [vmem:[%s5212_s28 + $0x1db0] sm:$0xff]  ;;  %1018 = vst [vmem:[%s5220_s29 + $0x2e8] sm:$0xff] %v1017_v29 }
  0x45   : > { %1020 = vst [vmem:[%s5220_s29 + $0x2f0] sm:$0xff] %v1019_v30  ;;  %1022 = vst [vmem:[%s5220_s29 + $0x2f8] sm:$0xff] %v1021_v31  ;;  %v1023_v32 = vld [vmem:[%s5212_s28 + $0x1e00] sm:$0xff]  ;;  %v1025_v33 = vld [vmem:[%s5212_s28 + $0x1e50] sm:$0xff] }
  0x46   : > { %v1027_v34 = vld [vmem:[%s5212_s28 + $0x1ea0] sm:$0xff]  ;;  %1024 = vst [vmem:[%s5220_s29 + $0x300] sm:$0xff] %v1023_v32  ;;  %1026 = vst [vmem:[%s5220_s29 + $0x308] sm:$0xff] %v1025_v33  ;;  %v1029_v35 = vld [vmem:[%s5212_s28 + $0x1ef0] sm:$0xff] }
  0x47   : > { %1028 = vst [vmem:[%s5220_s29 + $0x310] sm:$0xff] %v1027_v34  ;;  %v1031_v36 = vld [vmem:[%s5212_s28 + $0x1f40] sm:$0xff]  ;;  %v1033_v37 = vld [vmem:[%s5212_s28 + $0x1f90] sm:$0xff]  ;;  %1030 = vst [vmem:[%s5220_s29 + $0x318] sm:$0xff] %v1029_v35 }
  0x48   : > { %1032 = vst [vmem:[%s5220_s29 + $0x320] sm:$0xff] %v1031_v36  ;;  %1034 = vst [vmem:[%s5220_s29 + $0x328] sm:$0xff] %v1033_v37  ;;  %v1035_v38 = vld [vmem:[%s5212_s28 + $0x1fe0] sm:$0xff]  ;;  %v1037_v39 = vld [vmem:[%s5212_s28 + $0x2030] sm:$0xff] }
  0x49   : > { %v1039_v40 = vld [vmem:[%s5212_s28 + $0x2080] sm:$0xff]  ;;  %1036 = vst [vmem:[%s5220_s29 + $0x330] sm:$0xff] %v1035_v38  ;;  %1038 = vst [vmem:[%s5220_s29 + $0x338] sm:$0xff] %v1037_v39  ;;  %v1041_v41 = vld [vmem:[%s5212_s28 + $0x20d0] sm:$0xff] }
  0x4a   : > { %1040 = vst [vmem:[%s5220_s29 + $0x340] sm:$0xff] %v1039_v40  ;;  %v1043_v42 = vld [vmem:[%s5212_s28 + $0x2120] sm:$0xff]  ;;  %v1045_v43 = vld [vmem:[%s5212_s28 + $0x2170] sm:$0xff]  ;;  %1042 = vst [vmem:[%s5220_s29 + $0x348] sm:$0xff] %v1041_v41 }
  0x4b   : > { %1044 = vst [vmem:[%s5220_s29 + $0x350] sm:$0xff] %v1043_v42  ;;  %1046 = vst [vmem:[%s5220_s29 + $0x358] sm:$0xff] %v1045_v43  ;;  %v1047_v44 = vld [vmem:[%s5212_s28 + $0x21c0] sm:$0xff]  ;;  %v1049_v45 = vld [vmem:[%s5212_s28 + $0x2210] sm:$0xff] }
  0x4c   : > { %v1051_v46 = vld [vmem:[%s5212_s28 + $0x2260] sm:$0xff]  ;;  %1048 = vst [vmem:[%s5220_s29 + $0x360] sm:$0xff] %v1047_v44  ;;  %1050 = vst [vmem:[%s5220_s29 + $0x368] sm:$0xff] %v1049_v45  ;;  %v1053_v47 = vld [vmem:[%s5212_s28 + $0x22b0] sm:$0xff] }
  0x4d   : > { %1052 = vst [vmem:[%s5220_s29 + $0x370] sm:$0xff] %v1051_v46  ;;  %v1055_v48 = vld [vmem:[%s5212_s28 + $0x2300] sm:$0xff]  ;;  %v1057_v49 = vld [vmem:[%s5212_s28 + $0x2350] sm:$0xff]  ;;  %1054 = vst [vmem:[%s5220_s29 + $0x378] sm:$0xff] %v1053_v47 }
  0x4e   : > { %1056 = vst [vmem:[%s5220_s29 + $0x380] sm:$0xff] %v1055_v48  ;;  %1058 = vst [vmem:[%s5220_s29 + $0x388] sm:$0xff] %v1057_v49  ;;  %v1059_v50 = vld [vmem:[%s5212_s28 + $0x23a0] sm:$0xff]  ;;  %v1061_v51 = vld [vmem:[%s5212_s28 + $0x23f0] sm:$0xff] }
  0x4f   : > { %v1063_v52 = vld [vmem:[%s5212_s28 + $0x2440] sm:$0xff]  ;;  %1060 = vst [vmem:[%s5220_s29 + $0x390] sm:$0xff] %v1059_v50  ;;  %1062 = vst [vmem:[%s5220_s29 + $0x398] sm:$0xff] %v1061_v51  ;;  %v1065_v53 = vld [vmem:[%s5212_s28 + $0x2490] sm:$0xff] }
  0x50   : > { %1064 = vst [vmem:[%s5220_s29 + $0x3a0] sm:$0xff] %v1063_v52  ;;  %v1067_v54 = vld [vmem:[%s5212_s28 + $0x24e0] sm:$0xff]  ;;  %v1069_v55 = vld [vmem:[%s5212_s28 + $0x2530] sm:$0xff]  ;;  %1066 = vst [vmem:[%s5220_s29 + $0x3a8] sm:$0xff] %v1065_v53 }
  0x51   : > { %1068 = vst [vmem:[%s5220_s29 + $0x3b0] sm:$0xff] %v1067_v54  ;;  %1070 = vst [vmem:[%s5220_s29 + $0x3b8] sm:$0xff] %v1069_v55  ;;  %v1071_v56 = vld [vmem:[%s5212_s28 + $0x2580] sm:$0xff]  ;;  %v1073_v57 = vld [vmem:[%s5212_s28 + $0x25d0] sm:$0xff] }
  0x52   : > { %v1075_v58 = vld [vmem:[%s5212_s28 + $0x2620] sm:$0xff]  ;;  %1072 = vst [vmem:[%s5220_s29 + $0x3c0] sm:$0xff] %v1071_v56  ;;  %1074 = vst [vmem:[%s5220_s29 + $0x3c8] sm:$0xff] %v1073_v57  ;;  %v1077_v59 = vld [vmem:[%s5212_s28 + $0x2670] sm:$0xff] }
  0x53   : > { %1076 = vst [vmem:[%s5220_s29 + $0x3d0] sm:$0xff] %v1075_v58  ;;  %v1079_v60 = vld [vmem:[%s5212_s28 + $0x26c0] sm:$0xff]  ;;  %v1081_v61 = vld [vmem:[%s5212_s28 + $0x2710] sm:$0xff]  ;;  %1078 = vst [vmem:[%s5220_s29 + $0x3d8] sm:$0xff] %v1077_v59 }
  0x54   : > { %1080 = vst [vmem:[%s5220_s29 + $0x3e0] sm:$0xff] %v1079_v60  ;;  %1082 = vst [vmem:[%s5220_s29 + $0x3e8] sm:$0xff] %v1081_v61  ;;  %v1083_v62 = vld [vmem:[%s5212_s28 + $0x2760] sm:$0xff]  ;;  %v1085_v63 = vld [vmem:[%s5212_s28 + $0x27b0] sm:$0xff] }
  0x55   : > { %v1087_v0 = vld [vmem:[%s5212_s28 + $0x2800] sm:$0xff]  ;;  %1084 = vst [vmem:[%s5220_s29 + $0x3f0] sm:$0xff] %v1083_v62  ;;  %1086 = vst [vmem:[%s5220_s29 + $0x3f8] sm:$0xff] %v1085_v63  ;;  %v1089_v1 = vld [vmem:[%s5212_s28 + $0x2850] sm:$0xff] }
  0x56   : > { %1088 = vst [vmem:[%s5220_s29 + $0x400] sm:$0xff] %v1087_v0  ;;  %v1091_v2 = vld [vmem:[%s5212_s28 + $0x28a0] sm:$0xff]  ;;  %v1093_v3 = vld [vmem:[%s5212_s28 + $0x28f0] sm:$0xff]  ;;  %1090 = vst [vmem:[%s5220_s29 + $0x408] sm:$0xff] %v1089_v1 }
  0x57   : > { %1092 = vst [vmem:[%s5220_s29 + $0x410] sm:$0xff] %v1091_v2  ;;  %1094 = vst [vmem:[%s5220_s29 + $0x418] sm:$0xff] %v1093_v3  ;;  %v1095_v4 = vld [vmem:[%s5212_s28 + $0x2940] sm:$0xff]  ;;  %v1097_v5 = vld [vmem:[%s5212_s28 + $0x2990] sm:$0xff] }
  0x58   : > { %v1099_v6 = vld [vmem:[%s5212_s28 + $0x29e0] sm:$0xff]  ;;  %1096 = vst [vmem:[%s5220_s29 + $0x420] sm:$0xff] %v1095_v4  ;;  %1098 = vst [vmem:[%s5220_s29 + $0x428] sm:$0xff] %v1097_v5  ;;  %v1101_v7 = vld [vmem:[%s5212_s28 + $0x2a30] sm:$0xff] }
  0x59   : > { %1100 = vst [vmem:[%s5220_s29 + $0x430] sm:$0xff] %v1099_v6  ;;  %v1103_v8 = vld [vmem:[%s5212_s28 + $0x2a80] sm:$0xff]  ;;  %v1105_v9 = vld [vmem:[%s5212_s28 + $0x2ad0] sm:$0xff]  ;;  %1102 = vst [vmem:[%s5220_s29 + $0x438] sm:$0xff] %v1101_v7 }
  0x5a   : > { %1104 = vst [vmem:[%s5220_s29 + $0x440] sm:$0xff] %v1103_v8  ;;  %1106 = vst [vmem:[%s5220_s29 + $0x448] sm:$0xff] %v1105_v9  ;;  %v1107_v10 = vld [vmem:[%s5212_s28 + $0x2b20] sm:$0xff]  ;;  %v1109_v11 = vld [vmem:[%s5212_s28 + $0x2b70] sm:$0xff] }
  0x5b   : > { %v1111_v12 = vld [vmem:[%s5212_s28 + $0x2bc0] sm:$0xff]  ;;  %1108 = vst [vmem:[%s5220_s29 + $0x450] sm:$0xff] %v1107_v10  ;;  %1110 = vst [vmem:[%s5220_s29 + $0x458] sm:$0xff] %v1109_v11  ;;  %v1113_v13 = vld [vmem:[%s5212_s28 + $0x2c10] sm:$0xff] }
  0x5c   : > { %1112 = vst [vmem:[%s5220_s29 + $0x460] sm:$0xff] %v1111_v12  ;;  %v1115_v14 = vld [vmem:[%s5212_s28 + $0x2c60] sm:$0xff]  ;;  %v1117_v15 = vld [vmem:[%s5212_s28 + $0x2cb0] sm:$0xff]  ;;  %1114 = vst [vmem:[%s5220_s29 + $0x468] sm:$0xff] %v1113_v13 }
  0x5d   : > { %1116 = vst [vmem:[%s5220_s29 + $0x470] sm:$0xff] %v1115_v14  ;;  %1118 = vst [vmem:[%s5220_s29 + $0x478] sm:$0xff] %v1117_v15  ;;  %v1119_v16 = vld [vmem:[%s5212_s28 + $0x2d00] sm:$0xff]  ;;  %v1121_v17 = vld [vmem:[%s5212_s28 + $0x2d50] sm:$0xff] }
  0x5e   : > { %v1123_v18 = vld [vmem:[%s5212_s28 + $0x2da0] sm:$0xff]  ;;  %1120 = vst [vmem:[%s5220_s29 + $0x480] sm:$0xff] %v1119_v16  ;;  %1122 = vst [vmem:[%s5220_s29 + $0x488] sm:$0xff] %v1121_v17  ;;  %v1125_v19 = vld [vmem:[%s5212_s28 + $0x2df0] sm:$0xff] }
  0x5f   : > { %1124 = vst [vmem:[%s5220_s29 + $0x490] sm:$0xff] %v1123_v18  ;;  %v1127_v20 = vld [vmem:[%s5212_s28 + $0x2e40] sm:$0xff]  ;;  %v1129_v21 = vld [vmem:[%s5212_s28 + $0x2e90] sm:$0xff]  ;;  %1126 = vst [vmem:[%s5220_s29 + $0x498] sm:$0xff] %v1125_v19 }
  0x60   : > { %1128 = vst [vmem:[%s5220_s29 + $0x4a0] sm:$0xff] %v1127_v20  ;;  %1130 = vst [vmem:[%s5220_s29 + $0x4a8] sm:$0xff] %v1129_v21  ;;  %v1131_v22 = vld [vmem:[%s5212_s28 + $0x2ee0] sm:$0xff]  ;;  %v1133_v23 = vld [vmem:[%s5212_s28 + $0x2f30] sm:$0xff] }
  0x61   : > { %v1135_v24 = vld [vmem:[%s5212_s28 + $0x2f80] sm:$0xff]  ;;  %1132 = vst [vmem:[%s5220_s29 + $0x4b0] sm:$0xff] %v1131_v22  ;;  %1134 = vst [vmem:[%s5220_s29 + $0x4b8] sm:$0xff] %v1133_v23  ;;  %v1137_v25 = vld [vmem:[%s5212_s28 + $0x2fd0] sm:$0xff] }
  0x62   : > { %1136 = vst [vmem:[%s5220_s29 + $0x4c0] sm:$0xff] %v1135_v24  ;;  %v1139_v26 = vld [vmem:[%s5212_s28 + $0x3020] sm:$0xff]  ;;  %v1141_v27 = vld [vmem:[%s5212_s28 + $0x3070] sm:$0xff]  ;;  %1138 = vst [vmem:[%s5220_s29 + $0x4c8] sm:$0xff] %v1137_v25 }
  0x63   : > { %1140 = vst [vmem:[%s5220_s29 + $0x4d0] sm:$0xff] %v1139_v26  ;;  %1142 = vst [vmem:[%s5220_s29 + $0x4d8] sm:$0xff] %v1141_v27  ;;  %v1143_v28 = vld [vmem:[%s5212_s28 + $0x30c0] sm:$0xff]  ;;  %v1145_v29 = vld [vmem:[%s5212_s28 + $0x3110] sm:$0xff] }
  0x64   : > { %v1147_v30 = vld [vmem:[%s5212_s28 + $0x3160] sm:$0xff]  ;;  %1144 = vst [vmem:[%s5220_s29 + $0x4e0] sm:$0xff] %v1143_v28  ;;  %1146 = vst [vmem:[%s5220_s29 + $0x4e8] sm:$0xff] %v1145_v29  ;;  %v1149_v31 = vld [vmem:[%s5212_s28 + $0x31b0] sm:$0xff] }
  0x65   : > { %1148 = vst [vmem:[%s5220_s29 + $0x4f0] sm:$0xff] %v1147_v30  ;;  %v1151_v32 = vld [vmem:[%s5212_s28 + $0x3200] sm:$0xff]  ;;  %v1153_v33 = vld [vmem:[%s5212_s28 + $0x3250] sm:$0xff]  ;;  %1150 = vst [vmem:[%s5220_s29 + $0x4f8] sm:$0xff] %v1149_v31 }
  0x66   : > { %1152 = vst [vmem:[%s5220_s29 + $0x500] sm:$0xff] %v1151_v32  ;;  %1154 = vst [vmem:[%s5220_s29 + $0x508] sm:$0xff] %v1153_v33  ;;  %v1155_v34 = vld [vmem:[%s5212_s28 + $0x32a0] sm:$0xff]  ;;  %v1157_v35 = vld [vmem:[%s5212_s28 + $0x32f0] sm:$0xff] }
  0x67   : > { %v1159_v36 = vld [vmem:[%s5212_s28 + $0x3340] sm:$0xff]  ;;  %1156 = vst [vmem:[%s5220_s29 + $0x510] sm:$0xff] %v1155_v34  ;;  %1158 = vst [vmem:[%s5220_s29 + $0x518] sm:$0xff] %v1157_v35  ;;  %v1161_v37 = vld [vmem:[%s5212_s28 + $0x3390] sm:$0xff] }
  0x68   : > { %1160 = vst [vmem:[%s5220_s29 + $0x520] sm:$0xff] %v1159_v36  ;;  %v1163_v38 = vld [vmem:[%s5212_s28 + $0x33e0] sm:$0xff]  ;;  %v1165_v39 = vld [vmem:[%s5212_s28 + $0x3430] sm:$0xff]  ;;  %1162 = vst [vmem:[%s5220_s29 + $0x528] sm:$0xff] %v1161_v37 }
  0x69   : > { %1164 = vst [vmem:[%s5220_s29 + $0x530] sm:$0xff] %v1163_v38  ;;  %1166 = vst [vmem:[%s5220_s29 + $0x538] sm:$0xff] %v1165_v39  ;;  %v1167_v40 = vld [vmem:[%s5212_s28 + $0x3480] sm:$0xff]  ;;  %v1169_v41 = vld [vmem:[%s5212_s28 + $0x34d0] sm:$0xff] }
  0x6a   : > { %v1171_v42 = vld [vmem:[%s5212_s28 + $0x3520] sm:$0xff]  ;;  %1168 = vst [vmem:[%s5220_s29 + $0x540] sm:$0xff] %v1167_v40  ;;  %1170 = vst [vmem:[%s5220_s29 + $0x548] sm:$0xff] %v1169_v41  ;;  %v1173_v43 = vld [vmem:[%s5212_s28 + $0x3570] sm:$0xff] }
  0x6b   : > { %1172 = vst [vmem:[%s5220_s29 + $0x550] sm:$0xff] %v1171_v42  ;;  %v1175_v44 = vld [vmem:[%s5212_s28 + $0x35c0] sm:$0xff]  ;;  %v1177_v45 = vld [vmem:[%s5212_s28 + $0x3610] sm:$0xff]  ;;  %1174 = vst [vmem:[%s5220_s29 + $0x558] sm:$0xff] %v1173_v43 }
  0x6c   : > { %1176 = vst [vmem:[%s5220_s29 + $0x560] sm:$0xff] %v1175_v44  ;;  %1178 = vst [vmem:[%s5220_s29 + $0x568] sm:$0xff] %v1177_v45  ;;  %v1179_v46 = vld [vmem:[%s5212_s28 + $0x3660] sm:$0xff]  ;;  %v1181_v47 = vld [vmem:[%s5212_s28 + $0x36b0] sm:$0xff] }
  0x6d   : > { %v1183_v48 = vld [vmem:[%s5212_s28 + $0x3700] sm:$0xff]  ;;  %1180 = vst [vmem:[%s5220_s29 + $0x570] sm:$0xff] %v1179_v46  ;;  %1182 = vst [vmem:[%s5220_s29 + $0x578] sm:$0xff] %v1181_v47  ;;  %v1185_v49 = vld [vmem:[%s5212_s28 + $0x3750] sm:$0xff] }
  0x6e   : > { %1184 = vst [vmem:[%s5220_s29 + $0x580] sm:$0xff] %v1183_v48  ;;  %v1187_v50 = vld [vmem:[%s5212_s28 + $0x37a0] sm:$0xff]  ;;  %v1189_v51 = vld [vmem:[%s5212_s28 + $0x37f0] sm:$0xff]  ;;  %1186 = vst [vmem:[%s5220_s29 + $0x588] sm:$0xff] %v1185_v49 }
  0x6f   : > { %1188 = vst [vmem:[%s5220_s29 + $0x590] sm:$0xff] %v1187_v50  ;;  %1190 = vst [vmem:[%s5220_s29 + $0x598] sm:$0xff] %v1189_v51  ;;  %v1191_v52 = vld [vmem:[%s5212_s28 + $0x3840] sm:$0xff]  ;;  %v1193_v53 = vld [vmem:[%s5212_s28 + $0x3890] sm:$0xff] }
  0x70   : > { %v1195_v54 = vld [vmem:[%s5212_s28 + $0x38e0] sm:$0xff]  ;;  %1192 = vst [vmem:[%s5220_s29 + $0x5a0] sm:$0xff] %v1191_v52  ;;  %1194 = vst [vmem:[%s5220_s29 + $0x5a8] sm:$0xff] %v1193_v53  ;;  %v1197_v55 = vld [vmem:[%s5212_s28 + $0x3930] sm:$0xff] }
  0x71   : > { %1196 = vst [vmem:[%s5220_s29 + $0x5b0] sm:$0xff] %v1195_v54  ;;  %v1199_v56 = vld [vmem:[%s5212_s28 + $0x3980] sm:$0xff]  ;;  %v1201_v57 = vld [vmem:[%s5212_s28 + $0x39d0] sm:$0xff]  ;;  %1198 = vst [vmem:[%s5220_s29 + $0x5b8] sm:$0xff] %v1197_v55 }
  0x72   : > { %1200 = vst [vmem:[%s5220_s29 + $0x5c0] sm:$0xff] %v1199_v56  ;;  %1202 = vst [vmem:[%s5220_s29 + $0x5c8] sm:$0xff] %v1201_v57  ;;  %v1203_v58 = vld [vmem:[%s5212_s28 + $0x3a20] sm:$0xff]  ;;  %v1205_v59 = vld [vmem:[%s5212_s28 + $0x3a70] sm:$0xff] }
  0x73   : > { %v1207_v60 = vld [vmem:[%s5212_s28 + $0x3ac0] sm:$0xff]  ;;  %1204 = vst [vmem:[%s5220_s29 + $0x5d0] sm:$0xff] %v1203_v58  ;;  %1206 = vst [vmem:[%s5220_s29 + $0x5d8] sm:$0xff] %v1205_v59  ;;  %v1209_v61 = vld [vmem:[%s5212_s28 + $0x3b10] sm:$0xff] }
  0x74   : > { %1208 = vst [vmem:[%s5220_s29 + $0x5e0] sm:$0xff] %v1207_v60  ;;  %v1211_v62 = vld [vmem:[%s5212_s28 + $0x3b60] sm:$0xff]  ;;  %v1213_v63 = vld [vmem:[%s5212_s28 + $0x3bb0] sm:$0xff]  ;;  %1210 = vst [vmem:[%s5220_s29 + $0x5e8] sm:$0xff] %v1209_v61 }
  0x75   : > { %1212 = vst [vmem:[%s5220_s29 + $0x5f0] sm:$0xff] %v1211_v62  ;;  %1214 = vst [vmem:[%s5220_s29 + $0x5f8] sm:$0xff] %v1213_v63  ;;  %v1215_v0 = vld [vmem:[%s5212_s28 + $0x3c00] sm:$0xff]  ;;  %v1217_v1 = vld [vmem:[%s5212_s28 + $0x3c50] sm:$0xff] }
  0x76   : > { %v1219_v2 = vld [vmem:[%s5212_s28 + $0x3ca0] sm:$0xff]  ;;  %1216 = vst [vmem:[%s5220_s29 + $0x600] sm:$0xff] %v1215_v0  ;;  %1218 = vst [vmem:[%s5220_s29 + $0x608] sm:$0xff] %v1217_v1  ;;  %v1221_v3 = vld [vmem:[%s5212_s28 + $0x3cf0] sm:$0xff] }
  0x77   : > { %1220 = vst [vmem:[%s5220_s29 + $0x610] sm:$0xff] %v1219_v2  ;;  %v1223_v4 = vld [vmem:[%s5212_s28 + $0x3d40] sm:$0xff]  ;;  %v1225_v5 = vld [vmem:[%s5212_s28 + $0x3d90] sm:$0xff]  ;;  %1222 = vst [vmem:[%s5220_s29 + $0x618] sm:$0xff] %v1221_v3 }
  0x78   : > { %1224 = vst [vmem:[%s5220_s29 + $0x620] sm:$0xff] %v1223_v4  ;;  %1226 = vst [vmem:[%s5220_s29 + $0x628] sm:$0xff] %v1225_v5  ;;  %v1227_v6 = vld [vmem:[%s5212_s28 + $0x3de0] sm:$0xff]  ;;  %v1229_v7 = vld [vmem:[%s5212_s28 + $0x3e30] sm:$0xff] }
  0x79   : > { %v1231_v8 = vld [vmem:[%s5212_s28 + $0x3e80] sm:$0xff]  ;;  %1228 = vst [vmem:[%s5220_s29 + $0x630] sm:$0xff] %v1227_v6  ;;  %1230 = vst [vmem:[%s5220_s29 + $0x638] sm:$0xff] %v1229_v7  ;;  %v1233_v9 = vld [vmem:[%s5212_s28 + $0x3ed0] sm:$0xff] }
  0x7a   : > { %1232 = vst [vmem:[%s5220_s29 + $0x640] sm:$0xff] %v1231_v8  ;;  %v1235_v10 = vld [vmem:[%s5212_s28 + $0x3f20] sm:$0xff]  ;;  %v1237_v11 = vld [vmem:[%s5212_s28 + $0x3f70] sm:$0xff]  ;;  %1234 = vst [vmem:[%s5220_s29 + $0x648] sm:$0xff] %v1233_v9 }
  0x7b   : > { %1236 = vst [vmem:[%s5220_s29 + $0x650] sm:$0xff] %v1235_v10  ;;  %1238 = vst [vmem:[%s5220_s29 + $0x658] sm:$0xff] %v1237_v11  ;;  %v1239_v12 = vld [vmem:[%s5212_s28 + $0x3fc0] sm:$0xff]  ;;  %v1241_v13 = vld [vmem:[%s5212_s28 + $0x4010] sm:$0xff] }
  0x7c   : > { %v1243_v14 = vld [vmem:[%s5212_s28 + $0x4060] sm:$0xff]  ;;  %1240 = vst [vmem:[%s5220_s29 + $0x660] sm:$0xff] %v1239_v12  ;;  %1242 = vst [vmem:[%s5220_s29 + $0x668] sm:$0xff] %v1241_v13  ;;  %v1245_v15 = vld [vmem:[%s5212_s28 + $0x40b0] sm:$0xff] }
  0x7d   : > { %1244 = vst [vmem:[%s5220_s29 + $0x670] sm:$0xff] %v1243_v14  ;;  %v1247_v16 = vld [vmem:[%s5212_s28 + $0x4100] sm:$0xff]  ;;  %v1249_v17 = vld [vmem:[%s5212_s28 + $0x4150] sm:$0xff]  ;;  %1246 = vst [vmem:[%s5220_s29 + $0x678] sm:$0xff] %v1245_v15 }
  0x7e   : > { %1248 = vst [vmem:[%s5220_s29 + $0x680] sm:$0xff] %v1247_v16  ;;  %1250 = vst [vmem:[%s5220_s29 + $0x688] sm:$0xff] %v1249_v17  ;;  %v1251_v18 = vld [vmem:[%s5212_s28 + $0x41a0] sm:$0xff]  ;;  %v1253_v19 = vld [vmem:[%s5212_s28 + $0x41f0] sm:$0xff] }
  0x7f   : > { %v1255_v20 = vld [vmem:[%s5212_s28 + $0x4240] sm:$0xff]  ;;  %1252 = vst [vmem:[%s5220_s29 + $0x690] sm:$0xff] %v1251_v18  ;;  %1254 = vst [vmem:[%s5220_s29 + $0x698] sm:$0xff] %v1253_v19  ;;  %v1257_v21 = vld [vmem:[%s5212_s28 + $0x4290] sm:$0xff] }
  0x80   : > { %1256 = vst [vmem:[%s5220_s29 + $0x6a0] sm:$0xff] %v1255_v20  ;;  %v1259_v22 = vld [vmem:[%s5212_s28 + $0x42e0] sm:$0xff]  ;;  %v1261_v23 = vld [vmem:[%s5212_s28 + $0x4330] sm:$0xff]  ;;  %1258 = vst [vmem:[%s5220_s29 + $0x6a8] sm:$0xff] %v1257_v21 }
  0x81   : > { %1260 = vst [vmem:[%s5220_s29 + $0x6b0] sm:$0xff] %v1259_v22  ;;  %1262 = vst [vmem:[%s5220_s29 + $0x6b8] sm:$0xff] %v1261_v23  ;;  %v1263_v24 = vld [vmem:[%s5212_s28 + $0x4380] sm:$0xff]  ;;  %v1265_v25 = vld [vmem:[%s5212_s28 + $0x43d0] sm:$0xff] }
  0x82   : > { %v1267_v26 = vld [vmem:[%s5212_s28 + $0x4420] sm:$0xff]  ;;  %1264 = vst [vmem:[%s5220_s29 + $0x6c0] sm:$0xff] %v1263_v24  ;;  %1266 = vst [vmem:[%s5220_s29 + $0x6c8] sm:$0xff] %v1265_v25  ;;  %v1269_v27 = vld [vmem:[%s5212_s28 + $0x4470] sm:$0xff] }
  0x83   : > { %1268 = vst [vmem:[%s5220_s29 + $0x6d0] sm:$0xff] %v1267_v26  ;;  %v1271_v28 = vld [vmem:[%s5212_s28 + $0x44c0] sm:$0xff]  ;;  %v1273_v29 = vld [vmem:[%s5212_s28 + $0x4510] sm:$0xff]  ;;  %1270 = vst [vmem:[%s5220_s29 + $0x6d8] sm:$0xff] %v1269_v27 }
  0x84   : > { %1272 = vst [vmem:[%s5220_s29 + $0x6e0] sm:$0xff] %v1271_v28  ;;  %1274 = vst [vmem:[%s5220_s29 + $0x6e8] sm:$0xff] %v1273_v29  ;;  %v1275_v30 = vld [vmem:[%s5212_s28 + $0x4560] sm:$0xff]  ;;  %v1277_v31 = vld [vmem:[%s5212_s28 + $0x45b0] sm:$0xff] }
  0x85   : > { %v1279_v32 = vld [vmem:[%s5212_s28 + $0x4600] sm:$0xff]  ;;  %1276 = vst [vmem:[%s5220_s29 + $0x6f0] sm:$0xff] %v1275_v30  ;;  %1278 = vst [vmem:[%s5220_s29 + $0x6f8] sm:$0xff] %v1277_v31  ;;  %v1281_v33 = vld [vmem:[%s5212_s28 + $0x4650] sm:$0xff] }
  0x86   : > { %1280 = vst [vmem:[%s5220_s29 + $0x700] sm:$0xff] %v1279_v32  ;;  %v1283_v34 = vld [vmem:[%s5212_s28 + $0x46a0] sm:$0xff]  ;;  %v1285_v35 = vld [vmem:[%s5212_s28 + $0x46f0] sm:$0xff]  ;;  %1282 = vst [vmem:[%s5220_s29 + $0x708] sm:$0xff] %v1281_v33 }
  0x87   : > { %1284 = vst [vmem:[%s5220_s29 + $0x710] sm:$0xff] %v1283_v34  ;;  %1286 = vst [vmem:[%s5220_s29 + $0x718] sm:$0xff] %v1285_v35  ;;  %v1287_v36 = vld [vmem:[%s5212_s28 + $0x4740] sm:$0xff]  ;;  %v1289_v37 = vld [vmem:[%s5212_s28 + $0x4790] sm:$0xff] }
  0x88   : > { %v1291_v38 = vld [vmem:[%s5212_s28 + $0x47e0] sm:$0xff]  ;;  %1288 = vst [vmem:[%s5220_s29 + $0x720] sm:$0xff] %v1287_v36  ;;  %1290 = vst [vmem:[%s5220_s29 + $0x728] sm:$0xff] %v1289_v37  ;;  %v1293_v39 = vld [vmem:[%s5212_s28 + $0x4830] sm:$0xff] }
  0x89   : > { %1292 = vst [vmem:[%s5220_s29 + $0x730] sm:$0xff] %v1291_v38  ;;  %v1295_v40 = vld [vmem:[%s5212_s28 + $0x4880] sm:$0xff]  ;;  %v1297_v41 = vld [vmem:[%s5212_s28 + $0x48d0] sm:$0xff]  ;;  %1294 = vst [vmem:[%s5220_s29 + $0x738] sm:$0xff] %v1293_v39 }
  0x8a   : > { %1296 = vst [vmem:[%s5220_s29 + $0x740] sm:$0xff] %v1295_v40  ;;  %1298 = vst [vmem:[%s5220_s29 + $0x748] sm:$0xff] %v1297_v41  ;;  %v1299_v42 = vld [vmem:[%s5212_s28 + $0x4920] sm:$0xff]  ;;  %v1301_v43 = vld [vmem:[%s5212_s28 + $0x4970] sm:$0xff] }
  0x8b   : > { %v1303_v44 = vld [vmem:[%s5212_s28 + $0x49c0] sm:$0xff]  ;;  %1300 = vst [vmem:[%s5220_s29 + $0x750] sm:$0xff] %v1299_v42  ;;  %1302 = vst [vmem:[%s5220_s29 + $0x758] sm:$0xff] %v1301_v43  ;;  %v1305_v45 = vld [vmem:[%s5212_s28 + $0x4a10] sm:$0xff] }
  0x8c   : > { %1304 = vst [vmem:[%s5220_s29 + $0x760] sm:$0xff] %v1303_v44  ;;  %v1307_v46 = vld [vmem:[%s5212_s28 + $0x4a60] sm:$0xff]  ;;  %v1309_v47 = vld [vmem:[%s5212_s28 + $0x4ab0] sm:$0xff]  ;;  %1306 = vst [vmem:[%s5220_s29 + $0x768] sm:$0xff] %v1305_v45 }
  0x8d   : > { %1308 = vst [vmem:[%s5220_s29 + $0x770] sm:$0xff] %v1307_v46  ;;  %1310 = vst [vmem:[%s5220_s29 + $0x778] sm:$0xff] %v1309_v47  ;;  %v1311_v48 = vld [vmem:[%s5212_s28 + $0x4b00] sm:$0xff]  ;;  %v1313_v49 = vld [vmem:[%s5212_s28 + $0x4b50] sm:$0xff] }
  0x8e   : > { %v1315_v50 = vld [vmem:[%s5212_s28 + $0x4ba0] sm:$0xff]  ;;  %1312 = vst [vmem:[%s5220_s29 + $0x780] sm:$0xff] %v1311_v48  ;;  %1314 = vst [vmem:[%s5220_s29 + $0x788] sm:$0xff] %v1313_v49  ;;  %v1317_v51 = vld [vmem:[%s5212_s28 + $0x4bf0] sm:$0xff] }
  0x8f   : > { %1316 = vst [vmem:[%s5220_s29 + $0x790] sm:$0xff] %v1315_v50  ;;  %v1319_v52 = vld [vmem:[%s5212_s28 + $0x4c40] sm:$0xff]  ;;  %v1321_v53 = vld [vmem:[%s5212_s28 + $0x4c90] sm:$0xff]  ;;  %1318 = vst [vmem:[%s5220_s29 + $0x798] sm:$0xff] %v1317_v51 }
  0x90   : > { %1320 = vst [vmem:[%s5220_s29 + $0x7a0] sm:$0xff] %v1319_v52  ;;  %1322 = vst [vmem:[%s5220_s29 + $0x7a8] sm:$0xff] %v1321_v53  ;;  %v1323_v54 = vld [vmem:[%s5212_s28 + $0x4ce0] sm:$0xff]  ;;  %v1325_v55 = vld [vmem:[%s5212_s28 + $0x4d30] sm:$0xff] }
  0x91   : > { %v1327_v56 = vld [vmem:[%s5212_s28 + $0x4d80] sm:$0xff]  ;;  %1324 = vst [vmem:[%s5220_s29 + $0x7b0] sm:$0xff] %v1323_v54  ;;  %1326 = vst [vmem:[%s5220_s29 + $0x7b8] sm:$0xff] %v1325_v55  ;;  %v1329_v57 = vld [vmem:[%s5212_s28 + $0x4dd0] sm:$0xff] }
  0x92   : > { %1328 = vst [vmem:[%s5220_s29 + $0x7c0] sm:$0xff] %v1327_v56  ;;  %v1331_v58 = vld [vmem:[%s5212_s28 + $0x4e20] sm:$0xff]  ;;  %v1333_v59 = vld [vmem:[%s5212_s28 + $0x4e70] sm:$0xff]  ;;  %1330 = vst [vmem:[%s5220_s29 + $0x7c8] sm:$0xff] %v1329_v57 }
  0x93   : > { %1332 = vst [vmem:[%s5220_s29 + $0x7d0] sm:$0xff] %v1331_v58  ;;  %1334 = vst [vmem:[%s5220_s29 + $0x7d8] sm:$0xff] %v1333_v59  ;;  %v1335_v60 = vld [vmem:[%s5212_s28 + $0x4ec0] sm:$0xff]  ;;  %v1337_v61 = vld [vmem:[%s5212_s28 + $0x4f10] sm:$0xff] }
  0x94   : > { %v1339_v62 = vld [vmem:[%s5212_s28 + $0x4f60] sm:$0xff]  ;;  %1336 = vst [vmem:[%s5220_s29 + $0x7e0] sm:$0xff] %v1335_v60  ;;  %1338 = vst [vmem:[%s5220_s29 + $0x7e8] sm:$0xff] %v1337_v61  ;;  %v1341_v63 = vld [vmem:[%s5212_s28 + $0x4fb0] sm:$0xff] }
  0x95   : > { %1340 = vst [vmem:[%s5220_s29 + $0x7f0] sm:$0xff] %v1339_v62  ;;  %v1343_v0 = vld [vmem:[%s5212_s28 + $0x5000] sm:$0xff]  ;;  %v1345_v1 = vld [vmem:[%s5212_s28 + $0x5050] sm:$0xff]  ;;  %1342 = vst [vmem:[%s5220_s29 + $0x7f8] sm:$0xff] %v1341_v63 }
  0x96   : > { %1344 = vst [vmem:[%s5220_s29 + $0x800] sm:$0xff] %v1343_v0  ;;  %1346 = vst [vmem:[%s5220_s29 + $0x808] sm:$0xff] %v1345_v1  ;;  %v1347_v2 = vld [vmem:[%s5212_s28 + $0x50a0] sm:$0xff]  ;;  %v1349_v3 = vld [vmem:[%s5212_s28 + $0x50f0] sm:$0xff] }
  0x97   : > { %v1351_v4 = vld [vmem:[%s5212_s28 + $0x5140] sm:$0xff]  ;;  %1348 = vst [vmem:[%s5220_s29 + $0x810] sm:$0xff] %v1347_v2  ;;  %1350 = vst [vmem:[%s5220_s29 + $0x818] sm:$0xff] %v1349_v3  ;;  %v1353_v5 = vld [vmem:[%s5212_s28 + $0x5190] sm:$0xff] }
  0x98   : > { %1352 = vst [vmem:[%s5220_s29 + $0x820] sm:$0xff] %v1351_v4  ;;  %v1355_v6 = vld [vmem:[%s5212_s28 + $0x51e0] sm:$0xff]  ;;  %v1357_v7 = vld [vmem:[%s5212_s28 + $0x5230] sm:$0xff]  ;;  %1354 = vst [vmem:[%s5220_s29 + $0x828] sm:$0xff] %v1353_v5 }
  0x99   : > { %1356 = vst [vmem:[%s5220_s29 + $0x830] sm:$0xff] %v1355_v6  ;;  %1358 = vst [vmem:[%s5220_s29 + $0x838] sm:$0xff] %v1357_v7  ;;  %v1359_v8 = vld [vmem:[%s5212_s28 + $0x5280] sm:$0xff]  ;;  %v1361_v9 = vld [vmem:[%s5212_s28 + $0x52d0] sm:$0xff] }
  0x9a   : > { %v1363_v10 = vld [vmem:[%s5212_s28 + $0x5320] sm:$0xff]  ;;  %1360 = vst [vmem:[%s5220_s29 + $0x840] sm:$0xff] %v1359_v8  ;;  %1362 = vst [vmem:[%s5220_s29 + $0x848] sm:$0xff] %v1361_v9  ;;  %v1365_v11 = vld [vmem:[%s5212_s28 + $0x5370] sm:$0xff] }
  0x9b   : > { %1364 = vst [vmem:[%s5220_s29 + $0x850] sm:$0xff] %v1363_v10  ;;  %v1367_v12 = vld [vmem:[%s5212_s28 + $0x53c0] sm:$0xff]  ;;  %v1369_v13 = vld [vmem:[%s5212_s28 + $0x5410] sm:$0xff]  ;;  %1366 = vst [vmem:[%s5220_s29 + $0x858] sm:$0xff] %v1365_v11 }
  0x9c   : > { %1368 = vst [vmem:[%s5220_s29 + $0x860] sm:$0xff] %v1367_v12  ;;  %1370 = vst [vmem:[%s5220_s29 + $0x868] sm:$0xff] %v1369_v13  ;;  %v1371_v14 = vld [vmem:[%s5212_s28 + $0x5460] sm:$0xff]  ;;  %v1373_v15 = vld [vmem:[%s5212_s28 + $0x54b0] sm:$0xff] }
  0x9d   : > { %v1375_v16 = vld [vmem:[%s5212_s28 + $0x5500] sm:$0xff]  ;;  %1372 = vst [vmem:[%s5220_s29 + $0x870] sm:$0xff] %v1371_v14  ;;  %1374 = vst [vmem:[%s5220_s29 + $0x878] sm:$0xff] %v1373_v15  ;;  %v1377_v17 = vld [vmem:[%s5212_s28 + $0x5550] sm:$0xff] }
  0x9e   : > { %1376 = vst [vmem:[%s5220_s29 + $0x880] sm:$0xff] %v1375_v16  ;;  %v1379_v18 = vld [vmem:[%s5212_s28 + $0x55a0] sm:$0xff]  ;;  %v1381_v19 = vld [vmem:[%s5212_s28 + $0x55f0] sm:$0xff]  ;;  %1378 = vst [vmem:[%s5220_s29 + $0x888] sm:$0xff] %v1377_v17 }
  0x9f   : > { %1380 = vst [vmem:[%s5220_s29 + $0x890] sm:$0xff] %v1379_v18  ;;  %1382 = vst [vmem:[%s5220_s29 + $0x898] sm:$0xff] %v1381_v19  ;;  %v1383_v20 = vld [vmem:[%s5212_s28 + $0x5640] sm:$0xff]  ;;  %v1385_v21 = vld [vmem:[%s5212_s28 + $0x5690] sm:$0xff] }
  0xa0   : > { %v1387_v22 = vld [vmem:[%s5212_s28 + $0x56e0] sm:$0xff]  ;;  %1384 = vst [vmem:[%s5220_s29 + $0x8a0] sm:$0xff] %v1383_v20  ;;  %1386 = vst [vmem:[%s5220_s29 + $0x8a8] sm:$0xff] %v1385_v21  ;;  %v1389_v23 = vld [vmem:[%s5212_s28 + $0x5730] sm:$0xff] }
  0xa1   : > { %1388 = vst [vmem:[%s5220_s29 + $0x8b0] sm:$0xff] %v1387_v22  ;;  %v1391_v24 = vld [vmem:[%s5212_s28 + $0x5780] sm:$0xff]  ;;  %v1393_v25 = vld [vmem:[%s5212_s28 + $0x57d0] sm:$0xff]  ;;  %1390 = vst [vmem:[%s5220_s29 + $0x8b8] sm:$0xff] %v1389_v23 }
  0xa2   : > { %1392 = vst [vmem:[%s5220_s29 + $0x8c0] sm:$0xff] %v1391_v24  ;;  %1394 = vst [vmem:[%s5220_s29 + $0x8c8] sm:$0xff] %v1393_v25  ;;  %v1395_v26 = vld [vmem:[%s5212_s28 + $0x5820] sm:$0xff]  ;;  %v1397_v27 = vld [vmem:[%s5212_s28 + $0x5870] sm:$0xff] }
  0xa3   : > { %v1399_v28 = vld [vmem:[%s5212_s28 + $0x58c0] sm:$0xff]  ;;  %1396 = vst [vmem:[%s5220_s29 + $0x8d0] sm:$0xff] %v1395_v26  ;;  %1398 = vst [vmem:[%s5220_s29 + $0x8d8] sm:$0xff] %v1397_v27  ;;  %v1401_v29 = vld [vmem:[%s5212_s28 + $0x5910] sm:$0xff] }
  0xa4   : > { %1400 = vst [vmem:[%s5220_s29 + $0x8e0] sm:$0xff] %v1399_v28  ;;  %v1403_v30 = vld [vmem:[%s5212_s28 + $0x5960] sm:$0xff]  ;;  %v1405_v31 = vld [vmem:[%s5212_s28 + $0x59b0] sm:$0xff]  ;;  %1402 = vst [vmem:[%s5220_s29 + $0x8e8] sm:$0xff] %v1401_v29 }
  0xa5   : > { %1404 = vst [vmem:[%s5220_s29 + $0x8f0] sm:$0xff] %v1403_v30  ;;  %1406 = vst [vmem:[%s5220_s29 + $0x8f8] sm:$0xff] %v1405_v31  ;;  %v1407_v32 = vld [vmem:[%s5212_s28 + $0x5a00] sm:$0xff]  ;;  %v1409_v33 = vld [vmem:[%s5212_s28 + $0x5a50] sm:$0xff] }
  0xa6   : > { %v1411_v34 = vld [vmem:[%s5212_s28 + $0x5aa0] sm:$0xff]  ;;  %1408 = vst [vmem:[%s5220_s29 + $0x900] sm:$0xff] %v1407_v32  ;;  %1410 = vst [vmem:[%s5220_s29 + $0x908] sm:$0xff] %v1409_v33  ;;  %v1413_v35 = vld [vmem:[%s5212_s28 + $0x5af0] sm:$0xff] }
  0xa7   : > { %1412 = vst [vmem:[%s5220_s29 + $0x910] sm:$0xff] %v1411_v34  ;;  %v1415_v36 = vld [vmem:[%s5212_s28 + $0x5b40] sm:$0xff]  ;;  %v1417_v37 = vld [vmem:[%s5212_s28 + $0x5b90] sm:$0xff]  ;;  %1414 = vst [vmem:[%s5220_s29 + $0x918] sm:$0xff] %v1413_v35 }
  0xa8   : > { %1416 = vst [vmem:[%s5220_s29 + $0x920] sm:$0xff] %v1415_v36  ;;  %1418 = vst [vmem:[%s5220_s29 + $0x928] sm:$0xff] %v1417_v37  ;;  %v1419_v38 = vld [vmem:[%s5212_s28 + $0x5be0] sm:$0xff]  ;;  %v1421_v39 = vld [vmem:[%s5212_s28 + $0x5c30] sm:$0xff] }
  0xa9   : > { %v1423_v40 = vld [vmem:[%s5212_s28 + $0x5c80] sm:$0xff]  ;;  %1420 = vst [vmem:[%s5220_s29 + $0x930] sm:$0xff] %v1419_v38  ;;  %1422 = vst [vmem:[%s5220_s29 + $0x938] sm:$0xff] %v1421_v39  ;;  %v1425_v41 = vld [vmem:[%s5212_s28 + $0x5cd0] sm:$0xff] }
  0xaa   : > { %1424 = vst [vmem:[%s5220_s29 + $0x940] sm:$0xff] %v1423_v40  ;;  %v1427_v42 = vld [vmem:[%s5212_s28 + $0x5d20] sm:$0xff]  ;;  %v1429_v43 = vld [vmem:[%s5212_s28 + $0x5d70] sm:$0xff]  ;;  %1426 = vst [vmem:[%s5220_s29 + $0x948] sm:$0xff] %v1425_v41 }
  0xab   : > { %1428 = vst [vmem:[%s5220_s29 + $0x950] sm:$0xff] %v1427_v42  ;;  %1430 = vst [vmem:[%s5220_s29 + $0x958] sm:$0xff] %v1429_v43  ;;  %v1431_v44 = vld [vmem:[%s5212_s28 + $0x5dc0] sm:$0xff]  ;;  %v1433_v45 = vld [vmem:[%s5212_s28 + $0x5e10] sm:$0xff] }
  0xac   : > { %v1435_v46 = vld [vmem:[%s5212_s28 + $0x5e60] sm:$0xff]  ;;  %1432 = vst [vmem:[%s5220_s29 + $0x960] sm:$0xff] %v1431_v44  ;;  %1434 = vst [vmem:[%s5220_s29 + $0x968] sm:$0xff] %v1433_v45  ;;  %v1437_v47 = vld [vmem:[%s5212_s28 + $0x5eb0] sm:$0xff] }
  0xad   : > { %1436 = vst [vmem:[%s5220_s29 + $0x970] sm:$0xff] %v1435_v46  ;;  %v1439_v48 = vld [vmem:[%s5212_s28 + $0x5f00] sm:$0xff]  ;;  %v1441_v49 = vld [vmem:[%s5212_s28 + $0x5f50] sm:$0xff]  ;;  %1438 = vst [vmem:[%s5220_s29 + $0x978] sm:$0xff] %v1437_v47 }
  0xae   : > { %1440 = vst [vmem:[%s5220_s29 + $0x980] sm:$0xff] %v1439_v48  ;;  %1442 = vst [vmem:[%s5220_s29 + $0x988] sm:$0xff] %v1441_v49  ;;  %v1443_v50 = vld [vmem:[%s5212_s28 + $0x5fa0] sm:$0xff]  ;;  %v1445_v51 = vld [vmem:[%s5212_s28 + $0x5ff0] sm:$0xff] }
  0xaf   : > { %v1447_v52 = vld [vmem:[%s5212_s28 + $0x6040] sm:$0xff]  ;;  %1444 = vst [vmem:[%s5220_s29 + $0x990] sm:$0xff] %v1443_v50  ;;  %1446 = vst [vmem:[%s5220_s29 + $0x998] sm:$0xff] %v1445_v51  ;;  %v1449_v53 = vld [vmem:[%s5212_s28 + $0x6090] sm:$0xff] }
  0xb0   : > { %1448 = vst [vmem:[%s5220_s29 + $0x9a0] sm:$0xff] %v1447_v52  ;;  %v1451_v54 = vld [vmem:[%s5212_s28 + $0x60e0] sm:$0xff]  ;;  %v1453_v55 = vld [vmem:[%s5212_s28 + $0x6130] sm:$0xff]  ;;  %1450 = vst [vmem:[%s5220_s29 + $0x9a8] sm:$0xff] %v1449_v53 }
  0xb1   : > { %1452 = vst [vmem:[%s5220_s29 + $0x9b0] sm:$0xff] %v1451_v54  ;;  %1454 = vst [vmem:[%s5220_s29 + $0x9b8] sm:$0xff] %v1453_v55  ;;  %v1455_v56 = vld [vmem:[%s5212_s28 + $0x6180] sm:$0xff]  ;;  %v1457_v57 = vld [vmem:[%s5212_s28 + $0x61d0] sm:$0xff] }
  0xb2   : > { %v1459_v58 = vld [vmem:[%s5212_s28 + $0x6220] sm:$0xff]  ;;  %1456 = vst [vmem:[%s5220_s29 + $0x9c0] sm:$0xff] %v1455_v56  ;;  %1458 = vst [vmem:[%s5220_s29 + $0x9c8] sm:$0xff] %v1457_v57  ;;  %v1461_v59 = vld [vmem:[%s5212_s28 + $0x6270] sm:$0xff] }
  0xb3   : > { %1460 = vst [vmem:[%s5220_s29 + $0x9d0] sm:$0xff] %v1459_v58  ;;  %v1463_v60 = vld [vmem:[%s5212_s28 + $0x62c0] sm:$0xff]  ;;  %v1465_v61 = vld [vmem:[%s5212_s28 + $0x6310] sm:$0xff]  ;;  %1462 = vst [vmem:[%s5220_s29 + $0x9d8] sm:$0xff] %v1461_v59 }
  0xb4   : > { %1464 = vst [vmem:[%s5220_s29 + $0x9e0] sm:$0xff] %v1463_v60  ;;  %1466 = vst [vmem:[%s5220_s29 + $0x9e8] sm:$0xff] %v1465_v61  ;;  %v1467_v62 = vld [vmem:[%s5212_s28 + $0x6360] sm:$0xff]  ;;  %v1469_v63 = vld [vmem:[%s5212_s28 + $0x63b0] sm:$0xff] }
  0xb5   : > { %1468 = vst [vmem:[%s5220_s29 + $0x9f0] sm:$0xff] %v1467_v62  ;;  %1470 = vst [vmem:[%s5220_s29 + $0x9f8] sm:$0xff] %v1469_v63 }
  0xb6 PF: > { %p4162_p8 = scmp.ge.s32.totalorder %s5142_s16, 1  ;;  %p1483_p9 = scmp.lt.s32.totalorder %s5142_s16, 11 }
  0xb8   : > { %p1484_p10 = pnand %p4162_p8, %p1483_p9 }
  0xb9   : > { %s1490_s30 = sand.u32 (!%p1484_p10), 1, %s5126_s12   ;;  %v4692_v0 = vld [vmem:[%s6270_s0 + $0x4] ss:$80 sps:$4 sm:$0xff] (!%p1484_p10)   ;;  %v4698_v1 = vld [vmem:[%s6270_s0 + $0x2c] ss:$80 sps:$4 sm:$0xff] (!%p1484_p10)   ;;  %s4164_s18 = sshll.u32 (!%p1484_p10), %s5134_s14, 1 }
  0xba   : > { %1487 = sbr.rel (%p1484_p10) target bundleno = 741 (0x2e5), region = 66  ;;  %3621 = vmatprep.mubr.bf16.mxu1 (!%p1484_p10), %v4692_v0  ;;  %3836 = vmatprep.mubr.bf16.mxu0 (!%p1484_p10), %v4698_v1  ;;  %p1531_p11 = scmp.lt.s32.totalorder (!%p1484_p10), %s4164_s18, 19 }
  0xbb   : > { %s4553_s4 = smul.u32 (!%p1484_p10), 2560, %s1490_s30  ;;  %s4163_s23 = sshll.u32 (!%p1484_p10), %s1490_s30, 5 }
  0xbc   : > { %s1521_s24 = scalar_lea.vmem (!%p1484_p10), [#allocation3], %s4163_s23 }
  0xbd   : > { %s5867_s9 = scalar_lea.vmem (!%p1484_p10), [#allocation2], %s4553_s4 }
  0xbe   : > { %v4594_v2 = vld [vmem:[%s5867_s9 + $0x4] ss:$8 sps:$4 sm:$0xff] (!%p1484_p10)   ;;  %v4598_v4 = vld [vmem:[%s5867_s9] ss:$8 sps:$4 sm:$0xff] (!%p1484_p10)   ;;  %v4600_v6 = vld [vmem:[%s5867_s9 + $0x14] ss:$8 sps:$4 sm:$0xff] (!%p1484_p10)  }
  0xbf   : > { %v4596_v3 = vld [vmem:[%s5867_s9 + $0x504] ss:$8 sps:$4 sm:$0xff] (!%p1484_p10)   ;;  %3589 = vmatprep.subr.bf16.mxu1 (!%p1484_p10), %v4594_v2  ;;  %v4599_v5 = vld [vmem:[%s5867_s9 + $0x500] ss:$8 sps:$4 sm:$0xff] (!%p1484_p10)   ;;  %v4602_v7 = vld [vmem:[%s5867_s9 + $0x514] ss:$8 sps:$4 sm:$0xff] (!%p1484_p10)  }
  0xc0   : > { %3804 = vmatprep.subr.bf16.mxu0 (!%p1484_p10), %v4596_v3  ;;  %3590 = vmatpush1.bf16.msra.mxu1 (!%p1484_p10), %v4598_v4  ;;  %v4604_v8 = vld [vmem:[%s5867_s9 + $0x10] ss:$8 sps:$4 sm:$0xff] (!%p1484_p10)   ;;  %v4606_v10 = vld [vmem:[%s5867_s9 + $0x24] ss:$8 sps:$4 sm:$0xff] (!%p1484_p10)   ;;  %v4610_v12 = vld [vmem:[%s5867_s9 + $0x20] ss:$8 sps:$4 sm:$0xff] (!%p1484_p10)  }
  0xc1   : > { %3805 = vmatpush1.bf16.msra.mxu0 %v4599_v5  ;;  %3591 = vmatprep.subr.bf16.mxu1 %v4600_v6  ;;  %v4605_v9 = vld [vmem:[%s5867_s9 + $0x510] ss:$8 sps:$4 sm:$0xff]   ;;  %v4608_v11 = vld [vmem:[%s5867_s9 + $0x524] ss:$8 sps:$4 sm:$0xff]   ;;  %v4611_v13 = vld [vmem:[%s5867_s9 + $0x520] ss:$8 sps:$4 sm:$0xff]  }
  0xc2   : > { %3806 = vmatprep.subr.bf16.mxu0 %v4602_v7  ;;  %v4612_v14 = vld [vmem:[%s5867_s9 + $0x34] ss:$8 sps:$4 sm:$0xff]   ;;  %v4616_v16 = vld [vmem:[%s5867_s9 + $0x30] ss:$8 sps:$4 sm:$0xff]   ;;  %v4618_v18 = vld [vmem:[%s5867_s9 + $0x44] ss:$8 sps:$4 sm:$0xff]  }
  0xc3   : > { %v4614_v15 = vld [vmem:[%s5867_s9 + $0x534] ss:$8 sps:$4 sm:$0xff]   ;;  %v4617_v17 = vld [vmem:[%s5867_s9 + $0x530] ss:$8 sps:$4 sm:$0xff]   ;;  %v4620_v19 = vld [vmem:[%s5867_s9 + $0x544] ss:$8 sps:$4 sm:$0xff]  }
  0xc4   : > { %3592 = vmatpush1.bf16.msra.mxu1 %v4604_v8  ;;  %v4622_v20 = vld [vmem:[%s5867_s9 + $0x40] ss:$8 sps:$4 sm:$0xff]   ;;  %v4624_v22 = vld [vmem:[%s5867_s9 + $0x54] ss:$8 sps:$4 sm:$0xff]   ;;  %v4628_v24 = vld [vmem:[%s5867_s9 + $0x50] ss:$8 sps:$4 sm:$0xff]  }
  0xc5   : > { %3807 = vmatpush1.bf16.msra.mxu0 %v4605_v9  ;;  %3593 = vmatprep.subr.bf16.mxu1 %v4606_v10  ;;  %v4623_v21 = vld [vmem:[%s5867_s9 + $0x540] ss:$8 sps:$4 sm:$0xff]   ;;  %v4626_v23 = vld [vmem:[%s5867_s9 + $0x554] ss:$8 sps:$4 sm:$0xff]   ;;  %v4629_v25 = vld [vmem:[%s5867_s9 + $0x550] ss:$8 sps:$4 sm:$0xff]  }
  0xc6   : > { %3808 = vmatprep.subr.bf16.mxu0 %v4608_v11  ;;  %v4630_v26 = vld [vmem:[%s5867_s9 + $0x64] ss:$8 sps:$4 sm:$0xff]   ;;  %v4634_v28 = vld [vmem:[%s5867_s9 + $0x60] ss:$8 sps:$4 sm:$0xff]   ;;  %v4636_v30 = vld [vmem:[%s5867_s9 + $0x74] ss:$8 sps:$4 sm:$0xff]  }
  0xc7   : > { %v4632_v27 = vld [vmem:[%s5867_s9 + $0x564] ss:$8 sps:$4 sm:$0xff]   ;;  %v4635_v29 = vld [vmem:[%s5867_s9 + $0x560] ss:$8 sps:$4 sm:$0xff]   ;;  %v4638_v31 = vld [vmem:[%s5867_s9 + $0x574] ss:$8 sps:$4 sm:$0xff]  }
  0xc8   : > { %3594 = vmatpush1.bf16.msra.mxu1 %v4610_v12  ;;  %v4640_v32 = vld [vmem:[%s5867_s9 + $0x70] ss:$8 sps:$4 sm:$0xff]   ;;  %v4642_v34 = vld [vmem:[%s5867_s9 + $0x84] ss:$8 sps:$4 sm:$0xff]   ;;  %v4646_v36 = vld [vmem:[%s5867_s9 + $0x80] ss:$8 sps:$4 sm:$0xff]  }
  0xc9   : > { %3809 = vmatpush1.bf16.msra.mxu0 %v4611_v13  ;;  %3595 = vmatprep.subr.bf16.mxu1 %v4612_v14  ;;  %v4641_v33 = vld [vmem:[%s5867_s9 + $0x570] ss:$8 sps:$4 sm:$0xff]   ;;  %v4644_v35 = vld [vmem:[%s5867_s9 + $0x584] ss:$8 sps:$4 sm:$0xff]   ;;  %v4647_v37 = vld [vmem:[%s5867_s9 + $0x580] ss:$8 sps:$4 sm:$0xff]  }
  0xca   : > { %3810 = vmatprep.subr.bf16.mxu0 %v4614_v15  ;;  %v4648_v38 = vld [vmem:[%s5867_s9 + $0x94] ss:$8 sps:$4 sm:$0xff]   ;;  %v4652_v40 = vld [vmem:[%s5867_s9 + $0x90] ss:$8 sps:$4 sm:$0xff]   ;;  %v4654_v42 = vld [vmem:[%s5867_s9 + $0xa4] ss:$8 sps:$4 sm:$0xff]  }
  0xcb   : > { %v4650_v39 = vld [vmem:[%s5867_s9 + $0x594] ss:$8 sps:$4 sm:$0xff]   ;;  %v4653_v41 = vld [vmem:[%s5867_s9 + $0x590] ss:$8 sps:$4 sm:$0xff]   ;;  %v4656_v43 = vld [vmem:[%s5867_s9 + $0x5a4] ss:$8 sps:$4 sm:$0xff]  }
  0xcc   : > { %3596 = vmatpush1.bf16.msra.mxu1 %v4616_v16  ;;  %v4658_v44 = vld [vmem:[%s5867_s9 + $0xa0] ss:$8 sps:$4 sm:$0xff]   ;;  %v4660_v46 = vld [vmem:[%s5867_s9 + $0xb4] ss:$8 sps:$4 sm:$0xff]   ;;  %v4664_v48 = vld [vmem:[%s5867_s9 + $0xb0] ss:$8 sps:$4 sm:$0xff]  }
  0xcd   : > { %3811 = vmatpush1.bf16.msra.mxu0 %v4617_v17  ;;  %3597 = vmatprep.subr.bf16.mxu1 %v4618_v18  ;;  %v4659_v45 = vld [vmem:[%s5867_s9 + $0x5a0] ss:$8 sps:$4 sm:$0xff]   ;;  %v4662_v47 = vld [vmem:[%s5867_s9 + $0x5b4] ss:$8 sps:$4 sm:$0xff]   ;;  %v4665_v49 = vld [vmem:[%s5867_s9 + $0x5b0] ss:$8 sps:$4 sm:$0xff]  }
  0xce   : > { %3812 = vmatprep.subr.bf16.mxu0 %v4620_v19  ;;  %v4666_v50 = vld [vmem:[%s5867_s9 + $0xc4] ss:$8 sps:$4 sm:$0xff]   ;;  %v4670_v52 = vld [vmem:[%s5867_s9 + $0xc0] ss:$8 sps:$4 sm:$0xff]   ;;  %v4672_v54 = vld [vmem:[%s5867_s9 + $0xd4] ss:$8 sps:$4 sm:$0xff]  }
  0xcf   : > { %v4668_v51 = vld [vmem:[%s5867_s9 + $0x5c4] ss:$8 sps:$4 sm:$0xff]   ;;  %v4671_v53 = vld [vmem:[%s5867_s9 + $0x5c0] ss:$8 sps:$4 sm:$0xff]   ;;  %v4674_v55 = vld [vmem:[%s5867_s9 + $0x5d4] ss:$8 sps:$4 sm:$0xff]  }
  0xd0   : > { %3598 = vmatpush1.bf16.msra.mxu1 %v4622_v20  ;;  %v4676_v56 = vld [vmem:[%s5867_s9 + $0xd0] ss:$8 sps:$4 sm:$0xff]   ;;  %v4678_v58 = vld [vmem:[%s5867_s9 + $0xe4] ss:$8 sps:$4 sm:$0xff]   ;;  %v4682_v60 = vld [vmem:[%s5867_s9 + $0xe0] ss:$8 sps:$4 sm:$0xff]  }
  0xd1   : > { %3813 = vmatpush1.bf16.msra.mxu0 %v4623_v21  ;;  %3599 = vmatprep.subr.bf16.mxu1 %v4624_v22  ;;  %v4677_v57 = vld [vmem:[%s5867_s9 + $0x5d0] ss:$8 sps:$4 sm:$0xff]   ;;  %v4680_v59 = vld [vmem:[%s5867_s9 + $0x5e4] ss:$8 sps:$4 sm:$0xff]   ;;  %v4683_v61 = vld [vmem:[%s5867_s9 + $0x5e0] ss:$8 sps:$4 sm:$0xff]  }
  0xd2   : > { %3814 = vmatprep.subr.bf16.mxu0 %v4626_v23  ;;  %v4684_v62 = vld [vmem:[%s5867_s9 + $0xf4] ss:$8 sps:$4 sm:$0xff]   ;;  %v4688_v0 = vld [vmem:[%s5867_s9 + $0xf0] ss:$8 sps:$4 sm:$0xff]   ;;  %v4695_v2 = vld [vmem:[%s5867_s9 + $0x104] ss:$8 sps:$4 sm:$0xff]  }
  0xd3   : > { %v4686_v63 = vld [vmem:[%s5867_s9 + $0x5f4] ss:$8 sps:$4 sm:$0xff]   ;;  %v4689_v1 = vld [vmem:[%s5867_s9 + $0x5f0] ss:$8 sps:$4 sm:$0xff]   ;;  %v4701_v3 = vld [vmem:[%s5867_s9 + $0x604] ss:$8 sps:$4 sm:$0xff]  }
  0xd4   : > { %3600 = vmatpush1.bf16.msra.mxu1 %v4628_v24  ;;  %v4690_v4 = vld [vmem:[%s6270_s0] ss:$80 sps:$4 sm:$0xff]   ;;  %v4696_v5 = vld [vmem:[%s6270_s0 + $0x28] ss:$80 sps:$4 sm:$0xff]   ;;  %v4704_v8 = vld [vmem:[%s5867_s9 + $0x114] ss:$8 sps:$4 sm:$0xff]  }
  0xd5   : > { %3815 = vmatpush1.bf16.msra.mxu0 %v4629_v25  ;;  %3601 = vmatprep.subr.bf16.mxu1 %v4630_v26  ;;  %v4693_v6 = vld [vmem:[%s5867_s9 + $0x100] ss:$8 sps:$4 sm:$0xff]   ;;  %v4707_v9 = vld [vmem:[%s5867_s9 + $0x614] ss:$8 sps:$4 sm:$0xff]   ;;  %v4702_v10 = vld [vmem:[%s5867_s9 + $0x110] ss:$8 sps:$4 sm:$0xff]  }
  0xd6   : > { %3816 = vmatprep.subr.bf16.mxu0 %v4632_v27  ;;  %v4699_v7 = vld [vmem:[%s5867_s9 + $0x600] ss:$8 sps:$4 sm:$0xff]   ;;  %v4705_v11 = vld [vmem:[%s5867_s9 + $0x610] ss:$8 sps:$4 sm:$0xff]   ;;  %v4710_v12 = vld [vmem:[%s5867_s9 + $0x124] ss:$8 sps:$4 sm:$0xff]  }
  0xd7   : > { %v4713_v13 = vld [vmem:[%s5867_s9 + $0x624] ss:$8 sps:$4 sm:$0xff]   ;;  %v4708_v14 = vld [vmem:[%s5867_s9 + $0x120] ss:$8 sps:$4 sm:$0xff]   ;;  %v4716_v16 = vld [vmem:[%s5867_s9 + $0x134] ss:$8 sps:$4 sm:$0xff]  }
  0xd8   : > { %3602 = vmatpush1.bf16.msra.mxu1 %v4634_v28  ;;  %v4711_v15 = vld [vmem:[%s5867_s9 + $0x620] ss:$8 sps:$4 sm:$0xff]   ;;  %v4719_v17 = vld [vmem:[%s5867_s9 + $0x634] ss:$8 sps:$4 sm:$0xff]   ;;  %v4714_v18 = vld [vmem:[%s5867_s9 + $0x130] ss:$8 sps:$4 sm:$0xff]  }
  0xd9   : > { %3817 = vmatpush1.bf16.msra.mxu0 %v4635_v29  ;;  %3603 = vmatprep.subr.bf16.mxu1 %v4636_v30  ;;  %v4717_v19 = vld [vmem:[%s5867_s9 + $0x630] ss:$8 sps:$4 sm:$0xff]   ;;  %v4722_v20 = vld [vmem:[%s5867_s9 + $0x144] ss:$8 sps:$4 sm:$0xff]   ;;  %v4720_v22 = vld [vmem:[%s5867_s9 + $0x140] ss:$8 sps:$4 sm:$0xff]  }
  0xda   : > { %3818 = vmatprep.subr.bf16.mxu0 %v4638_v31  ;;  %v4725_v21 = vld [vmem:[%s5867_s9 + $0x644] ss:$8 sps:$4 sm:$0xff]   ;;  %v4723_v23 = vld [vmem:[%s5867_s9 + $0x640] ss:$8 sps:$4 sm:$0xff]   ;;  %v4728_v24 = vld [vmem:[%s5867_s9 + $0x154] ss:$8 sps:$4 sm:$0xff]  }
  0xdb   : > { %v4731_v25 = vld [vmem:[%s5867_s9 + $0x654] ss:$8 sps:$4 sm:$0xff]   ;;  %v4726_v26 = vld [vmem:[%s5867_s9 + $0x150] ss:$8 sps:$4 sm:$0xff]   ;;  %v4734_v28 = vld [vmem:[%s5867_s9 + $0x164] ss:$8 sps:$4 sm:$0xff]  }
  0xdc   : > { %3604 = vmatpush1.bf16.msra.mxu1 %v4640_v32  ;;  %v4729_v27 = vld [vmem:[%s5867_s9 + $0x650] ss:$8 sps:$4 sm:$0xff]   ;;  %v4737_v29 = vld [vmem:[%s5867_s9 + $0x664] ss:$8 sps:$4 sm:$0xff]   ;;  %v4732_v31 = vld [vmem:[%s5867_s9 + $0x160] ss:$8 sps:$4 sm:$0xff]  }
  0xdd   : > { %3819 = vmatpush1.bf16.msra.mxu0 %v4641_v33  ;;  %3605 = vmatprep.subr.bf16.mxu1 %v4642_v34  ;;  %v4794_v30 = vld [vmem:[%s6270_s0 + $0xc] ss:$80 sps:$4 sm:$0xff]   ;;  %v4735_v32 = vld [vmem:[%s5867_s9 + $0x660] ss:$8 sps:$4 sm:$0xff]   ;;  %v4800_v33 = vld [vmem:[%s6270_s0 + $0x34] ss:$80 sps:$4 sm:$0xff]  }
  0xde   : > { %3820 = vmatprep.subr.bf16.mxu0 %v4644_v35  ;;  %v4740_v34 = vld [vmem:[%s5867_s9 + $0x174] ss:$8 sps:$4 sm:$0xff]   ;;  %s6282_s18 = smov (!%p1531_p11, %s4164_s18), 19  ;;  %s4511_s12 = sshll.u32 (%p5199_p6), %s5134_s14, 4 }
  0xdf   : > { %v4743_v35 = vld [vmem:[%s5867_s9 + $0x674] ss:$8 sps:$4 sm:$0xff]   ;;  %s1533_s20 = scalar_lea.vmem %s6272_s2, %s6282_s18  ;;  %s4039_s26 = scalar_lea.vmem (%p5199_p6), %s6273_s3, %s4511_s12 }
  0xe0   : > { %3606 = vmatpush1.bf16.msra.mxu1 %v4646_v36  ;;  %v4738_v36 = vld [vmem:[%s5867_s9 + $0x170] ss:$8 sps:$4 sm:$0xff]  }
  0xe1   : > { %3821 = vmatpush1.bf16.msra.mxu0 %v4647_v37  ;;  %3607 = vmatprep.subr.bf16.mxu1 %v4648_v38  ;;  %v4741_v37 = vld [vmem:[%s5867_s9 + $0x670] ss:$8 sps:$4 sm:$0xff]   ;;  %v4746_v38 = vld [vmem:[%s5867_s9 + $0x184] ss:$8 sps:$4 sm:$0xff]  }
  0xe2   : > { %3822 = vmatprep.subr.bf16.mxu0 %v4650_v39  ;;  %v4749_v39 = vld [vmem:[%s5867_s9 + $0x684] ss:$8 sps:$4 sm:$0xff]  }
  0xe4   : > { %3608 = vmatpush1.bf16.msra.mxu1 %v4652_v40  ;;  %v4744_v40 = vld [vmem:[%s5867_s9 + $0x180] ss:$8 sps:$4 sm:$0xff]  }
  0xe5   : > { %3823 = vmatpush1.bf16.msra.mxu0 %v4653_v41  ;;  %3609 = vmatprep.subr.bf16.mxu1 %v4654_v42  ;;  %v4747_v41 = vld [vmem:[%s5867_s9 + $0x680] ss:$8 sps:$4 sm:$0xff]   ;;  %v4752_v42 = vld [vmem:[%s5867_s9 + $0x194] ss:$8 sps:$4 sm:$0xff]  }
  0xe6   : > { %3824 = vmatprep.subr.bf16.mxu0 %v4656_v43  ;;  %v4755_v43 = vld [vmem:[%s5867_s9 + $0x694] ss:$8 sps:$4 sm:$0xff]  }
  0xe8   : > { %3610 = vmatpush1.bf16.msra.mxu1 %v4658_v44  ;;  %v4750_v44 = vld [vmem:[%s5867_s9 + $0x190] ss:$8 sps:$4 sm:$0xff]  }
  0xe9   : > { %3825 = vmatpush1.bf16.msra.mxu0 %v4659_v45  ;;  %3611 = vmatprep.subr.bf16.mxu1 %v4660_v46  ;;  %v4753_v45 = vld [vmem:[%s5867_s9 + $0x690] ss:$8 sps:$4 sm:$0xff]   ;;  %v4758_v46 = vld [vmem:[%s5867_s9 + $0x1a4] ss:$8 sps:$4 sm:$0xff]  }
  0xea   : > { %3826 = vmatprep.subr.bf16.mxu0 %v4662_v47  ;;  %v4761_v47 = vld [vmem:[%s5867_s9 + $0x6a4] ss:$8 sps:$4 sm:$0xff]  }
  0xec   : > { %3612 = vmatpush1.bf16.msra.mxu1 %v4664_v48  ;;  %v4756_v48 = vld [vmem:[%s5867_s9 + $0x1a0] ss:$8 sps:$4 sm:$0xff]  }
  0xed   : > { %3827 = vmatpush1.bf16.msra.mxu0 %v4665_v49  ;;  %3613 = vmatprep.subr.bf16.mxu1 %v4666_v50  ;;  %v4759_v49 = vld [vmem:[%s5867_s9 + $0x6a0] ss:$8 sps:$4 sm:$0xff]   ;;  %v4764_v50 = vld [vmem:[%s5867_s9 + $0x1b4] ss:$8 sps:$4 sm:$0xff]  }
  0xee   : > { %3828 = vmatprep.subr.bf16.mxu0 %v4668_v51  ;;  %v4767_v51 = vld [vmem:[%s5867_s9 + $0x6b4] ss:$8 sps:$4 sm:$0xff]  }
  0xf0   : > { %3614 = vmatpush1.bf16.msra.mxu1 %v4670_v52  ;;  %v4762_v52 = vld [vmem:[%s5867_s9 + $0x1b0] ss:$8 sps:$4 sm:$0xff]  }
  0xf1   : > { %3829 = vmatpush1.bf16.msra.mxu0 %v4671_v53  ;;  %3615 = vmatprep.subr.bf16.mxu1 %v4672_v54  ;;  %v4765_v53 = vld [vmem:[%s5867_s9 + $0x6b0] ss:$8 sps:$4 sm:$0xff]   ;;  %v4770_v54 = vld [vmem:[%s5867_s9 + $0x1c4] ss:$8 sps:$4 sm:$0xff]  }
  0xf2   : > { %3830 = vmatprep.subr.bf16.mxu0 %v4674_v55  ;;  %v4773_v55 = vld [vmem:[%s5867_s9 + $0x6c4] ss:$8 sps:$4 sm:$0xff]  }
  0xf4   : > { %3616 = vmatpush1.bf16.msra.mxu1 %v4676_v56  ;;  %v4768_v56 = vld [vmem:[%s5867_s9 + $0x1c0] ss:$8 sps:$4 sm:$0xff]  }
  0xf5   : > { %3831 = vmatpush1.bf16.msra.mxu0 %v4677_v57  ;;  %3617 = vmatprep.subr.bf16.mxu1 %v4678_v58  ;;  %v4771_v57 = vld [vmem:[%s5867_s9 + $0x6c0] ss:$8 sps:$4 sm:$0xff]   ;;  %v4776_v58 = vld [vmem:[%s5867_s9 + $0x1d4] ss:$8 sps:$4 sm:$0xff]  }
  0xf6   : > { %3832 = vmatprep.subr.bf16.mxu0 %v4680_v59  ;;  %v4779_v59 = vld [vmem:[%s5867_s9 + $0x6d4] ss:$8 sps:$4 sm:$0xff]  }
  0xf8   : > { %3618 = vmatpush1.bf16.msra.mxu1 %v4682_v60  ;;  %v4774_v60 = vld [vmem:[%s5867_s9 + $0x1d0] ss:$8 sps:$4 sm:$0xff]  }
  0xf9   : > { %3833 = vmatpush1.bf16.msra.mxu0 %v4683_v61  ;;  %3619 = vmatprep.subr.bf16.mxu1 %v4684_v62  ;;  %v4777_v61 = vld [vmem:[%s5867_s9 + $0x6d0] ss:$8 sps:$4 sm:$0xff]   ;;  %v4782_v62 = vld [vmem:[%s5867_s9 + $0x1e4] ss:$8 sps:$4 sm:$0xff]  }
  0xfa   : > { %3834 = vmatprep.subr.bf16.mxu0 %v4686_v63  ;;  %v4785_v63 = vld [vmem:[%s5867_s9 + $0x6e4] ss:$8 sps:$4 sm:$0xff]  }
  0xfc   : > { %3620 = vmatpush1.bf16.msra.mxu1 %v4688_v0  ;;  %v4780_v0 = vld [vmem:[%s5867_s9 + $0x1e0] ss:$8 sps:$4 sm:$0xff]  }
  0xfd   : > { %3835 = vmatpush1.bf16.msra.mxu0 %v4689_v1  ;;  %3632 = vmatprep.subr.bf16.mxu1 %v4695_v2  ;;  %v4783_v1 = vld [vmem:[%s5867_s9 + $0x6e0] ss:$8 sps:$4 sm:$0xff]   ;;  %v4788_v2 = vld [vmem:[%s5867_s9 + $0x1f4] ss:$8 sps:$4 sm:$0xff]  }
  0xfe   : > { %3847 = vmatprep.subr.bf16.mxu0 %v4701_v3  ;;  %v4791_v3 = vld [vmem:[%s5867_s9 + $0x6f4] ss:$8 sps:$4 sm:$0xff]  }
  0xff   : > { %3622 = vmatmul.mubr.bf16.vlgmr.msra.gmra.mrb[0].mxu1 %v4690_v4  ;;  %v4786_v4 = vld [vmem:[%s5867_s9 + $0x1f0] ss:$8 sps:$4 sm:$0xff]  }
 0x100   : > { %3837 = vmatmul.mubr.bf16.vlgmr.msra.gmra.mrb[0].mxu0 %v4696_v5  ;;  %3633 = vmatpush1.bf16.msra.mxu1 %v4693_v6  ;;  %v4789_v5 = vld [vmem:[%s5867_s9 + $0x6f0] ss:$8 sps:$4 sm:$0xff]   ;;  %v4797_v6 = vld [vmem:[%s5867_s9 + $0x204] ss:$8 sps:$4 sm:$0xff]  }
 0x101   : > { %3848 = vmatpush1.bf16.msra.mxu0 %v4699_v7  ;;  %3634 = vmatprep.subr.bf16.mxu1 %v4704_v8  ;;  %v4803_v7 = vld [vmem:[%s5867_s9 + $0x704] ss:$8 sps:$4 sm:$0xff]   ;;  %v4792_v8 = vld [vmem:[%s6270_s0 + $0x8] ss:$80 sps:$4 sm:$0xff]  }
 0x102   : > { %3849 = vmatprep.subr.bf16.mxu0 %v4707_v9  ;;  %3664 = vmatprep.mubr.bf16.mxu1 %v4794_v30  ;;  %v4795_v9 = vld [vmem:[%s5867_s9 + $0x200] ss:$8 sps:$4 sm:$0xff]   ;;  %v4830_v30 = vld [vmem:[%s5867_s9 + $0x254] ss:$8 sps:$4 sm:$0xff]  }
 0x103   : > { %3879 = vmatprep.mubr.bf16.mxu0 %v4800_v33  ;;  %v4831_v33 = vld [vmem:[%s5867_s9 + $0x750] ss:$8 sps:$4 sm:$0xff]  }
 0x104   : > { %3635 = vmatpush1.bf16.msra.mxu1 %v4702_v10  ;;  %v4798_v10 = vld [vmem:[%s6270_s0 + $0x30] ss:$80 sps:$4 sm:$0xff]  }
 0x105   : > { %3850 = vmatpush1.bf16.msra.mxu0 %v4705_v11  ;;  %3636 = vmatprep.subr.bf16.mxu1 %v4710_v12  ;;  %v4801_v11 = vld [vmem:[%s5867_s9 + $0x700] ss:$8 sps:$4 sm:$0xff]   ;;  %v4806_v12 = vld [vmem:[%s5867_s9 + $0x214] ss:$8 sps:$4 sm:$0xff]  }
 0x106   : > { %3851 = vmatprep.subr.bf16.mxu0 %v4713_v13  ;;  %v4809_v13 = vld [vmem:[%s5867_s9 + $0x714] ss:$8 sps:$4 sm:$0xff]  }
 0x108   : > { %3637 = vmatpush1.bf16.msra.mxu1 %v4708_v14  ;;  %v4804_v14 = vld [vmem:[%s5867_s9 + $0x210] ss:$8 sps:$4 sm:$0xff]  }
 0x109   : > { %3852 = vmatpush1.bf16.msra.mxu0 %v4711_v15  ;;  %3638 = vmatprep.subr.bf16.mxu1 %v4716_v16  ;;  %v4896_v15 = vld [vmem:[%s6270_s0 + $0x14] ss:$80 sps:$4 sm:$0xff]   ;;  %v4807_v16 = vld [vmem:[%s5867_s9 + $0x710] ss:$8 sps:$4 sm:$0xff]  }
 0x10a   : > { %3853 = vmatprep.subr.bf16.mxu0 %v4719_v17  ;;  %v4812_v17 = vld [vmem:[%s5867_s9 + $0x224] ss:$8 sps:$4 sm:$0xff]  }
 0x10c   : > { %3639 = vmatpush1.bf16.msra.mxu1 %v4714_v18  ;;  %v4815_v18 = vld [vmem:[%s5867_s9 + $0x724] ss:$8 sps:$4 sm:$0xff]  }
 0x10d   : > { %3854 = vmatpush1.bf16.msra.mxu0 %v4717_v19  ;;  %3640 = vmatprep.subr.bf16.mxu1 %v4722_v20  ;;  %v4902_v19 = vld [vmem:[%s6270_s0 + $0x3c] ss:$80 sps:$4 sm:$0xff]   ;;  %v4810_v20 = vld [vmem:[%s5867_s9 + $0x220] ss:$8 sps:$4 sm:$0xff]  }
 0x10e   : > { %3855 = vmatprep.subr.bf16.mxu0 %v4725_v21  ;;  %v4813_v21 = vld [vmem:[%s5867_s9 + $0x720] ss:$8 sps:$4 sm:$0xff]  }
 0x110   : > { %3641 = vmatpush1.bf16.msra.mxu1 %v4720_v22  ;;  %v4818_v22 = vld [vmem:[%s5867_s9 + $0x234] ss:$8 sps:$4 sm:$0xff]  }
 0x111   : > { %3856 = vmatpush1.bf16.msra.mxu0 %v4723_v23  ;;  %3642 = vmatprep.subr.bf16.mxu1 %v4728_v24  ;;  %v4821_v23 = vld [vmem:[%s5867_s9 + $0x734] ss:$8 sps:$4 sm:$0xff]   ;;  %v4816_v24 = vld [vmem:[%s5867_s9 + $0x230] ss:$8 sps:$4 sm:$0xff]  }
 0x112   : > { %3857 = vmatprep.subr.bf16.mxu0 %v4731_v25  ;;  %v4819_v25 = vld [vmem:[%s5867_s9 + $0x730] ss:$8 sps:$4 sm:$0xff]  }
 0x114   : > { %3643 = vmatpush1.bf16.msra.mxu1 %v4726_v26  ;;  %v4824_v26 = vld [vmem:[%s5867_s9 + $0x244] ss:$8 sps:$4 sm:$0xff]  }
 0x115   : > { %3858 = vmatpush1.bf16.msra.mxu0 %v4729_v27  ;;  %3644 = vmatprep.subr.bf16.mxu1 %v4734_v28  ;;  %v4827_v27 = vld [vmem:[%s5867_s9 + $0x744] ss:$8 sps:$4 sm:$0xff]   ;;  %v4822_v28 = vld [vmem:[%s5867_s9 + $0x240] ss:$8 sps:$4 sm:$0xff]  }
 0x116   : > { %3859 = vmatprep.subr.bf16.mxu0 %v4737_v29  ;;  %v4825_v29 = vld [vmem:[%s5867_s9 + $0x740] ss:$8 sps:$4 sm:$0xff]  }
 0x118   : > { %3645 = vmatpush1.bf16.msra.mxu1 %v4732_v31  ;;  %v4833_v31 = vld [vmem:[%s5867_s9 + $0x754] ss:$8 sps:$4 sm:$0xff]  }
 0x119   : > { %3860 = vmatpush1.bf16.msra.mxu0 %v4735_v32  ;;  %3646 = vmatprep.subr.bf16.mxu1 %v4740_v34  ;;  %v4828_v32 = vld [vmem:[%s5867_s9 + $0x250] ss:$8 sps:$4 sm:$0xff]   ;;  %v4836_v34 = vld [vmem:[%s5867_s9 + $0x264] ss:$8 sps:$4 sm:$0xff]  }
 0x11a   : > { %3861 = vmatprep.subr.bf16.mxu0 %v4743_v35  ;;  %v4839_v35 = vld [vmem:[%s5867_s9 + $0x764] ss:$8 sps:$4 sm:$0xff]  }
 0x11c   : > { %3647 = vmatpush1.bf16.msra.mxu1 %v4738_v36  ;;  %v4834_v36 = vld [vmem:[%s5867_s9 + $0x260] ss:$8 sps:$4 sm:$0xff]  }
 0x11d   : > { %3862 = vmatpush1.bf16.msra.mxu0 %v4741_v37  ;;  %3648 = vmatprep.subr.bf16.mxu1 %v4746_v38  ;;  %v4837_v37 = vld [vmem:[%s5867_s9 + $0x760] ss:$8 sps:$4 sm:$0xff]   ;;  %v4842_v38 = vld [vmem:[%s5867_s9 + $0x274] ss:$8 sps:$4 sm:$0xff]  }
 0x11e   : > { %3863 = vmatprep.subr.bf16.mxu0 %v4749_v39  ;;  %v4845_v39 = vld [vmem:[%s5867_s9 + $0x774] ss:$8 sps:$4 sm:$0xff]  }
 0x120   : > { %3649 = vmatpush1.bf16.msra.mxu1 %v4744_v40  ;;  %v4840_v40 = vld [vmem:[%s5867_s9 + $0x270] ss:$8 sps:$4 sm:$0xff]  }
 0x121   : > { %3864 = vmatpush1.bf16.msra.mxu0 %v4747_v41  ;;  %3650 = vmatprep.subr.bf16.mxu1 %v4752_v42  ;;  %v4843_v41 = vld [vmem:[%s5867_s9 + $0x770] ss:$8 sps:$4 sm:$0xff]   ;;  %v4848_v42 = vld [vmem:[%s5867_s9 + $0x284] ss:$8 sps:$4 sm:$0xff]  }
 0x122   : > { %3865 = vmatprep.subr.bf16.mxu0 %v4755_v43  ;;  %v4851_v43 = vld [vmem:[%s5867_s9 + $0x784] ss:$8 sps:$4 sm:$0xff]  }
 0x124   : > { %3651 = vmatpush1.bf16.msra.mxu1 %v4750_v44  ;;  %v4846_v44 = vld [vmem:[%s5867_s9 + $0x280] ss:$8 sps:$4 sm:$0xff]  }
 0x125   : > { %3866 = vmatpush1.bf16.msra.mxu0 %v4753_v45  ;;  %3652 = vmatprep.subr.bf16.mxu1 %v4758_v46  ;;  %v4849_v45 = vld [vmem:[%s5867_s9 + $0x780] ss:$8 sps:$4 sm:$0xff]   ;;  %v4854_v46 = vld [vmem:[%s5867_s9 + $0x294] ss:$8 sps:$4 sm:$0xff]  }
 0x126   : > { %3867 = vmatprep.subr.bf16.mxu0 %v4761_v47  ;;  %v4857_v47 = vld [vmem:[%s5867_s9 + $0x794] ss:$8 sps:$4 sm:$0xff]  }
 0x128   : > { %3653 = vmatpush1.bf16.msra.mxu1 %v4756_v48  ;;  %v4852_v48 = vld [vmem:[%s5867_s9 + $0x290] ss:$8 sps:$4 sm:$0xff]  }
 0x129   : > { %3868 = vmatpush1.bf16.msra.mxu0 %v4759_v49  ;;  %3654 = vmatprep.subr.bf16.mxu1 %v4764_v50  ;;  %v4855_v49 = vld [vmem:[%s5867_s9 + $0x790] ss:$8 sps:$4 sm:$0xff]   ;;  %v4860_v50 = vld [vmem:[%s5867_s9 + $0x2a4] ss:$8 sps:$4 sm:$0xff]  }
 0x12a   : > { %3869 = vmatprep.subr.bf16.mxu0 %v4767_v51  ;;  %v4863_v51 = vld [vmem:[%s5867_s9 + $0x7a4] ss:$8 sps:$4 sm:$0xff]  }
 0x12c   : > { %3655 = vmatpush1.bf16.msra.mxu1 %v4762_v52  ;;  %v4858_v52 = vld [vmem:[%s5867_s9 + $0x2a0] ss:$8 sps:$4 sm:$0xff]  }
 0x12d   : > { %3870 = vmatpush1.bf16.msra.mxu0 %v4765_v53  ;;  %3656 = vmatprep.subr.bf16.mxu1 %v4770_v54  ;;  %v4861_v53 = vld [vmem:[%s5867_s9 + $0x7a0] ss:$8 sps:$4 sm:$0xff]   ;;  %v4866_v54 = vld [vmem:[%s5867_s9 + $0x2b4] ss:$8 sps:$4 sm:$0xff]  }
 0x12e   : > { %3871 = vmatprep.subr.bf16.mxu0 %v4773_v55  ;;  %v4869_v55 = vld [vmem:[%s5867_s9 + $0x7b4] ss:$8 sps:$4 sm:$0xff]  }
 0x130   : > { %3657 = vmatpush1.bf16.msra.mxu1 %v4768_v56  ;;  %v4864_v56 = vld [vmem:[%s5867_s9 + $0x2b0] ss:$8 sps:$4 sm:$0xff]  }
 0x131   : > { %3872 = vmatpush1.bf16.msra.mxu0 %v4771_v57  ;;  %3658 = vmatprep.subr.bf16.mxu1 %v4776_v58  ;;  %v4867_v57 = vld [vmem:[%s5867_s9 + $0x7b0] ss:$8 sps:$4 sm:$0xff]   ;;  %v4872_v58 = vld [vmem:[%s5867_s9 + $0x2c4] ss:$8 sps:$4 sm:$0xff]  }
 0x132   : > { %3873 = vmatprep.subr.bf16.mxu0 %v4779_v59  ;;  %v4875_v59 = vld [vmem:[%s5867_s9 + $0x7c4] ss:$8 sps:$4 sm:$0xff]  }
 0x134   : > { %3659 = vmatpush1.bf16.msra.mxu1 %v4774_v60  ;;  %v4870_v60 = vld [vmem:[%s5867_s9 + $0x2c0] ss:$8 sps:$4 sm:$0xff]  }
 0x135   : > { %3874 = vmatpush1.bf16.msra.mxu0 %v4777_v61  ;;  %3660 = vmatprep.subr.bf16.mxu1 %v4782_v62  ;;  %v4873_v61 = vld [vmem:[%s5867_s9 + $0x7c0] ss:$8 sps:$4 sm:$0xff]   ;;  %v4878_v62 = vld [vmem:[%s5867_s9 + $0x2d4] ss:$8 sps:$4 sm:$0xff]  }
 0x136   : > { %3875 = vmatprep.subr.bf16.mxu0 %v4785_v63  ;;  %v4881_v63 = vld [vmem:[%s5867_s9 + $0x7d4] ss:$8 sps:$4 sm:$0xff]  }
 0x138   : > { %3661 = vmatpush1.bf16.msra.mxu1 %v4780_v0  ;;  %v4876_v0 = vld [vmem:[%s5867_s9 + $0x2d0] ss:$8 sps:$4 sm:$0xff]  }
 0x139   : > { %3876 = vmatpush1.bf16.msra.mxu0 %v4783_v1  ;;  %3662 = vmatprep.subr.bf16.mxu1 %v4788_v2  ;;  %v4879_v1 = vld [vmem:[%s5867_s9 + $0x7d0] ss:$8 sps:$4 sm:$0xff]   ;;  %v4884_v2 = vld [vmem:[%s5867_s9 + $0x2e4] ss:$8 sps:$4 sm:$0xff]  }
 0x13a   : > { %3877 = vmatprep.subr.bf16.mxu0 %v4791_v3  ;;  %v4887_v3 = vld [vmem:[%s5867_s9 + $0x7e4] ss:$8 sps:$4 sm:$0xff]  }
 0x13c   : > { %3663 = vmatpush1.bf16.msra.mxu1 %v4786_v4  ;;  %v4882_v4 = vld [vmem:[%s5867_s9 + $0x2e0] ss:$8 sps:$4 sm:$0xff]  }
 0x13d   : > { %3878 = vmatpush1.bf16.msra.mxu0 %v4789_v5  ;;  %3675 = vmatprep.subr.bf16.mxu1 %v4797_v6  ;;  %v4885_v5 = vld [vmem:[%s5867_s9 + $0x7e0] ss:$8 sps:$4 sm:$0xff]   ;;  %v4890_v6 = vld [vmem:[%s5867_s9 + $0x2f4] ss:$8 sps:$4 sm:$0xff]  }
 0x13e   : > { %3890 = vmatprep.subr.bf16.mxu0 %v4803_v7  ;;  %v4893_v7 = vld [vmem:[%s5867_s9 + $0x7f4] ss:$8 sps:$4 sm:$0xff]  }
 0x13f   : > { %3665 = vmatmul.mubr.bf16.vlgmr.msra.gmra.mrb[0].mxu1 %v4792_v8  ;;  %v4888_v8 = vld [vmem:[%s5867_s9 + $0x2f0] ss:$8 sps:$4 sm:$0xff]  }
 0x140   : > { %3880 = vmatmul.mubr.bf16.vlgmr.msra.gmra.mrb[0].mxu0 %v4798_v10  ;;  %3676 = vmatpush1.bf16.msra.mxu1 %v4795_v9  ;;  %v4891_v9 = vld [vmem:[%s5867_s9 + $0x7f0] ss:$8 sps:$4 sm:$0xff]   ;;  %v4899_v10 = vld [vmem:[%s5867_s9 + $0x304] ss:$8 sps:$4 sm:$0xff]  }
 0x141   : > { %3891 = vmatpush1.bf16.msra.mxu0 %v4801_v11  ;;  %3677 = vmatprep.subr.bf16.mxu1 %v4806_v12  ;;  %v4905_v11 = vld [vmem:[%s5867_s9 + $0x804] ss:$8 sps:$4 sm:$0xff]   ;;  %v4894_v12 = vld [vmem:[%s6270_s0 + $0x10] ss:$80 sps:$4 sm:$0xff]  }
 0x142   : > { %3892 = vmatprep.subr.bf16.mxu0 %v4809_v13  ;;  %3707 = vmatprep.mubr.bf16.mxu1 %v4896_v15  ;;  %v4897_v13 = vld [vmem:[%s5867_s9 + $0x300] ss:$8 sps:$4 sm:$0xff]  }
 0x143   : > { %3922 = vmatprep.mubr.bf16.mxu0 %v4902_v19  ;;  %v4903_v15 = vld [vmem:[%s5867_s9 + $0x800] ss:$8 sps:$4 sm:$0xff]   ;;  %v5004_v19 = vld [vmem:[%s6270_s0 + $0x44] ss:$80 sps:$4 sm:$0xff]  }
 0x144   : > { %3678 = vmatpush1.bf16.msra.mxu1 %v4804_v14  ;;  %v4900_v14 = vld [vmem:[%s6270_s0 + $0x38] ss:$80 sps:$4 sm:$0xff]  }
 0x145   : > { %3893 = vmatpush1.bf16.msra.mxu0 %v4807_v16  ;;  %3679 = vmatprep.subr.bf16.mxu1 %v4812_v17  ;;  %v4908_v16 = vld [vmem:[%s5867_s9 + $0x314] ss:$8 sps:$4 sm:$0xff]  }
 0x146   : > { %3894 = vmatprep.subr.bf16.mxu0 %v4815_v18  ;;  %v4911_v17 = vld [vmem:[%s5867_s9 + $0x814] ss:$8 sps:$4 sm:$0xff]  }
 0x147   : > { %v4998_v18 = vld [vmem:[%s6270_s0 + $0x1c] ss:$80 sps:$4 sm:$0xff]  }
 0x148   : > { %3680 = vmatpush1.bf16.msra.mxu1 %v4810_v20  ;;  %v4906_v20 = vld [vmem:[%s5867_s9 + $0x310] ss:$8 sps:$4 sm:$0xff]  }
 0x149   : > { %3895 = vmatpush1.bf16.msra.mxu0 %v4813_v21  ;;  %3681 = vmatprep.subr.bf16.mxu1 %v4818_v22  ;;  %v4909_v21 = vld [vmem:[%s5867_s9 + $0x810] ss:$8 sps:$4 sm:$0xff]   ;;  %v4914_v22 = vld [vmem:[%s5867_s9 + $0x324] ss:$8 sps:$4 sm:$0xff]  }
 0x14a   : > { %3896 = vmatprep.subr.bf16.mxu0 %v4821_v23  ;;  %v4917_v23 = vld [vmem:[%s5867_s9 + $0x824] ss:$8 sps:$4 sm:$0xff]  }
 0x14c   : > { %3682 = vmatpush1.bf16.msra.mxu1 %v4816_v24  ;;  %v4912_v24 = vld [vmem:[%s5867_s9 + $0x320] ss:$8 sps:$4 sm:$0xff]  }
 0x14d   : > { %3897 = vmatpush1.bf16.msra.mxu0 %v4819_v25  ;;  %3683 = vmatprep.subr.bf16.mxu1 %v4824_v26  ;;  %v4915_v25 = vld [vmem:[%s5867_s9 + $0x820] ss:$8 sps:$4 sm:$0xff]   ;;  %v4920_v26 = vld [vmem:[%s5867_s9 + $0x334] ss:$8 sps:$4 sm:$0xff]  }
 0x14e   : > { %3898 = vmatprep.subr.bf16.mxu0 %v4827_v27  ;;  %v4923_v27 = vld [vmem:[%s5867_s9 + $0x834] ss:$8 sps:$4 sm:$0xff]  }
 0x150   : > { %3684 = vmatpush1.bf16.msra.mxu1 %v4822_v28  ;;  %v4918_v28 = vld [vmem:[%s5867_s9 + $0x330] ss:$8 sps:$4 sm:$0xff]  }
 0x151   : > { %3899 = vmatpush1.bf16.msra.mxu0 %v4825_v29  ;;  %3685 = vmatprep.subr.bf16.mxu1 %v4830_v30  ;;  %v4921_v29 = vld [vmem:[%s5867_s9 + $0x830] ss:$8 sps:$4 sm:$0xff]   ;;  %v4926_v30 = vld [vmem:[%s5867_s9 + $0x344] ss:$8 sps:$4 sm:$0xff]  }
 0x152   : > { %3900 = vmatprep.subr.bf16.mxu0 %v4833_v31  ;;  %v4929_v31 = vld [vmem:[%s5867_s9 + $0x844] ss:$8 sps:$4 sm:$0xff]  }
 0x154   : > { %3686 = vmatpush1.bf16.msra.mxu1 %v4828_v32  ;;  %v4924_v32 = vld [vmem:[%s5867_s9 + $0x340] ss:$8 sps:$4 sm:$0xff]  }
 0x155   : > { %3901 = vmatpush1.bf16.msra.mxu0 %v4831_v33  ;;  %3687 = vmatprep.subr.bf16.mxu1 %v4836_v34  ;;  %v4927_v33 = vld [vmem:[%s5867_s9 + $0x840] ss:$8 sps:$4 sm:$0xff]   ;;  %v4932_v34 = vld [vmem:[%s5867_s9 + $0x354] ss:$8 sps:$4 sm:$0xff]  }
 0x156   : > { %3902 = vmatprep.subr.bf16.mxu0 %v4839_v35  ;;  %v4935_v35 = vld [vmem:[%s5867_s9 + $0x854] ss:$8 sps:$4 sm:$0xff]  }
 0x158   : > { %3688 = vmatpush1.bf16.msra.mxu1 %v4834_v36  ;;  %v4930_v36 = vld [vmem:[%s5867_s9 + $0x350] ss:$8 sps:$4 sm:$0xff]  }
 0x159   : > { %3903 = vmatpush1.bf16.msra.mxu0 %v4837_v37  ;;  %3689 = vmatprep.subr.bf16.mxu1 %v4842_v38  ;;  %v4933_v37 = vld [vmem:[%s5867_s9 + $0x850] ss:$8 sps:$4 sm:$0xff]   ;;  %v4938_v38 = vld [vmem:[%s5867_s9 + $0x364] ss:$8 sps:$4 sm:$0xff]  }
 0x15a   : > { %3904 = vmatprep.subr.bf16.mxu0 %v4845_v39  ;;  %v4941_v39 = vld [vmem:[%s5867_s9 + $0x864] ss:$8 sps:$4 sm:$0xff]  }
 0x15c   : > { %3690 = vmatpush1.bf16.msra.mxu1 %v4840_v40  ;;  %v4936_v40 = vld [vmem:[%s5867_s9 + $0x360] ss:$8 sps:$4 sm:$0xff]  }
 0x15d   : > { %3905 = vmatpush1.bf16.msra.mxu0 %v4843_v41  ;;  %3691 = vmatprep.subr.bf16.mxu1 %v4848_v42  ;;  %v4939_v41 = vld [vmem:[%s5867_s9 + $0x860] ss:$8 sps:$4 sm:$0xff]   ;;  %v4944_v42 = vld [vmem:[%s5867_s9 + $0x374] ss:$8 sps:$4 sm:$0xff]  }
 0x15e   : > { %3906 = vmatprep.subr.bf16.mxu0 %v4851_v43  ;;  %v4947_v43 = vld [vmem:[%s5867_s9 + $0x874] ss:$8 sps:$4 sm:$0xff]  }
 0x160   : > { %3692 = vmatpush1.bf16.msra.mxu1 %v4846_v44  ;;  %v4942_v44 = vld [vmem:[%s5867_s9 + $0x370] ss:$8 sps:$4 sm:$0xff]  }
 0x161   : > { %3907 = vmatpush1.bf16.msra.mxu0 %v4849_v45  ;;  %3693 = vmatprep.subr.bf16.mxu1 %v4854_v46  ;;  %v4945_v45 = vld [vmem:[%s5867_s9 + $0x870] ss:$8 sps:$4 sm:$0xff]   ;;  %v4950_v46 = vld [vmem:[%s5867_s9 + $0x384] ss:$8 sps:$4 sm:$0xff]  }
 0x162   : > { %3908 = vmatprep.subr.bf16.mxu0 %v4857_v47  ;;  %v4953_v47 = vld [vmem:[%s5867_s9 + $0x884] ss:$8 sps:$4 sm:$0xff]  }
 0x164   : > { %3694 = vmatpush1.bf16.msra.mxu1 %v4852_v48  ;;  %v4948_v48 = vld [vmem:[%s5867_s9 + $0x380] ss:$8 sps:$4 sm:$0xff]  }
 0x165   : > { %3909 = vmatpush1.bf16.msra.mxu0 %v4855_v49  ;;  %3695 = vmatprep.subr.bf16.mxu1 %v4860_v50  ;;  %v4951_v49 = vld [vmem:[%s5867_s9 + $0x880] ss:$8 sps:$4 sm:$0xff]   ;;  %v4956_v50 = vld [vmem:[%s5867_s9 + $0x394] ss:$8 sps:$4 sm:$0xff]  }
 0x166   : > { %3910 = vmatprep.subr.bf16.mxu0 %v4863_v51  ;;  %v4959_v51 = vld [vmem:[%s5867_s9 + $0x894] ss:$8 sps:$4 sm:$0xff]  }
 0x168   : > { %3696 = vmatpush1.bf16.msra.mxu1 %v4858_v52  ;;  %v4954_v52 = vld [vmem:[%s5867_s9 + $0x390] ss:$8 sps:$4 sm:$0xff]  }
 0x169   : > { %3911 = vmatpush1.bf16.msra.mxu0 %v4861_v53  ;;  %3697 = vmatprep.subr.bf16.mxu1 %v4866_v54  ;;  %v4957_v53 = vld [vmem:[%s5867_s9 + $0x890] ss:$8 sps:$4 sm:$0xff]   ;;  %v4962_v54 = vld [vmem:[%s5867_s9 + $0x3a4] ss:$8 sps:$4 sm:$0xff]  }
 0x16a   : > { %3912 = vmatprep.subr.bf16.mxu0 %v4869_v55  ;;  %v4965_v55 = vld [vmem:[%s5867_s9 + $0x8a4] ss:$8 sps:$4 sm:$0xff]  }
 0x16c   : > { %3698 = vmatpush1.bf16.msra.mxu1 %v4864_v56  ;;  %v4960_v56 = vld [vmem:[%s5867_s9 + $0x3a0] ss:$8 sps:$4 sm:$0xff]  }
 0x16d   : > { %3913 = vmatpush1.bf16.msra.mxu0 %v4867_v57  ;;  %3699 = vmatprep.subr.bf16.mxu1 %v4872_v58  ;;  %v4963_v57 = vld [vmem:[%s5867_s9 + $0x8a0] ss:$8 sps:$4 sm:$0xff]   ;;  %v4968_v58 = vld [vmem:[%s5867_s9 + $0x3b4] ss:$8 sps:$4 sm:$0xff]  }
 0x16e   : > { %3914 = vmatprep.subr.bf16.mxu0 %v4875_v59  ;;  %v4971_v59 = vld [vmem:[%s5867_s9 + $0x8b4] ss:$8 sps:$4 sm:$0xff]  }
 0x170   : > { %3700 = vmatpush1.bf16.msra.mxu1 %v4870_v60  ;;  %v4966_v60 = vld [vmem:[%s5867_s9 + $0x3b0] ss:$8 sps:$4 sm:$0xff]  }
 0x171   : > { %3915 = vmatpush1.bf16.msra.mxu0 %v4873_v61  ;;  %3701 = vmatprep.subr.bf16.mxu1 %v4878_v62  ;;  %v4969_v61 = vld [vmem:[%s5867_s9 + $0x8b0] ss:$8 sps:$4 sm:$0xff]   ;;  %v4974_v62 = vld [vmem:[%s5867_s9 + $0x3c4] ss:$8 sps:$4 sm:$0xff]  }
 0x172   : > { %3916 = vmatprep.subr.bf16.mxu0 %v4881_v63  ;;  %v4977_v63 = vld [vmem:[%s5867_s9 + $0x8c4] ss:$8 sps:$4 sm:$0xff]  }
 0x174   : > { %3702 = vmatpush1.bf16.msra.mxu1 %v4876_v0  ;;  %v4972_v0 = vld [vmem:[%s5867_s9 + $0x3c0] ss:$8 sps:$4 sm:$0xff]  }
 0x175   : > { %3917 = vmatpush1.bf16.msra.mxu0 %v4879_v1  ;;  %3703 = vmatprep.subr.bf16.mxu1 %v4884_v2  ;;  %v4975_v1 = vld [vmem:[%s5867_s9 + $0x8c0] ss:$8 sps:$4 sm:$0xff]   ;;  %v4980_v2 = vld [vmem:[%s5867_s9 + $0x3d4] ss:$8 sps:$4 sm:$0xff]  }
 0x176   : > { %3918 = vmatprep.subr.bf16.mxu0 %v4887_v3  ;;  %v4983_v3 = vld [vmem:[%s5867_s9 + $0x8d4] ss:$8 sps:$4 sm:$0xff]  }
 0x178   : > { %3704 = vmatpush1.bf16.msra.mxu1 %v4882_v4  ;;  %v4978_v4 = vld [vmem:[%s5867_s9 + $0x3d0] ss:$8 sps:$4 sm:$0xff]  }
 0x179   : > { %3919 = vmatpush1.bf16.msra.mxu0 %v4885_v5  ;;  %3705 = vmatprep.subr.bf16.mxu1 %v4890_v6  ;;  %v4981_v5 = vld [vmem:[%s5867_s9 + $0x8d0] ss:$8 sps:$4 sm:$0xff]   ;;  %v4986_v6 = vld [vmem:[%s5867_s9 + $0x3e4] ss:$8 sps:$4 sm:$0xff]  }
 0x17a   : > { %3920 = vmatprep.subr.bf16.mxu0 %v4893_v7  ;;  %v4989_v7 = vld [vmem:[%s5867_s9 + $0x8e4] ss:$8 sps:$4 sm:$0xff]  }
 0x17c   : > { %3706 = vmatpush1.bf16.msra.mxu1 %v4888_v8  ;;  %v4984_v8 = vld [vmem:[%s5867_s9 + $0x3e0] ss:$8 sps:$4 sm:$0xff]  }
 0x17d   : > { %3921 = vmatpush1.bf16.msra.mxu0 %v4891_v9  ;;  %3718 = vmatprep.subr.bf16.mxu1 %v4899_v10  ;;  %v4987_v9 = vld [vmem:[%s5867_s9 + $0x8e0] ss:$8 sps:$4 sm:$0xff]   ;;  %v4992_v10 = vld [vmem:[%s5867_s9 + $0x3f4] ss:$8 sps:$4 sm:$0xff]  }
 0x17e   : > { %3933 = vmatprep.subr.bf16.mxu0 %v4905_v11  ;;  %v4995_v11 = vld [vmem:[%s5867_s9 + $0x8f4] ss:$8 sps:$4 sm:$0xff]  }
 0x17f   : > { %3708 = vmatmul.mubr.bf16.vlgmr.msra.gmra.mrb[0].mxu1 %v4894_v12  ;;  %v4990_v12 = vld [vmem:[%s5867_s9 + $0x3f0] ss:$8 sps:$4 sm:$0xff]  }
 0x180   : > { %3923 = vmatmul.mubr.bf16.vlgmr.msra.gmra.mrb[0].mxu0 %v4900_v14  ;;  %3719 = vmatpush1.bf16.msra.mxu1 %v4897_v13  ;;  %v4993_v13 = vld [vmem:[%s5867_s9 + $0x8f0] ss:$8 sps:$4 sm:$0xff]   ;;  %v5001_v14 = vld [vmem:[%s5867_s9 + $0x404] ss:$8 sps:$4 sm:$0xff]  }
 0x181   : > { %3934 = vmatpush1.bf16.msra.mxu0 %v4903_v15  ;;  %3720 = vmatprep.subr.bf16.mxu1 %v4908_v16  ;;  %v5007_v15 = vld [vmem:[%s5867_s9 + $0x904] ss:$8 sps:$4 sm:$0xff]   ;;  %v4996_v16 = vld [vmem:[%s6270_s0 + $0x18] ss:$80 sps:$4 sm:$0xff]  }
 0x182   : > { %3935 = vmatprep.subr.bf16.mxu0 %v4911_v17  ;;  %3750 = vmatprep.mubr.bf16.mxu1 %v4998_v18  ;;  %v5002_v17 = vld [vmem:[%s6270_s0 + $0x40] ss:$80 sps:$4 sm:$0xff]  }
 0x183   : > { %3965 = vmatprep.mubr.bf16.mxu0 %v5004_v19  ;;  %v4999_v18 = vld [vmem:[%s5867_s9 + $0x400] ss:$8 sps:$4 sm:$0xff]  }
 0x184   : > { %3721 = vmatpush1.bf16.msra.mxu1 %v4906_v20  ;;  %v5005_v19 = vld [vmem:[%s5867_s9 + $0x900] ss:$8 sps:$4 sm:$0xff]   ;;  %v5010_v20 = vld [vmem:[%s5867_s9 + $0x414] ss:$8 sps:$4 sm:$0xff]  }
 0x185   : > { %3936 = vmatpush1.bf16.msra.mxu0 %v4909_v21  ;;  %3722 = vmatprep.subr.bf16.mxu1 %v4914_v22  ;;  %v5013_v21 = vld [vmem:[%s5867_s9 + $0x914] ss:$8 sps:$4 sm:$0xff]  }
 0x186   : > { %3937 = vmatprep.subr.bf16.mxu0 %v4917_v23  ;;  %v5100_v22 = vld [vmem:[%s6270_s0 + $0x24] ss:$80 sps:$4 sm:$0xff]   ;;  %v5103_v23 = vld [vmem:[%s6270_s0 + $0x4c] ss:$80 sps:$4 sm:$0xff]  }
 0x188   : > { %3723 = vmatpush1.bf16.msra.mxu1 %v4912_v24  ;;  %v5008_v24 = vld [vmem:[%s5867_s9 + $0x410] ss:$8 sps:$4 sm:$0xff]  }
 0x189   : > { %3938 = vmatpush1.bf16.msra.mxu0 %v4915_v25  ;;  %3724 = vmatprep.subr.bf16.mxu1 %v4920_v26  ;;  %v5011_v25 = vld [vmem:[%s5867_s9 + $0x910] ss:$8 sps:$4 sm:$0xff]   ;;  %v5016_v26 = vld [vmem:[%s5867_s9 + $0x424] ss:$8 sps:$4 sm:$0xff]  }
 0x18a   : > { %3939 = vmatprep.subr.bf16.mxu0 %v4923_v27  ;;  %v5019_v27 = vld [vmem:[%s5867_s9 + $0x924] ss:$8 sps:$4 sm:$0xff]  }
 0x18c   : > { %3725 = vmatpush1.bf16.msra.mxu1 %v4918_v28  ;;  %v5014_v28 = vld [vmem:[%s5867_s9 + $0x420] ss:$8 sps:$4 sm:$0xff]  }
 0x18d   : > { %3940 = vmatpush1.bf16.msra.mxu0 %v4921_v29  ;;  %3726 = vmatprep.subr.bf16.mxu1 %v4926_v30  ;;  %v5017_v29 = vld [vmem:[%s5867_s9 + $0x920] ss:$8 sps:$4 sm:$0xff]   ;;  %v5022_v30 = vld [vmem:[%s5867_s9 + $0x434] ss:$8 sps:$4 sm:$0xff]  }
 0x18e   : > { %3941 = vmatprep.subr.bf16.mxu0 %v4929_v31  ;;  %v5025_v31 = vld [vmem:[%s5867_s9 + $0x934] ss:$8 sps:$4 sm:$0xff]  }
 0x190   : > { %3727 = vmatpush1.bf16.msra.mxu1 %v4924_v32  ;;  %v5020_v32 = vld [vmem:[%s5867_s9 + $0x430] ss:$8 sps:$4 sm:$0xff]  }
 0x191   : > { %3942 = vmatpush1.bf16.msra.mxu0 %v4927_v33  ;;  %3728 = vmatprep.subr.bf16.mxu1 %v4932_v34  ;;  %v5023_v33 = vld [vmem:[%s5867_s9 + $0x930] ss:$8 sps:$4 sm:$0xff]   ;;  %v5028_v34 = vld [vmem:[%s5867_s9 + $0x444] ss:$8 sps:$4 sm:$0xff]  }
 0x192   : > { %3943 = vmatprep.subr.bf16.mxu0 %v4935_v35  ;;  %v5031_v35 = vld [vmem:[%s5867_s9 + $0x944] ss:$8 sps:$4 sm:$0xff]  }
 0x194   : > { %3729 = vmatpush1.bf16.msra.mxu1 %v4930_v36  ;;  %v5026_v36 = vld [vmem:[%s5867_s9 + $0x440] ss:$8 sps:$4 sm:$0xff]  }
 0x195   : > { %3944 = vmatpush1.bf16.msra.mxu0 %v4933_v37  ;;  %3730 = vmatprep.subr.bf16.mxu1 %v4938_v38  ;;  %v5029_v37 = vld [vmem:[%s5867_s9 + $0x940] ss:$8 sps:$4 sm:$0xff]   ;;  %v5034_v38 = vld [vmem:[%s5867_s9 + $0x454] ss:$8 sps:$4 sm:$0xff]  }
 0x196   : > { %3945 = vmatprep.subr.bf16.mxu0 %v4941_v39  ;;  %v5037_v39 = vld [vmem:[%s5867_s9 + $0x954] ss:$8 sps:$4 sm:$0xff]  }
 0x198   : > { %3731 = vmatpush1.bf16.msra.mxu1 %v4936_v40  ;;  %v5032_v40 = vld [vmem:[%s5867_s9 + $0x450] ss:$8 sps:$4 sm:$0xff]  }
 0x199   : > { %3946 = vmatpush1.bf16.msra.mxu0 %v4939_v41  ;;  %3732 = vmatprep.subr.bf16.mxu1 %v4944_v42  ;;  %v5035_v41 = vld [vmem:[%s5867_s9 + $0x950] ss:$8 sps:$4 sm:$0xff]   ;;  %v5040_v42 = vld [vmem:[%s5867_s9 + $0x464] ss:$8 sps:$4 sm:$0xff]  }
 0x19a   : > { %3947 = vmatprep.subr.bf16.mxu0 %v4947_v43  ;;  %v5043_v43 = vld [vmem:[%s5867_s9 + $0x964] ss:$8 sps:$4 sm:$0xff]  }
 0x19c   : > { %3733 = vmatpush1.bf16.msra.mxu1 %v4942_v44  ;;  %v5038_v44 = vld [vmem:[%s5867_s9 + $0x460] ss:$8 sps:$4 sm:$0xff]  }
 0x19d   : > { %3948 = vmatpush1.bf16.msra.mxu0 %v4945_v45  ;;  %3734 = vmatprep.subr.bf16.mxu1 %v4950_v46  ;;  %v5041_v45 = vld [vmem:[%s5867_s9 + $0x960] ss:$8 sps:$4 sm:$0xff]   ;;  %v5046_v46 = vld [vmem:[%s5867_s9 + $0x474] ss:$8 sps:$4 sm:$0xff]  }
 0x19e   : > { %3949 = vmatprep.subr.bf16.mxu0 %v4953_v47  ;;  %v5049_v47 = vld [vmem:[%s5867_s9 + $0x974] ss:$8 sps:$4 sm:$0xff]  }
 0x1a0   : > { %3735 = vmatpush1.bf16.msra.mxu1 %v4948_v48  ;;  %v5044_v48 = vld [vmem:[%s5867_s9 + $0x470] ss:$8 sps:$4 sm:$0xff]  }
 0x1a1   : > { %3950 = vmatpush1.bf16.msra.mxu0 %v4951_v49  ;;  %3736 = vmatprep.subr.bf16.mxu1 %v4956_v50  ;;  %v5047_v49 = vld [vmem:[%s5867_s9 + $0x970] ss:$8 sps:$4 sm:$0xff]   ;;  %v5052_v50 = vld [vmem:[%s5867_s9 + $0x484] ss:$8 sps:$4 sm:$0xff]  }
 0x1a2   : > { %3951 = vmatprep.subr.bf16.mxu0 %v4959_v51  ;;  %v5055_v51 = vld [vmem:[%s5867_s9 + $0x984] ss:$8 sps:$4 sm:$0xff]  }
 0x1a4   : > { %3737 = vmatpush1.bf16.msra.mxu1 %v4954_v52  ;;  %v5050_v52 = vld [vmem:[%s5867_s9 + $0x480] ss:$8 sps:$4 sm:$0xff]  }
 0x1a5   : > { %3952 = vmatpush1.bf16.msra.mxu0 %v4957_v53  ;;  %3738 = vmatprep.subr.bf16.mxu1 %v4962_v54  ;;  %v5053_v53 = vld [vmem:[%s5867_s9 + $0x980] ss:$8 sps:$4 sm:$0xff]   ;;  %v5058_v54 = vld [vmem:[%s5867_s9 + $0x494] ss:$8 sps:$4 sm:$0xff]  }
 0x1a6   : > { %3953 = vmatprep.subr.bf16.mxu0 %v4965_v55  ;;  %v5061_v55 = vld [vmem:[%s5867_s9 + $0x994] ss:$8 sps:$4 sm:$0xff]  }
 0x1a8   : > { %3739 = vmatpush1.bf16.msra.mxu1 %v4960_v56  ;;  %v5056_v56 = vld [vmem:[%s5867_s9 + $0x490] ss:$8 sps:$4 sm:$0xff]  }
 0x1a9   : > { %3954 = vmatpush1.bf16.msra.mxu0 %v4963_v57  ;;  %3740 = vmatprep.subr.bf16.mxu1 %v4968_v58  ;;  %v5059_v57 = vld [vmem:[%s5867_s9 + $0x990] ss:$8 sps:$4 sm:$0xff]   ;;  %v5064_v58 = vld [vmem:[%s5867_s9 + $0x4a4] ss:$8 sps:$4 sm:$0xff]  }
 0x1aa   : > { %3955 = vmatprep.subr.bf16.mxu0 %v4971_v59  ;;  %v5067_v59 = vld [vmem:[%s5867_s9 + $0x9a4] ss:$8 sps:$4 sm:$0xff]  }
 0x1ac   : > { %3741 = vmatpush1.bf16.msra.mxu1 %v4966_v60  ;;  %v5062_v60 = vld [vmem:[%s5867_s9 + $0x4a0] ss:$8 sps:$4 sm:$0xff]  }
 0x1ad   : > { %3956 = vmatpush1.bf16.msra.mxu0 %v4969_v61  ;;  %3742 = vmatprep.subr.bf16.mxu1 %v4974_v62  ;;  %v5065_v61 = vld [vmem:[%s5867_s9 + $0x9a0] ss:$8 sps:$4 sm:$0xff]   ;;  %v5070_v62 = vld [vmem:[%s5867_s9 + $0x4b4] ss:$8 sps:$4 sm:$0xff]  }
 0x1ae   : > { %3957 = vmatprep.subr.bf16.mxu0 %v4977_v63  ;;  %v5073_v63 = vld [vmem:[%s5867_s9 + $0x9b4] ss:$8 sps:$4 sm:$0xff]  }
 0x1b0   : > { %3743 = vmatpush1.bf16.msra.mxu1 %v4972_v0  ;;  %v5068_v0 = vld [vmem:[%s5867_s9 + $0x4b0] ss:$8 sps:$4 sm:$0xff]  }
 0x1b1   : > { %3958 = vmatpush1.bf16.msra.mxu0 %v4975_v1  ;;  %3744 = vmatprep.subr.bf16.mxu1 %v4980_v2  ;;  %v5071_v1 = vld [vmem:[%s5867_s9 + $0x9b0] ss:$8 sps:$4 sm:$0xff]   ;;  %v5076_v2 = vld [vmem:[%s5867_s9 + $0x4c4] ss:$8 sps:$4 sm:$0xff]  }
 0x1b2   : > { %3959 = vmatprep.subr.bf16.mxu0 %v4983_v3  ;;  %v5079_v3 = vld [vmem:[%s5867_s9 + $0x9c4] ss:$8 sps:$4 sm:$0xff]  }
 0x1b4   : > { %3745 = vmatpush1.bf16.msra.mxu1 %v4978_v4  ;;  %v5074_v4 = vld [vmem:[%s5867_s9 + $0x4c0] ss:$8 sps:$4 sm:$0xff]  }
 0x1b5   : > { %3960 = vmatpush1.bf16.msra.mxu0 %v4981_v5  ;;  %3746 = vmatprep.subr.bf16.mxu1 %v4986_v6  ;;  %v5077_v5 = vld [vmem:[%s5867_s9 + $0x9c0] ss:$8 sps:$4 sm:$0xff]   ;;  %v5082_v6 = vld [vmem:[%s5867_s9 + $0x4d4] ss:$8 sps:$4 sm:$0xff]  }
 0x1b6   : > { %3961 = vmatprep.subr.bf16.mxu0 %v4989_v7  ;;  %v5085_v7 = vld [vmem:[%s5867_s9 + $0x9d4] ss:$8 sps:$4 sm:$0xff]  }
 0x1b8   : > { %3747 = vmatpush1.bf16.msra.mxu1 %v4984_v8  ;;  %v5080_v8 = vld [vmem:[%s5867_s9 + $0x4d0] ss:$8 sps:$4 sm:$0xff]  }
 0x1b9   : > { %3962 = vmatpush1.bf16.msra.mxu0 %v4987_v9  ;;  %3748 = vmatprep.subr.bf16.mxu1 %v4992_v10  ;;  %v5083_v9 = vld [vmem:[%s5867_s9 + $0x9d0] ss:$8 sps:$4 sm:$0xff]   ;;  %v5088_v10 = vld [vmem:[%s5867_s9 + $0x4e4] ss:$8 sps:$4 sm:$0xff]  }
 0x1ba   : > { %3963 = vmatprep.subr.bf16.mxu0 %v4995_v11  ;;  %v5091_v11 = vld [vmem:[%s5867_s9 + $0x9e4] ss:$8 sps:$4 sm:$0xff]  }
 0x1bc   : > { %3749 = vmatpush1.bf16.msra.mxu1 %v4990_v12  ;;  %v5086_v12 = vld [vmem:[%s5867_s9 + $0x4e0] ss:$8 sps:$4 sm:$0xff]  }
 0x1bd   : > { %3964 = vmatpush1.bf16.msra.mxu0 %v4993_v13  ;;  %3761 = vmatprep.subr.bf16.mxu1 %v5001_v14  ;;  %v5089_v13 = vld [vmem:[%s5867_s9 + $0x9e0] ss:$8 sps:$4 sm:$0xff]   ;;  %v5094_v14 = vld [vmem:[%s5867_s9 + $0x4f4] ss:$8 sps:$4 sm:$0xff]  }
 0x1be   : > { %3976 = vmatprep.subr.bf16.mxu0 %v5007_v15  ;;  %v5097_v15 = vld [vmem:[%s5867_s9 + $0x9f4] ss:$8 sps:$4 sm:$0xff]  }
 0x1bf   : > { %3751 = vmatmul.mubr.bf16.vlgmr.msra.gmra.mrb[0].mxu1 %v4996_v16  ;;  %v5092_v16 = vld [vmem:[%s5867_s9 + $0x4f0] ss:$8 sps:$4 sm:$0xff]  }
 0x1c0   : > { %3966 = vmatmul.mubr.bf16.vlgmr.msra.gmra.mrb[0].mxu0 %v5002_v17  ;;  %3762 = vmatpush1.bf16.msra.mxu1 %v4999_v18  ;;  %v5095_v17 = vld [vmem:[%s5867_s9 + $0x9f0] ss:$8 sps:$4 sm:$0xff]  }
 0x1c1   : > { %3977 = vmatpush1.bf16.msra.mxu0 %v5005_v19  ;;  %3763 = vmatprep.subr.bf16.mxu1 %v5010_v20  ;;  %v5098_v18 = vld [vmem:[%s6270_s0 + $0x20] ss:$80 sps:$4 sm:$0xff]   ;;  %v5101_v19 = vld [vmem:[%s6270_s0 + $0x48] ss:$80 sps:$4 sm:$0xff]   ;;  %v1879_v20 = vlaneseq }
 0x1c2   : > { %3978 = vmatprep.subr.bf16.mxu0 %v5013_v21  ;;  %3793 = vmatprep.mubr.bf16.mxu1 %v5100_v22 }
 0x1c3   : > { %4008 = vmatprep.mubr.bf16.mxu0 %v5103_v23  ;;  %v1880_v21 = vshrl.u32 %v1879_v20, 7  ;;  %v1877_v23 = vld [vmem:[%s1533_s20] sm:$0x3] }
 0x1c4   : > { %3764 = vmatpush1.bf16.msra.mxu1 %v5008_v24 }
 0x1c5   : > { %3979 = vmatpush1.bf16.msra.mxu0 %v5011_v25  ;;  %3765 = vmatprep.subr.bf16.mxu1 %v5016_v26  ;;  %v1881_v22 = vsub.s32 0, %v1880_v21  ;;  %v1885_v24 = vsub.s32 1, %v1880_v21 }
 0x1c6   : > { %3980 = vmatprep.subr.bf16.mxu0 %v5019_v27 }
 0x1c7   : > { %v1882_v25 = vrot.slane %v1877_v23, %v1881_v22  ;;  %v1886_v26 = vrot.slane %v1877_v23, %v1885_v24 }
 0x1c8   : > { %3766 = vmatpush1.bf16.msra.mxu1 %v5014_v28 }
 0x1c9   : > { %3981 = vmatpush1.bf16.msra.mxu0 %v5017_v29  ;;  %3767 = vmatprep.subr.bf16.mxu1 %v5022_v30 }
 0x1ca   : > { %3982 = vmatprep.subr.bf16.mxu0 %v5025_v31 }
 0x1cc   : > { %3768 = vmatpush1.bf16.msra.mxu1 %v5020_v32 }
 0x1cd   : > { %3983 = vmatpush1.bf16.msra.mxu0 %v5023_v33  ;;  %3769 = vmatprep.subr.bf16.mxu1 %v5028_v34 }
 0x1ce   : > { %3984 = vmatprep.subr.bf16.mxu0 %v5031_v35 }
 0x1d0   : > { %3770 = vmatpush1.bf16.msra.mxu1 %v5026_v36 }
 0x1d1   : > { %3985 = vmatpush1.bf16.msra.mxu0 %v5029_v37  ;;  %3771 = vmatprep.subr.bf16.mxu1 %v5034_v38 }
 0x1d2   : > { %3986 = vmatprep.subr.bf16.mxu0 %v5037_v39 }
 0x1d4   : > { %3772 = vmatpush1.bf16.msra.mxu1 %v5032_v40 }
 0x1d5   : > { %3987 = vmatpush1.bf16.msra.mxu0 %v5035_v41  ;;  %3773 = vmatprep.subr.bf16.mxu1 %v5040_v42 }
 0x1d6   : > { %3988 = vmatprep.subr.bf16.mxu0 %v5043_v43 }
 0x1d8   : > { %3774 = vmatpush1.bf16.msra.mxu1 %v5038_v44 }
 0x1d9   : > { %3989 = vmatpush1.bf16.msra.mxu0 %v5041_v45  ;;  %3775 = vmatprep.subr.bf16.mxu1 %v5046_v46 }
 0x1da   : > { %3990 = vmatprep.subr.bf16.mxu0 %v5049_v47 }
 0x1dc   : > { %3776 = vmatpush1.bf16.msra.mxu1 %v5044_v48 }
 0x1dd   : > { %3991 = vmatpush1.bf16.msra.mxu0 %v5047_v49  ;;  %3777 = vmatprep.subr.bf16.mxu1 %v5052_v50 }
 0x1de   : > { %3992 = vmatprep.subr.bf16.mxu0 %v5055_v51 }
 0x1e0   : > { %3778 = vmatpush1.bf16.msra.mxu1 %v5050_v52 }
 0x1e1   : > { %3993 = vmatpush1.bf16.msra.mxu0 %v5053_v53  ;;  %3779 = vmatprep.subr.bf16.mxu1 %v5058_v54 }
 0x1e2   : > { %3994 = vmatprep.subr.bf16.mxu0 %v5061_v55 }
 0x1e4   : > { %3780 = vmatpush1.bf16.msra.mxu1 %v5056_v56 }
 0x1e5   : > { %3995 = vmatpush1.bf16.msra.mxu0 %v5059_v57  ;;  %3781 = vmatprep.subr.bf16.mxu1 %v5064_v58 }
 0x1e6   : > { %3996 = vmatprep.subr.bf16.mxu0 %v5067_v59 }
 0x1e8   : > { %3782 = vmatpush1.bf16.msra.mxu1 %v5062_v60 }
 0x1e9   : > { %3997 = vmatpush1.bf16.msra.mxu0 %v5065_v61  ;;  %3783 = vmatprep.subr.bf16.mxu1 %v5070_v62 }
 0x1ea   : > { %3998 = vmatprep.subr.bf16.mxu0 %v5073_v63 }
 0x1ec   : > { %3784 = vmatpush1.bf16.msra.mxu1 %v5068_v0 }
 0x1ed   : > { %3999 = vmatpush1.bf16.msra.mxu0 %v5071_v1  ;;  %3785 = vmatprep.subr.bf16.mxu1 %v5076_v2 }
 0x1ee   : > { %4000 = vmatprep.subr.bf16.mxu0 %v5079_v3 }
 0x1f0   : > { %3786 = vmatpush1.bf16.msra.mxu1 %v5074_v4 }
 0x1f1   : > { %4001 = vmatpush1.bf16.msra.mxu0 %v5077_v5  ;;  %3787 = vmatprep.subr.bf16.mxu1 %v5082_v6 }
 0x1f2   : > { %4002 = vmatprep.subr.bf16.mxu0 %v5085_v7 }
 0x1f4   : > { %3788 = vmatpush1.bf16.msra.mxu1 %v5080_v8 }
 0x1f5   : > { %4003 = vmatpush1.bf16.msra.mxu0 %v5083_v9  ;;  %3789 = vmatprep.subr.bf16.mxu1 %v5088_v10 }
 0x1f6   : > { %4004 = vmatprep.subr.bf16.mxu0 %v5091_v11 }
 0x1f8   : > { %3790 = vmatpush1.bf16.msra.mxu1 %v5086_v12 }
 0x1f9   : > { %4005 = vmatpush1.bf16.msra.mxu0 %v5089_v13  ;;  %3791 = vmatprep.subr.bf16.mxu1 %v5094_v14 }
 0x1fa   : > { %4006 = vmatprep.subr.bf16.mxu0 %v5097_v15 }
 0x1fc   : > { %3792 = vmatpush1.bf16.msra.mxu1 %v5092_v16 }
 0x1fd   : > { %4007 = vmatpush1.bf16.msra.mxu0 %v5095_v17 }
 0x1ff   : > { %3794 = vmatmul.mubr.bf16.vlgmr.msra.gmra.mrb[0].mxu1 %v5098_v18 }
 0x200   : > { %4009 = vmatmul.mubr.bf16.vlgmr.msra.gmra.mrb[0].mxu0 %v5101_v19 }
 0x2d2   : > { %v3795_v27 = vpop.f32.mrb[0].mxu1 }
 0x2d3   : > { %v4010_v28 = vpop.f32.mrb[0].mxu0  ;;  %v4512_v29 = vadd.f32 %v3795_v27, %v1882_v25  ;;  %v3797_v30 = vpop.f32.mrb[1].mxu1 }
 0x2d4   : > { %v4012_v31 = vpop.f32.mrb[1].mxu0  ;;  %v4514_v32 = vadd.f32 %v3797_v30, %v1886_v26  ;;  %v3799_v33 = vpop.f32.mrb[2].mxu1 }
 0x2d5   : > { %v4014_v34 = vpop.f32.mrb[2].mxu0  ;;  %v4513_v35 = vadd.f32 %v4512_v29, %v4010_v28  ;;  %v4516_v36 = vadd.f32 %v3799_v33, %v1882_v25  ;;  %v3801_v37 = vpop.f32.mrb[3].mxu1 }
 0x2d6   : > { %v4016_v38 = vpop.f32.mrb[3].mxu0  ;;  %v4515_v39 = vadd.f32 %v4514_v32, %v4012_v31  ;;  %v4518_v40 = vadd.f32 %v3801_v37, %v1886_v26  ;;  %4033 = sbr.rel (!%p5199_p6) target bundleno = 741 (0x2e5), region = 74 }
 0x2d7   : > { %v4019_v41 = vmax.f32 %v4513_v35, 0.0  ;;  %v4517_v42 = vadd.f32 %v4516_v36, %v4014_v34 }
 0x2d8   : > { %v4020_v43 = vmax.f32 %v4515_v39, 0.0  ;;  %v4519_v44 = vadd.f32 %v4518_v40, %v4016_v38 }
 0x2d9   : > { %4023 = vst [vmem:[%s1521_s24] sm:$0xff] %v4019_v41  ;;  %v4021_v45 = vmax.f32 %v4517_v42, 0.0 }
 0x2da   : > { %4024 = vst [vmem:[%s1521_s24 + $0x8] sm:$0xff] %v4020_v43  ;;  %v4022_v46 = vmax.f32 %v4519_v44, 0.0 }
 0x2db   : > { %4025 = vst [vmem:[%s1521_s24 + $0x10] sm:$0xff] %v4021_v45 }
 0x2dc   : > { %4026 = vst [vmem:[%s1521_s24 + $0x18] sm:$0xff] %v4022_v46 }
 0x2e0   : > { %v4052_v47 = vld [vmem:[%s1521_s24] sm:$0xff] }
 0x2e1   : > { %v4054_v48 = vld [vmem:[%s1521_s24 + $0x8] sm:$0xff]  ;;  %4053 = vst [vmem:[%s4039_s26] sm:$0xff] %v4052_v47 }
 0x2e2   : > { %v4056_v49 = vld [vmem:[%s1521_s24 + $0x10] sm:$0xff]  ;;  %4055 = vst [vmem:[%s4039_s26 + $0x8] sm:$0xff] %v4054_v48 }
 0x2e3   : > { %v4058_v50 = vld [vmem:[%s1521_s24 + $0x18] sm:$0xff]  ;;  %4057 = vst [vmem:[%s4039_s26 + $0xa0] sm:$0xff] %v4056_v49 }
 0x2e4   : > { %4059 = vst [vmem:[%s4039_s26 + $0xa8] sm:$0xff] %v4058_v50 }
 0x2e5 PF: > { %s13_s16 = sadd.s32 1, %s5142_s16   ;;  %s6275_s12 = smov %s5130_s13 }
 0x2e6   : > { %p10_p12 = scmp.ge.s32.totalorder %s13_s16, 12   ;;  %s6276_s13 = smov %s5204_s22 }
 0x2e7   : > { %s6277_s14 = smov %s5138_s15  ;;  %s6278_s15 = smov %s6280_s17 }
 0x2e8   :  { %12 = sbr.rel (!%p10_p12) target bundleno = 3 (0x3), region = 134 }

// kernel: det_forward.17
= control target key start
LH: loop header
LB: loop body
LE: loop exit
PB: predicated region body
PF: predicated region fallthrough
CT: control target
= control target key end

     0   :  { %vm1832_vm0 = vcmask 523264   ;;  %s2999_s1 = inlined_call_operand.vmem [shape: bf16[2560,64], index: 1, kind: input, shape index: {}]   ;;  %s3000_s0 = inlined_call_operand.vmem [shape: bf16[16,2560], index: 0, kind: input, shape index: {}]   ;;  %s3001_s2 = inlined_call_operand.vmem [shape: f32[1,64], index: 2, kind: input, shape index: {}]   ;;  %s3002_s3 = inlined_call_operand.vmem [shape: f32[16,64], index: 3, kind: output, shape index: {}]  }
   0x1   :  { %v2240_v0 = vld [vmem:[%s2999_s1 + $0x40] sm:$0xff]   ;;  %v2244_v4 = vld [vmem:[%s2999_s1 + $0x48] sm:$0xff]   ;;  %v2248_v8 = vld [vmem:[%s2999_s1 + $0x50] sm:$0xff]  }
   0x2   :  { %v2241_v1 = vld [vmem:[%s2999_s1 + $0xc0] sm:$0xff]   ;;  %2020 = vmatprep.subr.bf16.mxu0 %v2240_v0  ;;  %v2245_v5 = vld [vmem:[%s2999_s1 + $0xc8] sm:$0xff]   ;;  %v2249_v9 = vld [vmem:[%s2999_s1 + $0xd0] sm:$0xff]  }
   0x3   :  { %v2242_v2 = vld [vmem:[%s2999_s1] sm:$0xff]   ;;  %2042 = vmatprep.subr.bf16.mxu1 %v2241_v1  ;;  %v2246_v6 = vld [vmem:[%s2999_s1 + $0x8] sm:$0xff]   ;;  %v2250_v10 = vld [vmem:[%s2999_s1 + $0x10] sm:$0xff]  }
   0x4   :  { %v2243_v3 = vld [vmem:[%s2999_s1 + $0x80] sm:$0xff]   ;;  %2021 = vmatpush3.bf16.msra.mxu0 %v2242_v2  ;;  %v2247_v7 = vld [vmem:[%s2999_s1 + $0x88] sm:$0xff]   ;;  %v2251_v11 = vld [vmem:[%s2999_s1 + $0x90] sm:$0xff]  }
   0x5   :  { %2043 = vmatpush3.bf16.msra.mxu1 %v2243_v3  ;;  %2022 = vmatprep.subr.bf16.mxu0 %v2244_v4  ;;  %v2252_v12 = vld [vmem:[%s2999_s1 + $0x58] sm:$0xff]   ;;  %v2256_v16 = vld [vmem:[%s2999_s1 + $0x60] sm:$0xff]   ;;  %v2260_v20 = vld [vmem:[%s2999_s1 + $0x68] sm:$0xff]  }
   0x6   :  { %2044 = vmatprep.subr.bf16.mxu1 %v2245_v5  ;;  %v2253_v13 = vld [vmem:[%s2999_s1 + $0xd8] sm:$0xff]   ;;  %v2257_v17 = vld [vmem:[%s2999_s1 + $0xe0] sm:$0xff]   ;;  %v2261_v21 = vld [vmem:[%s2999_s1 + $0xe8] sm:$0xff]  }
   0x7   :  { %v2254_v14 = vld [vmem:[%s2999_s1 + $0x18] sm:$0xff]   ;;  %v2258_v18 = vld [vmem:[%s2999_s1 + $0x20] sm:$0xff]   ;;  %v2262_v22 = vld [vmem:[%s2999_s1 + $0x28] sm:$0xff]  }
   0x8   :  { %2023 = vmatpush3.bf16.msra.mxu0 %v2246_v6  ;;  %v2255_v15 = vld [vmem:[%s2999_s1 + $0x98] sm:$0xff]   ;;  %v2259_v19 = vld [vmem:[%s2999_s1 + $0xa0] sm:$0xff]   ;;  %v2263_v23 = vld [vmem:[%s2999_s1 + $0xa8] sm:$0xff]  }
   0x9   :  { %2045 = vmatpush3.bf16.msra.mxu1 %v2247_v7  ;;  %2024 = vmatprep.subr.bf16.mxu0 %v2248_v8  ;;  %v2264_v24 = vld [vmem:[%s2999_s1 + $0x70] sm:$0xff]   ;;  %v2268_v28 = vld [vmem:[%s2999_s1 + $0x78] sm:$0xff]   ;;  %v2278_v36 = vld [vmem:[%s2999_s1 + $0x140] sm:$0xff]  }
   0xa   :  { %2046 = vmatprep.subr.bf16.mxu1 %v2249_v9  ;;  %v2265_v25 = vld [vmem:[%s2999_s1 + $0xf0] sm:$0xff]   ;;  %v2269_v29 = vld [vmem:[%s2999_s1 + $0xf8] sm:$0xff]   ;;  %v2279_v37 = vld [vmem:[%s2999_s1 + $0x1c0] sm:$0xff]  }
   0xb   :  { %v2266_v26 = vld [vmem:[%s2999_s1 + $0x30] sm:$0xff]   ;;  %v2270_v30 = vld [vmem:[%s2999_s1 + $0x38] sm:$0xff]   ;;  %v2280_v38 = vld [vmem:[%s2999_s1 + $0x100] sm:$0xff]  }
   0xc   :  { %2025 = vmatpush3.bf16.msra.mxu0 %v2250_v10  ;;  %v2267_v27 = vld [vmem:[%s2999_s1 + $0xb0] sm:$0xff]   ;;  %v2271_v31 = vld [vmem:[%s2999_s1 + $0xb8] sm:$0xff]   ;;  %v2281_v39 = vld [vmem:[%s2999_s1 + $0x180] sm:$0xff]  }
   0xd   :  { %2047 = vmatpush3.bf16.msra.mxu1 %v2251_v11  ;;  %2026 = vmatprep.subr.bf16.mxu0 %v2252_v12  ;;  %v2272_v32 = vld [vmem:[%s3000_s0] ss:$80 sps:$4 sm:$0xff]   ;;  %v2274_v33 = vld [vmem:[%s3000_s0 + $0x4] ss:$80 sps:$4 sm:$0xff]   ;;  %v2275_v34 = vld [vmem:[%s3000_s0 + $0x8] ss:$80 sps:$4 sm:$0xff]  }
   0xe   :  { %2048 = vmatprep.subr.bf16.mxu1 %v2253_v13  ;;  %v2277_v35 = vld [vmem:[%s3000_s0 + $0xc] ss:$80 sps:$4 sm:$0xff]   ;;  %1454 = vmatprep.mubr.bf16.mxu0 %v2274_v33  ;;  %v2286_v44 = vld [vmem:[%s2999_s1 + $0x150] sm:$0xff]   ;;  %v2294_v52 = vld [vmem:[%s2999_s1 + $0x160] sm:$0xff]  }
   0xf   :  { %1495 = vmatprep.mubr.bf16.mxu1 %v2277_v35  ;;  %v2282_v40 = vld [vmem:[%s2999_s1 + $0x148] sm:$0xff]   ;;  %v2287_v45 = vld [vmem:[%s2999_s1 + $0x1d0] sm:$0xff]   ;;  %v2290_v48 = vld [vmem:[%s2999_s1 + $0x158] sm:$0xff]  }
  0x10   :  { %2027 = vmatpush3.bf16.msra.mxu0 %v2254_v14  ;;  %v2283_v41 = vld [vmem:[%s2999_s1 + $0x1c8] sm:$0xff]   ;;  %v2288_v46 = vld [vmem:[%s2999_s1 + $0x110] sm:$0xff]   ;;  %v2291_v49 = vld [vmem:[%s2999_s1 + $0x1d8] sm:$0xff]  }
  0x11   :  { %2049 = vmatpush3.bf16.msra.mxu1 %v2255_v15  ;;  %2028 = vmatprep.subr.bf16.mxu0 %v2256_v16  ;;  %v2284_v42 = vld [vmem:[%s2999_s1 + $0x108] sm:$0xff]   ;;  %v2289_v47 = vld [vmem:[%s2999_s1 + $0x190] sm:$0xff]   ;;  %v2292_v50 = vld [vmem:[%s2999_s1 + $0x118] sm:$0xff]  }
  0x12   :  { %2050 = vmatprep.subr.bf16.mxu1 %v2257_v17  ;;  %v2285_v43 = vld [vmem:[%s2999_s1 + $0x188] sm:$0xff]   ;;  %v2293_v51 = vld [vmem:[%s2999_s1 + $0x198] sm:$0xff]   ;;  %v2295_v53 = vld [vmem:[%s2999_s1 + $0x1e0] sm:$0xff]  }
  0x13   :  { %v2296_v54 = vld [vmem:[%s2999_s1 + $0x120] sm:$0xff]   ;;  %v2298_v56 = vld [vmem:[%s2999_s1 + $0x168] sm:$0xff]   ;;  %v2302_v60 = vld [vmem:[%s2999_s1 + $0x170] sm:$0xff]  }
  0x14   :  { %2029 = vmatpush3.bf16.msra.mxu0 %v2258_v18  ;;  %v2297_v55 = vld [vmem:[%s2999_s1 + $0x1a0] sm:$0xff]   ;;  %v2299_v57 = vld [vmem:[%s2999_s1 + $0x1e8] sm:$0xff]   ;;  %v2303_v61 = vld [vmem:[%s2999_s1 + $0x1f0] sm:$0xff]  }
  0x15   :  { %2051 = vmatpush3.bf16.msra.mxu1 %v2259_v19  ;;  %2030 = vmatprep.subr.bf16.mxu0 %v2260_v20  ;;  %v2300_v58 = vld [vmem:[%s2999_s1 + $0x128] sm:$0xff]   ;;  %v2304_v62 = vld [vmem:[%s2999_s1 + $0x130] sm:$0xff]   ;;  %v2306_v0 = vld [vmem:[%s2999_s1 + $0x178] sm:$0xff]  }
  0x16   :  { %2052 = vmatprep.subr.bf16.mxu1 %v2261_v21  ;;  %v2301_v59 = vld [vmem:[%s2999_s1 + $0x1a8] sm:$0xff]   ;;  %v2305_v63 = vld [vmem:[%s2999_s1 + $0x1b0] sm:$0xff]   ;;  %v2307_v1 = vld [vmem:[%s2999_s1 + $0x1f8] sm:$0xff]  }
  0x17   :  { %v2308_v2 = vld [vmem:[%s2999_s1 + $0x138] sm:$0xff]   ;;  %v2310_v4 = vld [vmem:[%s3000_s0 + $0x10] ss:$80 sps:$4 sm:$0xff]   ;;  %v2312_v5 = vld [vmem:[%s3000_s0 + $0x14] ss:$80 sps:$4 sm:$0xff]  }
  0x18   :  { %2031 = vmatpush3.bf16.msra.mxu0 %v2262_v22  ;;  %v2309_v3 = vld [vmem:[%s2999_s1 + $0x1b8] sm:$0xff]   ;;  %v2316_v8 = vld [vmem:[%s2999_s1 + $0x240] sm:$0xff]   ;;  %v2320_v12 = vld [vmem:[%s2999_s1 + $0x248] sm:$0xff]  }
  0x19   :  { %2053 = vmatpush3.bf16.msra.mxu1 %v2263_v23  ;;  %2032 = vmatprep.subr.bf16.mxu0 %v2264_v24  ;;  %v2313_v6 = vld [vmem:[%s3000_s0 + $0x18] ss:$80 sps:$4 sm:$0xff]   ;;  %v2315_v7 = vld [vmem:[%s3000_s0 + $0x1c] ss:$80 sps:$4 sm:$0xff]   ;;  %v2317_v9 = vld [vmem:[%s2999_s1 + $0x2c0] sm:$0xff]  }
  0x1a   :  { %2054 = vmatprep.subr.bf16.mxu1 %v2265_v25  ;;  %v2318_v10 = vld [vmem:[%s2999_s1 + $0x200] sm:$0xff]   ;;  %v2321_v13 = vld [vmem:[%s2999_s1 + $0x2c8] sm:$0xff]   ;;  %v2324_v16 = vld [vmem:[%s2999_s1 + $0x250] sm:$0xff]  }
  0x1b   :  { %v2319_v11 = vld [vmem:[%s2999_s1 + $0x280] sm:$0xff]   ;;  %v2322_v14 = vld [vmem:[%s2999_s1 + $0x208] sm:$0xff]   ;;  %v2325_v17 = vld [vmem:[%s2999_s1 + $0x2d0] sm:$0xff]  }
  0x1c   :  { %2033 = vmatpush3.bf16.msra.mxu0 %v2266_v26  ;;  %v2323_v15 = vld [vmem:[%s2999_s1 + $0x288] sm:$0xff]   ;;  %v2326_v18 = vld [vmem:[%s2999_s1 + $0x210] sm:$0xff]   ;;  %v2328_v20 = vld [vmem:[%s2999_s1 + $0x258] sm:$0xff]  }
  0x1d   :  { %2055 = vmatpush3.bf16.msra.mxu1 %v2267_v27  ;;  %2034 = vmatprep.subr.bf16.mxu0 %v2268_v28  ;;  %v2327_v19 = vld [vmem:[%s2999_s1 + $0x290] sm:$0xff]   ;;  %v2329_v21 = vld [vmem:[%s2999_s1 + $0x2d8] sm:$0xff]   ;;  %v2332_v24 = vld [vmem:[%s2999_s1 + $0x260] sm:$0xff]  }
  0x1e   :  { %2056 = vmatprep.subr.bf16.mxu1 %v2269_v29  ;;  %v2330_v22 = vld [vmem:[%s2999_s1 + $0x218] sm:$0xff]   ;;  %v2333_v25 = vld [vmem:[%s2999_s1 + $0x2e0] sm:$0xff]   ;;  %v2336_v28 = vld [vmem:[%s2999_s1 + $0x268] sm:$0xff]  }
  0x1f   :  { %v2331_v23 = vld [vmem:[%s2999_s1 + $0x298] sm:$0xff]   ;;  %v2334_v26 = vld [vmem:[%s2999_s1 + $0x220] sm:$0xff]   ;;  %v2337_v29 = vld [vmem:[%s2999_s1 + $0x2e8] sm:$0xff]  }
  0x20   :  { %2035 = vmatpush3.bf16.msra.mxu0 %v2270_v30  ;;  %v2335_v27 = vld [vmem:[%s2999_s1 + $0x2a0] sm:$0xff]   ;;  %v2338_v30 = vld [vmem:[%s2999_s1 + $0x228] sm:$0xff]   ;;  %v2341_v33 = vld [vmem:[%s2999_s1 + $0x2f0] sm:$0xff]  }
  0x21   :  { %2057 = vmatpush3.bf16.msra.mxu1 %v2271_v31  ;;  %2064 = vmatprep.subr.bf16.mxu0 %v2278_v36  ;;  %v2339_v31 = vld [vmem:[%s2999_s1 + $0x2a8] sm:$0xff]   ;;  %v2343_v35 = vld [vmem:[%s2999_s1 + $0x2b0] sm:$0xff]   ;;  %v2344_v36 = vld [vmem:[%s2999_s1 + $0x278] sm:$0xff]  }
  0x22   :  { %2086 = vmatprep.subr.bf16.mxu1 %v2279_v37  ;;  %v2345_v37 = vld [vmem:[%s2999_s1 + $0x2f8] sm:$0xff]  }
  0x23   :  { %1455 = vmatmul.mubr.bf16.vlgmr.msra.gmra.mrb[0].mxu0 %v2272_v32  ;;  %v2340_v32 = vld [vmem:[%s2999_s1 + $0x270] sm:$0xff]  }
  0x24   :  { %1496 = vmatmul.mubr.bf16.vlgmr.msra.gmra.mrb[0].mxu1 %v2275_v34  ;;  %2065 = vmatpush3.bf16.msra.mxu0 %v2280_v38  ;;  %v2342_v34 = vld [vmem:[%s2999_s1 + $0x230] sm:$0xff]   ;;  %v2346_v38 = vld [vmem:[%s2999_s1 + $0x238] sm:$0xff]  }
  0x25   :  { %2087 = vmatpush3.bf16.msra.mxu1 %v2281_v39  ;;  %2066 = vmatprep.subr.bf16.mxu0 %v2282_v40  ;;  %v2347_v39 = vld [vmem:[%s2999_s1 + $0x2b8] sm:$0xff]   ;;  %v2348_v40 = vld [vmem:[%s3000_s0 + $0x20] ss:$80 sps:$4 sm:$0xff]  }
  0x26   :  { %2088 = vmatprep.subr.bf16.mxu1 %v2283_v41  ;;  %1536 = vmatprep.mubr.bf16.mxu0 %v2312_v5  ;;  %v2350_v41 = vld [vmem:[%s3000_s0 + $0x24] ss:$80 sps:$4 sm:$0xff]  }
  0x27   :  { %1577 = vmatprep.mubr.bf16.mxu1 %v2315_v7  ;;  %v2379_v5 = vld [vmem:[%s2999_s1 + $0x3f0] sm:$0xff]  }
  0x28   :  { %2067 = vmatpush3.bf16.msra.mxu0 %v2284_v42  ;;  %v2351_v42 = vld [vmem:[%s3000_s0 + $0x28] ss:$80 sps:$4 sm:$0xff]   ;;  %v2381_v7 = vld [vmem:[%s2999_s1 + $0x3b0] sm:$0xff]  }
  0x29   :  { %2089 = vmatpush3.bf16.msra.mxu1 %v2285_v43  ;;  %2068 = vmatprep.subr.bf16.mxu0 %v2286_v44  ;;  %v2353_v43 = vld [vmem:[%s3000_s0 + $0x2c] ss:$80 sps:$4 sm:$0xff]   ;;  %v2354_v44 = vld [vmem:[%s2999_s1 + $0x340] sm:$0xff]  }
  0x2a   :  { %2090 = vmatprep.subr.bf16.mxu1 %v2287_v45  ;;  %v2355_v45 = vld [vmem:[%s2999_s1 + $0x3c0] sm:$0xff]  }
  0x2c   :  { %2069 = vmatpush3.bf16.msra.mxu0 %v2288_v46  ;;  %v2356_v46 = vld [vmem:[%s2999_s1 + $0x300] sm:$0xff]  }
  0x2d   :  { %2091 = vmatpush3.bf16.msra.mxu1 %v2289_v47  ;;  %2070 = vmatprep.subr.bf16.mxu0 %v2290_v48  ;;  %v2357_v47 = vld [vmem:[%s2999_s1 + $0x380] sm:$0xff]   ;;  %v2358_v48 = vld [vmem:[%s2999_s1 + $0x348] sm:$0xff]  }
  0x2e   :  { %2092 = vmatprep.subr.bf16.mxu1 %v2291_v49  ;;  %v2359_v49 = vld [vmem:[%s2999_s1 + $0x3c8] sm:$0xff]  }
  0x30   :  { %2071 = vmatpush3.bf16.msra.mxu0 %v2292_v50  ;;  %v2360_v50 = vld [vmem:[%s2999_s1 + $0x308] sm:$0xff]  }
  0x31   :  { %2093 = vmatpush3.bf16.msra.mxu1 %v2293_v51  ;;  %2072 = vmatprep.subr.bf16.mxu0 %v2294_v52  ;;  %v2361_v51 = vld [vmem:[%s2999_s1 + $0x388] sm:$0xff]   ;;  %v2362_v52 = vld [vmem:[%s2999_s1 + $0x350] sm:$0xff]  }
  0x32   :  { %2094 = vmatprep.subr.bf16.mxu1 %v2295_v53  ;;  %v2363_v53 = vld [vmem:[%s2999_s1 + $0x3d0] sm:$0xff]  }
  0x34   :  { %2073 = vmatpush3.bf16.msra.mxu0 %v2296_v54  ;;  %v2364_v54 = vld [vmem:[%s2999_s1 + $0x310] sm:$0xff]  }
  0x35   :  { %2095 = vmatpush3.bf16.msra.mxu1 %v2297_v55  ;;  %2074 = vmatprep.subr.bf16.mxu0 %v2298_v56  ;;  %v2365_v55 = vld [vmem:[%s2999_s1 + $0x390] sm:$0xff]   ;;  %v2366_v56 = vld [vmem:[%s2999_s1 + $0x358] sm:$0xff]  }
  0x36   :  { %2096 = vmatprep.subr.bf16.mxu1 %v2299_v57  ;;  %v2367_v57 = vld [vmem:[%s2999_s1 + $0x3d8] sm:$0xff]  }
  0x38   :  { %2075 = vmatpush3.bf16.msra.mxu0 %v2300_v58  ;;  %v2368_v58 = vld [vmem:[%s2999_s1 + $0x318] sm:$0xff]  }
  0x39   :  { %2097 = vmatpush3.bf16.msra.mxu1 %v2301_v59  ;;  %2076 = vmatprep.subr.bf16.mxu0 %v2302_v60  ;;  %v2369_v59 = vld [vmem:[%s2999_s1 + $0x398] sm:$0xff]   ;;  %v2370_v60 = vld [vmem:[%s2999_s1 + $0x360] sm:$0xff]  }
  0x3a   :  { %2098 = vmatprep.subr.bf16.mxu1 %v2303_v61  ;;  %v2371_v61 = vld [vmem:[%s2999_s1 + $0x3e0] sm:$0xff]  }
  0x3c   :  { %2077 = vmatpush3.bf16.msra.mxu0 %v2304_v62  ;;  %v2372_v62 = vld [vmem:[%s2999_s1 + $0x320] sm:$0xff]  }
  0x3d   :  { %2099 = vmatpush3.bf16.msra.mxu1 %v2305_v63  ;;  %2078 = vmatprep.subr.bf16.mxu0 %v2306_v0  ;;  %v2373_v63 = vld [vmem:[%s2999_s1 + $0x3a0] sm:$0xff]   ;;  %v2374_v0 = vld [vmem:[%s2999_s1 + $0x368] sm:$0xff]  }
  0x3e   :  { %2100 = vmatprep.subr.bf16.mxu1 %v2307_v1  ;;  %v2375_v1 = vld [vmem:[%s2999_s1 + $0x3e8] sm:$0xff]  }
  0x40   :  { %2079 = vmatpush3.bf16.msra.mxu0 %v2308_v2  ;;  %v2376_v2 = vld [vmem:[%s2999_s1 + $0x328] sm:$0xff]  }
  0x41   :  { %2101 = vmatpush3.bf16.msra.mxu1 %v2309_v3  ;;  %2108 = vmatprep.subr.bf16.mxu0 %v2316_v8  ;;  %v2377_v3 = vld [vmem:[%s2999_s1 + $0x3a8] sm:$0xff]   ;;  %v2382_v8 = vld [vmem:[%s2999_s1 + $0x378] sm:$0xff]  }
  0x42   :  { %2130 = vmatprep.subr.bf16.mxu1 %v2317_v9  ;;  %v2383_v9 = vld [vmem:[%s2999_s1 + $0x3f8] sm:$0xff]  }
  0x43   :  { %1537 = vmatmul.mubr.bf16.vlgmr.msra.gmra.mrb[4].mxu0 %v2310_v4  ;;  %v2378_v4 = vld [vmem:[%s2999_s1 + $0x370] sm:$0xff]  }
  0x44   :  { %1578 = vmatmul.mubr.bf16.vlgmr.msra.gmra.mrb[4].mxu1 %v2313_v6  ;;  %2109 = vmatpush3.bf16.msra.mxu0 %v2318_v10  ;;  %v2380_v6 = vld [vmem:[%s2999_s1 + $0x330] sm:$0xff]   ;;  %v2384_v10 = vld [vmem:[%s2999_s1 + $0x338] sm:$0xff]  }
  0x45   :  { %2131 = vmatpush3.bf16.msra.mxu1 %v2319_v11  ;;  %2110 = vmatprep.subr.bf16.mxu0 %v2320_v12  ;;  %v2385_v11 = vld [vmem:[%s2999_s1 + $0x3b8] sm:$0xff]   ;;  %v2386_v12 = vld [vmem:[%s3000_s0 + $0x30] ss:$80 sps:$4 sm:$0xff]  }
  0x46   :  { %2132 = vmatprep.subr.bf16.mxu1 %v2321_v13  ;;  %1618 = vmatprep.mubr.bf16.mxu0 %v2350_v41  ;;  %v2388_v13 = vld [vmem:[%s3000_s0 + $0x34] ss:$80 sps:$4 sm:$0xff]  }
  0x47   :  { %1659 = vmatprep.mubr.bf16.mxu1 %v2353_v43  ;;  %v2417_v41 = vld [vmem:[%s2999_s1 + $0x4f0] sm:$0xff]  }
  0x48   :  { %2111 = vmatpush3.bf16.msra.mxu0 %v2322_v14  ;;  %v2389_v14 = vld [vmem:[%s3000_s0 + $0x38] ss:$80 sps:$4 sm:$0xff]   ;;  %v2419_v43 = vld [vmem:[%s2999_s1 + $0x4b0] sm:$0xff]  }
  0x49   :  { %2133 = vmatpush3.bf16.msra.mxu1 %v2323_v15  ;;  %2112 = vmatprep.subr.bf16.mxu0 %v2324_v16  ;;  %v2391_v15 = vld [vmem:[%s3000_s0 + $0x3c] ss:$80 sps:$4 sm:$0xff]   ;;  %v2392_v16 = vld [vmem:[%s2999_s1 + $0x440] sm:$0xff]  }
  0x4a   :  { %2134 = vmatprep.subr.bf16.mxu1 %v2325_v17  ;;  %v2393_v17 = vld [vmem:[%s2999_s1 + $0x4c0] sm:$0xff]  }
  0x4c   :  { %2113 = vmatpush3.bf16.msra.mxu0 %v2326_v18  ;;  %v2394_v18 = vld [vmem:[%s2999_s1 + $0x400] sm:$0xff]  }
  0x4d   :  { %2135 = vmatpush3.bf16.msra.mxu1 %v2327_v19  ;;  %2114 = vmatprep.subr.bf16.mxu0 %v2328_v20  ;;  %v2395_v19 = vld [vmem:[%s2999_s1 + $0x480] sm:$0xff]   ;;  %v2396_v20 = vld [vmem:[%s2999_s1 + $0x448] sm:$0xff]  }
  0x4e   :  { %2136 = vmatprep.subr.bf16.mxu1 %v2329_v21  ;;  %v2397_v21 = vld [vmem:[%s2999_s1 + $0x4c8] sm:$0xff]  }
  0x50   :  { %2115 = vmatpush3.bf16.msra.mxu0 %v2330_v22  ;;  %v2398_v22 = vld [vmem:[%s2999_s1 + $0x408] sm:$0xff]  }
  0x51   :  { %2137 = vmatpush3.bf16.msra.mxu1 %v2331_v23  ;;  %2116 = vmatprep.subr.bf16.mxu0 %v2332_v24  ;;  %v2399_v23 = vld [vmem:[%s2999_s1 + $0x488] sm:$0xff]   ;;  %v2400_v24 = vld [vmem:[%s2999_s1 + $0x450] sm:$0xff]  }
  0x52   :  { %2138 = vmatprep.subr.bf16.mxu1 %v2333_v25  ;;  %v2401_v25 = vld [vmem:[%s2999_s1 + $0x4d0] sm:$0xff]  }
  0x54   :  { %2117 = vmatpush3.bf16.msra.mxu0 %v2334_v26  ;;  %v2402_v26 = vld [vmem:[%s2999_s1 + $0x410] sm:$0xff]  }
  0x55   :  { %2139 = vmatpush3.bf16.msra.mxu1 %v2335_v27  ;;  %2118 = vmatprep.subr.bf16.mxu0 %v2336_v28  ;;  %v2403_v27 = vld [vmem:[%s2999_s1 + $0x490] sm:$0xff]   ;;  %v2404_v28 = vld [vmem:[%s2999_s1 + $0x458] sm:$0xff]  }
  0x56   :  { %2140 = vmatprep.subr.bf16.mxu1 %v2337_v29  ;;  %v2405_v29 = vld [vmem:[%s2999_s1 + $0x4d8] sm:$0xff]  }
  0x58   :  { %2119 = vmatpush3.bf16.msra.mxu0 %v2338_v30  ;;  %v2406_v30 = vld [vmem:[%s2999_s1 + $0x418] sm:$0xff]  }
  0x59   :  { %2141 = vmatpush3.bf16.msra.mxu1 %v2339_v31  ;;  %2120 = vmatprep.subr.bf16.mxu0 %v2340_v32  ;;  %v2407_v31 = vld [vmem:[%s2999_s1 + $0x498] sm:$0xff]   ;;  %v2408_v32 = vld [vmem:[%s2999_s1 + $0x460] sm:$0xff]  }
  0x5a   :  { %2142 = vmatprep.subr.bf16.mxu1 %v2341_v33  ;;  %v2409_v33 = vld [vmem:[%s2999_s1 + $0x4e0] sm:$0xff]  }
  0x5c   :  { %2121 = vmatpush3.bf16.msra.mxu0 %v2342_v34  ;;  %v2410_v34 = vld [vmem:[%s2999_s1 + $0x420] sm:$0xff]  }
  0x5d   :  { %2143 = vmatpush3.bf16.msra.mxu1 %v2343_v35  ;;  %2122 = vmatprep.subr.bf16.mxu0 %v2344_v36  ;;  %v2411_v35 = vld [vmem:[%s2999_s1 + $0x4a0] sm:$0xff]   ;;  %v2412_v36 = vld [vmem:[%s2999_s1 + $0x468] sm:$0xff]  }
  0x5e   :  { %2144 = vmatprep.subr.bf16.mxu1 %v2345_v37  ;;  %v2413_v37 = vld [vmem:[%s2999_s1 + $0x4e8] sm:$0xff]  }
  0x60   :  { %2123 = vmatpush3.bf16.msra.mxu0 %v2346_v38  ;;  %v2414_v38 = vld [vmem:[%s2999_s1 + $0x428] sm:$0xff]  }
  0x61   :  { %2145 = vmatpush3.bf16.msra.mxu1 %v2347_v39  ;;  %2152 = vmatprep.subr.bf16.mxu0 %v2354_v44  ;;  %v2415_v39 = vld [vmem:[%s2999_s1 + $0x4a8] sm:$0xff]   ;;  %v2420_v44 = vld [vmem:[%s2999_s1 + $0x478] sm:$0xff]  }
  0x62   :  { %2174 = vmatprep.subr.bf16.mxu1 %v2355_v45  ;;  %v2421_v45 = vld [vmem:[%s2999_s1 + $0x4f8] sm:$0xff]  }
  0x63   :  { %1619 = vmatmul.mubr.bf16.vlgmr.msra.gmra.mrb[8].mxu0 %v2348_v40  ;;  %v2416_v40 = vld [vmem:[%s2999_s1 + $0x470] sm:$0xff]  }
  0x64   :  { %1660 = vmatmul.mubr.bf16.vlgmr.msra.gmra.mrb[8].mxu1 %v2351_v42  ;;  %2153 = vmatpush3.bf16.msra.mxu0 %v2356_v46  ;;  %v2418_v42 = vld [vmem:[%s2999_s1 + $0x430] sm:$0xff]   ;;  %v2422_v46 = vld [vmem:[%s2999_s1 + $0x438] sm:$0xff]  }
  0x65   :  { %2175 = vmatpush3.bf16.msra.mxu1 %v2357_v47  ;;  %2154 = vmatprep.subr.bf16.mxu0 %v2358_v48  ;;  %v2423_v47 = vld [vmem:[%s2999_s1 + $0x4b8] sm:$0xff]   ;;  %v2424_v48 = vld [vmem:[%s3000_s0 + $0x40] ss:$80 sps:$4 sm:$0xff]  }
  0x66   :  { %2176 = vmatprep.subr.bf16.mxu1 %v2359_v49  ;;  %1700 = vmatprep.mubr.bf16.mxu0 %v2388_v13  ;;  %v2426_v49 = vld [vmem:[%s3000_s0 + $0x44] ss:$80 sps:$4 sm:$0xff]  }
  0x67   :  { %1741 = vmatprep.mubr.bf16.mxu1 %v2391_v15 }
  0x68   :  { %2155 = vmatpush3.bf16.msra.mxu0 %v2360_v50  ;;  %v2427_v50 = vld [vmem:[%s3000_s0 + $0x48] ss:$80 sps:$4 sm:$0xff]  }
  0x69   :  { %2177 = vmatpush3.bf16.msra.mxu1 %v2361_v51  ;;  %2156 = vmatprep.subr.bf16.mxu0 %v2362_v52  ;;  %v2429_v51 = vld [vmem:[%s3000_s0 + $0x4c] ss:$80 sps:$4 sm:$0xff]  }
  0x6a   :  { %2178 = vmatprep.subr.bf16.mxu1 %v2363_v53 }
  0x6c   :  { %2157 = vmatpush3.bf16.msra.mxu0 %v2364_v54  ;;  %v1839_v54 = vld [vmem:[%s3001_s2] ss:$0 sm:$0xff] }
  0x6d   :  { %2179 = vmatpush3.bf16.msra.mxu1 %v2365_v55  ;;  %2158 = vmatprep.subr.bf16.mxu0 %v2366_v56 }
  0x6e   :  { %2180 = vmatprep.subr.bf16.mxu1 %v2367_v57 }
  0x70   :  { %2159 = vmatpush3.bf16.msra.mxu0 %v2368_v58 }
  0x71   :  { %2181 = vmatpush3.bf16.msra.mxu1 %v2369_v59  ;;  %2160 = vmatprep.subr.bf16.mxu0 %v2370_v60 }
  0x72   :  { %2182 = vmatprep.subr.bf16.mxu1 %v2371_v61 }
  0x74   :  { %2161 = vmatpush3.bf16.msra.mxu0 %v2372_v62 }
  0x75   :  { %2183 = vmatpush3.bf16.msra.mxu1 %v2373_v63  ;;  %2162 = vmatprep.subr.bf16.mxu0 %v2374_v0 }
  0x76   :  { %2184 = vmatprep.subr.bf16.mxu1 %v2375_v1 }
  0x78   :  { %2163 = vmatpush3.bf16.msra.mxu0 %v2376_v2 }
  0x79   :  { %2185 = vmatpush3.bf16.msra.mxu1 %v2377_v3  ;;  %2164 = vmatprep.subr.bf16.mxu0 %v2378_v4 }
  0x7a   :  { %2186 = vmatprep.subr.bf16.mxu1 %v2379_v5 }
  0x7c   :  { %2165 = vmatpush3.bf16.msra.mxu0 %v2380_v6 }
  0x7d   :  { %2187 = vmatpush3.bf16.msra.mxu1 %v2381_v7  ;;  %2166 = vmatprep.subr.bf16.mxu0 %v2382_v8 }
  0x7e   :  { %2188 = vmatprep.subr.bf16.mxu1 %v2383_v9 }
  0x80   :  { %2167 = vmatpush3.bf16.msra.mxu0 %v2384_v10 }
  0x81   :  { %2189 = vmatpush3.bf16.msra.mxu1 %v2385_v11  ;;  %2196 = vmatprep.subr.bf16.mxu0 %v2392_v16 }
  0x82   :  { %2218 = vmatprep.subr.bf16.mxu1 %v2393_v17 }
  0x83   :  { %1701 = vmatmul.mubr.bf16.vlgmr.msra.gmra.mrb[12].mxu0 %v2386_v12 }
  0x84   :  { %1742 = vmatmul.mubr.bf16.vlgmr.msra.gmra.mrb[12].mxu1 %v2389_v14  ;;  %2197 = vmatpush3.bf16.msra.mxu0 %v2394_v18 }
  0x85   :  { %2219 = vmatpush3.bf16.msra.mxu1 %v2395_v19  ;;  %2198 = vmatprep.subr.bf16.mxu0 %v2396_v20 }
  0x86   :  { %2220 = vmatprep.subr.bf16.mxu1 %v2397_v21  ;;  %1782 = vmatprep.mubr.bf16.mxu0 %v2426_v49 }
  0x87   :  { %1823 = vmatprep.mubr.bf16.mxu1 %v2429_v51 }
  0x88   :  { %2199 = vmatpush3.bf16.msra.mxu0 %v2398_v22 }
  0x89   :  { %2221 = vmatpush3.bf16.msra.mxu1 %v2399_v23  ;;  %2200 = vmatprep.subr.bf16.mxu0 %v2400_v24 }
  0x8a   :  { %2222 = vmatprep.subr.bf16.mxu1 %v2401_v25 }
  0x8c   :  { %2201 = vmatpush3.bf16.msra.mxu0 %v2402_v26 }
  0x8d   :  { %2223 = vmatpush3.bf16.msra.mxu1 %v2403_v27  ;;  %2202 = vmatprep.subr.bf16.mxu0 %v2404_v28 }
  0x8e   :  { %2224 = vmatprep.subr.bf16.mxu1 %v2405_v29 }
  0x90   :  { %2203 = vmatpush3.bf16.msra.mxu0 %v2406_v30 }
  0x91   :  { %2225 = vmatpush3.bf16.msra.mxu1 %v2407_v31  ;;  %2204 = vmatprep.subr.bf16.mxu0 %v2408_v32 }
  0x92   :  { %2226 = vmatprep.subr.bf16.mxu1 %v2409_v33 }
  0x94   :  { %2205 = vmatpush3.bf16.msra.mxu0 %v2410_v34 }
  0x95   :  { %2227 = vmatpush3.bf16.msra.mxu1 %v2411_v35  ;;  %2206 = vmatprep.subr.bf16.mxu0 %v2412_v36 }
  0x96   :  { %2228 = vmatprep.subr.bf16.mxu1 %v2413_v37 }
  0x98   :  { %2207 = vmatpush3.bf16.msra.mxu0 %v2414_v38 }
  0x99   :  { %2229 = vmatpush3.bf16.msra.mxu1 %v2415_v39  ;;  %2208 = vmatprep.subr.bf16.mxu0 %v2416_v40 }
  0x9a   :  { %2230 = vmatprep.subr.bf16.mxu1 %v2417_v41 }
  0x9c   :  { %2209 = vmatpush3.bf16.msra.mxu0 %v2418_v42 }
  0x9d   :  { %2231 = vmatpush3.bf16.msra.mxu1 %v2419_v43  ;;  %2210 = vmatprep.subr.bf16.mxu0 %v2420_v44 }
  0x9e   :  { %2232 = vmatprep.subr.bf16.mxu1 %v2421_v45 }
  0xa0   :  { %2211 = vmatpush3.bf16.msra.mxu0 %v2422_v46 }
  0xa1   :  { %2233 = vmatpush3.bf16.msra.mxu1 %v2423_v47 }
  0xa3   :  { %1783 = vmatmul.mubr.bf16.vlgmr.msra.gmra.mrb[16].mxu0 %v2424_v48 }
  0xa4   :  { %1824 = vmatmul.mubr.bf16.vlgmr.msra.gmra.mrb[16].mxu1 %v2427_v50 }
  0xf6   :  { %v2036_v52 = vpop.f32.mrb[0].mxu0 }
  0xf7   :  { %v2058_v53 = vpop.f32.mrb[0].mxu1  ;;  %v2037_v55 = vpop.f32.mrb[1].mxu0 }
  0xf8   :  { %v2038_v56 = vadd.f32 %v2037_v55, %v2036_v52  ;;  %v2059_v57 = vpop.f32.mrb[1].mxu1  ;;  %v2039_v58 = vpop.f32.mrb[2].mxu0 }
  0xf9   :  { %v2060_v59 = vadd.f32 %v2059_v57, %v2058_v53  ;;  %v2061_v60 = vpop.f32.mrb[2].mxu1  ;;  %v2040_v61 = vpop.f32.mrb[3].mxu0 }
  0xfa   :  { %v1457_v62 = vadd.f32 %v2038_v56, %v1839_v54  ;;  %v2041_v63 = vadd.f32 %v2040_v61, %v2039_v58  ;;  %v2062_v0 = vpop.f32.mrb[3].mxu1 }
  0xfb   :  { %v2063_v1 = vadd.f32 %v2062_v0, %v2061_v60 }
  0xfc   :  { %v1498_v2 = vadd.f32 %v2060_v59, %v1457_v62  ;;  %v1460_v3 = vadd.f32 %v2041_v63, %v1839_v54 }
  0xfe   :  { %v1501_v4 = vadd.f32 %v2063_v1, %v1460_v3 }
 0x116   :  { %v2080_v5 = vpop.f32.mrb[4].mxu0 }
 0x117   :  { %v2081_v6 = vpop.f32.mrb[5].mxu0  ;;  %v2102_v7 = vpop.f32.mrb[4].mxu1 }
 0x118   :  { %v2082_v8 = vadd.f32 %v2081_v6, %v2080_v5  ;;  %v2083_v9 = vpop.f32.mrb[6].mxu0  ;;  %v2103_v10 = vpop.f32.mrb[5].mxu1 }
 0x119   :  { %v2084_v11 = vpop.f32.mrb[7].mxu0  ;;  %v2104_v13 = vadd.f32 %v2103_v10, %v2102_v7  ;;  %v2105_v14 = vpop.f32.mrb[6].mxu1 }
 0x11a   :  { %v1539_v12 = vadd.f32 %v2082_v8, %v1498_v2  ;;  %v2085_v15 = vadd.f32 %v2084_v11, %v2083_v9  ;;  %v2106_v16 = vpop.f32.mrb[7].mxu1 }
 0x11b   :  { %v2107_v19 = vadd.f32 %v2106_v16, %v2105_v14 }
 0x11c   :  { %v1580_v17 = vadd.f32 %v2104_v13, %v1539_v12  ;;  %v1542_v18 = vadd.f32 %v2085_v15, %v1501_v4 }
 0x11e   :  { %v1583_v20 = vadd.f32 %v2107_v19, %v1542_v18 }
 0x136   :  { %v2124_v21 = vpop.f32.mrb[8].mxu0 }
 0x137   :  { %v2146_v22 = vpop.f32.mrb[8].mxu1  ;;  %v2125_v23 = vpop.f32.mrb[9].mxu0 }
 0x138   :  { %v2126_v24 = vadd.f32 %v2125_v23, %v2124_v21  ;;  %v2147_v25 = vpop.f32.mrb[9].mxu1  ;;  %v2127_v26 = vpop.f32.mrb[10].mxu0 }
 0x139   :  { %v2148_v27 = vadd.f32 %v2147_v25, %v2146_v22  ;;  %v2149_v28 = vpop.f32.mrb[10].mxu1  ;;  %v2128_v29 = vpop.f32.mrb[11].mxu0 }
 0x13a   :  { %v1621_v30 = vadd.f32 %v2126_v24, %v1580_v17  ;;  %v2129_v31 = vadd.f32 %v2128_v29, %v2127_v26  ;;  %v2150_v32 = vpop.f32.mrb[11].mxu1 }
 0x13b   :  { %v2151_v33 = vadd.f32 %v2150_v32, %v2149_v28 }
 0x13c   :  { %v1662_v34 = vadd.f32 %v2148_v27, %v1621_v30  ;;  %v1624_v35 = vadd.f32 %v2129_v31, %v1583_v20 }
 0x13e   :  { %v1665_v36 = vadd.f32 %v2151_v33, %v1624_v35 }
 0x156   :  { %v2168_v37 = vpop.f32.mrb[12].mxu0 }
 0x157   :  { %v2190_v38 = vpop.f32.mrb[12].mxu1  ;;  %v2169_v39 = vpop.f32.mrb[13].mxu0 }
 0x158   :  { %v2170_v40 = vadd.f32 %v2169_v39, %v2168_v37  ;;  %v2191_v41 = vpop.f32.mrb[13].mxu1  ;;  %v2171_v42 = vpop.f32.mrb[14].mxu0 }
 0x159   :  { %v2192_v43 = vadd.f32 %v2191_v41, %v2190_v38  ;;  %v2193_v44 = vpop.f32.mrb[14].mxu1  ;;  %v2172_v45 = vpop.f32.mrb[15].mxu0 }
 0x15a   :  { %v1703_v46 = vadd.f32 %v2170_v40, %v1662_v34  ;;  %v2173_v47 = vadd.f32 %v2172_v45, %v2171_v42  ;;  %v2194_v48 = vpop.f32.mrb[15].mxu1 }
 0x15b   :  { %v2195_v49 = vadd.f32 %v2194_v48, %v2193_v44 }
 0x15c   :  { %v1744_v50 = vadd.f32 %v2192_v43, %v1703_v46  ;;  %v1706_v51 = vadd.f32 %v2173_v47, %v1665_v36 }
 0x15e   :  { %v1747_v52 = vadd.f32 %v2195_v49, %v1706_v51 }
 0x176   :  { %v2212_v53 = vpop.f32.mrb[16].mxu0 }
 0x177   :  { %v2213_v54 = vpop.f32.mrb[17].mxu0  ;;  %v2234_v55 = vpop.f32.mrb[16].mxu1 }
 0x178   :  { %v2214_v56 = vadd.f32 %v2213_v54, %v2212_v53  ;;  %v2215_v57 = vpop.f32.mrb[18].mxu0  ;;  %v2235_v58 = vpop.f32.mrb[17].mxu1 }
 0x179   :  { %v2216_v59 = vpop.f32.mrb[19].mxu0  ;;  %v2236_v61 = vadd.f32 %v2235_v58, %v2234_v55  ;;  %v2237_v62 = vpop.f32.mrb[18].mxu1 }
 0x17a   :  { %v1785_v60 = vadd.f32 %v2214_v56, %v1744_v50  ;;  %v2217_v63 = vadd.f32 %v2216_v59, %v2215_v57  ;;  %v2238_v0 = vpop.f32.mrb[19].mxu1 }
 0x17b   :  { %v2239_v3 = vadd.f32 %v2238_v0, %v2237_v62 }
 0x17c   :  { %v1826_v1 = vadd.f32 %v2236_v61, %v1785_v60  ;;  %v1788_v2 = vadd.f32 %v2217_v63, %v1747_v52 }
 0x17e   :  { %1833 = vst.msk [vmem:[%s3002_s3] sm:$0xff] %vm1832_vm0, %v1826_v1  ;;  %v1829_v4 = vadd.f32 %v2239_v3, %v1788_v2 }
 0x180   :  { %1834 = vst.msk [vmem:[%s3002_s3 + $0x8] sm:$0xff] %vm1832_vm0, %v1829_v4 }

// kernel: det_forward.18
= control target key start
LH: loop header
LB: loop body
LE: loop exit
PB: predicated region body
PF: predicated region fallthrough
CT: control target
= control target key end

     0   :  { %s1486_s12 = smov 0   ;;  %s1488_s13 = smov 0   ;;  %s1788_s0 = inlined_call_operand.vmem [shape: bf16[16,640], index: 0, kind: input, shape index: {}]   ;;  %s1789_s1 = inlined_call_operand.vmem [shape: bf16[640,640], index: 1, kind: input, shape index: {}]   ;;  %s1790_s2 = inlined_call_operand.vmem [shape: f32[1,640], index: 2, kind: input, shape index: {}]   ;;  %s1791_s3 = inlined_call_operand.vmem [shape: f32[16,640], index: 3, kind: output, shape index: {}]  }
   0x1   :  { %s1490_s14 = smov 0   ;;  %s1492_s15 = smov 0  }
   0x2   :  { %s1494_s16 = smov 0  }
   0x3 LB: > { %s22_s17 = sadd.s32 1, %s1458_s15  ;;  %s1202_s18 = sadd.s32 4294967295, %s1462_s16   ;;  %s1462_s16 = sphi %s1494_s16, %s13_s16   ;;  %s1458_s15 = sphi %s1492_s15, %s1796_s15   ;;  %s1454_s14 = sphi %s1490_s14, %s1795_s14   ;;  %s1450_s13 = sphi %s1488_s13, %s1794_s13   ;;  %s1446_s12 = sphi %s1486_s12, %s1793_s12  }
   0x4   : > { %p23_p0 = scmp.ge.s32.totalorder %s22_s17, 5  ;;  %p65_p1 = scmp.ne.s32.totalorder %s1450_s13, %s1446_s12 }
   0x5   : > { %p66_p2 = scmp.eq.s32.totalorder %s1462_s16, 0  ;;  %p123_p4 = scmp.eq.s32.totalorder %s1202_s18, 4 }
   0x6   : > { %s1798_s17 = smov (%p23_p0, %s22_s17), 0  ;;  %s58_s20 = sadd.s32 1, %s1450_s13 }
   0x7   : > { %p67_p3 = por %p66_p2, %p65_p1  ;;  %s55_s19 = ssub.s32 %s1458_s15, %s1798_s17 }
   0x8   : > { %p56_p5 = scmp.eq.s32.totalorder %s55_s19, 0  ;;  %p1521_p6 = por %p123_p4, %p65_p1 }
   0x9   : > { %p1206_p7 = scmp.ge.s32.totalorder %s1462_s16, 5 }
   0xa   : > { %s1526_s22 = scalar_select %p56_p5, %s1450_s13, %s58_s20  }
   0xb   : > { %155 = sbr.rel (%p1206_p7) target bundleno = 75 (0x4b), region = 20 }
  0x12   : > { %158 = sbr.rel (!%p67_p3) target bundleno = 75 (0x4b), region = 24  ;;  %s160_s23 = sand.u32 (%p67_p3), 1, %s1450_s13  }
  0x13   : > { %s1207_s24 = sshll.u32 (%p67_p3), %s1458_s15, 2  ;;  %s1333_s25 = smul.u32 (%p67_p3), 320, %s160_s23 }
  0x14   : > { %s1534_s28 = scalar_lea.vmem (%p67_p3), %s1789_s1, %s1207_s24 }
  0x15   : > { %v180_v0 = vld [vmem:[%s1534_s28] sm:$0xf] (%p67_p3)  ;;  %v182_v1 = vld [vmem:[%s1534_s28 + $0x14] sm:$0xf] (%p67_p3)  ;;  %v184_v2 = vld [vmem:[%s1534_s28 + $0x28] sm:$0xf] (%p67_p3) }
  0x16   : > { %v186_v3 = vld [vmem:[%s1534_s28 + $0x3c] sm:$0xf] (%p67_p3)  ;;  %v188_v4 = vld [vmem:[%s1534_s28 + $0x50] sm:$0xf] (%p67_p3)  ;;  %s1541_s29 = scalar_lea.vmem (%p67_p3), [#allocation2], %s1333_s25 }
  0x17   : > { %181 = vst [vmem:[%s1541_s29] sm:$0xf] (%p67_p3), %v180_v0  ;;  %183 = vst [vmem:[%s1541_s29 + $0x4] sm:$0xf] (%p67_p3), %v182_v1  ;;  %v190_v5 = vld [vmem:[%s1534_s28 + $0x64] sm:$0xf] (%p67_p3) }
  0x18   : > { %185 = vst [vmem:[%s1541_s29 + $0x8] sm:$0xf] (%p67_p3), %v184_v2  ;;  %187 = vst [vmem:[%s1541_s29 + $0xc] sm:$0xf] (%p67_p3), %v186_v3  ;;  %v192_v6 = vld [vmem:[%s1534_s28 + $0x78] sm:$0xf] (%p67_p3) }
  0x19   : > { %189 = vst [vmem:[%s1541_s29 + $0x10] sm:$0xf] %v188_v4  ;;  %v194_v7 = vld [vmem:[%s1534_s28 + $0x8c] sm:$0xf]  ;;  %191 = vst [vmem:[%s1541_s29 + $0x14] sm:$0xf] %v190_v5 }
  0x1a   : > { %193 = vst [vmem:[%s1541_s29 + $0x18] sm:$0xf] %v192_v6  ;;  %195 = vst [vmem:[%s1541_s29 + $0x1c] sm:$0xf] %v194_v7  ;;  %v196_v8 = vld [vmem:[%s1534_s28 + $0xa0] sm:$0xf] }
  0x1b   : > { %v198_v9 = vld [vmem:[%s1534_s28 + $0xb4] sm:$0xf]  ;;  %v200_v10 = vld [vmem:[%s1534_s28 + $0xc8] sm:$0xf]  ;;  %197 = vst [vmem:[%s1541_s29 + $0x20] sm:$0xf] %v196_v8 }
  0x1c   : > { %199 = vst [vmem:[%s1541_s29 + $0x24] sm:$0xf] %v198_v9  ;;  %201 = vst [vmem:[%s1541_s29 + $0x28] sm:$0xf] %v200_v10  ;;  %v202_v11 = vld [vmem:[%s1534_s28 + $0xdc] sm:$0xf] }
  0x1d   : > { %v204_v12 = vld [vmem:[%s1534_s28 + $0xf0] sm:$0xf]  ;;  %v206_v13 = vld [vmem:[%s1534_s28 + $0x104] sm:$0xf]  ;;  %203 = vst [vmem:[%s1541_s29 + $0x2c] sm:$0xf] %v202_v11 }
  0x1e   : > { %205 = vst [vmem:[%s1541_s29 + $0x30] sm:$0xf] %v204_v12  ;;  %207 = vst [vmem:[%s1541_s29 + $0x34] sm:$0xf] %v206_v13  ;;  %v208_v14 = vld [vmem:[%s1534_s28 + $0x118] sm:$0xf] }
  0x1f   : > { %v210_v15 = vld [vmem:[%s1534_s28 + $0x12c] sm:$0xf]  ;;  %v212_v16 = vld [vmem:[%s1534_s28 + $0x140] sm:$0xf]  ;;  %209 = vst [vmem:[%s1541_s29 + $0x38] sm:$0xf] %v208_v14 }
  0x20   : > { %211 = vst [vmem:[%s1541_s29 + $0x3c] sm:$0xf] %v210_v15  ;;  %213 = vst [vmem:[%s1541_s29 + $0x40] sm:$0xf] %v212_v16  ;;  %v214_v17 = vld [vmem:[%s1534_s28 + $0x154] sm:$0xf] }
  0x21   : > { %v216_v18 = vld [vmem:[%s1534_s28 + $0x168] sm:$0xf]  ;;  %v218_v19 = vld [vmem:[%s1534_s28 + $0x17c] sm:$0xf]  ;;  %215 = vst [vmem:[%s1541_s29 + $0x44] sm:$0xf] %v214_v17 }
  0x22   : > { %217 = vst [vmem:[%s1541_s29 + $0x48] sm:$0xf] %v216_v18  ;;  %219 = vst [vmem:[%s1541_s29 + $0x4c] sm:$0xf] %v218_v19  ;;  %v220_v20 = vld [vmem:[%s1534_s28 + $0x190] sm:$0xf] }
  0x23   : > { %v222_v21 = vld [vmem:[%s1534_s28 + $0x1a4] sm:$0xf]  ;;  %v224_v22 = vld [vmem:[%s1534_s28 + $0x1b8] sm:$0xf]  ;;  %221 = vst [vmem:[%s1541_s29 + $0x50] sm:$0xf] %v220_v20 }
  0x24   : > { %223 = vst [vmem:[%s1541_s29 + $0x54] sm:$0xf] %v222_v21  ;;  %225 = vst [vmem:[%s1541_s29 + $0x58] sm:$0xf] %v224_v22  ;;  %v226_v23 = vld [vmem:[%s1534_s28 + $0x1cc] sm:$0xf] }
  0x25   : > { %v228_v24 = vld [vmem:[%s1534_s28 + $0x1e0] sm:$0xf]  ;;  %v230_v25 = vld [vmem:[%s1534_s28 + $0x1f4] sm:$0xf]  ;;  %227 = vst [vmem:[%s1541_s29 + $0x5c] sm:$0xf] %v226_v23 }
  0x26   : > { %229 = vst [vmem:[%s1541_s29 + $0x60] sm:$0xf] %v228_v24  ;;  %231 = vst [vmem:[%s1541_s29 + $0x64] sm:$0xf] %v230_v25  ;;  %v232_v26 = vld [vmem:[%s1534_s28 + $0x208] sm:$0xf] }
  0x27   : > { %v234_v27 = vld [vmem:[%s1534_s28 + $0x21c] sm:$0xf]  ;;  %v236_v28 = vld [vmem:[%s1534_s28 + $0x230] sm:$0xf]  ;;  %233 = vst [vmem:[%s1541_s29 + $0x68] sm:$0xf] %v232_v26 }
  0x28   : > { %235 = vst [vmem:[%s1541_s29 + $0x6c] sm:$0xf] %v234_v27  ;;  %237 = vst [vmem:[%s1541_s29 + $0x70] sm:$0xf] %v236_v28  ;;  %v238_v29 = vld [vmem:[%s1534_s28 + $0x244] sm:$0xf] }
  0x29   : > { %v240_v30 = vld [vmem:[%s1534_s28 + $0x258] sm:$0xf]  ;;  %v242_v31 = vld [vmem:[%s1534_s28 + $0x26c] sm:$0xf]  ;;  %239 = vst [vmem:[%s1541_s29 + $0x74] sm:$0xf] %v238_v29 }
  0x2a   : > { %241 = vst [vmem:[%s1541_s29 + $0x78] sm:$0xf] %v240_v30  ;;  %243 = vst [vmem:[%s1541_s29 + $0x7c] sm:$0xf] %v242_v31  ;;  %v244_v32 = vld [vmem:[%s1534_s28 + $0x280] sm:$0xf] }
  0x2b   : > { %v246_v33 = vld [vmem:[%s1534_s28 + $0x294] sm:$0xf]  ;;  %v248_v34 = vld [vmem:[%s1534_s28 + $0x2a8] sm:$0xf]  ;;  %245 = vst [vmem:[%s1541_s29 + $0x80] sm:$0xf] %v244_v32 }
  0x2c   : > { %247 = vst [vmem:[%s1541_s29 + $0x84] sm:$0xf] %v246_v33  ;;  %249 = vst [vmem:[%s1541_s29 + $0x88] sm:$0xf] %v248_v34  ;;  %v250_v35 = vld [vmem:[%s1534_s28 + $0x2bc] sm:$0xf] }
  0x2d   : > { %v252_v36 = vld [vmem:[%s1534_s28 + $0x2d0] sm:$0xf]  ;;  %v254_v37 = vld [vmem:[%s1534_s28 + $0x2e4] sm:$0xf]  ;;  %251 = vst [vmem:[%s1541_s29 + $0x8c] sm:$0xf] %v250_v35 }
  0x2e   : > { %253 = vst [vmem:[%s1541_s29 + $0x90] sm:$0xf] %v252_v36  ;;  %255 = vst [vmem:[%s1541_s29 + $0x94] sm:$0xf] %v254_v37  ;;  %v256_v38 = vld [vmem:[%s1534_s28 + $0x2f8] sm:$0xf] }
  0x2f   : > { %v258_v39 = vld [vmem:[%s1534_s28 + $0x30c] sm:$0xf]  ;;  %v260_v40 = vld [vmem:[%s1534_s28 + $0x320] sm:$0xf]  ;;  %257 = vst [vmem:[%s1541_s29 + $0x98] sm:$0xf] %v256_v38 }
  0x30   : > { %259 = vst [vmem:[%s1541_s29 + $0x9c] sm:$0xf] %v258_v39  ;;  %261 = vst [vmem:[%s1541_s29 + $0xa0] sm:$0xf] %v260_v40  ;;  %v262_v41 = vld [vmem:[%s1534_s28 + $0x334] sm:$0xf] }
  0x31   : > { %v264_v42 = vld [vmem:[%s1534_s28 + $0x348] sm:$0xf]  ;;  %v266_v43 = vld [vmem:[%s1534_s28 + $0x35c] sm:$0xf]  ;;  %263 = vst [vmem:[%s1541_s29 + $0xa4] sm:$0xf] %v262_v41 }
  0x32   : > { %265 = vst [vmem:[%s1541_s29 + $0xa8] sm:$0xf] %v264_v42  ;;  %267 = vst [vmem:[%s1541_s29 + $0xac] sm:$0xf] %v266_v43  ;;  %v268_v44 = vld [vmem:[%s1534_s28 + $0x370] sm:$0xf] }
  0x33   : > { %v270_v45 = vld [vmem:[%s1534_s28 + $0x384] sm:$0xf]  ;;  %v272_v46 = vld [vmem:[%s1534_s28 + $0x398] sm:$0xf]  ;;  %269 = vst [vmem:[%s1541_s29 + $0xb0] sm:$0xf] %v268_v44 }
  0x34   : > { %271 = vst [vmem:[%s1541_s29 + $0xb4] sm:$0xf] %v270_v45  ;;  %273 = vst [vmem:[%s1541_s29 + $0xb8] sm:$0xf] %v272_v46  ;;  %v274_v47 = vld [vmem:[%s1534_s28 + $0x3ac] sm:$0xf] }
  0x35   : > { %v276_v48 = vld [vmem:[%s1534_s28 + $0x3c0] sm:$0xf]  ;;  %v278_v49 = vld [vmem:[%s1534_s28 + $0x3d4] sm:$0xf]  ;;  %275 = vst [vmem:[%s1541_s29 + $0xbc] sm:$0xf] %v274_v47 }
  0x36   : > { %277 = vst [vmem:[%s1541_s29 + $0xc0] sm:$0xf] %v276_v48  ;;  %279 = vst [vmem:[%s1541_s29 + $0xc4] sm:$0xf] %v278_v49  ;;  %v280_v50 = vld [vmem:[%s1534_s28 + $0x3e8] sm:$0xf] }
  0x37   : > { %v282_v51 = vld [vmem:[%s1534_s28 + $0x3fc] sm:$0xf]  ;;  %v284_v52 = vld [vmem:[%s1534_s28 + $0x410] sm:$0xf]  ;;  %281 = vst [vmem:[%s1541_s29 + $0xc8] sm:$0xf] %v280_v50 }
  0x38   : > { %283 = vst [vmem:[%s1541_s29 + $0xcc] sm:$0xf] %v282_v51  ;;  %285 = vst [vmem:[%s1541_s29 + $0xd0] sm:$0xf] %v284_v52  ;;  %v286_v53 = vld [vmem:[%s1534_s28 + $0x424] sm:$0xf] }
  0x39   : > { %v288_v54 = vld [vmem:[%s1534_s28 + $0x438] sm:$0xf]  ;;  %v290_v55 = vld [vmem:[%s1534_s28 + $0x44c] sm:$0xf]  ;;  %287 = vst [vmem:[%s1541_s29 + $0xd4] sm:$0xf] %v286_v53 }
  0x3a   : > { %289 = vst [vmem:[%s1541_s29 + $0xd8] sm:$0xf] %v288_v54  ;;  %291 = vst [vmem:[%s1541_s29 + $0xdc] sm:$0xf] %v290_v55  ;;  %v292_v56 = vld [vmem:[%s1534_s28 + $0x460] sm:$0xf] }
  0x3b   : > { %v294_v57 = vld [vmem:[%s1534_s28 + $0x474] sm:$0xf]  ;;  %v296_v58 = vld [vmem:[%s1534_s28 + $0x488] sm:$0xf]  ;;  %293 = vst [vmem:[%s1541_s29 + $0xe0] sm:$0xf] %v292_v56 }
  0x3c   : > { %295 = vst [vmem:[%s1541_s29 + $0xe4] sm:$0xf] %v294_v57  ;;  %297 = vst [vmem:[%s1541_s29 + $0xe8] sm:$0xf] %v296_v58  ;;  %v298_v59 = vld [vmem:[%s1534_s28 + $0x49c] sm:$0xf] }
  0x3d   : > { %v300_v60 = vld [vmem:[%s1534_s28 + $0x4b0] sm:$0xf]  ;;  %v302_v61 = vld [vmem:[%s1534_s28 + $0x4c4] sm:$0xf]  ;;  %299 = vst [vmem:[%s1541_s29 + $0xec] sm:$0xf] %v298_v59 }
  0x3e   : > { %301 = vst [vmem:[%s1541_s29 + $0xf0] sm:$0xf] %v300_v60  ;;  %303 = vst [vmem:[%s1541_s29 + $0xf4] sm:$0xf] %v302_v61  ;;  %v304_v62 = vld [vmem:[%s1534_s28 + $0x4d8] sm:$0xf] }
  0x3f   : > { %v306_v63 = vld [vmem:[%s1534_s28 + $0x4ec] sm:$0xf]  ;;  %v308_v0 = vld [vmem:[%s1534_s28 + $0x500] sm:$0xf]  ;;  %305 = vst [vmem:[%s1541_s29 + $0xf8] sm:$0xf] %v304_v62 }
  0x40   : > { %307 = vst [vmem:[%s1541_s29 + $0xfc] sm:$0xf] %v306_v63  ;;  %309 = vst [vmem:[%s1541_s29 + $0x100] sm:$0xf] %v308_v0  ;;  %v310_v1 = vld [vmem:[%s1534_s28 + $0x514] sm:$0xf] }
  0x41   : > { %v312_v2 = vld [vmem:[%s1534_s28 + $0x528] sm:$0xf]  ;;  %v314_v3 = vld [vmem:[%s1534_s28 + $0x53c] sm:$0xf]  ;;  %311 = vst [vmem:[%s1541_s29 + $0x104] sm:$0xf] %v310_v1 }
  0x42   : > { %313 = vst [vmem:[%s1541_s29 + $0x108] sm:$0xf] %v312_v2  ;;  %315 = vst [vmem:[%s1541_s29 + $0x10c] sm:$0xf] %v314_v3  ;;  %v316_v4 = vld [vmem:[%s1534_s28 + $0x550] sm:$0xf] }
  0x43   : > { %v318_v5 = vld [vmem:[%s1534_s28 + $0x564] sm:$0xf]  ;;  %v320_v6 = vld [vmem:[%s1534_s28 + $0x578] sm:$0xf]  ;;  %317 = vst [vmem:[%s1541_s29 + $0x110] sm:$0xf] %v316_v4 }
  0x44   : > { %319 = vst [vmem:[%s1541_s29 + $0x114] sm:$0xf] %v318_v5  ;;  %321 = vst [vmem:[%s1541_s29 + $0x118] sm:$0xf] %v320_v6  ;;  %v322_v7 = vld [vmem:[%s1534_s28 + $0x58c] sm:$0xf] }
  0x45   : > { %v324_v8 = vld [vmem:[%s1534_s28 + $0x5a0] sm:$0xf]  ;;  %v326_v9 = vld [vmem:[%s1534_s28 + $0x5b4] sm:$0xf]  ;;  %323 = vst [vmem:[%s1541_s29 + $0x11c] sm:$0xf] %v322_v7 }
  0x46   : > { %325 = vst [vmem:[%s1541_s29 + $0x120] sm:$0xf] %v324_v8  ;;  %327 = vst [vmem:[%s1541_s29 + $0x124] sm:$0xf] %v326_v9  ;;  %v328_v10 = vld [vmem:[%s1534_s28 + $0x5c8] sm:$0xf] }
  0x47   : > { %v330_v11 = vld [vmem:[%s1534_s28 + $0x5dc] sm:$0xf]  ;;  %v332_v12 = vld [vmem:[%s1534_s28 + $0x5f0] sm:$0xf]  ;;  %329 = vst [vmem:[%s1541_s29 + $0x128] sm:$0xf] %v328_v10 }
  0x48   : > { %331 = vst [vmem:[%s1541_s29 + $0x12c] sm:$0xf] %v330_v11  ;;  %333 = vst [vmem:[%s1541_s29 + $0x130] sm:$0xf] %v332_v12  ;;  %v334_v13 = vld [vmem:[%s1534_s28 + $0x604] sm:$0xf] }
  0x49   : > { %v336_v14 = vld [vmem:[%s1534_s28 + $0x618] sm:$0xf]  ;;  %v338_v15 = vld [vmem:[%s1534_s28 + $0x62c] sm:$0xf]  ;;  %335 = vst [vmem:[%s1541_s29 + $0x134] sm:$0xf] %v334_v13 }
  0x4a   : > { %337 = vst [vmem:[%s1541_s29 + $0x138] sm:$0xf] %v336_v14  ;;  %339 = vst [vmem:[%s1541_s29 + $0x13c] sm:$0xf] %v338_v15 }
  0x4b PF: > { %p1208_p8 = scmp.ge.s32.totalorder %s1462_s16, 1  ;;  %p527_p9 = scmp.lt.s32.totalorder %s1462_s16, 6 }
  0x4d   : > { %p528_p10 = pnand %p1208_p8, %p527_p9 }
  0x4e   : > { %s534_s30 = sand.u32 (!%p528_p10), 1, %s1446_s12   ;;  %v1410_v16 = vld [vmem:[%s1788_s0 + $0x4] ss:$20 sps:$4 sm:$0xff] (!%p528_p10)   ;;  %v1414_v17 = vld [vmem:[%s1788_s0 + $0xc] ss:$20 sps:$4 sm:$0xff] (!%p528_p10)   ;;  %v1464_v52 = vmov (!%p528_p10), 0.0  }
  0x4f   : > { %531 = sbr.rel (%p528_p10) target bundleno = 375 (0x177), region = 69  ;;  %968 = vmatprep.mubr.bf16.mxu0 (!%p528_p10), %v1410_v16  ;;  %1009 = vmatprep.mubr.bf16.mxu1 (!%p528_p10), %v1414_v17  ;;  %v1408_v47 = vld [vmem:[%s1788_s0] ss:$20 sps:$4 sm:$0xff] (!%p528_p10)   ;;  %v1412_v50 = vld [vmem:[%s1788_s0 + $0x8] ss:$20 sps:$4 sm:$0xff] (!%p528_p10)   ;;  %vm1465_vm0 = vmmov (!%p528_p10), 0  }
  0x50   : > { %s1334_s4 = smul.u32 (!%p528_p10), 320, %s534_s30  ;;  %v1423_v61 = vld [vmem:[%s1788_s0 + $0x10] ss:$20 sps:$4 sm:$0xff] (!%p528_p10)   ;;  %p572_p11 = scmp.lt.s32.totalorder (!%p528_p10), %s1454_s14, 4 }
  0x51   : > { %s1209_s28 = sshll.u32 (!%p528_p10), %s534_s30, 4 }
  0x52   : > { %s1709_s9 = scalar_lea.vmem (!%p528_p10), [#allocation2], %s1334_s4  ;;  %s564_s29 = scalar_lea.vmem (!%p528_p10), [#allocation3], %s1209_s28 }
  0x53   : > { %v1377_v18 = vld [vmem:[%s1709_s9 + $0x40] sm:$0xff] (!%p528_p10)   ;;  %v1381_v22 = vld [vmem:[%s1709_s9 + $0x48] sm:$0xff] (!%p528_p10)   ;;  %v1385_v26 = vld [vmem:[%s1709_s9 + $0x50] sm:$0xff] (!%p528_p10)  }
  0x54   : > { %v1378_v19 = vld [vmem:[%s1709_s9] sm:$0xff] (!%p528_p10)   ;;  %1260 = vmatprep.subr.bf16.mxu0 (!%p528_p10), %v1377_v18  ;;  %v1382_v23 = vld [vmem:[%s1709_s9 + $0x8] sm:$0xff] (!%p528_p10)   ;;  %v1386_v27 = vld [vmem:[%s1709_s9 + $0x10] sm:$0xff] (!%p528_p10)  }
  0x55   : > { %v1379_v20 = vld [vmem:[%s1709_s9 + $0xc0] sm:$0xff] (!%p528_p10)   ;;  %1261 = vmatpush3.bf16.msra.mxu0 (!%p528_p10), %v1378_v19  ;;  %v1383_v24 = vld [vmem:[%s1709_s9 + $0xc8] sm:$0xff] (!%p528_p10)   ;;  %v1387_v28 = vld [vmem:[%s1709_s9 + $0xd0] sm:$0xff] (!%p528_p10)  }
  0x56   : > { %v1380_v21 = vld [vmem:[%s1709_s9 + $0x80] sm:$0xff]   ;;  %1282 = vmatprep.subr.bf16.mxu1 %v1379_v20  ;;  %1262 = vmatprep.subr.bf16.mxu0 %v1381_v22  ;;  %v1384_v25 = vld [vmem:[%s1709_s9 + $0x88] sm:$0xff]   ;;  %v1388_v29 = vld [vmem:[%s1709_s9 + $0x90] sm:$0xff]   ;;  %s573_s24 = scalar_select %p572_p11, %s1454_s14, 4 }
  0x57   : > { %1283 = vmatpush3.bf16.msra.mxu1 %v1380_v21  ;;  %v1389_v30 = vld [vmem:[%s1709_s9 + $0x58] sm:$0xff]   ;;  %v1393_v34 = vld [vmem:[%s1709_s9 + $0x60] sm:$0xff]   ;;  %v1397_v38 = vld [vmem:[%s1709_s9 + $0x68] sm:$0xff]   ;;  %s1257_s4 = sshll.u32 (%p1521_p6), %s1454_s14, 3 }
  0x58   : > { %1284 = vmatprep.subr.bf16.mxu1 %v1383_v24  ;;  %v1390_v31 = vld [vmem:[%s1709_s9 + $0x18] sm:$0xff]   ;;  %v1394_v35 = vld [vmem:[%s1709_s9 + $0x20] sm:$0xff]   ;;  %v1398_v39 = vld [vmem:[%s1709_s9 + $0x28] sm:$0xff]   ;;  %s574_s27 = scalar_lea.vmem %s1790_s2, %s573_s24  ;;  %s1074_s5 = scalar_lea.vmem (%p1521_p6), %s1791_s3, %s1257_s4 }
  0x59   : > { %1263 = vmatpush3.bf16.msra.mxu0 %v1382_v23  ;;  %v1391_v32 = vld [vmem:[%s1709_s9 + $0xd8] sm:$0xff]   ;;  %v1395_v36 = vld [vmem:[%s1709_s9 + $0xe0] sm:$0xff]   ;;  %v1399_v40 = vld [vmem:[%s1709_s9 + $0xe8] sm:$0xff]  }
  0x5a   : > { %1264 = vmatprep.subr.bf16.mxu0 %v1385_v26  ;;  %v1392_v33 = vld [vmem:[%s1709_s9 + $0x98] sm:$0xff]   ;;  %v1396_v37 = vld [vmem:[%s1709_s9 + $0xa0] sm:$0xff]   ;;  %v1400_v41 = vld [vmem:[%s1709_s9 + $0xa8] sm:$0xff]  }
  0x5b   : > { %1285 = vmatpush3.bf16.msra.mxu1 %v1384_v25  ;;  %v1401_v42 = vld [vmem:[%s1709_s9 + $0x70] sm:$0xff]   ;;  %v1405_v46 = vld [vmem:[%s1709_s9 + $0x78] sm:$0xff]   ;;  %v1415_v53 = vld [vmem:[%s1709_s9 + $0x100] sm:$0xff]  }
  0x5c   : > { %1286 = vmatprep.subr.bf16.mxu1 %v1387_v28  ;;  %v1402_v43 = vld [vmem:[%s1709_s9 + $0x30] sm:$0xff]   ;;  %v1406_v48 = vld [vmem:[%s1709_s9 + $0x38] sm:$0xff]   ;;  %v1416_v54 = vld [vmem:[%s1709_s9 + $0x108] sm:$0xff]  }
  0x5d   : > { %1265 = vmatpush3.bf16.msra.mxu0 %v1386_v27  ;;  %v1403_v44 = vld [vmem:[%s1709_s9 + $0xf0] sm:$0xff]   ;;  %v1407_v49 = vld [vmem:[%s1709_s9 + $0xf8] sm:$0xff]   ;;  %v1419_v57 = vld [vmem:[%s1709_s9 + $0x120] sm:$0xff]  }
  0x5e   : > { %1266 = vmatprep.subr.bf16.mxu0 %v1389_v30  ;;  %v1404_v45 = vld [vmem:[%s1709_s9 + $0xb0] sm:$0xff]   ;;  %v1411_v51 = vld [vmem:[%s1709_s9 + $0xb8] sm:$0xff]   ;;  %v1420_v58 = vld [vmem:[%s1709_s9 + $0x128] sm:$0xff]  }
  0x5f   : > { %1287 = vmatpush3.bf16.msra.mxu1 %v1388_v29  ;;  %v1417_v55 = vld [vmem:[%s1709_s9 + $0x110] sm:$0xff]   ;;  %v1418_v56 = vld [vmem:[%s1709_s9 + $0x118] sm:$0xff]   ;;  %v1210_v63 = vld [vmem:[%s574_s27] ss:$0 sm:$0xff] }
  0x60   : > { %1288 = vmatprep.subr.bf16.mxu1 %v1391_v32  ;;  %v1421_v59 = vld [vmem:[%s1709_s9 + $0x130] sm:$0xff]   ;;  %v1422_v60 = vld [vmem:[%s1709_s9 + $0x138] sm:$0xff]  }
  0x61   : > { %1267 = vmatpush3.bf16.msra.mxu0 %v1390_v31 }
  0x62   : > { %1268 = vmatprep.subr.bf16.mxu0 %v1393_v34 }
  0x63   : > { %1289 = vmatpush3.bf16.msra.mxu1 %v1392_v33 }
  0x64   : > { %1290 = vmatprep.subr.bf16.mxu1 %v1395_v36 }
  0x65   : > { %1269 = vmatpush3.bf16.msra.mxu0 %v1394_v35 }
  0x66   : > { %1270 = vmatprep.subr.bf16.mxu0 %v1397_v38 }
  0x67   : > { %1291 = vmatpush3.bf16.msra.mxu1 %v1396_v37 }
  0x68   : > { %1292 = vmatprep.subr.bf16.mxu1 %v1399_v40 }
  0x69   : > { %1271 = vmatpush3.bf16.msra.mxu0 %v1398_v39 }
  0x6a   : > { %1272 = vmatprep.subr.bf16.mxu0 %v1401_v42 }
  0x6b   : > { %1293 = vmatpush3.bf16.msra.mxu1 %v1400_v41 }
  0x6c   : > { %1294 = vmatprep.subr.bf16.mxu1 %v1403_v44 }
  0x6d   : > { %1273 = vmatpush3.bf16.msra.mxu0 %v1402_v43 }
  0x6e   : > { %1274 = vmatprep.subr.bf16.mxu0 %v1405_v46 }
  0x6f   : > { %1295 = vmatpush3.bf16.msra.mxu1 %v1404_v45 }
  0x70   : > { %1296 = vmatprep.subr.bf16.mxu1 %v1407_v49 }
  0x71   : > { %1275 = vmatpush3.bf16.msra.mxu0 %v1406_v48 }
  0x72   : > { %1313 = vmatprep.subr.bf16.mxu0 %v1464_v52 }
  0x73   : > { %1297 = vmatpush3.bf16.msra.mxu1 %v1411_v51 }
  0x74   : > { %969 = vmatmul.mubr.bf16.vlgmr.msra.gmra.mrb[0].mxu0 %v1408_v47 }
  0x75   : > { %1314 = vmatpush3.bf16.msra.mxu0 %v1415_v53  ;;  %1329 = vmatprep.mubr.msk.bf16.mxu0 %vm1465_vm0, %v1464_v52 }
  0x76   : > { %1010 = vmatmul.mubr.bf16.vlgmr.msra.gmra.mrb[0].mxu1 %v1412_v50  ;;  %1315 = vmatprep.subr.bf16.mxu0 %v1464_v52 }
  0x79   : > { %1316 = vmatpush3.bf16.msra.mxu0 %v1416_v54 }
  0x7a   : > { %1317 = vmatprep.subr.bf16.mxu0 %v1464_v52 }
  0x7d   : > { %1318 = vmatpush3.bf16.msra.mxu0 %v1417_v55 }
  0x7e   : > { %1319 = vmatprep.subr.bf16.mxu0 %v1464_v52 }
  0x81   : > { %1320 = vmatpush3.bf16.msra.mxu0 %v1418_v56 }
  0x82   : > { %1321 = vmatprep.subr.bf16.mxu0 %v1464_v52 }
  0x85   : > { %1322 = vmatpush3.bf16.msra.mxu0 %v1419_v57 }
  0x86   : > { %1323 = vmatprep.subr.bf16.mxu0 %v1464_v52 }
  0x89   : > { %1324 = vmatpush3.bf16.msra.mxu0 %v1420_v58 }
  0x8a   : > { %1325 = vmatprep.subr.bf16.mxu0 %v1464_v52 }
  0x8d   : > { %1326 = vmatpush3.bf16.msra.mxu0 %v1421_v59 }
  0x8e   : > { %1327 = vmatprep.subr.bf16.mxu0 %v1464_v52 }
  0x91   : > { %1328 = vmatpush3.bf16.msra.mxu0 %v1422_v60 }
  0x94   : > { %1330 = vmatmul.mubr.bf16.vlgmr.msra.gmra.mrb[4].mxu0 %v1423_v61 }
 0x147   : > { %v1276_v62 = vpop.f32.mrb[0].mxu0 }
 0x148   : > { %v1277_v0 = vpop.f32.mrb[1].mxu0 }
 0x149   : > { %v1278_v1 = vadd.f32 %v1277_v0, %v1276_v62  ;;  %v1279_v2 = vpop.f32.mrb[2].mxu0  ;;  %v1298_v3 = vpop.f32.mrb[0].mxu1 }
 0x14a   : > { %v1280_v4 = vpop.f32.mrb[3].mxu0  ;;  %v1299_v5 = vpop.f32.mrb[1].mxu1 }
 0x14b   : > { %v971_v6 = vadd.f32 %v1278_v1, %v1210_v63  ;;  %v1281_v7 = vadd.f32 %v1280_v4, %v1279_v2  ;;  %v1300_v8 = vadd.f32 %v1299_v5, %v1298_v3  ;;  %v1301_v9 = vpop.f32.mrb[2].mxu1 }
 0x14c   : > { %v1302_v10 = vpop.f32.mrb[3].mxu1 }
 0x14d   : > { %v974_v11 = vadd.f32 %v1281_v7, %v1210_v63  ;;  %v1303_v12 = vadd.f32 %v1302_v10, %v1301_v9  ;;  %v1012_v13 = vadd.f32 %v1300_v8, %v971_v6 }
 0x14f   : > { %v1015_v14 = vadd.f32 %v1303_v12, %v974_v11 }
 0x167   : > { %v1052_v15 = vpop.f32.mrb[4].mxu0 }
 0x168   : > { %v1053_v16 = vadd.f32 %v1052_v15, %v1012_v13  ;;  %v1331_v17 = vpop.f32.mrb[5].mxu0  ;;  %1069 = sbr.rel (!%p1521_p6) target bundleno = 375 (0x177), region = 77 }
 0x169   : > { %v1055_v18 = vpop.f32.mrb[6].mxu0 }
 0x16a   : > { %v1059_v19 = vmax.f32 %v1053_v16, 0.0  ;;  %v1056_v20 = vadd.f32 %v1055_v18, %v1015_v14  ;;  %v1332_v21 = vpop.f32.mrb[7].mxu0 }
 0x16c   : > { %1061 = vst [vmem:[%s564_s29] sm:$0xff] %v1059_v19  ;;  %v1060_v22 = vmax.f32 %v1056_v20, 0.0 }
 0x16e   : > { %1062 = vst [vmem:[%s564_s29 + $0x8] sm:$0xff] %v1060_v22 }
 0x173   : > { %v1104_v23 = vld [vmem:[%s564_s29] sm:$0xff] }
 0x174   : > { %1105 = vst [vmem:[%s1074_s5] sm:$0xff] %v1104_v23 }
 0x175   : > { %v1106_v24 = vld [vmem:[%s564_s29 + $0x8] sm:$0xff] }
 0x176   : > { %1107 = vst [vmem:[%s1074_s5 + $0x28] sm:$0xff] %v1106_v24 }
 0x177 PF: > { %s13_s16 = sadd.s32 1, %s1462_s16   ;;  %s1793_s12 = smov %s1450_s13 }
 0x178   : > { %p10_p12 = scmp.ge.s32.totalorder %s13_s16, 7   ;;  %s1794_s13 = smov %s1526_s22 }
 0x179   : > { %s1795_s14 = smov %s1458_s15  ;;  %s1796_s15 = smov %s1798_s17 }
 0x17a   :  { %12 = sbr.rel (!%p10_p12) target bundleno = 3 (0x3), region = 152 }

// kernel: det_forward.19
= control target key start
LH: loop header
LB: loop body
LE: loop exit
PB: predicated region body
PF: predicated region fallthrough
CT: control target
= control target key end

     0   :  { %v679_v33 = vmov 0.0   ;;  %vm680_vm0 = vmmov 0   ;;  %vm504_vm1 = vcmask 523264   ;;  %s856_s1 = inlined_call_operand.vmem [shape: bf16[640,64], index: 1, kind: input, shape index: {}]   ;;  %s857_s0 = inlined_call_operand.vmem [shape: bf16[16,640], index: 0, kind: input, shape index: {}]   ;;  %s858_s2 = inlined_call_operand.vmem [shape: f32[1,64], index: 2, kind: input, shape index: {}]   ;;  %s859_s3 = inlined_call_operand.vmem [shape: f32[16,64], index: 3, kind: input, shape index: {}]   ;;  %s860_s4 = inlined_call_operand.vmem [shape: f32[16,64], index: 4, kind: output, shape index: {}]  }
   0x1   :  { %v632_v0 = vld [vmem:[%s856_s1 + $0x40] sm:$0xff]   ;;  %v636_v4 = vld [vmem:[%s856_s1 + $0x48] sm:$0xff]   ;;  %v640_v8 = vld [vmem:[%s856_s1 + $0x50] sm:$0xff]  }
   0x2   :  { %v633_v1 = vld [vmem:[%s856_s1] sm:$0xff]   ;;  %557 = vmatprep.subr.bf16.mxu0 %v632_v0  ;;  %v637_v5 = vld [vmem:[%s856_s1 + $0x8] sm:$0xff]   ;;  %v641_v9 = vld [vmem:[%s856_s1 + $0x10] sm:$0xff]  }
   0x3   :  { %v634_v2 = vld [vmem:[%s856_s1 + $0xc0] sm:$0xff]   ;;  %558 = vmatpush3.bf16.msra.mxu0 %v633_v1  ;;  %v638_v6 = vld [vmem:[%s856_s1 + $0xc8] sm:$0xff]   ;;  %v642_v10 = vld [vmem:[%s856_s1 + $0xd0] sm:$0xff]  }
   0x4   :  { %v635_v3 = vld [vmem:[%s856_s1 + $0x80] sm:$0xff]   ;;  %579 = vmatprep.subr.bf16.mxu1 %v634_v2  ;;  %559 = vmatprep.subr.bf16.mxu0 %v636_v4  ;;  %v639_v7 = vld [vmem:[%s856_s1 + $0x88] sm:$0xff]   ;;  %v643_v11 = vld [vmem:[%s856_s1 + $0x90] sm:$0xff]  }
   0x5   :  { %580 = vmatpush3.bf16.msra.mxu1 %v635_v3  ;;  %v644_v12 = vld [vmem:[%s856_s1 + $0x58] sm:$0xff]   ;;  %v648_v16 = vld [vmem:[%s856_s1 + $0x60] sm:$0xff]   ;;  %v652_v20 = vld [vmem:[%s856_s1 + $0x68] sm:$0xff]  }
   0x6   :  { %581 = vmatprep.subr.bf16.mxu1 %v638_v6  ;;  %v645_v13 = vld [vmem:[%s856_s1 + $0x18] sm:$0xff]   ;;  %v649_v17 = vld [vmem:[%s856_s1 + $0x20] sm:$0xff]   ;;  %v653_v21 = vld [vmem:[%s856_s1 + $0x28] sm:$0xff]  }
   0x7   :  { %560 = vmatpush3.bf16.msra.mxu0 %v637_v5  ;;  %v646_v14 = vld [vmem:[%s856_s1 + $0xd8] sm:$0xff]   ;;  %v650_v18 = vld [vmem:[%s856_s1 + $0xe0] sm:$0xff]   ;;  %v654_v22 = vld [vmem:[%s856_s1 + $0xe8] sm:$0xff]  }
   0x8   :  { %561 = vmatprep.subr.bf16.mxu0 %v640_v8  ;;  %v647_v15 = vld [vmem:[%s856_s1 + $0x98] sm:$0xff]   ;;  %v651_v19 = vld [vmem:[%s856_s1 + $0xa0] sm:$0xff]   ;;  %v655_v23 = vld [vmem:[%s856_s1 + $0xa8] sm:$0xff]  }
   0x9   :  { %582 = vmatpush3.bf16.msra.mxu1 %v639_v7  ;;  %v656_v24 = vld [vmem:[%s856_s1 + $0x70] sm:$0xff]   ;;  %v660_v28 = vld [vmem:[%s856_s1 + $0x78] sm:$0xff]   ;;  %v669_v36 = vld [vmem:[%s857_s0 + $0xc] ss:$20 sps:$4 sm:$0xff]  }
   0xa   :  { %583 = vmatprep.subr.bf16.mxu1 %v642_v10  ;;  %v657_v25 = vld [vmem:[%s856_s1 + $0x30] sm:$0xff]   ;;  %v661_v29 = vld [vmem:[%s856_s1 + $0x38] sm:$0xff]   ;;  %v670_v37 = vld [vmem:[%s856_s1 + $0x100] sm:$0xff]   ;;  %450 = vmatprep.mubr.bf16.mxu1 %v669_v36 }
   0xb   :  { %562 = vmatpush3.bf16.msra.mxu0 %v641_v9  ;;  %v658_v26 = vld [vmem:[%s856_s1 + $0xf0] sm:$0xff]   ;;  %v662_v30 = vld [vmem:[%s856_s1 + $0xf8] sm:$0xff]   ;;  %v671_v38 = vld [vmem:[%s856_s1 + $0x108] sm:$0xff]  }
   0xc   :  { %563 = vmatprep.subr.bf16.mxu0 %v644_v12  ;;  %v659_v27 = vld [vmem:[%s856_s1 + $0xb0] sm:$0xff]   ;;  %v665_v32 = vld [vmem:[%s857_s0 + $0x4] ss:$20 sps:$4 sm:$0xff]   ;;  %v667_v35 = vld [vmem:[%s857_s0 + $0x8] ss:$20 sps:$4 sm:$0xff]  }
   0xd   :  { %584 = vmatpush3.bf16.msra.mxu1 %v643_v11  ;;  %v663_v31 = vld [vmem:[%s857_s0] ss:$20 sps:$4 sm:$0xff]   ;;  %v666_v34 = vld [vmem:[%s856_s1 + $0xb8] sm:$0xff]   ;;  %409 = vmatprep.mubr.bf16.mxu0 %v665_v32  ;;  %v675_v42 = vld [vmem:[%s856_s1 + $0x128] sm:$0xff]  }
   0xe   :  { %585 = vmatprep.subr.bf16.mxu1 %v646_v14  ;;  %v672_v39 = vld [vmem:[%s856_s1 + $0x110] sm:$0xff]   ;;  %v673_v40 = vld [vmem:[%s856_s1 + $0x118] sm:$0xff]   ;;  %v674_v41 = vld [vmem:[%s856_s1 + $0x120] sm:$0xff]  }
   0xf   :  { %564 = vmatpush3.bf16.msra.mxu0 %v645_v13  ;;  %v676_v43 = vld [vmem:[%s856_s1 + $0x130] sm:$0xff]   ;;  %v677_v44 = vld [vmem:[%s856_s1 + $0x138] sm:$0xff]   ;;  %v511_v47 = vld [vmem:[%s858_s2] ss:$0 sm:$0xff] }
  0x10   :  { %565 = vmatprep.subr.bf16.mxu0 %v648_v16  ;;  %v678_v45 = vld [vmem:[%s857_s0 + $0x10] ss:$20 sps:$4 sm:$0xff]   ;;  %v501_v4 = vld [vmem:[%s859_s3 + $0x8] sm:$0xff] }
  0x11   :  { %586 = vmatpush3.bf16.msra.mxu1 %v647_v15  ;;  %v500_v0 = vld [vmem:[%s859_s3] sm:$0xff] }
  0x12   :  { %587 = vmatprep.subr.bf16.mxu1 %v650_v18 }
  0x13   :  { %566 = vmatpush3.bf16.msra.mxu0 %v649_v17 }
  0x14   :  { %567 = vmatprep.subr.bf16.mxu0 %v652_v20 }
  0x15   :  { %588 = vmatpush3.bf16.msra.mxu1 %v651_v19 }
  0x16   :  { %589 = vmatprep.subr.bf16.mxu1 %v654_v22 }
  0x17   :  { %568 = vmatpush3.bf16.msra.mxu0 %v653_v21 }
  0x18   :  { %569 = vmatprep.subr.bf16.mxu0 %v656_v24 }
  0x19   :  { %590 = vmatpush3.bf16.msra.mxu1 %v655_v23 }
  0x1a   :  { %591 = vmatprep.subr.bf16.mxu1 %v658_v26 }
  0x1b   :  { %570 = vmatpush3.bf16.msra.mxu0 %v657_v25 }
  0x1c   :  { %571 = vmatprep.subr.bf16.mxu0 %v660_v28 }
  0x1d   :  { %592 = vmatpush3.bf16.msra.mxu1 %v659_v27 }
  0x1e   :  { %593 = vmatprep.subr.bf16.mxu1 %v662_v30 }
  0x1f   :  { %572 = vmatpush3.bf16.msra.mxu0 %v661_v29 }
  0x20   :  { %610 = vmatprep.subr.bf16.mxu0 %v679_v33 }
  0x21   :  { %594 = vmatpush3.bf16.msra.mxu1 %v666_v34 }
  0x22   :  { %410 = vmatmul.mubr.bf16.vlgmr.msra.gmra.mrb[0].mxu0 %v663_v31 }
  0x23   :  { %626 = vmatprep.mubr.msk.bf16.mxu0 %vm680_vm0, %v679_v33  ;;  %611 = vmatpush3.bf16.msra.mxu0 %v670_v37 }
  0x24   :  { %451 = vmatmul.mubr.bf16.vlgmr.msra.gmra.mrb[0].mxu1 %v667_v35  ;;  %612 = vmatprep.subr.bf16.mxu0 %v679_v33 }
  0x27   :  { %613 = vmatpush3.bf16.msra.mxu0 %v671_v38 }
  0x28   :  { %614 = vmatprep.subr.bf16.mxu0 %v679_v33 }
  0x2b   :  { %615 = vmatpush3.bf16.msra.mxu0 %v672_v39 }
  0x2c   :  { %616 = vmatprep.subr.bf16.mxu0 %v679_v33 }
  0x2f   :  { %617 = vmatpush3.bf16.msra.mxu0 %v673_v40 }
  0x30   :  { %618 = vmatprep.subr.bf16.mxu0 %v679_v33 }
  0x33   :  { %619 = vmatpush3.bf16.msra.mxu0 %v674_v41 }
  0x34   :  { %620 = vmatprep.subr.bf16.mxu0 %v679_v33 }
  0x37   :  { %621 = vmatpush3.bf16.msra.mxu0 %v675_v42 }
  0x38   :  { %622 = vmatprep.subr.bf16.mxu0 %v679_v33 }
  0x3b   :  { %623 = vmatpush3.bf16.msra.mxu0 %v676_v43 }
  0x3c   :  { %624 = vmatprep.subr.bf16.mxu0 %v679_v33 }
  0x3f   :  { %625 = vmatpush3.bf16.msra.mxu0 %v677_v44 }
  0x42   :  { %627 = vmatmul.mubr.bf16.vlgmr.msra.gmra.mrb[4].mxu0 %v678_v45 }
  0xf5   :  { %v573_v46 = vpop.f32.mrb[0].mxu0 }
  0xf6   :  { %v574_v48 = vpop.f32.mrb[1].mxu0 }
  0xf7   :  { %v575_v49 = vadd.f32 %v574_v48, %v573_v46  ;;  %v576_v50 = vpop.f32.mrb[2].mxu0  ;;  %v595_v51 = vpop.f32.mrb[0].mxu1 }
  0xf8   :  { %v577_v52 = vpop.f32.mrb[3].mxu0  ;;  %v596_v55 = vpop.f32.mrb[1].mxu1 }
  0xf9   :  { %v412_v53 = vadd.f32 %v575_v49, %v511_v47  ;;  %v578_v54 = vadd.f32 %v577_v52, %v576_v50  ;;  %v597_v56 = vadd.f32 %v596_v55, %v595_v51  ;;  %v598_v57 = vpop.f32.mrb[2].mxu1 }
  0xfa   :  { %v599_v59 = vpop.f32.mrb[3].mxu1 }
  0xfb   :  { %v415_v58 = vadd.f32 %v578_v54, %v511_v47  ;;  %v600_v60 = vadd.f32 %v599_v59, %v598_v57  ;;  %v453_v61 = vadd.f32 %v597_v56, %v412_v53 }
  0xfd   :  { %v456_v62 = vadd.f32 %v600_v60, %v415_v58 }
 0x115   :  { %v493_v63 = vpop.f32.mrb[4].mxu0 }
 0x116   :  { %v494_v1 = vadd.f32 %v493_v63, %v453_v61  ;;  %v628_v2 = vpop.f32.mrb[5].mxu0 }
 0x117   :  { %v496_v3 = vpop.f32.mrb[6].mxu0 }
 0x118   :  { %v502_v5 = vadd.f32 %v500_v0, %v494_v1  ;;  %v497_v6 = vadd.f32 %v496_v3, %v456_v62  ;;  %v629_v7 = vpop.f32.mrb[7].mxu0 }
 0x11a   :  { %505 = vst.msk [vmem:[%s860_s4] sm:$0xff] %vm504_vm1, %v502_v5  ;;  %v503_v8 = vadd.f32 %v501_v4, %v497_v6 }
 0x11c   :  { %506 = vst.msk [vmem:[%s860_s4 + $0x8] sm:$0xff] %vm504_vm1, %v503_v8 }

// kernel: det_forward.20
= control target key start
LH: loop header
LB: loop body
LE: loop exit
PB: predicated region body
PF: predicated region fallthrough
CT: control target
= control target key end

     0   :  { %s1118_s12 = smov 0   ;;  %s1120_s13 = smov 0   ;;  %s1334_s0 = inlined_call_operand.vmem [shape: bf16[16,384], index: 0, kind: input, shape index: {}]   ;;  %s1335_s1 = inlined_call_operand.vmem [shape: bf16[384,384], index: 1, kind: input, shape index: {}]   ;;  %s1336_s2 = inlined_call_operand.vmem [shape: f32[1,384], index: 2, kind: input, shape index: {}]   ;;  %s1337_s3 = inlined_call_operand.vmem [shape: f32[16,384], index: 3, kind: output, shape index: {}]  }
   0x1   :  { %s1122_s14 = smov 0   ;;  %s1124_s15 = smov 0  }
   0x2   :  { %s1126_s16 = smov 0  }
   0x3 LB: > { %s22_s17 = sadd.s32 1, %s1090_s15  ;;  %s893_s18 = sadd.s32 4294967295, %s1094_s16   ;;  %s1094_s16 = sphi %s1126_s16, %s13_s16   ;;  %s1090_s15 = sphi %s1124_s15, %s1342_s15   ;;  %s1086_s14 = sphi %s1122_s14, %s1341_s14   ;;  %s1082_s13 = sphi %s1120_s13, %s1340_s13   ;;  %s1078_s12 = sphi %s1118_s12, %s1339_s12  }
   0x4   : > { %p23_p0 = scmp.ge.s32.totalorder %s22_s17, 3  ;;  %p65_p1 = scmp.ne.s32.totalorder %s1082_s13, %s1078_s12 }
   0x5   : > { %p66_p2 = scmp.eq.s32.totalorder %s1094_s16, 0  ;;  %p123_p4 = scmp.eq.s32.totalorder %s893_s18, 2 }
   0x6   : > { %s1344_s17 = smov (%p23_p0, %s22_s17), 0  ;;  %s58_s20 = sadd.s32 1, %s1082_s13 }
   0x7   : > { %p67_p3 = por %p66_p2, %p65_p1  ;;  %s55_s19 = ssub.s32 %s1090_s15, %s1344_s17 }
   0x8   : > { %p56_p5 = scmp.eq.s32.totalorder %s55_s19, 0  ;;  %p1153_p6 = por %p123_p4, %p65_p1 }
   0x9   : > { %p897_p7 = scmp.ge.s32.totalorder %s1094_s16, 3 }
   0xa   : > { %s1158_s22 = scalar_select %p56_p5, %s1082_s13, %s58_s20  }
   0xb   : > { %155 = sbr.rel (%p897_p7) target bundleno = 54 (0x36), region = 20 }
  0x12   : > { %158 = sbr.rel (!%p67_p3) target bundleno = 54 (0x36), region = 24  ;;  %s160_s23 = sand.u32 (%p67_p3), 1, %s1082_s13  }
  0x13   : > { %s898_s24 = sshll.u32 (%p67_p3), %s1090_s15, 2  ;;  %s984_s25 = smul.u32 (%p67_p3), 192, %s160_s23 }
  0x14   : > { %s1166_s28 = scalar_lea.vmem (%p67_p3), %s1335_s1, %s898_s24 }
  0x15   : > { %v180_v0 = vld [vmem:[%s1166_s28] sm:$0xf] (%p67_p3)  ;;  %v182_v1 = vld [vmem:[%s1166_s28 + $0xc] sm:$0xf] (%p67_p3)  ;;  %v184_v2 = vld [vmem:[%s1166_s28 + $0x18] sm:$0xf] (%p67_p3) }
  0x16   : > { %v186_v3 = vld [vmem:[%s1166_s28 + $0x24] sm:$0xf] (%p67_p3)  ;;  %v188_v4 = vld [vmem:[%s1166_s28 + $0x30] sm:$0xf] (%p67_p3)  ;;  %s1173_s29 = scalar_lea.vmem (%p67_p3), [#allocation2], %s984_s25 }
  0x17   : > { %181 = vst [vmem:[%s1173_s29] sm:$0xf] (%p67_p3), %v180_v0  ;;  %183 = vst [vmem:[%s1173_s29 + $0x4] sm:$0xf] (%p67_p3), %v182_v1  ;;  %v190_v5 = vld [vmem:[%s1166_s28 + $0x3c] sm:$0xf] (%p67_p3) }
  0x18   : > { %185 = vst [vmem:[%s1173_s29 + $0x8] sm:$0xf] (%p67_p3), %v184_v2  ;;  %187 = vst [vmem:[%s1173_s29 + $0xc] sm:$0xf] (%p67_p3), %v186_v3  ;;  %v192_v6 = vld [vmem:[%s1166_s28 + $0x48] sm:$0xf] (%p67_p3) }
  0x19   : > { %189 = vst [vmem:[%s1173_s29 + $0x10] sm:$0xf] %v188_v4  ;;  %v194_v7 = vld [vmem:[%s1166_s28 + $0x54] sm:$0xf]  ;;  %191 = vst [vmem:[%s1173_s29 + $0x14] sm:$0xf] %v190_v5 }
  0x1a   : > { %193 = vst [vmem:[%s1173_s29 + $0x18] sm:$0xf] %v192_v6  ;;  %195 = vst [vmem:[%s1173_s29 + $0x1c] sm:$0xf] %v194_v7  ;;  %v196_v8 = vld [vmem:[%s1166_s28 + $0x60] sm:$0xf] }
  0x1b   : > { %v198_v9 = vld [vmem:[%s1166_s28 + $0x6c] sm:$0xf]  ;;  %v200_v10 = vld [vmem:[%s1166_s28 + $0x78] sm:$0xf]  ;;  %197 = vst [vmem:[%s1173_s29 + $0x20] sm:$0xf] %v196_v8 }
  0x1c   : > { %199 = vst [vmem:[%s1173_s29 + $0x24] sm:$0xf] %v198_v9  ;;  %201 = vst [vmem:[%s1173_s29 + $0x28] sm:$0xf] %v200_v10  ;;  %v202_v11 = vld [vmem:[%s1166_s28 + $0x84] sm:$0xf] }
  0x1d   : > { %v204_v12 = vld [vmem:[%s1166_s28 + $0x90] sm:$0xf]  ;;  %v206_v13 = vld [vmem:[%s1166_s28 + $0x9c] sm:$0xf]  ;;  %203 = vst [vmem:[%s1173_s29 + $0x2c] sm:$0xf] %v202_v11 }
  0x1e   : > { %205 = vst [vmem:[%s1173_s29 + $0x30] sm:$0xf] %v204_v12  ;;  %207 = vst [vmem:[%s1173_s29 + $0x34] sm:$0xf] %v206_v13  ;;  %v208_v14 = vld [vmem:[%s1166_s28 + $0xa8] sm:$0xf] }
  0x1f   : > { %v210_v15 = vld [vmem:[%s1166_s28 + $0xb4] sm:$0xf]  ;;  %v212_v16 = vld [vmem:[%s1166_s28 + $0xc0] sm:$0xf]  ;;  %209 = vst [vmem:[%s1173_s29 + $0x38] sm:$0xf] %v208_v14 }
  0x20   : > { %211 = vst [vmem:[%s1173_s29 + $0x3c] sm:$0xf] %v210_v15  ;;  %213 = vst [vmem:[%s1173_s29 + $0x40] sm:$0xf] %v212_v16  ;;  %v214_v17 = vld [vmem:[%s1166_s28 + $0xcc] sm:$0xf] }
  0x21   : > { %v216_v18 = vld [vmem:[%s1166_s28 + $0xd8] sm:$0xf]  ;;  %v218_v19 = vld [vmem:[%s1166_s28 + $0xe4] sm:$0xf]  ;;  %215 = vst [vmem:[%s1173_s29 + $0x44] sm:$0xf] %v214_v17 }
  0x22   : > { %217 = vst [vmem:[%s1173_s29 + $0x48] sm:$0xf] %v216_v18  ;;  %219 = vst [vmem:[%s1173_s29 + $0x4c] sm:$0xf] %v218_v19  ;;  %v220_v20 = vld [vmem:[%s1166_s28 + $0xf0] sm:$0xf] }
  0x23   : > { %v222_v21 = vld [vmem:[%s1166_s28 + $0xfc] sm:$0xf]  ;;  %v224_v22 = vld [vmem:[%s1166_s28 + $0x108] sm:$0xf]  ;;  %221 = vst [vmem:[%s1173_s29 + $0x50] sm:$0xf] %v220_v20 }
  0x24   : > { %223 = vst [vmem:[%s1173_s29 + $0x54] sm:$0xf] %v222_v21  ;;  %225 = vst [vmem:[%s1173_s29 + $0x58] sm:$0xf] %v224_v22  ;;  %v226_v23 = vld [vmem:[%s1166_s28 + $0x114] sm:$0xf] }
  0x25   : > { %v228_v24 = vld [vmem:[%s1166_s28 + $0x120] sm:$0xf]  ;;  %v230_v25 = vld [vmem:[%s1166_s28 + $0x12c] sm:$0xf]  ;;  %227 = vst [vmem:[%s1173_s29 + $0x5c] sm:$0xf] %v226_v23 }
  0x26   : > { %229 = vst [vmem:[%s1173_s29 + $0x60] sm:$0xf] %v228_v24  ;;  %231 = vst [vmem:[%s1173_s29 + $0x64] sm:$0xf] %v230_v25  ;;  %v232_v26 = vld [vmem:[%s1166_s28 + $0x138] sm:$0xf] }
  0x27   : > { %v234_v27 = vld [vmem:[%s1166_s28 + $0x144] sm:$0xf]  ;;  %v236_v28 = vld [vmem:[%s1166_s28 + $0x150] sm:$0xf]  ;;  %233 = vst [vmem:[%s1173_s29 + $0x68] sm:$0xf] %v232_v26 }
  0x28   : > { %235 = vst [vmem:[%s1173_s29 + $0x6c] sm:$0xf] %v234_v27  ;;  %237 = vst [vmem:[%s1173_s29 + $0x70] sm:$0xf] %v236_v28  ;;  %v238_v29 = vld [vmem:[%s1166_s28 + $0x15c] sm:$0xf] }
  0x29   : > { %v240_v30 = vld [vmem:[%s1166_s28 + $0x168] sm:$0xf]  ;;  %v242_v31 = vld [vmem:[%s1166_s28 + $0x174] sm:$0xf]  ;;  %239 = vst [vmem:[%s1173_s29 + $0x74] sm:$0xf] %v238_v29 }
  0x2a   : > { %241 = vst [vmem:[%s1173_s29 + $0x78] sm:$0xf] %v240_v30  ;;  %243 = vst [vmem:[%s1173_s29 + $0x7c] sm:$0xf] %v242_v31  ;;  %v244_v32 = vld [vmem:[%s1166_s28 + $0x180] sm:$0xf] }
  0x2b   : > { %v246_v33 = vld [vmem:[%s1166_s28 + $0x18c] sm:$0xf]  ;;  %v248_v34 = vld [vmem:[%s1166_s28 + $0x198] sm:$0xf]  ;;  %245 = vst [vmem:[%s1173_s29 + $0x80] sm:$0xf] %v244_v32 }
  0x2c   : > { %247 = vst [vmem:[%s1173_s29 + $0x84] sm:$0xf] %v246_v33  ;;  %249 = vst [vmem:[%s1173_s29 + $0x88] sm:$0xf] %v248_v34  ;;  %v250_v35 = vld [vmem:[%s1166_s28 + $0x1a4] sm:$0xf] }
  0x2d   : > { %v252_v36 = vld [vmem:[%s1166_s28 + $0x1b0] sm:$0xf]  ;;  %v254_v37 = vld [vmem:[%s1166_s28 + $0x1bc] sm:$0xf]  ;;  %251 = vst [vmem:[%s1173_s29 + $0x8c] sm:$0xf] %v250_v35 }
  0x2e   : > { %253 = vst [vmem:[%s1173_s29 + $0x90] sm:$0xf] %v252_v36  ;;  %255 = vst [vmem:[%s1173_s29 + $0x94] sm:$0xf] %v254_v37  ;;  %v256_v38 = vld [vmem:[%s1166_s28 + $0x1c8] sm:$0xf] }
  0x2f   : > { %v258_v39 = vld [vmem:[%s1166_s28 + $0x1d4] sm:$0xf]  ;;  %v260_v40 = vld [vmem:[%s1166_s28 + $0x1e0] sm:$0xf]  ;;  %257 = vst [vmem:[%s1173_s29 + $0x98] sm:$0xf] %v256_v38 }
  0x30   : > { %259 = vst [vmem:[%s1173_s29 + $0x9c] sm:$0xf] %v258_v39  ;;  %261 = vst [vmem:[%s1173_s29 + $0xa0] sm:$0xf] %v260_v40  ;;  %v262_v41 = vld [vmem:[%s1166_s28 + $0x1ec] sm:$0xf] }
  0x31   : > { %v264_v42 = vld [vmem:[%s1166_s28 + $0x1f8] sm:$0xf]  ;;  %v266_v43 = vld [vmem:[%s1166_s28 + $0x204] sm:$0xf]  ;;  %263 = vst [vmem:[%s1173_s29 + $0xa4] sm:$0xf] %v262_v41 }
  0x32   : > { %265 = vst [vmem:[%s1173_s29 + $0xa8] sm:$0xf] %v264_v42  ;;  %267 = vst [vmem:[%s1173_s29 + $0xac] sm:$0xf] %v266_v43  ;;  %v268_v44 = vld [vmem:[%s1166_s28 + $0x210] sm:$0xf] }
  0x33   : > { %v270_v45 = vld [vmem:[%s1166_s28 + $0x21c] sm:$0xf]  ;;  %v272_v46 = vld [vmem:[%s1166_s28 + $0x228] sm:$0xf]  ;;  %269 = vst [vmem:[%s1173_s29 + $0xb0] sm:$0xf] %v268_v44 }
  0x34   : > { %271 = vst [vmem:[%s1173_s29 + $0xb4] sm:$0xf] %v270_v45  ;;  %273 = vst [vmem:[%s1173_s29 + $0xb8] sm:$0xf] %v272_v46  ;;  %v274_v47 = vld [vmem:[%s1166_s28 + $0x234] sm:$0xf] }
  0x35   : > { %275 = vst [vmem:[%s1173_s29 + $0xbc] sm:$0xf] %v274_v47 }
  0x36 PF: > { %p899_p8 = scmp.ge.s32.totalorder %s1094_s16, 1  ;;  %p399_p9 = scmp.lt.s32.totalorder %s1094_s16, 4 }
  0x38   : > { %p400_p10 = pnand %p899_p8, %p399_p9 }
  0x39   : > { %s406_s30 = sand.u32 (!%p400_p10), 1, %s1078_s12   ;;  %v1096_v48 = vmov (!%p400_p10), 0.0   ;;  %v1053_v49 = vld [vmem:[%s1334_s0 + $0x4] ss:$12 sps:$4 sm:$0xff] (!%p400_p10)   ;;  %vm1097_vm0 = vmmov (!%p400_p10), 0   ;;  %p444_p11 = scmp.lt.s32.totalorder (!%p400_p10), %s1086_s14, 2 }
  0x3a   : > { %403 = sbr.rel (%p400_p10) target bundleno = 327 (0x147), region = 69  ;;  %964 = vmatprep.subr.bf16.mxu1 (!%p400_p10), %v1096_v48  ;;  %980 = vmatprep.mubr.msk.bf16.mxu1 (!%p400_p10), %vm1097_vm0, %v1096_v48  ;;  %v1051_v10 = vld [vmem:[%s1334_s0] ss:$12 sps:$4 sm:$0xff] (!%p400_p10)   ;;  %v1055_v11 = vld [vmem:[%s1334_s0 + $0x8] ss:$12 sps:$4 sm:$0xff] (!%p400_p10)   ;;  %s900_s24 = sshll.u32 (!%p400_p10), %s406_s30, 4 }
  0x3b   : > { %s985_s4 = smul.u32 (!%p400_p10), 192, %s406_s30  ;;  %700 = vmatprep.mubr.bf16.mxu0 (!%p400_p10), %v1053_v49  ;;  %s436_s25 = scalar_lea.vmem (!%p400_p10), [#allocation3], %s900_s24 }
  0x3d   : > { %s1274_s7 = scalar_lea.vmem (!%p400_p10), [#allocation2], %s985_s4 }
  0x3e   : > { %v1028_v50 = vld [vmem:[%s1274_s7 + $0x40] sm:$0xff] (!%p400_p10)   ;;  %v1031_v53 = vld [vmem:[%s1274_s7 + $0x48] sm:$0xff] (!%p400_p10)   ;;  %v1034_v56 = vld [vmem:[%s1274_s7 + $0x50] sm:$0xff] (!%p400_p10)  }
  0x3f   : > { %v1029_v51 = vld [vmem:[%s1274_s7] sm:$0xff] (!%p400_p10)   ;;  %933 = vmatprep.subr.bf16.mxu0 (!%p400_p10), %v1028_v50  ;;  %v1032_v54 = vld [vmem:[%s1274_s7 + $0x8] sm:$0xff] (!%p400_p10)   ;;  %v1035_v57 = vld [vmem:[%s1274_s7 + $0x10] sm:$0xff] (!%p400_p10)  }
  0x40   : > { %v1030_v52 = vld [vmem:[%s1274_s7 + $0x80] sm:$0xff] (!%p400_p10)   ;;  %934 = vmatpush3.bf16.msra.mxu0 (!%p400_p10), %v1029_v51  ;;  %v1033_v55 = vld [vmem:[%s1274_s7 + $0x88] sm:$0xff] (!%p400_p10)   ;;  %v1036_v58 = vld [vmem:[%s1274_s7 + $0x90] sm:$0xff] (!%p400_p10)  }
  0x41   : > { %965 = vmatpush3.bf16.msra.mxu1 %v1030_v52  ;;  %935 = vmatprep.subr.bf16.mxu0 %v1031_v53  ;;  %v1037_v59 = vld [vmem:[%s1274_s7 + $0x58] sm:$0xff]   ;;  %v1040_v62 = vld [vmem:[%s1274_s7 + $0x60] sm:$0xff]   ;;  %v1043_v1 = vld [vmem:[%s1274_s7 + $0x68] sm:$0xff]   ;;  %s445_s18 = scalar_select %p444_p11, %s1086_s14, 2 }
  0x42   : > { %966 = vmatprep.subr.bf16.mxu1 %v1096_v48  ;;  %v1038_v60 = vld [vmem:[%s1274_s7 + $0x18] sm:$0xff]   ;;  %v1041_v63 = vld [vmem:[%s1274_s7 + $0x20] sm:$0xff]   ;;  %v1044_v2 = vld [vmem:[%s1274_s7 + $0x28] sm:$0xff]   ;;  %s930_s26 = sshll.u32 (%p1153_p6), %s1086_s14, 3 }
  0x43   : > { %v1039_v61 = vld [vmem:[%s1274_s7 + $0x98] sm:$0xff]   ;;  %v1042_v0 = vld [vmem:[%s1274_s7 + $0xa0] sm:$0xff]   ;;  %v1045_v3 = vld [vmem:[%s1274_s7 + $0xa8] sm:$0xff]   ;;  %s446_s23 = scalar_lea.vmem %s1336_s2, %s445_s18  ;;  %s765_s28 = scalar_lea.vmem (%p1153_p6), %s1337_s3, %s930_s26 }
  0x44   : > { %936 = vmatpush3.bf16.msra.mxu0 %v1032_v54  ;;  %v1046_v4 = vld [vmem:[%s1274_s7 + $0x70] sm:$0xff]   ;;  %v1049_v7 = vld [vmem:[%s1274_s7 + $0x78] sm:$0xff]   ;;  %v901_v14 = vld [vmem:[%s446_s23] ss:$0 sm:$0xff] }
  0x45   : > { %967 = vmatpush3.bf16.msra.mxu1 %v1033_v55  ;;  %937 = vmatprep.subr.bf16.mxu0 %v1034_v56  ;;  %v1047_v5 = vld [vmem:[%s1274_s7 + $0x30] sm:$0xff]   ;;  %v1050_v8 = vld [vmem:[%s1274_s7 + $0x38] sm:$0xff]  }
  0x46   : > { %968 = vmatprep.subr.bf16.mxu1 %v1096_v48  ;;  %v1048_v6 = vld [vmem:[%s1274_s7 + $0xb0] sm:$0xff]   ;;  %v1054_v9 = vld [vmem:[%s1274_s7 + $0xb8] sm:$0xff]  }
  0x48   : > { %938 = vmatpush3.bf16.msra.mxu0 %v1035_v57 }
  0x49   : > { %969 = vmatpush3.bf16.msra.mxu1 %v1036_v58  ;;  %939 = vmatprep.subr.bf16.mxu0 %v1037_v59 }
  0x4a   : > { %970 = vmatprep.subr.bf16.mxu1 %v1096_v48 }
  0x4c   : > { %940 = vmatpush3.bf16.msra.mxu0 %v1038_v60 }
  0x4d   : > { %971 = vmatpush3.bf16.msra.mxu1 %v1039_v61  ;;  %941 = vmatprep.subr.bf16.mxu0 %v1040_v62 }
  0x4e   : > { %972 = vmatprep.subr.bf16.mxu1 %v1096_v48 }
  0x50   : > { %942 = vmatpush3.bf16.msra.mxu0 %v1041_v63 }
  0x51   : > { %973 = vmatpush3.bf16.msra.mxu1 %v1042_v0  ;;  %943 = vmatprep.subr.bf16.mxu0 %v1043_v1 }
  0x52   : > { %974 = vmatprep.subr.bf16.mxu1 %v1096_v48 }
  0x54   : > { %944 = vmatpush3.bf16.msra.mxu0 %v1044_v2 }
  0x55   : > { %975 = vmatpush3.bf16.msra.mxu1 %v1045_v3  ;;  %945 = vmatprep.subr.bf16.mxu0 %v1046_v4 }
  0x56   : > { %976 = vmatprep.subr.bf16.mxu1 %v1096_v48 }
  0x58   : > { %946 = vmatpush3.bf16.msra.mxu0 %v1047_v5 }
  0x59   : > { %977 = vmatpush3.bf16.msra.mxu1 %v1048_v6  ;;  %947 = vmatprep.subr.bf16.mxu0 %v1049_v7 }
  0x5a   : > { %978 = vmatprep.subr.bf16.mxu1 %v1096_v48 }
  0x5c   : > { %948 = vmatpush3.bf16.msra.mxu0 %v1050_v8 }
  0x5d   : > { %979 = vmatpush3.bf16.msra.mxu1 %v1054_v9 }
  0x5f   : > { %701 = vmatmul.mubr.bf16.vlgmr.msra.gmra.mrb[0].mxu0 %v1051_v10 }
  0x60   : > { %981 = vmatmul.mubr.bf16.vlgmr.msra.gmra.mrb[0].mxu1 %v1055_v11 }
 0x132   : > { %v949_v12 = vpop.f32.mrb[0].mxu0 }
 0x133   : > { %v950_v13 = vpop.f32.mrb[1].mxu0  ;;  %v743_v15 = vpop.f32.mrb[0].mxu1 }
 0x134   : > { %v951_v16 = vadd.f32 %v950_v13, %v949_v12  ;;  %v952_v17 = vpop.f32.mrb[2].mxu0  ;;  %v982_v18 = vpop.f32.mrb[1].mxu1 }
 0x135   : > { %v953_v19 = vpop.f32.mrb[3].mxu0  ;;  %v746_v20 = vpop.f32.mrb[2].mxu1 }
 0x136   : > { %v703_v21 = vadd.f32 %v951_v16, %v901_v14  ;;  %v954_v22 = vadd.f32 %v953_v19, %v952_v17  ;;  %v983_v23 = vpop.f32.mrb[3].mxu1 }
 0x138   : > { %v744_v24 = vadd.f32 %v743_v15, %v703_v21  ;;  %v706_v25 = vadd.f32 %v954_v22, %v901_v14  ;;  %760 = sbr.rel (!%p1153_p6) target bundleno = 327 (0x147), region = 77 }
 0x13a   : > { %v750_v26 = vmax.f32 %v744_v24, 0.0  ;;  %v747_v27 = vadd.f32 %v746_v20, %v706_v25 }
 0x13c   : > { %752 = vst [vmem:[%s436_s25] sm:$0xff] %v750_v26  ;;  %v751_v28 = vmax.f32 %v747_v27, 0.0 }
 0x13e   : > { %753 = vst [vmem:[%s436_s25 + $0x8] sm:$0xff] %v751_v28 }
 0x143   : > { %v795_v29 = vld [vmem:[%s436_s25] sm:$0xff] }
 0x144   : > { %796 = vst [vmem:[%s765_s28] sm:$0xff] %v795_v29 }
 0x145   : > { %v797_v30 = vld [vmem:[%s436_s25 + $0x8] sm:$0xff] }
 0x146   : > { %798 = vst [vmem:[%s765_s28 + $0x18] sm:$0xff] %v797_v30 }
 0x147 PF: > { %s13_s16 = sadd.s32 1, %s1094_s16   ;;  %s1339_s12 = smov %s1082_s13 }
 0x148   : > { %p10_p12 = scmp.ge.s32.totalorder %s13_s16, 5   ;;  %s1340_s13 = smov %s1158_s22 }
 0x149   : > { %s1341_s14 = smov %s1090_s15  ;;  %s1342_s15 = smov %s1344_s17 }
 0x14a   :  { %12 = sbr.rel (!%p10_p12) target bundleno = 3 (0x3), region = 152 }

// kernel: det_forward.21
= control target key start
LH: loop header
LB: loop body
LE: loop exit
PB: predicated region body
PF: predicated region fallthrough
CT: control target
= control target key end

     0   :  { %v439_v1 = vmov 0.0   ;;  %vm440_vm0 = vmmov 0   ;;  %vm323_vm1 = vcmask 523264   ;;  %s562_s1 = inlined_call_operand.vmem [shape: bf16[384,64], index: 1, kind: input, shape index: {}]   ;;  %s563_s0 = inlined_call_operand.vmem [shape: bf16[16,384], index: 0, kind: input, shape index: {}]   ;;  %s564_s2 = inlined_call_operand.vmem [shape: f32[1,64], index: 2, kind: input, shape index: {}]   ;;  %s565_s3 = inlined_call_operand.vmem [shape: f32[16,64], index: 3, kind: input, shape index: {}]   ;;  %s566_s4 = inlined_call_operand.vmem [shape: f32[16,64], index: 4, kind: output, shape index: {}]  }
   0x1   :  { %v411_v0 = vld [vmem:[%s562_s1 + $0x40] sm:$0xff]   ;;  %389 = vmatprep.subr.bf16.mxu1 %v439_v1  ;;  %405 = vmatprep.mubr.msk.bf16.mxu1 %vm440_vm0, %v439_v1  ;;  %v414_v4 = vld [vmem:[%s562_s1 + $0x48] sm:$0xff]   ;;  %v417_v7 = vld [vmem:[%s562_s1 + $0x50] sm:$0xff]  }
   0x2   :  { %v412_v2 = vld [vmem:[%s562_s1] sm:$0xff]   ;;  %358 = vmatprep.subr.bf16.mxu0 %v411_v0  ;;  %v415_v5 = vld [vmem:[%s562_s1 + $0x8] sm:$0xff]   ;;  %v418_v8 = vld [vmem:[%s562_s1 + $0x10] sm:$0xff]  }
   0x3   :  { %v413_v3 = vld [vmem:[%s562_s1 + $0x80] sm:$0xff]   ;;  %359 = vmatpush3.bf16.msra.mxu0 %v412_v2  ;;  %v416_v6 = vld [vmem:[%s562_s1 + $0x88] sm:$0xff]   ;;  %v419_v9 = vld [vmem:[%s562_s1 + $0x90] sm:$0xff]  }
   0x4   :  { %390 = vmatpush3.bf16.msra.mxu1 %v413_v3  ;;  %360 = vmatprep.subr.bf16.mxu0 %v414_v4  ;;  %v420_v10 = vld [vmem:[%s562_s1 + $0x58] sm:$0xff]   ;;  %v423_v13 = vld [vmem:[%s562_s1 + $0x60] sm:$0xff]   ;;  %v426_v16 = vld [vmem:[%s562_s1 + $0x68] sm:$0xff]  }
   0x5   :  { %391 = vmatprep.subr.bf16.mxu1 %v439_v1  ;;  %v421_v11 = vld [vmem:[%s562_s1 + $0x18] sm:$0xff]   ;;  %v424_v14 = vld [vmem:[%s562_s1 + $0x20] sm:$0xff]   ;;  %v427_v17 = vld [vmem:[%s562_s1 + $0x28] sm:$0xff]  }
   0x6   :  { %v422_v12 = vld [vmem:[%s562_s1 + $0x98] sm:$0xff]   ;;  %v425_v15 = vld [vmem:[%s562_s1 + $0xa0] sm:$0xff]   ;;  %v428_v18 = vld [vmem:[%s562_s1 + $0xa8] sm:$0xff]  }
   0x7   :  { %361 = vmatpush3.bf16.msra.mxu0 %v415_v5  ;;  %v429_v19 = vld [vmem:[%s562_s1 + $0x70] sm:$0xff]   ;;  %v432_v22 = vld [vmem:[%s562_s1 + $0x78] sm:$0xff]   ;;  %v434_v26 = vld [vmem:[%s563_s0] ss:$12 sps:$4 sm:$0xff]  }
   0x8   :  { %392 = vmatpush3.bf16.msra.mxu1 %v416_v6  ;;  %362 = vmatprep.subr.bf16.mxu0 %v417_v7  ;;  %v430_v20 = vld [vmem:[%s562_s1 + $0x30] sm:$0xff]   ;;  %v433_v24 = vld [vmem:[%s562_s1 + $0x38] sm:$0xff]   ;;  %v330_v30 = vld [vmem:[%s564_s2] ss:$0 sm:$0xff] }
   0x9   :  { %393 = vmatprep.subr.bf16.mxu1 %v439_v1  ;;  %v431_v21 = vld [vmem:[%s562_s1 + $0xb0] sm:$0xff]   ;;  %v437_v25 = vld [vmem:[%s562_s1 + $0xb8] sm:$0xff]   ;;  %v319_v40 = vld [vmem:[%s565_s3] sm:$0xff] }
   0xa   :  { %v436_v23 = vld [vmem:[%s563_s0 + $0x4] ss:$12 sps:$4 sm:$0xff]   ;;  %v438_v27 = vld [vmem:[%s563_s0 + $0x8] ss:$12 sps:$4 sm:$0xff]  }
   0xb   :  { %363 = vmatpush3.bf16.msra.mxu0 %v418_v8  ;;  %269 = vmatprep.mubr.bf16.mxu0 %v436_v23  ;;  %v320_v43 = vld [vmem:[%s565_s3 + $0x8] sm:$0xff] }
   0xc   :  { %394 = vmatpush3.bf16.msra.mxu1 %v419_v9  ;;  %364 = vmatprep.subr.bf16.mxu0 %v420_v10 }
   0xd   :  { %395 = vmatprep.subr.bf16.mxu1 %v439_v1 }
   0xf   :  { %365 = vmatpush3.bf16.msra.mxu0 %v421_v11 }
  0x10   :  { %396 = vmatpush3.bf16.msra.mxu1 %v422_v12  ;;  %366 = vmatprep.subr.bf16.mxu0 %v423_v13 }
  0x11   :  { %397 = vmatprep.subr.bf16.mxu1 %v439_v1 }
  0x13   :  { %367 = vmatpush3.bf16.msra.mxu0 %v424_v14 }
  0x14   :  { %398 = vmatpush3.bf16.msra.mxu1 %v425_v15  ;;  %368 = vmatprep.subr.bf16.mxu0 %v426_v16 }
  0x15   :  { %399 = vmatprep.subr.bf16.mxu1 %v439_v1 }
  0x17   :  { %369 = vmatpush3.bf16.msra.mxu0 %v427_v17 }
  0x18   :  { %400 = vmatpush3.bf16.msra.mxu1 %v428_v18  ;;  %370 = vmatprep.subr.bf16.mxu0 %v429_v19 }
  0x19   :  { %401 = vmatprep.subr.bf16.mxu1 %v439_v1 }
  0x1b   :  { %371 = vmatpush3.bf16.msra.mxu0 %v430_v20 }
  0x1c   :  { %402 = vmatpush3.bf16.msra.mxu1 %v431_v21  ;;  %372 = vmatprep.subr.bf16.mxu0 %v432_v22 }
  0x1d   :  { %403 = vmatprep.subr.bf16.mxu1 %v439_v1 }
  0x1f   :  { %373 = vmatpush3.bf16.msra.mxu0 %v433_v24 }
  0x20   :  { %404 = vmatpush3.bf16.msra.mxu1 %v437_v25 }
  0x22   :  { %270 = vmatmul.mubr.bf16.vlgmr.msra.gmra.mrb[0].mxu0 %v434_v26 }
  0x23   :  { %406 = vmatmul.mubr.bf16.vlgmr.msra.gmra.mrb[0].mxu1 %v438_v27 }
  0xf5   :  { %v374_v28 = vpop.f32.mrb[0].mxu0 }
  0xf6   :  { %v375_v29 = vpop.f32.mrb[1].mxu0  ;;  %v312_v31 = vpop.f32.mrb[0].mxu1 }
  0xf7   :  { %v376_v32 = vadd.f32 %v375_v29, %v374_v28  ;;  %v377_v33 = vpop.f32.mrb[2].mxu0  ;;  %v407_v34 = vpop.f32.mrb[1].mxu1 }
  0xf8   :  { %v378_v35 = vpop.f32.mrb[3].mxu0  ;;  %v315_v36 = vpop.f32.mrb[2].mxu1 }
  0xf9   :  { %v272_v37 = vadd.f32 %v376_v32, %v330_v30  ;;  %v379_v38 = vadd.f32 %v378_v35, %v377_v33  ;;  %v408_v39 = vpop.f32.mrb[3].mxu1 }
  0xfb   :  { %v313_v41 = vadd.f32 %v312_v31, %v272_v37  ;;  %v275_v42 = vadd.f32 %v379_v38, %v330_v30 }
  0xfd   :  { %v321_v44 = vadd.f32 %v319_v40, %v313_v41  ;;  %v316_v45 = vadd.f32 %v315_v36, %v275_v42 }
  0xff   :  { %324 = vst.msk [vmem:[%s566_s4] sm:$0xff] %vm323_vm1, %v321_v44  ;;  %v322_v46 = vadd.f32 %v320_v43, %v316_v45 }
 0x101   :  { %325 = vst.msk [vmem:[%s566_s4 + $0x8] sm:$0xff] %vm323_vm1, %v322_v46 }

// kernel: neg.4
= control target key start
LH: loop header
LB: loop body
LE: loop exit
PB: predicated region body
PF: predicated region fallthrough
CT: control target
= control target key end

     0   :  { %s24_s0 = inlined_call_operand.vmem [shape: f32[32], index: 0, kind: input, shape index: {}]   ;;  %s25_s1 = inlined_call_operand.vmem [shape: f32[32], index: 1, kind: output, shape index: {}]  }
   0x1   :  { %v2_v0 = vld [vmem:[%s24_s0] sm:$0x1] }
   0x2   :  { %v5_v1 = vxor.u32 2147483648, %v2_v0 }
   0x4   :  { %7 = vst [vmem:[%s25_s1] sm:$0x1] %v5_v1 }

// kernel: neg.3
= control target key start
LH: loop header
LB: loop body
LE: loop exit
PB: predicated region body
PF: predicated region fallthrough
CT: control target
= control target key end

     0   :  { %s24_s0 = inlined_call_operand.vmem [shape: f32[128], index: 0, kind: input, shape index: {}]   ;;  %s25_s1 = inlined_call_operand.vmem [shape: f32[128], index: 1, kind: output, shape index: {}]  }
   0x1   :  { %v2_v0 = vld [vmem:[%s24_s0] sm:$0x1] }
   0x2   :  { %v5_v1 = vxor.u32 2147483648, %v2_v0 }
   0x4   :  { %7 = vst [vmem:[%s25_s1] sm:$0x1] %v5_v1 }

</bundles_post_ra>
